<compile_context>
chip_gen: v7x
topology: tpu7x:2x2x1
jax: 0.10.0
libtpu: 0.0.40
codegen_flags: <defaults>
</compile_context>

<pallas_src>
import functools

import jax
import jax.numpy as jnp
from jax.experimental import pallas as pl
from jax.experimental.pallas import tpu as pltpu


def _conv_meanpool_kernel(x_ref, w_ref, b_ref, o_ref, xpad_ref,
                          *, H, W, C, Ke, p, Nb):
    """One batch block (Nb elements) per grid step.

    x_ref    : (Nb, H, W, C)        unpadded input block (VMEM, input dtype)
    w_ref    : (Ke*Ke*C, C)         folded 4x4 / stride-2 weights (VMEM, bf16)
    b_ref    : (1, C)               conv bias (VMEM, f32)
    o_ref    : (Nb, Ho*Wo, C)       pooled output block (VMEM)
    xpad_ref : (Nb, H+2p, W+2p, C)  bf16 padded-input scratch (VMEM)
    """
    Ho, Wo = H // 2, W // 2
    Hp, Wp = H + 2 * p, W + 2 * p

    # ---- in-kernel 'same' zero padding (no jnp.pad HBM round trip).
    # Borders re-zeroed every step (cheap) -> correct under any core sharding;
    # interior overwritten with the bf16-cast input block.
    if p > 0:
        zrow = jnp.zeros((Nb, p, Wp, C), jnp.bfloat16)
        xpad_ref[:, 0:p, :, :] = zrow
        xpad_ref[:, Hp - p:Hp, :, :] = zrow
        zcol = jnp.zeros((Nb, Hp, p, C), jnp.bfloat16)
        xpad_ref[:, :, 0:p, :] = zcol
        xpad_ref[:, :, Wp - p:Wp, :] = zcol
    xpad_ref[:, p:p + H, p:p + W, :] = x_ref[...].astype(jnp.bfloat16)

    # ---- pooled-resolution im2col: one (Nb*Ho*Wo, Ke*Ke*C) patch matrix.
    # Stride-2 tap extraction via an even/odd parity reshape:
    #   xr[A, r, B, s, :] == xpad[2A + r, 2B + s, :]
    rows = []
    for b in range(Nb):                                   # small static unroll
        xv = xpad_ref[b]                                  # (Hp, Wp, C) bf16
        xr = xv.reshape(Hp // 2, 2, Wp // 2, 2, C)
        cols = []
        for eh in range(Ke):
            qh, rh = eh // 2, eh % 2
            for ew in range(Ke):
                qw, rw = ew // 2, ew % 2
                tap = xr[qh:qh + Ho, rh, qw:qw + Wo, rw, :]   # (Ho, Wo, C)
                cols.append(tap.reshape(Ho * Wo, C))
        rows.append(jnp.concatenate(cols, axis=-1))       # (Ho*Wo, Ke*Ke*C)
    patches = jnp.concatenate(rows, axis=0) if Nb > 1 else rows[0]

    # ---- single MXU matmul (contraction Ke*Ke*C), f32 accumulation;
    # bias applied once at pooled resolution.
    acc = jnp.dot(patches, w_ref[...], preferred_element_type=jnp.float32)
    acc = acc + b_ref[...]                                 # (Nb*Ho*Wo, C) + (1, C)
    o_ref[...] = acc.reshape(Nb, Ho * Wo, C).astype(o_ref.dtype)


def _pick_batch_block(N, H, W, C, p, Ke, itemsize):
    """Largest divisor of N that fits a per-step VMEM budget and fills the MXU M dim."""
    Ho, Wo = H // 2, W // 2
    Hp, Wp = H + 2 * p, W + 2 * p
    per_elem = (2 * H * W * C * itemsize          # x block (double-buffered)
                + Hp * Wp * C * 2                 # bf16 padded scratch
                + Ho * Wo * Ke * Ke * C * 2       # bf16 patch matrix
                + Ho * Wo * C * 4                 # f32 accumulator
                + 2 * Ho * Wo * C * itemsize)     # out block (double-buffered)
    nb_vmem = max(1, (24 * 1024 * 1024) // max(per_elem, 1))
    nb_mxu = max(1, pl.cdiv(256, Ho * Wo))        # aim for M = Nb*Ho*Wo >= 256
    target = int(max(1, min(N, nb_vmem, nb_mxu)))
    for nb in range(target, 0, -1):
        if N % nb == 0:
            return nb
    return 1


def conv_mean_pool(x_nchw, weight, bias=None, *, kernel_size=3):
    """x_nchw: (N, C, H, W); weight: (kH, kW, Cin, Cout) HWIO; bias: (Cout,) or None."""
    N, C, H, W = x_nchw.shape
    K = kernel_size
    assert K % 2 == 1, "'same' padding assumes odd kernel_size"
    assert H % 2 == 0 and W % 2 == 0, "spatial dims must be even for 2x2 pool"
    p = K // 2
    Ke = K + 1                      # effective kernel after folding the 2x2 mean pool
    Ho, Wo = H // 2, W // 2

    # Layout glue only (no padding in HBM): NCHW -> NHWC.
    x = jnp.transpose(x_nchw, (0, 2, 3, 1))              # (N, H, W, C)

    # Fold the mean-pool into the conv weights: box-filter the KxK kernel with
    # ones(2,2)/4 -> a (K+1)x(K+1) stride-2 kernel. Tiny op, done once in the wrapper.
    wz = jnp.pad(weight, ((1, 1), (1, 1), (0, 0), (0, 0)))
    w_eff = 0.25 * (wz[:-1, :-1] + wz[1:, :-1] + wz[:-1, 1:] + wz[1:, 1:])  # (Ke,Ke,C,C)
    w2d = w_eff.reshape(Ke * Ke * C, C).astype(jnp.bfloat16)

    if bias is None:
        bias = jnp.zeros((C,), jnp.float32)
    b2 = bias.reshape(1, C).astype(jnp.float32)

    Nb = _pick_batch_block(N, H, W, C, p, Ke, x.dtype.itemsize)
    Hp, Wp = H + 2 * p, W + 2 * p

    kernel = functools.partial(_conv_meanpool_kernel,
                               H=H, W=W, C=C, Ke=Ke, p=p, Nb=Nb)

    out = pl.pallas_call(
        kernel,
        out_shape=jax.ShapeDtypeStruct((N, Ho * Wo, C), x.dtype),
        grid_spec=pltpu.PrefetchScalarGridSpec(
            num_scalar_prefetch=0,
            grid=(N // Nb,),
            in_specs=[
                pl.BlockSpec((Nb, H, W, C), lambda n: (n, 0, 0, 0)),
                pl.BlockSpec((Ke * Ke * C, C), lambda n: (0, 0)),   # resident
                pl.BlockSpec((1, C), lambda n: (0, 0)),             # resident
            ],
            out_specs=pl.BlockSpec((Nb, Ho * Wo, C), lambda n: (n, 0, 0)),
            scratch_shapes=[pltpu.VMEM((Nb, Hp, Wp, C), jnp.bfloat16)],
        ),
        compiler_params=pltpu.CompilerParams(
            dimension_semantics=("parallel",),           # batch blocks independent
            vmem_limit_bytes=48 * 1024 * 1024,           # > scoped default, fits v5e/v6e/v7x
        ),
    )(x, w2d, b2)

    out = out.reshape(N, Ho, Wo, C)                      # free contiguous view
    return jnp.transpose(out, (0, 3, 1, 2))              # back to NCHW


def _reference(x_nchw, weight, bias, kernel_size=3):
    """Pure-JAX f32 reference (mirrors the PyTorch forward)."""
    p = kernel_size // 2
    x = jnp.transpose(x_nchw, (0, 2, 3, 1))  # NHWC
    y = jax.lax.conv_general_dilated(
        x, weight, window_strides=(1, 1), padding=[(p, p), (p, p)],
        dimension_numbers=("NHWC", "HWIO", "NHWC"),
    ) + bias
    pooled = (y[:, ::2, ::2] + y[:, 1::2, ::2]
              + y[:, ::2, 1::2] + y[:, 1::2, 1::2]) / 4.0
    return jnp.transpose(pooled, (0, 3, 1, 2))


if __name__ == "__main__":
    # Small shapes consistent with the module: output_dim == in/out channels.
    N, C, H, W = 2, 4, 16, 16
    K = 3

    key = jax.random.PRNGKey(0)
    kx, kw, kb = jax.random.split(key, 3)

    x = jax.random.normal(kx, (N, C, H, W), dtype=jnp.float32)
    # Deterministic synthetic parameters (nn.Conv2d(C, C, K) init ranges,
    # stored here as HWIO = (K, K, Cin, Cout)).
    fan_in = C * K * K
    bound = 1.0 / (fan_in ** 0.5)
    weight = jax.random.uniform(kw, (K, K, C, C), jnp.float32, -bound, bound)
    bias = jax.random.uniform(kb, (C,), jnp.float32, -bound, bound)

    out = conv_mean_pool(x, weight, bias, kernel_size=K)
    out = jax.block_until_ready(out)

    ref = _reference(x, weight, bias, kernel_size=K)
    assert out.shape == (N, C, H // 2, W // 2)
    # bf16 operands (f32 accumulation) -> looser tolerance than a pure-f32 kernel;
    # structural bugs (tap misalignment etc.) would produce errors ~O(0.1-0.5).
    assert jnp.allclose(out, ref, atol=5e-2, rtol=5e-2)

    print("KERNEL_OK")
</pallas_src>

<mosaic_0001>
module attributes {stable_mosaic.version = 11 : i64} {
  func.func @_conv_meanpool_kernel(%arg0: i32, %arg1: memref<2x16x16x4xf32, #tpu.memory_space<vmem>>, %arg2: memref<64x4xbf16, #tpu.memory_space<vmem>>, %arg3: memref<1x4xf32, #tpu.memory_space<vmem>>, %arg4: memref<2x64x4xf32, #tpu.memory_space<vmem>>, %arg5: memref<2x18x18x4xbf16, #tpu.memory_space<vmem>>) attributes {dimension_semantics = [#tpu.dimension_semantics<parallel>], iteration_bounds = array<i64: 1>, scalar_prefetch = 0 : i64, scratch_operands = 1 : i64, tpu.core_type = #tpu.core_type<tc>, window_params = [{transform_indices = @transform_0, window_bounds = array<i64: 2, 16, 16, 4>}, {pipeline_mode = #tpu.pipeline_mode<synchronous>, transform_indices = @transform_1, window_bounds = array<i64: 64, 4>}, {pipeline_mode = #tpu.pipeline_mode<synchronous>, transform_indices = @transform_2, window_bounds = array<i64: 1, 4>}, {transform_indices = @transform_3, window_bounds = array<i64: 2, 64, 4>}]} {
    %cst = arith.constant 0.000000e+00 : bf16
    %0 = vector.broadcast %cst : bf16 to vector<2x1x18x4xbf16>
    %c0 = arith.constant 0 : index
    %c0_0 = arith.constant 0 : index
    %c0_1 = arith.constant 0 : index
    %c0_2 = arith.constant 0 : index
    %1 = vector.load %arg5[%c0, %c0_0, %c0_1, %c0_2] : memref<2x18x18x4xbf16, #tpu.memory_space<vmem>>, vector<2x1x18x4xbf16>
    tpu.vector_store %arg5[%c0, %c0_0, %c0_1, %c0_2], %0 {strides = array<i32>} : memref<2x18x18x4xbf16, #tpu.memory_space<vmem>>, vector<2x1x18x4xbf16>,
    %c0_3 = arith.constant 0 : index
    %c17 = arith.constant 17 : index
    %c0_4 = arith.constant 0 : index
    %c0_5 = arith.constant 0 : index
    %2 = vector.load %arg5[%c0_3, %c17, %c0_4, %c0_5] : memref<2x18x18x4xbf16, #tpu.memory_space<vmem>>, vector<2x1x18x4xbf16>
    tpu.vector_store %arg5[%c0_3, %c17, %c0_4, %c0_5], %0 {strides = array<i32>} : memref<2x18x18x4xbf16, #tpu.memory_space<vmem>>, vector<2x1x18x4xbf16>,
    %cst_6 = arith.constant 0.000000e+00 : bf16
    %3 = vector.broadcast %cst_6 : bf16 to vector<2x18x1x4xbf16>
    %c0_7 = arith.constant 0 : index
    %c0_8 = arith.constant 0 : index
    %c0_9 = arith.constant 0 : index
    %c0_10 = arith.constant 0 : index
    %4 = vector.load %arg5[%c0_7, %c0_8, %c0_9, %c0_10] : memref<2x18x18x4xbf16, #tpu.memory_space<vmem>>, vector<2x18x1x4xbf16>
    tpu.vector_store %arg5[%c0_7, %c0_8, %c0_9, %c0_10], %3 {strides = array<i32>} : memref<2x18x18x4xbf16, #tpu.memory_space<vmem>>, vector<2x18x1x4xbf16>,
    %c0_11 = arith.constant 0 : index
    %c0_12 = arith.constant 0 : index
    %c17_13 = arith.constant 17 : index
    %c0_14 = arith.constant 0 : index
    %5 = vector.load %arg5[%c0_11, %c0_12, %c17_13, %c0_14] : memref<2x18x18x4xbf16, #tpu.memory_space<vmem>>, vector<2x18x1x4xbf16>
    tpu.vector_store %arg5[%c0_11, %c0_12, %c17_13, %c0_14], %3 {strides = array<i32>} : memref<2x18x18x4xbf16, #tpu.memory_space<vmem>>, vector<2x18x1x4xbf16>,
    %c0_15 = arith.constant 0 : index
    %c0_16 = arith.constant 0 : index
    %c0_17 = arith.constant 0 : index
    %c0_18 = arith.constant 0 : index
    %6 = vector.load %arg1[%c0_15, %c0_16, %c0_17, %c0_18] : memref<2x16x16x4xf32, #tpu.memory_space<vmem>>, vector<2x16x16x4xf32>
    %7 = arith.truncf %6 : vector<2x16x16x4xf32> to vector<2x16x16x4xbf16>
    %c0_19 = arith.constant 0 : index
    %c1 = arith.constant 1 : index
    %c1_20 = arith.constant 1 : index
    %c0_21 = arith.constant 0 : index
    %8 = vector.load %arg5[%c0_19, %c1, %c1_20, %c0_21] : memref<2x18x18x4xbf16, #tpu.memory_space<vmem>>, vector<2x16x16x4xbf16>
    tpu.vector_store %arg5[%c0_19, %c1, %c1_20, %c0_21], %7 {strides = array<i32>} : memref<2x18x18x4xbf16, #tpu.memory_space<vmem>>, vector<2x16x16x4xbf16>,
    %c0_22 = arith.constant 0 : index
    %c0_23 = arith.constant 0 : index
    %c0_24 = arith.constant 0 : index
    %c0_25 = arith.constant 0 : index
    %9 = vector.load %arg5[%c0_22, %c0_23, %c0_24, %c0_25] : memref<2x18x18x4xbf16, #tpu.memory_space<vmem>>, vector<1x18x18x4xbf16>
    %10 = vector.shape_cast %9 : vector<1x18x18x4xbf16> to vector<18x18x4xbf16>
    %11 = vector.shape_cast %10 : vector<18x18x4xbf16> to vector<9x2x9x2x4xbf16>
    %12 = vector.extract_strided_slice %11 {offsets = [0, 0, 0, 0, 0], sizes = [8, 1, 8, 1, 4], strides = [1, 1, 1, 1, 1]} : vector<9x2x9x2x4xbf16> to vector<8x1x8x1x4xbf16>
    %13 = vector.shape_cast %12 : vector<8x1x8x1x4xbf16> to vector<8x8x4xbf16>
    %14 = vector.shape_cast %13 : vector<8x8x4xbf16> to vector<64x4xbf16>
    %15 = vector.extract_strided_slice %11 {offsets = [0, 0, 0, 1, 0], sizes = [8, 1, 8, 1, 4], strides = [1, 1, 1, 1, 1]} : vector<9x2x9x2x4xbf16> to vector<8x1x8x1x4xbf16>
    %16 = vector.shape_cast %15 : vector<8x1x8x1x4xbf16> to vector<8x8x4xbf16>
    %17 = vector.shape_cast %16 : vector<8x8x4xbf16> to vector<64x4xbf16>
    %18 = vector.extract_strided_slice %11 {offsets = [0, 0, 1, 0, 0], sizes = [8, 1, 8, 1, 4], strides = [1, 1, 1, 1, 1]} : vector<9x2x9x2x4xbf16> to vector<8x1x8x1x4xbf16>
    %19 = vector.shape_cast %18 : vector<8x1x8x1x4xbf16> to vector<8x8x4xbf16>
    %20 = vector.shape_cast %19 : vector<8x8x4xbf16> to vector<64x4xbf16>
    %21 = vector.extract_strided_slice %11 {offsets = [0, 0, 1, 1, 0], sizes = [8, 1, 8, 1, 4], strides = [1, 1, 1, 1, 1]} : vector<9x2x9x2x4xbf16> to vector<8x1x8x1x4xbf16>
    %22 = vector.shape_cast %21 : vector<8x1x8x1x4xbf16> to vector<8x8x4xbf16>
    %23 = vector.shape_cast %22 : vector<8x8x4xbf16> to vector<64x4xbf16>
    %24 = vector.extract_strided_slice %11 {offsets = [0, 1, 0, 0, 0], sizes = [8, 1, 8, 1, 4], strides = [1, 1, 1, 1, 1]} : vector<9x2x9x2x4xbf16> to vector<8x1x8x1x4xbf16>
    %25 = vector.shape_cast %24 : vector<8x1x8x1x4xbf16> to vector<8x8x4xbf16>
    %26 = vector.shape_cast %25 : vector<8x8x4xbf16> to vector<64x4xbf16>
    %27 = vector.extract_strided_slice %11 {offsets = [0, 1, 0, 1, 0], sizes = [8, 1, 8, 1, 4], strides = [1, 1, 1, 1, 1]} : vector<9x2x9x2x4xbf16> to vector<8x1x8x1x4xbf16>
    %28 = vector.shape_cast %27 : vector<8x1x8x1x4xbf16> to vector<8x8x4xbf16>
    %29 = vector.shape_cast %28 : vector<8x8x4xbf16> to vector<64x4xbf16>
    %30 = vector.extract_strided_slice %11 {offsets = [0, 1, 1, 0, 0], sizes = [8, 1, 8, 1, 4], strides = [1, 1, 1, 1, 1]} : vector<9x2x9x2x4xbf16> to vector<8x1x8x1x4xbf16>
    %31 = vector.shape_cast %30 : vector<8x1x8x1x4xbf16> to vector<8x8x4xbf16>
    %32 = vector.shape_cast %31 : vector<8x8x4xbf16> to vector<64x4xbf16>
    %33 = vector.extract_strided_slice %11 {offsets = [0, 1, 1, 1, 0], sizes = [8, 1, 8, 1, 4], strides = [1, 1, 1, 1, 1]} : vector<9x2x9x2x4xbf16> to vector<8x1x8x1x4xbf16>
    %34 = vector.shape_cast %33 : vector<8x1x8x1x4xbf16> to vector<8x8x4xbf16>
    %35 = vector.shape_cast %34 : vector<8x8x4xbf16> to vector<64x4xbf16>
    %36 = vector.extract_strided_slice %11 {offsets = [1, 0, 0, 0, 0], sizes = [8, 1, 8, 1, 4], strides = [1, 1, 1, 1, 1]} : vector<9x2x9x2x4xbf16> to vector<8x1x8x1x4xbf16>
    %37 = vector.shape_cast %36 : vector<8x1x8x1x4xbf16> to vector<8x8x4xbf16>
    %38 = vector.shape_cast %37 : vector<8x8x4xbf16> to vector<64x4xbf16>
    %39 = vector.extract_strided_slice %11 {offsets = [1, 0, 0, 1, 0], sizes = [8, 1, 8, 1, 4], strides = [1, 1, 1, 1, 1]} : vector<9x2x9x2x4xbf16> to vector<8x1x8x1x4xbf16>
    %40 = vector.shape_cast %39 : vector<8x1x8x1x4xbf16> to vector<8x8x4xbf16>
    %41 = vector.shape_cast %40 : vector<8x8x4xbf16> to vector<64x4xbf16>
    %42 = vector.extract_strided_slice %11 {offsets = [1, 0, 1, 0, 0], sizes = [8, 1, 8, 1, 4], strides = [1, 1, 1, 1, 1]} : vector<9x2x9x2x4xbf16> to vector<8x1x8x1x4xbf16>
    %43 = vector.shape_cast %42 : vector<8x1x8x1x4xbf16> to vector<8x8x4xbf16>
    %44 = vector.shape_cast %43 : vector<8x8x4xbf16> to vector<64x4xbf16>
    %45 = vector.extract_strided_slice %11 {offsets = [1, 0, 1, 1, 0], sizes = [8, 1, 8, 1, 4], strides = [1, 1, 1, 1, 1]} : vector<9x2x9x2x4xbf16> to vector<8x1x8x1x4xbf16>
    %46 = vector.shape_cast %45 : vector<8x1x8x1x4xbf16> to vector<8x8x4xbf16>
    %47 = vector.shape_cast %46 : vector<8x8x4xbf16> to vector<64x4xbf16>
    %48 = vector.extract_strided_slice %11 {offsets = [1, 1, 0, 0, 0], sizes = [8, 1, 8, 1, 4], strides = [1, 1, 1, 1, 1]} : vector<9x2x9x2x4xbf16> to vector<8x1x8x1x4xbf16>
    %49 = vector.shape_cast %48 : vector<8x1x8x1x4xbf16> to vector<8x8x4xbf16>
    %50 = vector.shape_cast %49 : vector<8x8x4xbf16> to vector<64x4xbf16>
    %51 = vector.extract_strided_slice %11 {offsets = [1, 1, 0, 1, 0], sizes = [8, 1, 8, 1, 4], strides = [1, 1, 1, 1, 1]} : vector<9x2x9x2x4xbf16> to vector<8x1x8x1x4xbf16>
    %52 = vector.shape_cast %51 : vector<8x1x8x1x4xbf16> to vector<8x8x4xbf16>
    %53 = vector.shape_cast %52 : vector<8x8x4xbf16> to vector<64x4xbf16>
    %54 = vector.extract_strided_slice %11 {offsets = [1, 1, 1, 0, 0], sizes = [8, 1, 8, 1, 4], strides = [1, 1, 1, 1, 1]} : vector<9x2x9x2x4xbf16> to vector<8x1x8x1x4xbf16>
    %55 = vector.shape_cast %54 : vector<8x1x8x1x4xbf16> to vector<8x8x4xbf16>
    %56 = vector.shape_cast %55 : vector<8x8x4xbf16> to vector<64x4xbf16>
    %57 = vector.extract_strided_slice %11 {offsets = [1, 1, 1, 1, 0], sizes = [8, 1, 8, 1, 4], strides = [1, 1, 1, 1, 1]} : vector<9x2x9x2x4xbf16> to vector<8x1x8x1x4xbf16>
    %58 = vector.shape_cast %57 : vector<8x1x8x1x4xbf16> to vector<8x8x4xbf16>
    %59 = vector.shape_cast %58 : vector<8x8x4xbf16> to vector<64x4xbf16>
    %60 = tpu.concatenate %14, %17, %20, %23, %26, %29, %32, %35, %38, %41, %44, %47, %50, %53, %56, %59 in 1 : vector<64x4xbf16>, vector<64x4xbf16>, vector<64x4xbf16>, vector<64x4xbf16>, vector<64x4xbf16>, vector<64x4xbf16>, vector<64x4xbf16>, vector<64x4xbf16>, vector<64x4xbf16>, vector<64x4xbf16>, vector<64x4xbf16>, vector<64x4xbf16>, vector<64x4xbf16>, vector<64x4xbf16>, vector<64x4xbf16>, vector<64x4xbf16> -> vector<64x64xbf16>
    %c1_26 = arith.constant 1 : index
    %c0_27 = arith.constant 0 : index
    %c0_28 = arith.constant 0 : index
    %c0_29 = arith.constant 0 : index
    %61 = vector.load %arg5[%c1_26, %c0_27, %c0_28, %c0_29] : memref<2x18x18x4xbf16, #tpu.memory_space<vmem>>, vector<1x18x18x4xbf16>
    %62 = vector.shape_cast %61 : vector<1x18x18x4xbf16> to vector<18x18x4xbf16>
    %63 = vector.shape_cast %62 : vector<18x18x4xbf16> to vector<9x2x9x2x4xbf16>
    %64 = vector.extract_strided_slice %63 {offsets = [0, 0, 0, 0, 0], sizes = [8, 1, 8, 1, 4], strides = [1, 1, 1, 1, 1]} : vector<9x2x9x2x4xbf16> to vector<8x1x8x1x4xbf16>
    %65 = vector.shape_cast %64 : vector<8x1x8x1x4xbf16> to vector<8x8x4xbf16>
    %66 = vector.shape_cast %65 : vector<8x8x4xbf16> to vector<64x4xbf16>
    %67 = vector.extract_strided_slice %63 {offsets = [0, 0, 0, 1, 0], sizes = [8, 1, 8, 1, 4], strides = [1, 1, 1, 1, 1]} : vector<9x2x9x2x4xbf16> to vector<8x1x8x1x4xbf16>
    %68 = vector.shape_cast %67 : vector<8x1x8x1x4xbf16> to vector<8x8x4xbf16>
    %69 = vector.shape_cast %68 : vector<8x8x4xbf16> to vector<64x4xbf16>
    %70 = vector.extract_strided_slice %63 {offsets = [0, 0, 1, 0, 0], sizes = [8, 1, 8, 1, 4], strides = [1, 1, 1, 1, 1]} : vector<9x2x9x2x4xbf16> to vector<8x1x8x1x4xbf16>
    %71 = vector.shape_cast %70 : vector<8x1x8x1x4xbf16> to vector<8x8x4xbf16>
    %72 = vector.shape_cast %71 : vector<8x8x4xbf16> to vector<64x4xbf16>
    %73 = vector.extract_strided_slice %63 {offsets = [0, 0, 1, 1, 0], sizes = [8, 1, 8, 1, 4], strides = [1, 1, 1, 1, 1]} : vector<9x2x9x2x4xbf16> to vector<8x1x8x1x4xbf16>
    %74 = vector.shape_cast %73 : vector<8x1x8x1x4xbf16> to vector<8x8x4xbf16>
    %75 = vector.shape_cast %74 : vector<8x8x4xbf16> to vector<64x4xbf16>
    %76 = vector.extract_strided_slice %63 {offsets = [0, 1, 0, 0, 0], sizes = [8, 1, 8, 1, 4], strides = [1, 1, 1, 1, 1]} : vector<9x2x9x2x4xbf16> to vector<8x1x8x1x4xbf16>
    %77 = vector.shape_cast %76 : vector<8x1x8x1x4xbf16> to vector<8x8x4xbf16>
    %78 = vector.shape_cast %77 : vector<8x8x4xbf16> to vector<64x4xbf16>
    %79 = vector.extract_strided_slice %63 {offsets = [0, 1, 0, 1, 0], sizes = [8, 1, 8, 1, 4], strides = [1, 1, 1, 1, 1]} : vector<9x2x9x2x4xbf16> to vector<8x1x8x1x4xbf16>
    %80 = vector.shape_cast %79 : vector<8x1x8x1x4xbf16> to vector<8x8x4xbf16>
    %81 = vector.shape_cast %80 : vector<8x8x4xbf16> to vector<64x4xbf16>
    %82 = vector.extract_strided_slice %63 {offsets = [0, 1, 1, 0, 0], sizes = [8, 1, 8, 1, 4], strides = [1, 1, 1, 1, 1]} : vector<9x2x9x2x4xbf16> to vector<8x1x8x1x4xbf16>
    %83 = vector.shape_cast %82 : vector<8x1x8x1x4xbf16> to vector<8x8x4xbf16>
    %84 = vector.shape_cast %83 : vector<8x8x4xbf16> to vector<64x4xbf16>
    %85 = vector.extract_strided_slice %63 {offsets = [0, 1, 1, 1, 0], sizes = [8, 1, 8, 1, 4], strides = [1, 1, 1, 1, 1]} : vector<9x2x9x2x4xbf16> to vector<8x1x8x1x4xbf16>
    %86 = vector.shape_cast %85 : vector<8x1x8x1x4xbf16> to vector<8x8x4xbf16>
    %87 = vector.shape_cast %86 : vector<8x8x4xbf16> to vector<64x4xbf16>
    %88 = vector.extract_strided_slice %63 {offsets = [1, 0, 0, 0, 0], sizes = [8, 1, 8, 1, 4], strides = [1, 1, 1, 1, 1]} : vector<9x2x9x2x4xbf16> to vector<8x1x8x1x4xbf16>
    %89 = vector.shape_cast %88 : vector<8x1x8x1x4xbf16> to vector<8x8x4xbf16>
    %90 = vector.shape_cast %89 : vector<8x8x4xbf16> to vector<64x4xbf16>
    %91 = vector.extract_strided_slice %63 {offsets = [1, 0, 0, 1, 0], sizes = [8, 1, 8, 1, 4], strides = [1, 1, 1, 1, 1]} : vector<9x2x9x2x4xbf16> to vector<8x1x8x1x4xbf16>
    %92 = vector.shape_cast %91 : vector<8x1x8x1x4xbf16> to vector<8x8x4xbf16>
    %93 = vector.shape_cast %92 : vector<8x8x4xbf16> to vector<64x4xbf16>
    %94 = vector.extract_strided_slice %63 {offsets = [1, 0, 1, 0, 0], sizes = [8, 1, 8, 1, 4], strides = [1, 1, 1, 1, 1]} : vector<9x2x9x2x4xbf16> to vector<8x1x8x1x4xbf16>
    %95 = vector.shape_cast %94 : vector<8x1x8x1x4xbf16> to vector<8x8x4xbf16>
    %96 = vector.shape_cast %95 : vector<8x8x4xbf16> to vector<64x4xbf16>
    %97 = vector.extract_strided_slice %63 {offsets = [1, 0, 1, 1, 0], sizes = [8, 1, 8, 1, 4], strides = [1, 1, 1, 1, 1]} : vector<9x2x9x2x4xbf16> to vector<8x1x8x1x4xbf16>
    %98 = vector.shape_cast %97 : vector<8x1x8x1x4xbf16> to vector<8x8x4xbf16>
    %99 = vector.shape_cast %98 : vector<8x8x4xbf16> to vector<64x4xbf16>
    %100 = vector.extract_strided_slice %63 {offsets = [1, 1, 0, 0, 0], sizes = [8, 1, 8, 1, 4], strides = [1, 1, 1, 1, 1]} : vector<9x2x9x2x4xbf16> to vector<8x1x8x1x4xbf16>
    %101 = vector.shape_cast %100 : vector<8x1x8x1x4xbf16> to vector<8x8x4xbf16>
    %102 = vector.shape_cast %101 : vector<8x8x4xbf16> to vector<64x4xbf16>
    %103 = vector.extract_strided_slice %63 {offsets = [1, 1, 0, 1, 0], sizes = [8, 1, 8, 1, 4], strides = [1, 1, 1, 1, 1]} : vector<9x2x9x2x4xbf16> to vector<8x1x8x1x4xbf16>
    %104 = vector.shape_cast %103 : vector<8x1x8x1x4xbf16> to vector<8x8x4xbf16>
    %105 = vector.shape_cast %104 : vector<8x8x4xbf16> to vector<64x4xbf16>
    %106 = vector.extract_strided_slice %63 {offsets = [1, 1, 1, 0, 0], sizes = [8, 1, 8, 1, 4], strides = [1, 1, 1, 1, 1]} : vector<9x2x9x2x4xbf16> to vector<8x1x8x1x4xbf16>
    %107 = vector.shape_cast %106 : vector<8x1x8x1x4xbf16> to vector<8x8x4xbf16>
    %108 = vector.shape_cast %107 : vector<8x8x4xbf16> to vector<64x4xbf16>
    %109 = vector.extract_strided_slice %63 {offsets = [1, 1, 1, 1, 0], sizes = [8, 1, 8, 1, 4], strides = [1, 1, 1, 1, 1]} : vector<9x2x9x2x4xbf16> to vector<8x1x8x1x4xbf16>
    %110 = vector.shape_cast %109 : vector<8x1x8x1x4xbf16> to vector<8x8x4xbf16>
    %111 = vector.shape_cast %110 : vector<8x8x4xbf16> to vector<64x4xbf16>
    %112 = tpu.concatenate %66, %69, %72, %75, %78, %81, %84, %87, %90, %93, %96, %99, %102, %105, %108, %111 in 1 : vector<64x4xbf16>, vector<64x4xbf16>, vector<64x4xbf16>, vector<64x4xbf16>, vector<64x4xbf16>, vector<64x4xbf16>, vector<64x4xbf16>, vector<64x4xbf16>, vector<64x4xbf16>, vector<64x4xbf16>, vector<64x4xbf16>, vector<64x4xbf16>, vector<64x4xbf16>, vector<64x4xbf16>, vector<64x4xbf16>, vector<64x4xbf16> -> vector<64x64xbf16>
    %113 = tpu.concatenate %60, %112 in 0 : vector<64x64xbf16>, vector<64x64xbf16> -> vector<128x64xbf16>
    %c0_30 = arith.constant 0 : index
    %c0_31 = arith.constant 0 : index
    %114 = vector.load %arg2[%c0_30, %c0_31] : memref<64x4xbf16, #tpu.memory_space<vmem>>, vector<64x4xbf16>
    %cst_32 = arith.constant dense<0.000000e+00> : vector<128x4xf32>
    %115 = tpu.matmul %113, %114, %cst_32 {dimension_numbers = #tpu.dot_dimension_numbers<[1], [0], [0], [1], [0, 0, 1, 1], [], []>} : vector<128x64xbf16>, vector<64x4xbf16>, vector<128x4xf32> -> vector<128x4xf32>
    %c0_33 = arith.constant 0 : index
    %c0_34 = arith.constant 0 : index
    %116 = vector.load %arg3[%c0_33, %c0_34] : memref<1x4xf32, #tpu.memory_space<vmem>>, vector<1x4xf32>
    %117 = vector.broadcast %116 : vector<1x4xf32> to vector<128x4xf32>
    %118 = arith.addf %115, %117 : vector<128x4xf32>
    %119 = vector.shape_cast %118 : vector<128x4xf32> to vector<2x64x4xf32>
    %c0_35 = arith.constant 0 : index
    %c0_36 = arith.constant 0 : index
    %c0_37 = arith.constant 0 : index
    %120 = vector.load %arg4[%c0_35, %c0_36, %c0_37] : memref<2x64x4xf32, #tpu.memory_space<vmem>>, vector<2x64x4xf32>
    tpu.vector_store %arg4[%c0_35, %c0_36, %c0_37], %119 {strides = array<i32>} : memref<2x64x4xf32, #tpu.memory_space<vmem>>, vector<2x64x4xf32>,
    return
  }
  func.func @transform_0(%arg0: i32) -> (i32, i32, i32, i32) {
    %c0_i32 = arith.constant 0 : i32
    %c0_i32_0 = arith.constant 0 : i32
    %c0_i32_1 = arith.constant 0 : i32
    %c0_i32_2 = arith.constant 0 : i32
    return %arg0, %c0_i32, %c0_i32_0, %c0_i32_1 : i32, i32, i32, i32
  }
  func.func @transform_1(%arg0: i32) -> (i32, i32) {
    %c0_i32 = arith.constant 0 : i32
    %c0_i32_0 = arith.constant 0 : i32
    %c0_i32_1 = arith.constant 0 : i32
    return %c0_i32, %c0_i32_0 : i32, i32
  }
  func.func @transform_2(%arg0: i32) -> (i32, i32) {
    %c0_i32 = arith.constant 0 : i32
    %c0_i32_0 = arith.constant 0 : i32
    %c0_i32_1 = arith.constant 0 : i32
    return %c0_i32, %c0_i32_0 : i32, i32
  }
  func.func @transform_3(%arg0: i32) -> (i32, i32, i32) {
    %c0_i32 = arith.constant 0 : i32
    %c0_i32_0 = arith.constant 0 : i32
    %c0_i32_1 = arith.constant 0 : i32
    return %arg0, %c0_i32, %c0_i32_0 : i32, i32, i32
  }
}

</mosaic_0001>

<bundles_post_ra>
// kernel: tpu_custom_call.1
= control target key start
LH: loop header
LB: loop body
LE: loop exit
PB: predicated region body
PF: predicated region fallthrough
CT: control target
= control target key end

     0   :  { %vm18_vm0 = vcmask 24576   ;;  %vm31_vm1 = vsmask.f32 256  ;;  %v45_v0 = vld [vmem:[#allocation2 + $0x30] sm:$0x1]  ;;  %v19133_v1 = vmov 0  ;;  %v1495_v61 = vlaneseq  ;;  %s18361_s0 = inlined_call_operand.vmem [shape: f32[2,16,16,4], index: 0, kind: input, shape index: {}]   ;;  %s18362_s1 = inlined_call_operand.vmem [shape: bf16[64,4], index: 1, kind: input, shape index: {}]   ;;  %s18363_s2 = inlined_call_operand.vmem [shape: f32[1,4], index: 2, kind: input, shape index: {}]   ;;  %s18364_s3 = inlined_call_operand.vmem [shape: f32[2,64,4], index: 3, kind: output, shape index: {}]  }
   0x1   :  { %vm11649_vm2 = vmand %vm18_vm0, %vm31_vm1  ;;  %v51_v2 = vld [vmem:[#allocation2 + $0x48] sm:$0x1]  ;;  %v57_v3 = vld [vmem:[#allocation2 + $0x60] sm:$0x1]  ;;  %vm141_vm3 = vsmask.f32 7938 }
   0x2   :  { %v19134_v1 = vsel %vm11649_vm2, 4294967295, %v19133_v1  ;;  %v46_v4 = vsel %vm11649_vm2, 0, %v45_v0  ;;  %v52_v5 = vsel %vm11649_vm2, 0, %v51_v2  ;;  %v58_v6 = vsel %vm11649_vm2, 0, %v57_v3  ;;  %vm11661_vm4 = vmand %vm18_vm0, %vm141_vm3  ;;  %v257_v8 = vld [vmem:[%s18361_s0 + $0x30] sm:$0xff]  ;;  %v258_v9 = vld [vmem:[%s18361_s0 + $0x38] sm:$0xff] }
   0x3   :  { %19135 = vst [vmem:[#allocation3_spill] sm:$0xff] %v19134_v1  ;;  %v19136_v7 = vmov 0  ;;  %vm15_vm5 = vcmask 27648   ;;  %47 = vst [vmem:[#allocation2 + $0x30] sm:$0x1] %v46_v4  ;;  %v261_v10 = vld [vmem:[%s18361_s0 + $0x50] sm:$0xff]  ;;  %v11487_v13 = vpack.c.bf16 %v257_v8, %v257_v8  ;;  %v11488_v14 = vpack.c.bf16 %v258_v9, %v258_v9 }
   0x4   :  { %v19137_v7 = vsel %vm11661_vm4, 4294967295, %v19136_v7  ;;  %53 = vst [vmem:[#allocation2 + $0x48] sm:$0x1] %v52_v5  ;;  %59 = vst [vmem:[#allocation2 + $0x60] sm:$0x1] %v58_v6  ;;  %v262_v11 = vld [vmem:[%s18361_s0 + $0x58] sm:$0xff]  ;;  %v11491_v16 = vpack.c.bf16 %v261_v10, %v261_v10 }
   0x5   :  { %19138 = vst [vmem:[#allocation4_spill] sm:$0xff] %v19137_v7  ;;  %v265_v12 = vld [vmem:[%s18361_s0 + $0x70] sm:$0xff]  ;;  %vm507_vm6 = vsmask.f32 4368  ;;  %v266_v15 = vld [vmem:[%s18361_s0 + $0x78] sm:$0xff]  ;;  %v11492_v17 = vpack.c.bf16 %v262_v11, %v262_v11  ;;  %v561_v20 = vshrl.u32 %v11487_v13, 16  ;;  %vm11696_vm8 = vmand %vm15_vm5, %vm141_vm3 }
   0x6   :  { %v11495_v18 = vpack.c.bf16 %v265_v12, %v265_v12  ;;  %v11496_v19 = vpack.c.bf16 %v266_v15, %v266_v15  ;;  %v564_v21 = vshll.u32 %v11487_v13, 16  ;;  %v569_v22 = vshrl.u32 %v11488_v14, 16  ;;  %vm11687_vm7 = vmor %vm31_vm1, %vm507_vm6  ;;  %v39_v55 = vld [vmem:[#allocation2 + $0x18] sm:$0x1]  ;;  %v93_v58 = vld [vmem:[#allocation2 + $0xf0] sm:$0x1] }
   0x7   :  { %v572_v23 = vshll.u32 %v11488_v14, 16  ;;  %v595_v24 = vshrl.u32 %v11491_v16, 16  ;;  %v598_v25 = vshll.u32 %v11491_v16, 16  ;;  %v603_v26 = vshrl.u32 %v11492_v17, 16  ;;  %v36_v62 = vld [vmem:[#allocation2 + $0xc] sm:$0x1] }
   0x8   :  { %v563_v27 = vrot.slane %v561_v20, 7  ;;  %v11683_v28 = vrot.slane %v569_v22, 7  ;;  %v606_v29 = vshll.u32 %v11492_v17, 16  ;;  %v629_v30 = vshrl.u32 %v11495_v18, 16  ;;  %v42_v63 = vld [vmem:[#allocation2 + $0x24] sm:$0x1] }
   0x9   :  { %v19140_v31 = vmov 0  ;;  %v597_v32 = vrot.slane %v595_v24, 7  ;;  %v11691_v33 = vrot.slane %v603_v26, 7  ;;  %v632_v34 = vshll.u32 %v11495_v18, 16  ;;  %v253_v5 = vld [vmem:[%s18361_s0 + $0x10] sm:$0xff]  ;;  %v254_v11 = vld [vmem:[%s18361_s0 + $0x18] sm:$0xff] }
   0xa   :  { %19139 = vst [vmem:[#allocation5_spill] sm:$0xff] %v11683_v28  ;;  %v19141_v31 = vsel %vm11687_vm7, 4294967295, %v19140_v31  ;;  %v637_v35 = vshrl.u32 %v11496_v19, 16  ;;  %v566_v36 = vor.u32 %v564_v21, %v563_v27  ;;  %v567_v37 = vrot.slane %v563_v27, 4  ;;  %v1173_v45 = vld [vmem:[#allocation2 + $0x30] sm:$0xf] }
   0xb   :  { %19142 = vst [vmem:[#allocation6_spill] sm:$0xff] %v19141_v31  ;;  %19143 = vst [vmem:[#allocation7_spill] sm:$0xff] %v11691_v33  ;;  %v574_v38 = vor.u32 %v572_v23, %v11683_v28  ;;  %v631_v39 = vrot.slane %v629_v30, 7  ;;  %v19144_v40 = vmov 0  ;;  %v600_v41 = vor.u32 %v598_v25, %v597_v32  ;;  %v1187_v46 = vld [vmem:[#allocation2 + $0x48] sm:$0xf] }
   0xc   :  { %v19145_v40 = vsel %vm11696_vm8, 4294967295, %v19144_v40  ;;  %v601_v42 = vrot.slane %v597_v32, 4  ;;  %v608_v43 = vor.u32 %v606_v29, %v11691_v33  ;;  %v11701_v44 = vrot.slane %v637_v35, 7  ;;  %v1201_v51 = vld [vmem:[#allocation2 + $0x60] sm:$0xf]  ;;  %v285_v13 = vld [vmem:[%s18361_s0 + $0x110] sm:$0xff] }
   0xd   :  { %19146 = vst [vmem:[#allocation8_spill] sm:$0xff] %v19145_v40  ;;  %v575_v47 = vsel %vm11687_vm7, %v567_v37, %v574_v38  ;;  %v634_v48 = vor.u32 %v632_v34, %v631_v39  ;;  %v635_v49 = vrot.slane %v631_v39, 4  ;;  %v640_v50 = vshll.u32 %v11496_v19, 16  ;;  %v286_v18 = vld [vmem:[%s18361_s0 + $0x118] sm:$0xff]  ;;  %v251_v29 = vld [vmem:[%s18361_s0] sm:$0xff]  ;;  %v252_v30 = vld [vmem:[%s18361_s0 + $0x8] sm:$0xff] }
   0xe   :  { %19147 = vst [vmem:[#allocation9_spill] sm:$0xff] %v11701_v44  ;;  %v609_v52 = vsel %vm11687_vm7, %v601_v42, %v608_v43  ;;  %v1174_v53 = vsel %vm11696_vm8, %v566_v36, %v1173_v45  ;;  %1176 = vst.msk [vmem:[#allocation2 + $0x34] sm:$0xf] %vm15_vm5, %v575_v47  ;;  %v1188_v54 = vsel %vm11696_vm8, %v600_v41, %v1187_v46  ;;  %v11610_v59 = vmov 1966171168   ;;  %s11612_s9 = smov 4  }
   0xf   :  { %v642_v56 = vor.u32 %v640_v50, %v11701_v44  ;;  %1175 = vst [vmem:[#allocation2 + $0x30] sm:$0xf] %v1174_v53  ;;  %1189 = vst [vmem:[#allocation2 + $0x48] sm:$0xf] %v1188_v54  ;;  %v1202_v57 = vsel %vm11696_vm8, %v634_v48, %v1201_v51  ;;  %v1493_v60 = vunpack.c.l.s4 %v11610_v59  ;;  %v40_v2 = vsel %vm11649_vm2, 0, %v39_v55  ;;  %s11613_s5 = smov 16  }
  0x10   :  { %1190 = vst.msk [vmem:[#allocation2 + $0x4c] sm:$0xf] %vm15_vm5, %v609_v52  ;;  %1203 = vst [vmem:[#allocation2 + $0x60] sm:$0xf] %v1202_v57  ;;  %v11611_v3 = vmov 0   ;;  %v94_v4 = vsel %vm11649_vm2, 0, %v93_v58  ;;  %v11748_v15 = vpack.c.bf16 %v253_v5, %v253_v5  ;;  %v11750_v17 = vpack.c.bf16 %v254_v11, %v254_v11 }
  0x11   :  { %v643_v0 = vsel %vm11687_vm7, %v635_v49, %v642_v56  ;;  %16 = vst.msk [vmem:[#allocation2] sm:$0xf] %vm15_vm5, %v11611_v3  ;;  %17 = vst.msk [vmem:[#allocation2 + $0x4] sm:$0xf] %vm15_vm5, %v11611_v3  ;;  %v37_v6 = vsel %vm11649_vm2, 0, %v36_v62  ;;  %v43_v8 = vsel %vm11649_vm2, 0, %v42_v63  ;;  %v1494_v9 = vunpack.c.0.s8 %v1493_v60 }
  0x12   :  { %1204 = vst.msk [vmem:[#allocation2 + $0x64] sm:$0xf] %vm15_vm5, %v643_v0  ;;  %41 = vst [vmem:[#allocation2 + $0x18] sm:$0x1] %v40_v2  ;;  %v1496_v10 = vshrl.u32 %v1495_v61, 7  ;;  %v11757_v22 = vpack.c.bf16 %v285_v13, %v285_v13  ;;  %v527_v26 = vshrl.u32 %v11748_v15, 16  ;;  %v11760_v27 = vpack.c.bf16 %v286_v18, %v286_v18 }
  0x13   :  { %19 = vst.msk [vmem:[#allocation2 + $0x8] sm:$0x1] %vm18_vm0, %v11611_v3  ;;  %22 = vst.msk [vmem:[#allocation2 + $0xe0] sm:$0x1] %vm18_vm0, %v11611_v3  ;;  %v530_v34 = vshll.u32 %v11748_v15, 16  ;;  %v535_v35 = vshrl.u32 %v11750_v17, 16  ;;  %v11776_v46 = vpack.c.bf16 %v251_v29, %v251_v29  ;;  %v11778_v47 = vpack.c.bf16 %v252_v30, %v252_v30 }
  0x14   :  { %20 = vst.msk [vmem:[#allocation2 + $0xd8] sm:$0xf] %vm15_vm5, %v11611_v3  ;;  %21 = vst.msk [vmem:[#allocation2 + $0xdc] sm:$0xf] %vm15_vm5, %v11611_v3  ;;  %v11755_v20 = vsub.s32 %v1494_v9, %v1496_v10  ;;  %v538_v36 = vshll.u32 %v11750_v17, 16  ;;  %v799_v41 = vshrl.u32 %v11757_v22, 16 }
  0x15   :  { %24 = vst.msk [vmem:[#allocation2 + $0xcc] sm:$0xf] %vm15_vm5, %v11611_v3  ;;  %25 = vst.msk [vmem:[#allocation2 + $0xd0] sm:$0xf] %vm15_vm5, %v11611_v3  ;;  %v802_v45 = vshll.u32 %v11757_v22, 16  ;;  %v11788_v54 = vrot.slane %v527_v26, 7 }
  0x16   :  { %26 = vst.msk [vmem:[#allocation2 + $0xd4] sm:$0x1] %vm18_vm0, %v11611_v3  ;;  %29 = vst.msk [vmem:[#allocation2 + $0x1ac] sm:$0x1] %vm18_vm0, %v11611_v3  ;;  %v11790_v55 = vrot.slane %v535_v35, 7  ;;  %v11798_v62 = vrot.slane %v799_v41, 7 }
  0x17   :  { %27 = vst.msk [vmem:[#allocation2 + $0x1a4] sm:$0xf] %vm15_vm5, %v11611_v3  ;;  %28 = vst.msk [vmem:[#allocation2 + $0x1a8] sm:$0xf] %vm15_vm5, %v11611_v3  ;;  %v807_v63 = vshrl.u32 %v11760_v27, 16  ;;  %vm3561_vm9 = vcmask 1041409  }
  0x18   :  { %95 = vst [vmem:[#allocation2 + $0xf0] sm:$0x1] %v94_v4  ;;  %38 = vst [vmem:[#allocation2 + $0xc] sm:$0x1] %v37_v6  ;;  %vm3564_vm10 = vcmask 1042434   ;;  %vm3567_vm11 = vcmask 1043459  }
  0x19   :  { %44 = vst [vmem:[#allocation2 + $0x24] sm:$0x1] %v43_v8  ;;  %v11373_v12 = vld.sshfl [vmem:[#allocation2 + $0x34] sm:$0x33 pattern:$0x75316420] }
  0x1a   :  { %v11372_v14 = vld.sshfl [vmem:[#allocation2 + $0x30] sm:$0x33 pattern:$0x75316420]  ;;  %19148 = vst [vmem:[#allocation10_spill] sm:$0xff] %v11755_v20  ;;  %v1763_v24 = vcombine.high %v11373_v12, %v11373_v12  ;;  %v1770_v43 = vrot.slane %v11373_v12, %v11755_v20  ;;  %19149 = vst [vmem:[#allocation11_spill] sm:$0xff] %v11790_v55 }
  0x1b   :  { %v11378_v16 = vld.sshfl [vmem:[#allocation2 + $0x48] sm:$0x33 pattern:$0x75316420]  ;;  %v1739_v21 = vcombine.high %v11372_v14, %v11372_v14  ;;  %v1746_v37 = vrot.slane %v11372_v14, %v11755_v20  ;;  %vm3570_vm12 = vcmask 1044484   ;;  %vm3573_vm13 = vcmask 1045509  }
  0x1c   :  { %v11379_v19 = vld.sshfl [vmem:[#allocation2 + $0x4c] sm:$0x33 pattern:$0x75316420]  ;;  %v1863_v25 = vcombine.high %v11378_v16, %v11378_v16  ;;  %v1777_v48 = vrot.slane %v1763_v24, %v11755_v20  ;;  %v1870_v49 = vrot.slane %v11378_v16, %v11755_v20  ;;  %v1778_v60 = vcombine.high %v1770_v43, %v1770_v43  ;;  %s11614_s21 = smov 20   ;;  %s11615_s22 = smov 8  }
  0x1d   :  { %v11384_v23 = vld.sshfl [vmem:[#allocation2 + $0x60] sm:$0x33 pattern:$0x75316420]  ;;  %v1887_v32 = vcombine.high %v11379_v19, %v11379_v19  ;;  %v1753_v38 = vrot.slane %v1739_v21, %v11755_v20  ;;  %v1894_v51 = vrot.slane %v11379_v19, %v11755_v20  ;;  %v1754_v56 = vcombine.high %v1746_v37, %v1746_v37  ;;  %s11616_s23 = smov 12   ;;  %s11617_s24 = smov 24  }
  0x1e   :  { %v1987_v39 = vcombine.high %v11384_v23, %v11384_v23  ;;  %v11385_v42 = vld.sshfl [vmem:[#allocation2 + $0x64] sm:$0x33 pattern:$0x75316420]  ;;  %v1877_v50 = vrot.slane %v1863_v25, %v11755_v20  ;;  %v11786_v53 = vrot.slane %v11384_v23, %v11755_v20  ;;  %v1779_v0 = vcombine.high %v1777_v48, %v1777_v48  ;;  %s11618_s25 = smov 28   ;;  %s11619_s26 = smov 32  }
  0x1f   :  { %v1901_v52 = vrot.slane %v1887_v32, %v11755_v20  ;;  %v1755_v57 = vcombine.high %v1753_v38, %v1753_v38  ;;  %v2011_v59 = vcombine.high %v11385_v42, %v11385_v42  ;;  %v11796_v61 = vrot.slane %v11385_v42, %v11755_v20  ;;  %s11620_s14 = smov 36   ;;  %s11621_s17 = smov 40  }
  0x20   :  { %v11793_v58 = vrot.slane %v1987_v39, %v11755_v20  ;;  %v1878_v2 = vcombine.high %v1870_v49, %v1870_v49  ;;  %v1879_v3 = vcombine.high %v1877_v50, %v1877_v50  ;;  %v1902_v4 = vcombine.high %v1894_v51, %v1894_v51  ;;  %s11622_s27 = smov 44   ;;  %s11623_s6 = smov 48  }
  0x21   :  { %v1903_v5 = vcombine.high %v1901_v52, %v1901_v52  ;;  %v2002_v6 = vcombine.high %v11786_v53, %v11786_v53  ;;  %v2830_v8 = vrot.slane %v1746_v37, %v11755_v20  ;;  %v2844_v9 = vrot.slane %v1753_v38, %v11755_v20 }
  0x22   :  { %v2003_v10 = vcombine.high %v11793_v58, %v11793_v58  ;;  %v11808_v11 = vrot.slane %v2011_v59, %v11755_v20  ;;  %v2858_v12 = vrot.slane %v1754_v56, %v11755_v20  ;;  %v2872_v13 = vrot.slane %v1755_v57, %v11755_v20 }
  0x23   :  { %v2026_v14 = vcombine.high %v11796_v61, %v11796_v61  ;;  %v2886_v16 = vrot.slane %v1770_v43, %v11755_v20  ;;  %v2900_v18 = vrot.slane %v1777_v48, %v11755_v20  ;;  %v2914_v19 = vrot.slane %v1778_v60, %v11755_v20 }
  0x24   :  { %v2928_v21 = vrot.slane %v1779_v0, %v11755_v20  ;;  %v2942_v23 = vrot.slane %v1870_v49, %v11755_v20  ;;  %v2956_v24 = vrot.slane %v1877_v50, %v11755_v20  ;;  %v2970_v25 = vrot.slane %v1878_v2, %v11755_v20 }
  0x25   :  { %v11822_v26 = vrot.slane %v2830_v8, %v11755_v20  ;;  %v2984_v29 = vrot.slane %v1879_v3, %v11755_v20  ;;  %v2998_v30 = vrot.slane %v1894_v51, %v11755_v20  ;;  %v3012_v32 = vrot.slane %v1901_v52, %v11755_v20 }
  0x26   :  { %v2851_v35 = vrot.slane %v2844_v9, %v11755_v20  ;;  %v2865_v37 = vrot.slane %v2858_v12, %v11755_v20  ;;  %v2879_v38 = vrot.slane %v2872_v13, %v11755_v20  ;;  %v3026_v39 = vrot.slane %v1902_v4, %v11755_v20 }
  0x27   :  { %19150 = vst [vmem:[#allocation12_spill] sm:$0xff] %v11822_v26  ;;  %v2893_v41 = vrot.slane %v2886_v16, %v11755_v20  ;;  %v2907_v42 = vrot.slane %v2900_v18, %v11755_v20  ;;  %v2921_v43 = vrot.slane %v2914_v19, %v11755_v20  ;;  %v3040_v48 = vrot.slane %v1903_v5, %v11755_v20 }
  0x28   :  { %v2935_v49 = vrot.slane %v2928_v21, %v11755_v20  ;;  %v11837_v50 = vrot.slane %v2942_v23, %v11755_v20  ;;  %v2963_v51 = vrot.slane %v2956_v24, %v11755_v20  ;;  %v2977_v52 = vrot.slane %v2970_v25, %v11755_v20 }
  0x29   :  { %v2991_v56 = vrot.slane %v2984_v29, %v11755_v20  ;;  %v3005_v57 = vrot.slane %v2998_v30, %v11755_v20  ;;  %v3019_v59 = vrot.slane %v3012_v32, %v11755_v20  ;;  %v3054_v60 = vrot.slane %v11786_v53, %v11755_v20 }
  0x2a   :  { %19151 = vst [vmem:[#allocation13_spill] sm:$0xff] %v11837_v50  ;;  %v3033_v0 = vrot.slane %v3026_v39, %v11755_v20  ;;  %v3068_v2 = vrot.slane %v11793_v58, %v11755_v20  ;;  %v18366_v3 = vunpack.c.l.b16 %v11822_v26  ;;  %v11850_v4 = vunpack.c.l.b16 %v2865_v37 }
  0x2b   :  { %vm3576_vm14 = vcmask 1046534   ;;  %v3047_v5 = vrot.slane %v3040_v48, %v11755_v20  ;;  %v11854_v8 = vrot.slane %v2002_v6, %v11755_v20  ;;  %v11856_v9 = vunpack.c.l.b16 %v2879_v38 }
  0x2c   :  { %19152 = vst [vmem:[#allocation14_spill] sm:$0xff] %v11850_v4  ;;  %v11858_v12 = vunpack.c.l.b16 %v2893_v41  ;;  %vm3579_vm15 = vcmask 1047559   ;;  %v11860_v53 = vunpack.c.l.b16 %v2851_v35  ;;  %v11862_v13 = vunpack.c.l.b16 %v2907_v42 }
  0x2d   :  { %19153 = vst [vmem:[#allocation15_spill] sm:$0xff] %v11854_v8  ;;  %19154 = vst [vmem:[#allocation16_spill] sm:$0xff] %v11856_v9  ;;  %v18365_v16 = vunpack.c.l.b16 %v11837_v50  ;;  %v11865_v18 = vunpack.c.l.b16 %v2977_v52  ;;  %v11867_v19 = vunpack.c.l.b16 %v2921_v43  ;;  %v11869_v21 = vunpack.c.l.b16 %v2935_v49 }
  0x2e   :  { %19155 = vst [vmem:[#allocation17_spill] sm:$0xff] %v11858_v12  ;;  %19156 = vst [vmem:[#allocation18_spill] sm:$0xff] %v11860_v53  ;;  %v11871_v23 = vunpack.c.l.b16 %v2991_v56  ;;  %v11873_v6 = vunpack.c.l.b16 %v3005_v57  ;;  %v11875_v24 = vunpack.c.l.b16 %v2963_v51  ;;  %v11877_v25 = vunpack.c.l.b16 %v3019_v59 }
  0x2f   :  { %19157 = vst [vmem:[#allocation19_spill] sm:$0xff] %v11862_v13  ;;  %19158 = vst [vmem:[#allocation20_spill] sm:$0xff] %v11865_v18  ;;  %v3711_v29 = vrot.slane %v18366_v3, 1  ;;  %v18378_v30 = vrot.slane %v11850_v4, 7  ;;  %v11882_v32 = vunpack.c.l.b16 %v3033_v0  ;;  %v11884_v35 = vunpack.c.l.b16 %v3047_v5 }
  0x30   :  { %19159 = vst [vmem:[#allocation21_spill] sm:$0xff] %v11867_v19  ;;  %19160 = vst [vmem:[#allocation22_spill] sm:$0xff] %v11869_v21  ;;  %v18377_v37 = vrot.slane %v11856_v9, 6  ;;  %v18367_v38 = vrot.slane %v11858_v12, 5  ;;  %v18376_v41 = vrot.slane %v11862_v13, 4  ;;  %v3725_v42 = vrot.slane %v18365_v16, 1 }
  0x31   :  { %19161 = vst [vmem:[#allocation23_spill] sm:$0xff] %v11871_v23  ;;  %19162 = vst [vmem:[#allocation24_spill] sm:$0xff] %v11873_v6  ;;  %v3712_v39 = vsel %vm3561_vm9, %v11860_v53, %v3711_v29  ;;  %v18368_v43 = vrot.slane %v11865_v18, 7  ;;  %v18370_v49 = vrot.slane %v11867_v19, 3  ;;  %v18369_v51 = vrot.slane %v11871_v23, 6 }
  0x32   :  { %19163 = vst [vmem:[#allocation25_spill] sm:$0xff] %v11875_v24  ;;  %19164 = vst [vmem:[#allocation26_spill] sm:$0xff] %v11877_v25  ;;  %v3714_v48 = vsel %vm3564_vm10, %v18378_v30, %v3712_v39  ;;  %v18375_v52 = vrot.slane %v11873_v6, 5  ;;  %v18371_v57 = vrot.slane %v11869_v21, 2  ;;  %v3726_v59 = vsel %vm3561_vm9, %v11875_v24, %v3725_v42  ;;  %v99_v18 = vld [vmem:[#allocation2 + $0x108] sm:$0x1] }
  0x33   :  { %19165 = vst [vmem:[#allocation27_spill] sm:$0xff] %v11882_v32  ;;  %19166 = vst [vmem:[#allocation28_spill] sm:$0xff] %v11884_v35  ;;  %v3716_v56 = vsel %vm3567_vm11, %v18377_v37, %v3714_v48  ;;  %v18374_v0 = vrot.slane %v11877_v25, 4  ;;  %v2027_v5 = vcombine.high %v11808_v11, %v11808_v11  ;;  %v3728_v39 = vsel %vm3564_vm10, %v18368_v43, %v3726_v59 }
  0x34   :  { %v3718_v29 = vsel %vm3570_vm12, %v18367_v38, %v3716_v56  ;;  %v18372_v48 = vrot.slane %v11882_v32, 3  ;;  %v11920_v42 = vrot.slane %v2003_v10, %v11755_v20  ;;  %v3730_v56 = vsel %vm3567_vm11, %v18369_v51, %v3728_v39  ;;  %v33_v38 = vld [vmem:[#allocation2] sm:$0x1]  ;;  %v1159_v39 = vld [vmem:[#allocation2 + $0x18] sm:$0xf] }
  0x35   :  { %v3720_v16 = vsel %vm3573_vm13, %v18376_v41, %v3718_v29  ;;  %v18373_v3 = vrot.slane %v11884_v35, 2  ;;  %v11930_v59 = vrot.slane %v3054_v60, %v11755_v20  ;;  %v3110_v43 = vrot.slane %v11796_v61, %v11755_v20 }
  0x36   :  { %19167 = vst [vmem:[#allocation29_spill] sm:$0xff] %v11920_v42  ;;  %v3722_v58 = vsel %vm3576_vm14, %v18370_v49, %v3720_v16  ;;  %v3732_v10 = vsel %vm3570_vm12, %v18375_v52, %v3730_v56  ;;  %v11941_v29 = vrot.slane %v3068_v2, %v11755_v20  ;;  %v11361_v16 = vld.sshfl [vmem:[#allocation2 + $0x4] sm:$0x33 pattern:$0x75316420]  ;;  %v3124_v49 = vrot.slane %v11808_v11, %v11755_v20 }
  0x37   :  { %19168 = vst [vmem:[#allocation30_spill] sm:$0xff] %v11930_v59  ;;  %v11948_v60 = vsel %vm3579_vm15, %v18371_v57, %v3722_v58  ;;  %v3734_v51 = vsel %vm3573_vm13, %v18374_v0, %v3732_v10  ;;  %v11959_v2 = vrot.slane %v2026_v14, %v11755_v20  ;;  %v34_v58 = vsel %vm11649_vm2, 0, %v33_v38  ;;  %v87_v57 = vld [vmem:[#allocation2 + $0xd8] sm:$0x1] }
  0x38   :  { %19169 = vst [vmem:[#allocation31_spill] sm:$0xff] %v11941_v29  ;;  %19170 = vst [vmem:[#allocation32_spill] sm:$0xff] %v11948_v60  ;;  %v3736_v56 = vsel %vm3576_vm14, %v18372_v48, %v3734_v51  ;;  %v532_v61 = vor.u32 %v530_v34, %v11788_v54  ;;  %v533_v14 = vrot.slane %v11788_v54, 4  ;;  %v11978_v51 = vrot.slane %v3110_v43, %v11755_v20 }
  0x39   :  { %19171 = vst [vmem:[#allocation33_spill] sm:$0xff] %v11959_v2  ;;  %v11971_v11 = vsel %vm3579_vm15, %v18373_v3, %v3736_v56  ;;  %35 = vst [vmem:[#allocation2] sm:$0x1] %v34_v58  ;;  %v540_v10 = vor.u32 %v538_v36, %v11790_v55  ;;  %v1515_v48 = vcombine.high %v11361_v16, %v11361_v16  ;;  %v88_v54 = vsel %vm11649_vm2, 0, %v87_v57 }
  0x3a   :  { %19172 = vst [vmem:[#allocation34_spill] sm:$0xff] %v11971_v11  ;;  %19173 = vst [vmem:[#allocation35_spill] sm:$0xff] %v11978_v51  ;;  %v3796_v38 = vpack.c.b16 %v11971_v11, %v11948_v60  ;;  %v11986_v56 = vrot.slane %v2027_v5, %v11755_v20  ;;  %v1160_v15 = vsel %vm11696_vm8, %v532_v61, %v1159_v39  ;;  %v1271_v39 = vld [vmem:[#allocation2 + $0xf0] sm:$0xf]  ;;  %v810_v22 = vshll.u32 %v11760_v27, 16 }
  0x3b   :  { %v1522_v34 = vrot.slane %v11361_v16, %v11755_v20  ;;  %v11994_v43 = vrot.slane %v3124_v49, %v11755_v20  ;;  %v541_v17 = vsel %vm11687_vm7, %v533_v14, %v540_v10  ;;  %1161 = vst [vmem:[#allocation2 + $0x18] sm:$0xf] %v1160_v15  ;;  %v1529_v36 = vrot.slane %v1515_v48, %v11755_v20  ;;  %v11415_v16 = vld.sshfl [vmem:[#allocation2 + $0xdc] sm:$0x33 pattern:$0x75316420] }
  0x3c   :  { %19174 = vst [vmem:[#allocation36_spill] sm:$0xff] %v11986_v56  ;;  %3801 = vrot.lane.b32.xlu1 %v3796_v38, %s11612_s9  ;;  %89 = vst [vmem:[#allocation2 + $0xd8] sm:$0x1] %v88_v54  ;;  %v804_v5 = vor.u32 %v802_v45, %v11798_v62  ;;  %v805_v10 = vrot.slane %v11798_v62, 4  ;;  %v12011_v14 = vrot.slane %v807_v63, 7  ;;  %v6400_v54 = vcombine.high %v11415_v16, %v11415_v16 }
  0x3d   :  { %19175 = vst [vmem:[#allocation37_spill] sm:$0xff] %v11994_v43  ;;  %1162 = vst.msk [vmem:[#allocation2 + $0x1c] sm:$0xf] %vm15_vm5, %v541_v17  ;;  %v1530_v57 = vcombine.high %v1522_v34, %v1522_v34  ;;  %v2662_v58 = vrot.slane %v1522_v34, %v11755_v20  ;;  %v1531_v61 = vcombine.high %v1529_v36, %v1529_v36  ;;  %v510_v6 = vshrl.u32 %v11776_v46, 16 }
  0x3e   :  { %v2676_v48 = vrot.slane %v1529_v36, %v11755_v20  ;;  %19176 = vst [vmem:[#allocation38_spill] sm:$0xff] %v12011_v14  ;;  %v1272_v15 = vsel %vm11696_vm8, %v804_v5, %v1271_v39  ;;  %v812_v36 = vor.u32 %v810_v22, %v12011_v14  ;;  %v12022_v63 = vrot.slane %v11415_v16, %v11755_v20 }
  0x3f   :  { %v2669_v45 = vrot.slane %v2662_v58, %v11755_v20  ;;  %v2690_v38 = vrot.slane %v1530_v57, %v11755_v20  ;;  %v2704_v17 = vrot.slane %v1531_v61, %v11755_v20  ;;  %1273 = vst [vmem:[#allocation2 + $0xf0] sm:$0xf] %v1272_v15  ;;  %vm19130_vm0 = vcmask 31744  }
  0x40   :  { %v11360_v34 = vld.sshfl [vmem:[#allocation2] sm:$0x33 pattern:$0x75316420]  ;;  %v2683_v62 = vrot.slane %v2676_v48, %v11755_v20  ;;  %v813_v61 = vsel %vm11687_vm7, %v805_v10, %v812_v36  ;;  %v12034_v48 = vrot.slane %v6400_v54, %v11755_v20  ;;  %vm19129_vm1 = vcmask 64512  }
  0x41   :  { %v1491_v27 = vcombine.high %v11360_v34, %v11360_v34  ;;  %v1498_v58 = vrot.slane %v11360_v34, %v11755_v20  ;;  %v2697_v57 = vrot.slane %v2690_v38, %v11755_v20  ;;  %v12026_v49 = vunpack.c.l.b16 %v2669_v45  ;;  %1274 = vst.msk [vmem:[#allocation2 + $0xf4] sm:$0xf] %vm15_vm5, %v813_v61 }
  0x42   :  { %v2711_v5 = vrot.slane %v2704_v17, %v11755_v20  ;;  %v12029_v39 = vunpack.c.l.b16 %v2683_v62  ;;  %v11366_v22 = vld.sshfl [vmem:[#allocation2 + $0x18] sm:$0x33 pattern:$0x75316420]  ;;  %vm6152_vm3 = vcmask 130048   ;;  %vm6179_vm6 = vcmask 228352  }
  0x43   :  { %19177 = vst [vmem:[#allocation39_spill] sm:$0xff] %v12026_v49  ;;  %v1505_v16 = vrot.slane %v1491_v27, %v11755_v20  ;;  %v1506_v15 = vcombine.high %v1498_v58, %v1498_v58  ;;  %v2606_v34 = vrot.slane %v1498_v58, %v11755_v20  ;;  %v12038_v3 = vunpack.c.l.b16 %v2697_v57 }
  0x44   :  { %19178 = vst [vmem:[#allocation40_spill] sm:$0xff] %v12029_v39  ;;  %v11367_v45 = vld.sshfl [vmem:[#allocation2 + $0x1c] sm:$0x33 pattern:$0x75316420]  ;;  %v1615_v38 = vcombine.high %v11366_v22, %v11366_v22  ;;  %v1622_v62 = vrot.slane %v11366_v22, %v11755_v20  ;;  %v12042_v17 = vunpack.c.l.b16 %v2711_v5 }
  0x45   :  { %19179 = vst [vmem:[#allocation41_spill] sm:$0xff] %v12038_v3  ;;  %v1507_v54 = vcombine.high %v1505_v16, %v1505_v16  ;;  %v1639_v36 = vcombine.high %v11367_v45, %v11367_v45  ;;  %v1646_v0 = vrot.slane %v11367_v45, %v11755_v20  ;;  %v12047_v27 = vrot.slane %v2606_v34, %v11755_v20 }
  0x46   :  { %19180 = vst [vmem:[#allocation42_spill] sm:$0xff] %v12042_v17  ;;  %v1629_v58 = vrot.slane %v1615_v38, %v11755_v20  ;;  %v1630_v57 = vcombine.high %v1622_v62, %v1622_v62  ;;  %v2620_v61 = vrot.slane %v1505_v16, %v11755_v20  ;;  %v2634_v52 = vrot.slane %v1506_v15, %v11755_v20 }
  0x47   :  { %19181 = vst [vmem:[#allocation43_spill] sm:$0xff] %v12047_v27  ;;  %v1653_v22 = vrot.slane %v1639_v36, %v11755_v20  ;;  %v1654_v5 = vcombine.high %v1646_v0, %v1646_v0  ;;  %v2648_v41 = vrot.slane %v1507_v54, %v11755_v20  ;;  %v2718_v37 = vrot.slane %v1622_v62, %v11755_v20 }
  0x48   :  { %v1631_v30 = vcombine.high %v1629_v58, %v1629_v58  ;;  %v2627_v45 = vrot.slane %v2620_v61, %v11755_v20  ;;  %v2641_v34 = vrot.slane %v2634_v52, %v11755_v20  ;;  %v2732_v10 = vrot.slane %v1629_v58, %v11755_v20 }
  0x49   :  { %v1655_v38 = vcombine.high %v1653_v22, %v1653_v22  ;;  %v2655_v11 = vrot.slane %v2648_v41, %v11755_v20  ;;  %v12060_v16 = vrot.slane %v2718_v37, %v11755_v20  ;;  %v2746_v15 = vrot.slane %v1630_v57, %v11755_v20 }
  0x4a   :  { %v2739_v36 = vrot.slane %v2732_v10, %v11755_v20  ;;  %v2760_v54 = vrot.slane %v1631_v30, %v11755_v20  ;;  %v2774_v62 = vrot.slane %v1646_v0, %v11755_v20  ;;  %v2788_v61 = vrot.slane %v1653_v22, %v11755_v20 }
  0x4b   :  { %19182 = vst [vmem:[#allocation44_spill] sm:$0xff] %v12060_v16  ;;  %v2753_v52 = vrot.slane %v2746_v15, %v11755_v20  ;;  %v2802_v58 = vrot.slane %v1654_v5, %v11755_v20  ;;  %v2816_v44 = vrot.slane %v1655_v38, %v11755_v20  ;;  %v12074_v50 = vunpack.c.l.b16 %v2627_v45 }
  0x4c   :  { %v2767_v37 = vrot.slane %v2760_v54, %v11755_v20  ;;  %v2781_v57 = vrot.slane %v2774_v62, %v11755_v20  ;;  %v2795_v10 = vrot.slane %v2788_v61, %v11755_v20  ;;  %v12078_v22 = vunpack.c.l.b16 %v2641_v34 }
  0x4d   :  { %19183 = vst [vmem:[#allocation45_spill] sm:$0xff] %v12074_v50  ;;  %v2809_v30 = vrot.slane %v2802_v58, %v11755_v20  ;;  %v2823_v0 = vrot.slane %v2816_v44, %v11755_v20  ;;  %v12080_v15 = vunpack.c.l.b16 %v2655_v11  ;;  %v12083_v38 = vunpack.c.l.b16 %v2739_v36  ;;  %v11414_v44 = vld.sshfl [vmem:[#allocation2 + $0xd8] sm:$0x33 pattern:$0x75316420] }
  0x4e   :  { %19184 = vst [vmem:[#allocation46_spill] sm:$0xff] %v12078_v22  ;;  %v12085_v41 = vunpack.c.l.b16 %v2753_v52  ;;  %v12087_v54 = vunpack.c.l.b16 %v2767_v37  ;;  %v12089_v62 = vunpack.c.l.b16 %v2781_v57  ;;  %v12091_v45 = vunpack.c.l.b16 %v2795_v10  ;;  %v11420_v36 = vld.sshfl [vmem:[#allocation2 + $0xf0] sm:$0x33 pattern:$0x75316420] }
  0x4f   :  { %19185 = vst [vmem:[#allocation47_spill] sm:$0xff] %v12080_v15  ;;  %19186 = vst [vmem:[#allocation48_spill] sm:$0xff] %v12083_v38  ;;  %v12093_v61 = vunpack.c.l.b16 %v2809_v30  ;;  %v12095_v58 = vunpack.c.l.b16 %v2823_v0  ;;  %v19193_v11 = vunpack.c.l.b16 %v12047_v27  ;;  %v19194_v10 = vunpack.c.l.b16 %v12060_v16 }
  0x50   :  { %19187 = vst [vmem:[#allocation49_spill] sm:$0xff] %v12085_v41  ;;  %19188 = vst [vmem:[#allocation50_spill] sm:$0xff] %v12087_v54  ;;  %v19195_v52 = vrot.slane %v12078_v22, 7  ;;  %v19196_v27 = vrot.slane %v12080_v15, 6  ;;  %v6376_v16 = vcombine.high %v11414_v44, %v11414_v44  ;;  %v6383_v2 = vrot.slane %v11414_v44, %v11755_v20 }
  0x51   :  { %19189 = vst [vmem:[#allocation51_spill] sm:$0xff] %v12089_v62  ;;  %19190 = vst [vmem:[#allocation52_spill] sm:$0xff] %v12091_v45  ;;  %v3683_v34 = vrot.slane %v19193_v11, 1  ;;  %v3697_v30 = vrot.slane %v19194_v10, 1  ;;  %v19197_v11 = vrot.slane %v12085_v41, 7  ;;  %v19201_v44 = vrot.slane %v12089_v62, 5 }
  0x52   :  { %19191 = vst [vmem:[#allocation53_spill] sm:$0xff] %v12093_v61  ;;  %19192 = vst [vmem:[#allocation54_spill] sm:$0xff] %v12095_v58  ;;  %v11421_v10 = vld.sshfl [vmem:[#allocation2 + $0xf4] sm:$0x33 pattern:$0x75316420]  ;;  %v6500_v42 = vcombine.high %v11420_v36, %v11420_v36  ;;  %v6507_v8 = vrot.slane %v11420_v36, %v11755_v20 }
  0x53   :  { %v3684_v26 = vsel %vm3561_vm9, %v12074_v50, %v3683_v34  ;;  %v3698_v57 = vsel %vm3561_vm9, %v12083_v38, %v3697_v30  ;;  %v19199_v30 = vrot.slane %v12087_v54, 6  ;;  %v19203_v56 = vrot.slane %v12091_v45, 4 }
  0x54   :  { %v3686_v37 = vsel %vm3564_vm10, %v19195_v52, %v3684_v26  ;;  %v3700_v5 = vsel %vm3564_vm10, %v19197_v11, %v3698_v57  ;;  %v19198_v26 = vrot.slane %v12026_v49, 5  ;;  %v19200_v57 = vrot.slane %v12029_v39, 4 }
  0x55   :  { %v3688_v34 = vsel %vm3567_vm11, %v19196_v27, %v3686_v37  ;;  %v3702_v0 = vsel %vm3567_vm11, %v19199_v30, %v3700_v5  ;;  %v6415_v27 = vcombine.high %v12022_v63, %v12022_v63  ;;  %v6416_v37 = vcombine.high %v12034_v48, %v12034_v48 }
  0x56   :  { %v3690_v52 = vsel %vm3570_vm12, %v19198_v26, %v3688_v34  ;;  %v3704_v43 = vsel %vm3570_vm12, %v19201_v44, %v3702_v0  ;;  %v6390_v34 = vrot.slane %v6376_v16, %v11755_v20  ;;  %v6391_v26 = vcombine.high %v6383_v2, %v6383_v2 }
  0x57   :  { %v3692_v11 = vsel %vm3573_vm13, %v19200_v57, %v3690_v52  ;;  %v19202_v5 = vrot.slane %v12038_v3, 3  ;;  %v3706_v51 = vsel %vm3573_vm13, %v19203_v56, %v3704_v43  ;;  %v19204_v52 = vrot.slane %v12042_v17, 2 }
  0x58   :  { %v19205_v0 = vrot.slane %v12093_v61, 3  ;;  %v6392_v44 = vcombine.high %v6390_v34, %v6390_v34  ;;  %v6524_v35 = vcombine.high %v11421_v10, %v11421_v10  ;;  %v19206_v21 = vrot.slane %v12095_v58, 2 }
  0x59   :  { %v3694_v30 = vsel %vm3576_vm14, %v19202_v5, %v3692_v11  ;;  %v6514_v56 = vrot.slane %v6500_v42, %v11755_v20  ;;  %v6515_v43 = vcombine.high %v6507_v8, %v6507_v8  ;;  %v6531_v36 = vrot.slane %v11421_v10, %v11755_v20 }
  0x5a   :  { %v3696_v57 = vsel %vm3579_vm15, %v19204_v52, %v3694_v30  ;;  %v3708_v16 = vsel %vm3576_vm14, %v19205_v0, %v3706_v51  ;;  %v6538_v52 = vrot.slane %v6524_v35, %v11755_v20  ;;  %v7491_v51 = vrot.slane %v6383_v2, %v11755_v20 }
  0x5b   :  { %v12159_v11 = vsel %vm3579_vm15, %v19206_v21, %v3708_v16  ;;  %v6516_v0 = vcombine.high %v6514_v56, %v6514_v56  ;;  %v6539_v32 = vcombine.high %v6531_v36, %v6531_v36  ;;  %v7505_v25 = vrot.slane %v6390_v34, %v11755_v20 }
  0x5c   :  { %19207 = vst [vmem:[#allocation55_spill] sm:$0xff] %v12159_v11  ;;  %v3795_v5 = vpack.c.b16 %v12159_v11, %v3696_v57  ;;  %v7519_v21 = vrot.slane %v6391_v26, %v11755_v20  ;;  %v6540_v42 = vcombine.high %v6538_v52, %v6538_v52  ;;  %v12172_v10 = vrot.slane %v7491_v51, %v11755_v20 }
  0x5d   :  { %v7533_v57 = vrot.slane %v6392_v44, %v11755_v20  ;;  %v7547_v16 = vrot.slane %v12022_v63, %v11755_v20  ;;  %v7512_v35 = vrot.slane %v7505_v25, %v11755_v20  ;;  %v7561_v34 = vrot.slane %v12034_v48, %v11755_v20 }
  0x5e   :  { %3799 = vrot.lane.b32.xlu0 %v3795_v5, %s11612_s9  ;;  %19208 = vst [vmem:[#allocation56_spill] sm:$0xff] %v12172_v10  ;;  %v7526_v2 = vrot.slane %v7519_v21, %v11755_v20  ;;  %v7575_v26 = vrot.slane %v6415_v27, %v11755_v20  ;;  %v7589_v51 = vrot.slane %v6416_v37, %v11755_v20 }
  0x5f   :  { %v7540_v5 = vrot.slane %v7533_v57, %v11755_v20  ;;  %v7554_v30 = vrot.slane %v7547_v16, %v11755_v20  ;;  %v7603_v44 = vrot.slane %v6507_v8, %v11755_v20  ;;  %v7568_v11 = vrot.slane %v7561_v34, %v11755_v20 }
  0x60   :  { %v7582_v63 = vrot.slane %v7575_v26, %v11755_v20  ;;  %v7617_v25 = vrot.slane %v6514_v56, %v11755_v20  ;;  %v7631_v21 = vrot.slane %v6515_v43, %v11755_v20  ;;  %v7596_v48 = vrot.slane %v7589_v51, %v11755_v20 }
  0x61   :  { %v12192_v27 = vrot.slane %v7603_v44, %v11755_v20  ;;  %v7645_v57 = vrot.slane %v6516_v0, %v11755_v20  ;;  %v7659_v16 = vrot.slane %v6531_v36, %v11755_v20  ;;  %v7673_v34 = vrot.slane %v6538_v52, %v11755_v20 }
  0x62   :  { %v7624_v37 = vrot.slane %v7617_v25, %v11755_v20  ;;  %v7638_v8 = vrot.slane %v7631_v21, %v11755_v20  ;;  %v7687_v26 = vrot.slane %v6539_v32, %v11755_v20  ;;  %v7701_v51 = vrot.slane %v6540_v42, %v11755_v20 }
  0x63   :  { %19209 = vst [vmem:[#allocation57_spill] sm:$0xff] %v12192_v27  ;;  %v7652_v56 = vrot.slane %v7645_v57, %v11755_v20  ;;  %v7666_v43 = vrot.slane %v7659_v16, %v11755_v20  ;;  %v7680_v0 = vrot.slane %v7673_v34, %v11755_v20  ;;  %v12206_v60 = vunpack.c.l.b16 %v7512_v35 }
  0x64   :  { %v7694_v36 = vrot.slane %v7687_v26, %v11755_v20  ;;  %v12208_v25 = vunpack.c.l.b16 %v7526_v2  ;;  %v7708_v52 = vrot.slane %v7701_v51, %v11755_v20  ;;  %v12211_v21 = vunpack.c.l.b16 %v7540_v5 }
  0x65   :  { %19210 = vst [vmem:[#allocation58_spill] sm:$0xff] %v12206_v60  ;;  %v12213_v32 = vunpack.c.l.b16 %v7554_v30  ;;  %v12215_v57 = vunpack.c.l.b16 %v7568_v11  ;;  %v12217_v16 = vunpack.c.l.b16 %v7582_v63  ;;  %v12219_v42 = vunpack.c.l.b16 %v7596_v48 }
  0x66   :  { %19211 = vst [vmem:[#allocation59_spill] sm:$0xff] %v12208_v25  ;;  %19212 = vst [vmem:[#allocation60_spill] sm:$0xff] %v12211_v21  ;;  %v18400_v34 = vunpack.c.l.b16 %v12192_v27  ;;  %v12222_v44 = vunpack.c.l.b16 %v7624_v37  ;;  %v12224_v35 = vunpack.c.l.b16 %v7638_v8  ;;  %v12226_v2 = vunpack.c.l.b16 %v7652_v56  ;;  %v255_v37 = vld [vmem:[%s18361_s0 + $0x20] sm:$0xff]  ;;  %v256_v56 = vld [vmem:[%s18361_s0 + $0x28] sm:$0xff] }
  0x67   :  { %19213 = vst [vmem:[#allocation61_spill] sm:$0xff] %v12213_v32  ;;  %19214 = vst [vmem:[#allocation62_spill] sm:$0xff] %v12215_v57  ;;  %v12228_v26 = vunpack.c.l.b16 %v7666_v43  ;;  %v12230_v5 = vunpack.c.l.b16 %v7680_v0  ;;  %v12232_v30 = vunpack.c.l.b16 %v7694_v36  ;;  %v12234_v11 = vunpack.c.l.b16 %v7708_v52 }
  0x68   :  { %19215 = vst [vmem:[#allocation63_spill] sm:$0xff] %v12217_v16  ;;  %19216 = vst [vmem:[#allocation64_spill] sm:$0xff] %v12219_v42  ;;  %v19224_v63 = vunpack.c.l.b16 %v12172_v10  ;;  %v18407_v51 = vrot.slane %v12208_v25, 7  ;;  %v8575_v52 = vrot.slane %v18400_v34, 1  ;;  %v19226_v19 = vrot.slane %v12213_v32, 5 }
  0x69   :  { %19217 = vst [vmem:[#allocation65_spill] sm:$0xff] %v12222_v44  ;;  %19218 = vst [vmem:[#allocation66_spill] sm:$0xff] %v12224_v35  ;;  %v11485_v34 = vpack.c.bf16 %v255_v37, %v255_v37  ;;  %v19228_v23 = vrot.slane %v12215_v57, 4  ;;  %v513_v27 = vshll.u32 %v11776_v46, 16  ;;  %v518_v37 = vshrl.u32 %v11778_v47, 16 }
  0x6a   :  { %19219 = vst [vmem:[#allocation67_spill] sm:$0xff] %v12226_v2  ;;  %19220 = vst [vmem:[#allocation68_spill] sm:$0xff] %v12228_v26  ;;  %v8561_v48 = vrot.slane %v19224_v63, 1  ;;  %v19225_v63 = vrot.slane %v12211_v21, 6  ;;  %v8576_v10 = vsel %vm3561_vm9, %v12222_v44, %v8575_v52  ;;  %v19229_v52 = vrot.slane %v12226_v2, 6 }
  0x6b   :  { %19221 = vst [vmem:[#allocation69_spill] sm:$0xff] %v12230_v5  ;;  %19222 = vst [vmem:[#allocation70_spill] sm:$0xff] %v12232_v30  ;;  %v544_v13 = vshrl.u32 %v11485_v34, 16  ;;  %v19236_v12 = vrot.slane %v12234_v11, 2 }
  0x6c   :  { %19223 = vst [vmem:[#allocation71_spill] sm:$0xff] %v12234_v11  ;;  %v8562_v0 = vsel %vm3561_vm9, %v12206_v60, %v8561_v48  ;;  %v11486_v48 = vpack.c.bf16 %v256_v56, %v256_v56  ;;  %v19232_v56 = vrot.slane %v12219_v42, 2 }
  0x6d   :  { %v8564_v43 = vsel %vm3564_vm10, %v18407_v51, %v8562_v0  ;;  %v19227_v51 = vrot.slane %v12224_v35, 7 }
  0x6e   :  { %v8566_v8 = vsel %vm3567_vm11, %v19225_v63, %v8564_v43  ;;  %v552_v24 = vshrl.u32 %v11486_v48, 16 }
  0x6f   :  { %v8568_v0 = vsel %vm3570_vm12, %v19226_v19, %v8566_v8  ;;  %v8578_v36 = vsel %vm3564_vm10, %v19227_v51, %v8576_v10  ;;  %v19230_v19 = vrot.slane %v12217_v16, 3  ;;  %v19231_v10 = vrot.slane %v12228_v26, 5 }
  0x70   :  { %v8570_v43 = vsel %vm3573_vm13, %v19228_v23, %v8568_v0  ;;  %v8580_v63 = vsel %vm3567_vm11, %v19229_v52, %v8578_v36  ;;  %v521_v23 = vshll.u32 %v11778_v47, 16  ;;  %v19233_v0 = vrot.slane %v12230_v5, 4  ;;  %v1152_v47 = vld [vmem:[#allocation2 + $0xc] sm:$0xf] }
  0x71   :  { %v8572_v8 = vsel %vm3576_vm14, %v19230_v19, %v8570_v43  ;;  %v8582_v51 = vsel %vm3570_vm12, %v19231_v10, %v8580_v63  ;;  %v512_v52 = vrot.slane %v510_v6, 7  ;;  %v19234_v43 = vrot.slane %v12232_v30, 3  ;;  %v105_v6 = vld [vmem:[#allocation2 + $0x120] sm:$0x1] }
  0x72   :  { %v8574_v36 = vsel %vm3579_vm15, %v19232_v56, %v8572_v8  ;;  %v8584_v46 = vsel %vm3573_vm13, %v19233_v0, %v8582_v51  ;;  %v12299_v63 = vrot.slane %v518_v37, 7  ;;  %v547_v10 = vshll.u32 %v11485_v34, 16  ;;  %v289_v0 = vld [vmem:[%s18361_s0 + $0x130] sm:$0xff]  ;;  %v290_v37 = vld [vmem:[%s18361_s0 + $0x138] sm:$0xff] }
  0x73   :  { %v8586_v19 = vsel %vm3576_vm14, %v19234_v43, %v8584_v46  ;;  %v515_v56 = vor.u32 %v513_v27, %v512_v52  ;;  %v516_v9 = vrot.slane %v512_v52, 4  ;;  %v546_v51 = vrot.slane %v544_v13, 7  ;;  %v293_v13 = vld [vmem:[%s18361_s0 + $0x150] sm:$0xff]  ;;  %v294_v27 = vld [vmem:[%s18361_s0 + $0x158] sm:$0xff] }
  0x74   :  { %19235 = vst [vmem:[#allocation72_spill] sm:$0xff] %v12299_v63  ;;  %v12304_v8 = vsel %vm3579_vm15, %v19236_v12, %v8586_v19  ;;  %v523_v46 = vor.u32 %v521_v23, %v12299_v63  ;;  %v12314_v43 = vrot.slane %v552_v24, 7  ;;  %v555_v12 = vshll.u32 %v11486_v48, 16  ;;  %v1166_v19 = vld [vmem:[#allocation2 + $0x24] sm:$0xf] }
  0x75   :  { %19237 = vst [vmem:[#allocation73_spill] sm:$0xff] %v12304_v8  ;;  %v8673_v34 = vpack.c.b16 %v12304_v8, %v8574_v36  ;;  %v549_v52 = vor.u32 %v547_v10, %v546_v51  ;;  %v550_v11 = vrot.slane %v546_v51, 4  ;;  %v1153_v33 = vsel %vm11696_vm8, %v515_v56, %v1152_v47  ;;  %v90_v24 = vld [vmem:[#allocation2 + $0xe4] sm:$0x1]  ;;  %v96_v8 = vld [vmem:[#allocation2 + $0xfc] sm:$0x1] }
  0x76   :  { %19238 = vst [vmem:[#allocation74_spill] sm:$0xff] %v12314_v43  ;;  %v100_v23 = vsel %vm11649_vm2, 0, %v99_v18  ;;  %v524_v48 = vsel %vm11687_vm7, %v516_v9, %v523_v46  ;;  %v557_v36 = vor.u32 %v555_v12, %v12314_v43  ;;  %1154 = vst [vmem:[#allocation2 + $0xc] sm:$0xf] %v1153_v33  ;;  %v106_v10 = vsel %vm11649_vm2, 0, %v105_v6 }
  0x77   :  { %8677 = vrot.lane.b32.xlu0 %v8673_v34, %s11612_s9  ;;  %101 = vst [vmem:[#allocation2 + $0x108] sm:$0x1] %v100_v23  ;;  %v11519_v51 = vpack.c.bf16 %v289_v0, %v289_v0  ;;  %1155 = vst.msk [vmem:[#allocation2 + $0x10] sm:$0xf] %vm15_vm5, %v524_v48  ;;  %v1167_v47 = vsel %vm11696_vm8, %v549_v52, %v1166_v19  ;;  %v11520_v18 = vpack.c.bf16 %v290_v37, %v290_v37  ;;  %v283_v0 = vld [vmem:[%s18361_s0 + $0x100] sm:$0xff]  ;;  %v284_v37 = vld [vmem:[%s18361_s0 + $0x108] sm:$0xff] }
  0x78   :  { %107 = vst [vmem:[#allocation2 + $0x120] sm:$0x1] %v106_v10  ;;  %v11523_v56 = vpack.c.bf16 %v293_v13, %v293_v13  ;;  %v11524_v34 = vpack.c.bf16 %v294_v27, %v294_v27  ;;  %v558_v9 = vsel %vm11687_vm7, %v550_v11, %v557_v36  ;;  %1168 = vst [vmem:[#allocation2 + $0x24] sm:$0xf] %v1167_v47  ;;  %v91_v6 = vsel %vm11649_vm2, 0, %v90_v24  ;;  %v287_v27 = vld [vmem:[%s18361_s0 + $0x120] sm:$0xff] }
  0x79   :  { %v833_v33 = vshrl.u32 %v11519_v51, 16  ;;  %v836_v46 = vshll.u32 %v11519_v51, 16  ;;  %1169 = vst.msk [vmem:[#allocation2 + $0x28] sm:$0xf] %vm15_vm5, %v558_v9  ;;  %v841_v12 = vshrl.u32 %v11520_v18, 16  ;;  %v844_v19 = vshll.u32 %v11520_v18, 16 }
  0x7a   :  { %v867_v13 = vshrl.u32 %v11523_v56, 16  ;;  %v870_v11 = vshll.u32 %v11523_v56, 16  ;;  %92 = vst [vmem:[#allocation2 + $0xe4] sm:$0x1] %v91_v6  ;;  %v875_v23 = vshrl.u32 %v11524_v34, 16  ;;  %v878_v24 = vshll.u32 %v11524_v34, 16 }
  0x7b   :  { %v835_v52 = vrot.slane %v833_v33, 7  ;;  %v97_v48 = vsel %vm11649_vm2, 0, %v96_v8  ;;  %v288_v36 = vld [vmem:[%s18361_s0 + $0x128] sm:$0xff]  ;;  %v12354_v10 = vrot.slane %v841_v12, 7  ;;  %v12358_v47 = vpack.c.bf16 %v283_v0, %v283_v0  ;;  %v259_v56 = vld [vmem:[%s18361_s0 + $0x40] sm:$0xff] }
  0x7c   :  { %v12356_v51 = vrot.slane %v867_v13, 7  ;;  %98 = vst [vmem:[#allocation2 + $0xfc] sm:$0x1] %v97_v48  ;;  %v12360_v18 = vpack.c.bf16 %v284_v37, %v284_v37  ;;  %v12365_v8 = vrot.slane %v875_v23, 7  ;;  %v12367_v33 = vpack.c.bf16 %v287_v27, %v287_v27 }
  0x7d   :  { %19239 = vst [vmem:[#allocation75_spill] sm:$0xff] %v12354_v10  ;;  %v838_v34 = vor.u32 %v836_v46, %v835_v52  ;;  %v839_v9 = vrot.slane %v835_v52, 4  ;;  %v11363_v6 = vld.sshfl [vmem:[#allocation2 + $0xc] sm:$0x33 pattern:$0x75316420]  ;;  %v846_v12 = vor.u32 %v844_v19, %v12354_v10  ;;  %v12374_v37 = vpack.c.bf16 %v288_v36, %v288_v36 }
  0x7e   :  { %19240 = vst [vmem:[#allocation76_spill] sm:$0xff] %v12365_v8  ;;  %v12371_v13 = vor.u32 %v870_v11, %v12356_v51  ;;  %v11364_v48 = vld.sshfl [vmem:[#allocation2 + $0x10] sm:$0x33 pattern:$0x75316420]  ;;  %v1553_v43 = vcombine.high %v11363_v6, %v11363_v6  ;;  %v1560_v63 = vrot.slane %v11363_v6, %v11755_v20  ;;  %v12378_v46 = vor.u32 %v878_v24, %v12365_v8 }
  0x7f   :  { %v1285_v52 = vld [vmem:[#allocation2 + $0x108] sm:$0xf]  ;;  %v12380_v27 = vpack.c.bf16 %v259_v56, %v259_v56  ;;  %v11369_v23 = vld.sshfl [vmem:[#allocation2 + $0x24] sm:$0x33 pattern:$0x75316420]  ;;  %v1577_v28 = vcombine.high %v11364_v48, %v11364_v48  ;;  %v1584_v19 = vrot.slane %v11364_v48, %v11755_v20  ;;  %v847_v11 = vsel %vm11687_vm7, %v839_v9, %v846_v12 }
  0x80   :  { %v1286_v36 = vsel %vm11696_vm8, %v838_v34, %v1285_v52  ;;  %v11370_v0 = vld.sshfl [vmem:[#allocation2 + $0x28] sm:$0x33 pattern:$0x75316420]  ;;  %v1567_v10 = vrot.slane %v1553_v43, %v11755_v20  ;;  %v1568_v6 = vcombine.high %v1560_v63, %v1560_v63  ;;  %v1677_v4 = vcombine.high %v11369_v23, %v11369_v23  ;;  %1288 = vst.msk [vmem:[#allocation2 + $0x10c] sm:$0xf] %vm15_vm5, %v847_v11 }
  0x81   :  { %v1684_v24 = vrot.slane %v11369_v23, %v11755_v20  ;;  %1287 = vst [vmem:[#allocation2 + $0x108] sm:$0xf] %v1286_v36  ;;  %v1591_v56 = vrot.slane %v1577_v28, %v11755_v20  ;;  %v1592_v8 = vcombine.high %v1584_v19, %v1584_v19  ;;  %v1701_v48 = vcombine.high %v11370_v0, %v11370_v0  ;;  %v1299_v44 = vld [vmem:[#allocation2 + $0x120] sm:$0xf] }
  0x82   :  { %v1708_v53 = vrot.slane %v11370_v0, %v11755_v20  ;;  %v1569_v9 = vcombine.high %v1567_v10, %v1567_v10  ;;  %v1691_v12 = vrot.slane %v1677_v4, %v11755_v20  ;;  %v4133_v52 = vrot.slane %v1560_v63, %v11755_v20 }
  0x83   :  { %v1692_v34 = vcombine.high %v1684_v24, %v1684_v24  ;;  %v1593_v43 = vcombine.high %v1591_v56, %v1591_v56  ;;  %v1715_v30 = vrot.slane %v1701_v48, %v11755_v20  ;;  %v4147_v23 = vrot.slane %v1567_v10, %v11755_v20 }
  0x84   :  { %v1716_v42 = vcombine.high %v1708_v53, %v1708_v53  ;;  %v1693_v36 = vcombine.high %v1691_v12, %v1691_v12  ;;  %v12397_v11 = vrot.slane %v4133_v52, %v11755_v20  ;;  %v4161_v28 = vrot.slane %v1568_v6, %v11755_v20 }
  0x85   :  { %v4175_v0 = vrot.slane %v1569_v9, %v11755_v20  ;;  %v1717_v58 = vcombine.high %v1715_v30, %v1715_v30  ;;  %v4154_v4 = vrot.slane %v4147_v23, %v11755_v20  ;;  %v4189_v5 = vrot.slane %v1584_v19, %v11755_v20 }
  0x86   :  { %v4203_v63 = vrot.slane %v1591_v56, %v11755_v20  ;;  %v4168_v48 = vrot.slane %v4161_v28, %v11755_v20  ;;  %v4217_v10 = vrot.slane %v1592_v8, %v11755_v20  ;;  %v4231_v52 = vrot.slane %v1593_v43, %v11755_v20 }
  0x87   :  { %v4182_v14 = vrot.slane %v4175_v0, %v11755_v20  ;;  %v4196_v26 = vrot.slane %v4189_v5, %v11755_v20  ;;  %v4245_v9 = vrot.slane %v1684_v24, %v11755_v20  ;;  %v4259_v23 = vrot.slane %v1691_v12, %v11755_v20  ;;  %v11427_v17 = vld.sshfl [vmem:[#allocation2 + $0x10c] sm:$0x33 pattern:$0x75316420] }
  0x88   :  { %v4210_v6 = vrot.slane %v4203_v63, %v11755_v20  ;;  %v4224_v19 = vrot.slane %v4217_v10, %v11755_v20  ;;  %v4238_v56 = vrot.slane %v4231_v52, %v11755_v20  ;;  %v4273_v28 = vrot.slane %v1692_v34, %v11755_v20 }
  0x89   :  { %v4287_v0 = vrot.slane %v1693_v36, %v11755_v20  ;;  %v12417_v8 = vrot.slane %v4245_v9, %v11755_v20  ;;  %v4266_v43 = vrot.slane %v4259_v23, %v11755_v20  ;;  %v4301_v5 = vrot.slane %v1708_v53, %v11755_v20 }
  0x8a   :  { %v4315_v63 = vrot.slane %v1715_v30, %v11755_v20  ;;  %v4280_v24 = vrot.slane %v4273_v28, %v11755_v20  ;;  %v4329_v10 = vrot.slane %v1716_v42, %v11755_v20  ;;  %v4343_v52 = vrot.slane %v1717_v58, %v11755_v20 }
  0x8b   :  { %v4294_v12 = vrot.slane %v4287_v0, %v11755_v20  ;;  %v4308_v34 = vrot.slane %v4301_v5, %v11755_v20  ;;  %v12429_v16 = vunpack.c.l.b16 %v4154_v4  ;;  %v12433_v23 = vunpack.c.l.b16 %v4168_v48 }
  0x8c   :  { %v4322_v36 = vrot.slane %v4315_v63, %v11755_v20  ;;  %v4336_v53 = vrot.slane %v4329_v10, %v11755_v20  ;;  %v4350_v30 = vrot.slane %v4343_v52, %v11755_v20  ;;  %v12435_v28 = vunpack.c.l.b16 %v4182_v14 }
  0x8d   :  { %19241 = vst [vmem:[#allocation77_spill] sm:$0xff] %v12429_v16  ;;  %19242 = vst [vmem:[#allocation78_spill] sm:$0xff] %v12433_v23  ;;  %v12437_v0 = vunpack.c.l.b16 %v4196_v26  ;;  %v12439_v42 = vunpack.c.l.b16 %v4210_v6  ;;  %v12441_v58 = vunpack.c.l.b16 %v4224_v19  ;;  %v12443_v5 = vunpack.c.l.b16 %v4238_v56 }
  0x8e   :  { %19243 = vst [vmem:[#allocation79_spill] sm:$0xff] %v12435_v28  ;;  %v12446_v4 = vunpack.c.l.b16 %v4266_v43  ;;  %v12448_v9 = vunpack.c.l.b16 %v4280_v24  ;;  %v12450_v10 = vunpack.c.l.b16 %v4294_v12  ;;  %v12452_v48 = vunpack.c.l.b16 %v4308_v34  ;;  %v11426_v24 = vld.sshfl [vmem:[#allocation2 + $0x108] sm:$0x33 pattern:$0x75316420] }
  0x8f   :  { %19244 = vst [vmem:[#allocation80_spill] sm:$0xff] %v12437_v0  ;;  %19245 = vst [vmem:[#allocation81_spill] sm:$0xff] %v12439_v42  ;;  %v12454_v14 = vunpack.c.l.b16 %v4322_v36  ;;  %v12456_v26 = vunpack.c.l.b16 %v4336_v53  ;;  %v12458_v6 = vunpack.c.l.b16 %v4350_v30  ;;  %v5087_v19 = vrot.slane %v12429_v16, 7 }
  0x90   :  { %19246 = vst [vmem:[#allocation82_spill] sm:$0xff] %v12441_v58  ;;  %19247 = vst [vmem:[#allocation83_spill] sm:$0xff] %v12443_v5  ;;  %v5089_v56 = vrot.slane %v12433_v23, 6  ;;  %v5091_v52 = vrot.slane %v12435_v28, 5  ;;  %v5093_v43 = vrot.slane %v12437_v0, 4  ;;  %v5095_v12 = vrot.slane %v12439_v42, 3 }
  0x91   :  { %19248 = vst [vmem:[#allocation84_spill] sm:$0xff] %v12446_v4  ;;  %19249 = vst [vmem:[#allocation85_spill] sm:$0xff] %v12448_v9  ;;  %v5097_v34 = vrot.slane %v12441_v58, 2  ;;  %v5099_v36 = vrot.slane %v12443_v5, 1  ;;  %v5101_v53 = vrot.slane %v12446_v4, 7  ;;  %v19255_v30 = vunpack.c.l.b16 %v12397_v11 }
  0x92   :  { %19250 = vst [vmem:[#allocation86_spill] sm:$0xff] %v12450_v10  ;;  %19251 = vst [vmem:[#allocation87_spill] sm:$0xff] %v12452_v48  ;;  %v5103_v2 = vrot.slane %v12448_v9, 6  ;;  %v5105_v57 = vrot.slane %v12450_v10, 5  ;;  %v5107_v35 = vrot.slane %v12452_v48, 4  ;;  %v19256_v21 = vunpack.c.l.b16 %v12417_v8 }
  0x93   :  { %19252 = vst [vmem:[#allocation88_spill] sm:$0xff] %v12454_v14  ;;  %19253 = vst [vmem:[#allocation89_spill] sm:$0xff] %v12456_v26  ;;  %v5088_v63 = vsel %vm3561_vm9, %v5087_v19, %v19255_v30  ;;  %v5109_v25 = vrot.slane %v12454_v14, 3  ;;  %v5111_v60 = vrot.slane %v12456_v26, 2  ;;  %v5113_v45 = vrot.slane %v12458_v6, 1 }
  0x94   :  { %19254 = vst [vmem:[#allocation90_spill] sm:$0xff] %v12458_v6  ;;  %v5090_v32 = vsel %vm3564_vm10, %v5089_v56, %v5088_v63  ;;  %v5102_v61 = vsel %vm3561_vm9, %v5101_v53, %v19256_v21  ;;  %v19257_v55 = vrot.slane %v12356_v51, 4  ;;  %v1300_v53 = vsel %vm11696_vm8, %v12371_v13, %v1299_v44 }
  0x95   :  { %v5092_v19 = vsel %vm3567_vm11, %v5091_v52, %v5090_v32  ;;  %v5104_v30 = vsel %vm3564_vm10, %v5103_v2, %v5102_v61  ;;  %v6624_v32 = vcombine.high %v11426_v24, %v11426_v24  ;;  %1301 = vst [vmem:[#allocation2 + $0x120] sm:$0xf] %v1300_v53  ;;  %v6631_v51 = vrot.slane %v11426_v24, %v11755_v20 }
  0x96   :  { %v881_v63 = vsel %vm11687_vm7, %v19257_v55, %v12378_v46  ;;  %v5094_v56 = vsel %vm3570_vm12, %v5093_v43, %v5092_v19  ;;  %v5106_v21 = vsel %vm3567_vm11, %v5105_v57, %v5104_v30  ;;  %v6648_v52 = vcombine.high %v11427_v17, %v11427_v17 }
  0x97   :  { %1302 = vst.msk [vmem:[#allocation2 + $0x124] sm:$0xf] %vm15_vm5, %v881_v63  ;;  %v5096_v61 = vsel %vm3573_vm13, %v5095_v12, %v5094_v56  ;;  %v5108_v2 = vsel %vm3570_vm12, %v5107_v35, %v5106_v21  ;;  %v6638_v57 = vrot.slane %v6624_v32, %v11755_v20  ;;  %v6655_v43 = vrot.slane %v11427_v17, %v11755_v20 }
  0x98   :  { %v5098_v55 = vsel %vm3576_vm14, %v5097_v34, %v5096_v61  ;;  %v5110_v46 = vsel %vm3573_vm13, %v5109_v25, %v5108_v2  ;;  %v6639_v19 = vcombine.high %v6631_v51, %v6631_v51  ;;  %v6662_v12 = vrot.slane %v6648_v52, %v11755_v20 }
  0x99   :  { %v5100_v44 = vsel %vm3579_vm15, %v5099_v36, %v5098_v55  ;;  %v5112_v13 = vsel %vm3576_vm14, %v5111_v60, %v5110_v46  ;;  %v6640_v24 = vcombine.high %v6638_v57, %v6638_v57  ;;  %v6663_v30 = vcombine.high %v6655_v43, %v6655_v43 }
  0x9a   :  { %v12505_v35 = vsel %vm3579_vm15, %v5113_v45, %v5112_v13  ;;  %v7715_v34 = vrot.slane %v6631_v51, %v11755_v20  ;;  %v6664_v63 = vcombine.high %v6662_v12, %v6662_v12  ;;  %v7729_v56 = vrot.slane %v6638_v57, %v11755_v20 }
  0x9b   :  { %19258 = vst [vmem:[#allocation91_spill] sm:$0xff] %v12505_v35  ;;  %v5199_v25 = vpack.c.b16 %v12505_v35, %v5100_v44  ;;  %v7743_v17 = vrot.slane %v6639_v19, %v11755_v20  ;;  %v7757_v60 = vrot.slane %v6640_v24, %v11755_v20  ;;  %v7771_v21 = vrot.slane %v6655_v43, %v11755_v20 }
  0x9c   :  { %v12512_v36 = vrot.slane %v7715_v34, %v11755_v20  ;;  %v7785_v45 = vrot.slane %v6662_v12, %v11755_v20  ;;  %v7736_v32 = vrot.slane %v7729_v56, %v11755_v20  ;;  %v7799_v2 = vrot.slane %v6663_v30, %v11755_v20  ;;  %v11432_v52 = vld.sshfl [vmem:[#allocation2 + $0x120] sm:$0x33 pattern:$0x75316420] }
  0x9d   :  { %5203 = vrot.lane.b32.xlu1 %v5199_v25, %s11613_s5  ;;  %v7750_v61 = vrot.slane %v7743_v17, %v11755_v20  ;;  %v7813_v51 = vrot.slane %v6664_v63, %v11755_v20  ;;  %v7764_v57 = vrot.slane %v7757_v60, %v11755_v20  ;;  %v7778_v43 = vrot.slane %v7771_v21, %v11755_v20 }
  0x9e   :  { %19259 = vst [vmem:[#allocation92_spill] sm:$0xff] %v12512_v36  ;;  %v11433_v53 = vld.sshfl [vmem:[#allocation2 + $0x124] sm:$0x33 pattern:$0x75316420]  ;;  %v6748_v44 = vcombine.high %v11432_v52, %v11432_v52  ;;  %v6755_v13 = vrot.slane %v11432_v52, %v11755_v20  ;;  %v7792_v19 = vrot.slane %v7785_v45, %v11755_v20  ;;  %v7806_v12 = vrot.slane %v7799_v2, %v11755_v20 }
  0x9f   :  { %v6772_v55 = vcombine.high %v11433_v53, %v11433_v53  ;;  %v6779_v46 = vrot.slane %v11433_v53, %v11755_v20  ;;  %v7820_v34 = vrot.slane %v7813_v51, %v11755_v20  ;;  %v12545_v35 = vunpack.c.l.b16 %v7736_v32 }
  0xa0   :  { %v6762_v63 = vrot.slane %v6748_v44, %v11755_v20  ;;  %v6763_v56 = vcombine.high %v6755_v13, %v6755_v13  ;;  %v7827_v17 = vrot.slane %v6755_v13, %v11755_v20  ;;  %v12553_v3 = vunpack.c.l.b16 %v7764_v57 }
  0xa1   :  { %v6786_v24 = vrot.slane %v6772_v55, %v11755_v20  ;;  %v6787_v30 = vcombine.high %v6779_v46, %v6779_v46  ;;  %v7883_v25 = vrot.slane %v6779_v46, %v11755_v20  ;;  %19261 = vst [vmem:[#allocation94_spill] sm:$0xff] %v12545_v35  ;;  %v12560_v32 = vunpack.c.l.b16 %v7806_v12 }
  0xa2   :  { %v6764_v52 = vcombine.high %v6762_v63, %v6762_v63  ;;  %v12538_v55 = vrot.slane %v7827_v17, %v11755_v20  ;;  %v7841_v51 = vrot.slane %v6762_v63, %v11755_v20  ;;  %v7855_v46 = vrot.slane %v6763_v56, %v11755_v20  ;;  %19263 = vst [vmem:[#allocation96_spill] sm:$0xff] %v12553_v3 }
  0xa3   :  { %v6788_v21 = vcombine.high %v6786_v24, %v6786_v24  ;;  %v7890_v53 = vrot.slane %v7883_v25, %v11755_v20  ;;  %v7897_v45 = vrot.slane %v6786_v24, %v11755_v20  ;;  %v7911_v2 = vrot.slane %v6787_v30, %v11755_v20  ;;  %19266 = vst [vmem:[#allocation99_spill] sm:$0xff] %v12560_v32 }
  0xa4   :  { %19260 = vst [vmem:[#allocation93_spill] sm:$0xff] %v12538_v55  ;;  %v7848_v24 = vrot.slane %v7841_v51, %v11755_v20  ;;  %v7862_v30 = vrot.slane %v7855_v46, %v11755_v20  ;;  %v7869_v25 = vrot.slane %v6764_v52, %v11755_v20  ;;  %v12550_v17 = vunpack.c.l.b16 %v7750_v61 }
  0xa5   :  { %v7904_v44 = vrot.slane %v7897_v45, %v11755_v20  ;;  %v7918_v13 = vrot.slane %v7911_v2, %v11755_v20  ;;  %v7925_v60 = vrot.slane %v6788_v21, %v11755_v20  ;;  %v12555_v56 = vunpack.c.l.b16 %v7778_v43 }
  0xa6   :  { %19262 = vst [vmem:[#allocation95_spill] sm:$0xff] %v12550_v17  ;;  %v12557_v45 = vunpack.c.l.b16 %v7792_v19  ;;  %v7876_v21 = vrot.slane %v7869_v25, %v11755_v20  ;;  %v12562_v2 = vunpack.c.l.b16 %v7820_v34  ;;  %v18474_v51 = vunpack.c.l.b16 %v12538_v55 }
  0xa7   :  { %v7932_v63 = vrot.slane %v7925_v60, %v11755_v20  ;;  %19264 = vst [vmem:[#allocation97_spill] sm:$0xff] %v12555_v56  ;;  %v12565_v46 = vunpack.c.l.b16 %v7848_v24  ;;  %v12567_v61 = vunpack.c.l.b16 %v7862_v30  ;;  %v12569_v52 = vunpack.c.l.b16 %v7890_v53 }
  0xa8   :  { %19265 = vst [vmem:[#allocation98_spill] sm:$0xff] %v12557_v45  ;;  %19267 = vst [vmem:[#allocation100_spill] sm:$0xff] %v12562_v2  ;;  %v12571_v57 = vunpack.c.l.b16 %v7904_v44  ;;  %v12573_v43 = vunpack.c.l.b16 %v7876_v21  ;;  %v12575_v19 = vunpack.c.l.b16 %v7918_v13  ;;  %v19275_v12 = vunpack.c.l.b16 %v12512_v36 }
  0xa9   :  { %19268 = vst [vmem:[#allocation101_spill] sm:$0xff] %v12565_v46  ;;  %19269 = vst [vmem:[#allocation102_spill] sm:$0xff] %v12567_v61  ;;  %v12577_v60 = vunpack.c.l.b16 %v7932_v63  ;;  %v18476_v25 = vrot.slane %v12550_v17, 7  ;;  %v8603_v63 = vrot.slane %v18474_v51, 1  ;;  %v18477_v24 = vrot.slane %v12567_v61, 7 }
  0xaa   :  { %19270 = vst [vmem:[#allocation103_spill] sm:$0xff] %v12569_v52  ;;  %19271 = vst [vmem:[#allocation104_spill] sm:$0xff] %v12571_v57  ;;  %v8589_v34 = vrot.slane %v19275_v12, 1  ;;  %v19276_v36 = vrot.slane %v12553_v3, 6  ;;  %v19277_v55 = vrot.slane %v12555_v56, 5  ;;  %v782_v30 = vshrl.u32 %v12358_v47, 16 }
  0xab   :  { %19272 = vst [vmem:[#allocation105_spill] sm:$0xff] %v12573_v43  ;;  %19273 = vst [vmem:[#allocation106_spill] sm:$0xff] %v12575_v19  ;;  %v8604_v13 = vsel %vm3561_vm9, %v12565_v46, %v8603_v63  ;;  %v785_v21 = vshll.u32 %v12358_v47, 16  ;;  %v19284_v47 = vrot.slane %v12571_v57, 4 }
  0xac   :  { %19274 = vst [vmem:[#allocation107_spill] sm:$0xff] %v12577_v60  ;;  %v8590_v44 = vsel %vm3561_vm9, %v12545_v35, %v8589_v34  ;;  %v784_v56 = vrot.slane %v782_v30, 7 }
  0xad   :  { %v8592_v12 = vsel %vm3564_vm10, %v18476_v25, %v8590_v44  ;;  %v8606_v25 = vsel %vm3564_vm10, %v18477_v24, %v8604_v13  ;;  %v19281_v24 = vrot.slane %v12569_v52, 5  ;;  %v48_v52 = vld [vmem:[#allocation2 + $0x3c] sm:$0x1] }
  0xae   :  { %v8594_v34 = vsel %vm3567_vm11, %v19276_v36, %v8592_v12  ;;  %v19278_v36 = vrot.slane %v12557_v45, 4  ;;  %v19279_v12 = vrot.slane %v12573_v43, 6  ;;  %v793_v45 = vshll.u32 %v12360_v18, 16 }
  0xaf   :  { %v8596_v44 = vsel %vm3570_vm12, %v19277_v55, %v8594_v34  ;;  %v790_v55 = vshrl.u32 %v12360_v18, 16  ;;  %v19280_v34 = vrot.slane %v12560_v32, 3  ;;  %v787_v18 = vor.u32 %v785_v21, %v784_v56 }
  0xb0   :  { %v8598_v63 = vsel %vm3573_vm13, %v19278_v36, %v8596_v44  ;;  %v8608_v51 = vsel %vm3567_vm11, %v19279_v12, %v8606_v25  ;;  %v19282_v44 = vrot.slane %v12562_v2, 2  ;;  %v788_v30 = vrot.slane %v784_v56, 4  ;;  %v263_v56 = vld [vmem:[%s18361_s0 + $0x60] sm:$0xff] }
  0xb1   :  { %v8600_v13 = vsel %vm3576_vm14, %v19280_v34, %v8598_v63  ;;  %v8610_v53 = vsel %vm3570_vm12, %v19281_v24, %v8608_v51  ;;  %v12635_v12 = vrot.slane %v790_v55, 7  ;;  %v816_v63 = vshrl.u32 %v12367_v33, 16  ;;  %v1264_v34 = vld [vmem:[#allocation2 + $0xe4] sm:$0xf] }
  0xb2   :  { %v12630_v36 = vsel %vm3579_vm15, %v19282_v44, %v8600_v13  ;;  %v8612_v25 = vsel %vm3573_vm13, %v19284_v47, %v8610_v53  ;;  %v19286_v51 = vrot.slane %v12575_v19, 3  ;;  %v819_v2 = vshll.u32 %v12367_v33, 16  ;;  %v54_v13 = vld [vmem:[#allocation2 + $0x54] sm:$0x1]  ;;  %v260_v19 = vld [vmem:[%s18361_s0 + $0x48] sm:$0xff] }
  0xb3   :  { %19283 = vst [vmem:[#allocation108_spill] sm:$0xff] %v12630_v36  ;;  %19285 = vst [vmem:[#allocation109_spill] sm:$0xff] %v12635_v12  ;;  %v19287_v44 = vrot.slane %v12577_v60, 2  ;;  %v795_v53 = vor.u32 %v793_v45, %v12635_v12  ;;  %v818_v55 = vrot.slane %v816_v63, 7  ;;  %v824_v47 = vshrl.u32 %v12374_v37, 16  ;;  %v264_v33 = vld [vmem:[%s18361_s0 + $0x68] sm:$0xff] }
  0xb4   :  { %v8614_v24 = vsel %vm3576_vm14, %v19286_v51, %v8612_v25  ;;  %v827_v45 = vshll.u32 %v12374_v37, 16  ;;  %v1265_v25 = vsel %vm11696_vm8, %v787_v18, %v1264_v34  ;;  %v1278_v63 = vld [vmem:[#allocation2 + $0xfc] sm:$0xf]  ;;  %v49_v51 = vsel %vm11649_vm2, 0, %v48_v52 }
  0xb5   :  { %v12645_v57 = vsel %vm3579_vm15, %v19287_v44, %v8614_v24  ;;  %v796_v24 = vsel %vm11687_vm7, %v788_v30, %v795_v53  ;;  %v821_v44 = vor.u32 %v819_v2, %v818_v55  ;;  %v822_v12 = vrot.slane %v818_v55, 4  ;;  %1266 = vst [vmem:[#allocation2 + $0xe4] sm:$0xf] %v1265_v25  ;;  %50 = vst [vmem:[#allocation2 + $0x3c] sm:$0x1] %v49_v51 }
  0xb6   :  { %19288 = vst [vmem:[#allocation110_spill] sm:$0xff] %v12645_v57  ;;  %v8674_v21 = vpack.c.b16 %v12645_v57, %v12630_v36  ;;  %v12667_v60 = vrot.slane %v824_v47, 7  ;;  %1267 = vst.msk [vmem:[#allocation2 + $0xe8] sm:$0xf] %vm15_vm5, %v796_v24  ;;  %v55_v37 = vsel %vm11649_vm2, 0, %v54_v13  ;;  %v11490_v34 = vpack.c.bf16 %v260_v19, %v260_v19 }
  0xb7   :  { %v11493_v18 = vpack.c.bf16 %v263_v56, %v263_v56  ;;  %v11494_v57 = vpack.c.bf16 %v264_v33, %v264_v33  ;;  %v1279_v2 = vsel %vm11696_vm8, %v821_v44, %v1278_v63  ;;  %56 = vst [vmem:[#allocation2 + $0x54] sm:$0x1] %v55_v37  ;;  %v578_v30 = vshrl.u32 %v12380_v27, 16 }
  0xb8   :  { %19289 = vst [vmem:[#allocation111_spill] sm:$0xff] %v12667_v60  ;;  %8679 = vrot.lane.b32.xlu0 %v8674_v21, %s11612_s9  ;;  %v829_v52 = vor.u32 %v827_v45, %v12667_v60  ;;  %v581_v53 = vshll.u32 %v12380_v27, 16  ;;  %1280 = vst [vmem:[#allocation2 + $0xfc] sm:$0xf] %v1279_v2  ;;  %v586_v55 = vshrl.u32 %v11490_v34, 16  ;;  %v589_v47 = vshll.u32 %v11490_v34, 16 }
  0xb9   :  { %v612_v21 = vshrl.u32 %v11493_v18, 16  ;;  %v615_v25 = vshll.u32 %v11493_v18, 16  ;;  %v580_v13 = vrot.slane %v578_v30, 7  ;;  %v620_v56 = vshrl.u32 %v11494_v57, 16 }
  0xba   :  { %v830_v19 = vsel %vm11687_vm7, %v822_v12, %v829_v52  ;;  %v623_v33 = vshll.u32 %v11494_v57, 16  ;;  %v12681_v45 = vrot.slane %v586_v55, 7  ;;  %v19291_v51 = vunpack.c.l.b16 %v12397_v11 }
  0xbb   :  { %1281 = vst.msk [vmem:[#allocation2 + $0x100] sm:$0xf] %vm15_vm5, %v830_v19  ;;  %v614_v63 = vrot.slane %v612_v21, 7  ;;  %v18494_v27 = vrot.slane %v12433_v23, 7  ;;  %v583_v44 = vor.u32 %v581_v53, %v580_v13  ;;  %v584_v37 = vrot.slane %v580_v13, 4 }
  0xbc   :  { %19290 = vst [vmem:[#allocation112_spill] sm:$0xff] %v12681_v45  ;;  %v5211_v24 = vrot.slane %v19291_v51, 1  ;;  %v12686_v34 = vrot.slane %v620_v56, 7  ;;  %v591_v52 = vor.u32 %v589_v47, %v12681_v45  ;;  %v1180_v19 = vld [vmem:[#allocation2 + $0x3c] sm:$0xf] }
  0xbd   :  { %v11417_v12 = vld.sshfl [vmem:[#allocation2 + $0xe4] sm:$0x33 pattern:$0x75316420]  ;;  %v12690_v57 = vor.u32 %v615_v25, %v614_v63  ;;  %v618_v2 = vrot.slane %v614_v63, 4  ;;  %v1181_v63 = vsel %vm11696_vm8, %v583_v44, %v1180_v19 }
  0xbe   :  { %19292 = vst [vmem:[#allocation113_spill] sm:$0xff] %v12686_v34  ;;  %v5212_v30 = vsel %vm3561_vm9, %v12429_v16, %v5211_v24  ;;  %v11418_v55 = vld.sshfl [vmem:[#allocation2 + $0xe8] sm:$0x33 pattern:$0x75316420]  ;;  %v6438_v11 = vcombine.high %v11417_v12, %v11417_v12  ;;  %v6445_v21 = vrot.slane %v11417_v12, %v11755_v20  ;;  %v625_v53 = vor.u32 %v623_v33, %v12686_v34 }
  0xbf   :  { %v12699_v13 = vsel %vm3564_vm10, %v18494_v27, %v5212_v30  ;;  %v6462_v56 = vcombine.high %v11418_v55, %v11418_v55  ;;  %v6469_v47 = vrot.slane %v11418_v55, %v11755_v20  ;;  %v592_v25 = vsel %vm11687_vm7, %v584_v37, %v591_v52  ;;  %v11423_v51 = vld.sshfl [vmem:[#allocation2 + $0xfc] sm:$0x33 pattern:$0x75316420]  ;;  %1182 = vst [vmem:[#allocation2 + $0x3c] sm:$0xf] %v1181_v63 }
  0xc0   :  { %v6452_v24 = vrot.slane %v6438_v11, %v11755_v20  ;;  %v6453_v12 = vcombine.high %v6445_v21, %v6445_v21  ;;  %v9011_v33 = vrot.slane %v6445_v21, %v11755_v20  ;;  %v626_v18 = vsel %vm11687_vm7, %v618_v2, %v625_v53  ;;  %1183 = vst.msk [vmem:[#allocation2 + $0x40] sm:$0xf] %vm15_vm5, %v592_v25 }
  0xc1   :  { %v6476_v30 = vrot.slane %v6462_v56, %v11755_v20  ;;  %v6477_v55 = vcombine.high %v6469_v47, %v6469_v47  ;;  %v6562_v27 = vcombine.high %v11423_v51, %v11423_v51  ;;  %v6569_v37 = vrot.slane %v11423_v51, %v11755_v20  ;;  %1197 = vst.msk [vmem:[#allocation2 + $0x58] sm:$0xf] %vm15_vm5, %v626_v18 }
  0xc2   :  { %v11424_v44 = vld.sshfl [vmem:[#allocation2 + $0x100] sm:$0x33 pattern:$0x75316420]  ;;  %v6454_v52 = vcombine.high %v6452_v24, %v6452_v24  ;;  %v12715_v11 = vrot.slane %v9011_v33, %v11755_v20  ;;  %v9025_v21 = vrot.slane %v6452_v24, %v11755_v20  ;;  %v9039_v2 = vrot.slane %v6453_v12, %v11755_v20 }
  0xc3   :  { %v6478_v53 = vcombine.high %v6476_v30, %v6476_v30  ;;  %v6576_v19 = vrot.slane %v6562_v27, %v11755_v20  ;;  %v6577_v25 = vcombine.high %v6569_v37, %v6569_v37  ;;  %v6586_v56 = vcombine.high %v11424_v44, %v11424_v44 }
  0xc4   :  { %v6593_v63 = vrot.slane %v11424_v44, %v11755_v20  ;;  %v9032_v51 = vrot.slane %v9025_v21, %v11755_v20  ;;  %v9046_v18 = vrot.slane %v9039_v2, %v11755_v20  ;;  %v9053_v36 = vrot.slane %v6454_v52, %v11755_v20 }
  0xc5   :  { %v6578_v34 = vcombine.high %v6576_v19, %v6576_v19  ;;  %v6600_v33 = vrot.slane %v6586_v56, %v11755_v20  ;;  %v9067_v24 = vrot.slane %v6469_v47, %v11755_v20  ;;  %v9081_v12 = vrot.slane %v6476_v30, %v11755_v20 }
  0xc6   :  { %v6601_v45 = vcombine.high %v6593_v63, %v6593_v63  ;;  %v9060_v27 = vrot.slane %v9053_v36, %v11755_v20  ;;  %v9095_v60 = vrot.slane %v6477_v55, %v11755_v20  ;;  %v9109_v44 = vrot.slane %v6478_v53, %v11755_v20 }
  0xc7   :  { %v6602_v23 = vcombine.high %v6600_v33, %v6600_v33  ;;  %v9074_v21 = vrot.slane %v9067_v24, %v11755_v20  ;;  %v9088_v2 = vrot.slane %v9081_v12, %v11755_v20  ;;  %v9123_v52 = vrot.slane %v6569_v37, %v11755_v20 }
  0xc8   :  { %v9102_v56 = vrot.slane %v9095_v60, %v11755_v20  ;;  %v9116_v47 = vrot.slane %v9109_v44, %v11755_v20  ;;  %v9137_v30 = vrot.slane %v6576_v19, %v11755_v20  ;;  %v9151_v16 = vrot.slane %v6577_v25, %v11755_v20  ;;  %v11382_v15 = vld.sshfl [vmem:[#allocation2 + $0x58] sm:$0x33 pattern:$0x75316420] }
  0xc9   :  { %v12738_v36 = vrot.slane %v9123_v52, %v11755_v20  ;;  %v9165_v55 = vrot.slane %v6578_v34, %v11755_v20  ;;  %v9179_v53 = vrot.slane %v6593_v63, %v11755_v20  ;;  %v9193_v24 = vrot.slane %v6600_v33, %v11755_v20 }
  0xca   :  { %v9144_v12 = vrot.slane %v9137_v30, %v11755_v20  ;;  %v9158_v37 = vrot.slane %v9151_v16, %v11755_v20  ;;  %v9207_v60 = vrot.slane %v6601_v45, %v11755_v20  ;;  %v9221_v44 = vrot.slane %v6602_v23, %v11755_v20 }
  0xcb   :  { %v9172_v19 = vrot.slane %v9165_v55, %v11755_v20  ;;  %v9186_v25 = vrot.slane %v9179_v53, %v11755_v20  ;;  %v9200_v52 = vrot.slane %v9193_v24, %v11755_v20  ;;  %v12753_v32 = vunpack.c.l.b16 %v9032_v51  ;;  %v1194_v24 = vld [vmem:[#allocation2 + $0x54] sm:$0xf] }
  0xcc   :  { %v9214_v63 = vrot.slane %v9207_v60, %v11755_v20  ;;  %v9228_v33 = vrot.slane %v9221_v44, %v11755_v20  ;;  %v12755_v30 = vunpack.c.l.b16 %v9046_v18  ;;  %v12757_v16 = vunpack.c.l.b16 %v9060_v27 }
  0xcd   :  { %19293 = vst [vmem:[#allocation114_spill] sm:$0xff] %v12753_v32  ;;  %v12759_v45 = vunpack.c.l.b16 %v9074_v21  ;;  %v12761_v23 = vunpack.c.l.b16 %v9088_v2  ;;  %v12763_v55 = vunpack.c.l.b16 %v9102_v56  ;;  %v12765_v53 = vunpack.c.l.b16 %v9116_v47 }
  0xce   :  { %19294 = vst [vmem:[#allocation115_spill] sm:$0xff] %v12755_v30  ;;  %19295 = vst [vmem:[#allocation116_spill] sm:$0xff] %v12757_v16  ;;  %v12768_v34 = vunpack.c.l.b16 %v9144_v12  ;;  %v12770_v60 = vunpack.c.l.b16 %v9158_v37  ;;  %v12772_v51 = vunpack.c.l.b16 %v9172_v19  ;;  %v12774_v18 = vunpack.c.l.b16 %v9186_v25  ;;  %v11375_v12 = vld.sshfl [vmem:[#allocation2 + $0x3c] sm:$0x33 pattern:$0x75316420] }
  0xcf   :  { %19296 = vst [vmem:[#allocation117_spill] sm:$0xff] %v12759_v45  ;;  %19297 = vst [vmem:[#allocation118_spill] sm:$0xff] %v12761_v23  ;;  %v12776_v27 = vunpack.c.l.b16 %v9200_v52  ;;  %v12778_v21 = vunpack.c.l.b16 %v9214_v63  ;;  %v12780_v2 = vunpack.c.l.b16 %v9228_v33  ;;  %v9965_v56 = vrot.slane %v12753_v32, 7 }
  0xd0   :  { %19298 = vst [vmem:[#allocation119_spill] sm:$0xff] %v12763_v55  ;;  %19299 = vst [vmem:[#allocation120_spill] sm:$0xff] %v12765_v53  ;;  %v9967_v47 = vrot.slane %v12755_v30, 6  ;;  %v9969_v44 = vrot.slane %v12757_v16, 5  ;;  %v9971_v37 = vrot.slane %v12759_v45, 4  ;;  %v9973_v19 = vrot.slane %v12761_v23, 3 }
  0xd1   :  { %19300 = vst [vmem:[#allocation121_spill] sm:$0xff] %v12768_v34  ;;  %19301 = vst [vmem:[#allocation122_spill] sm:$0xff] %v12770_v60  ;;  %v9975_v25 = vrot.slane %v12763_v55, 2  ;;  %v9977_v52 = vrot.slane %v12765_v53, 1  ;;  %v19307_v33 = vunpack.c.l.b16 %v12715_v11  ;;  %v9979_v3 = vrot.slane %v12768_v34, 7 }
  0xd2   :  { %19302 = vst [vmem:[#allocation123_spill] sm:$0xff] %v12772_v51  ;;  %19303 = vst [vmem:[#allocation124_spill] sm:$0xff] %v12774_v18  ;;  %v11376_v63 = vld.sshfl [vmem:[#allocation2 + $0x40] sm:$0x33 pattern:$0x75316420]  ;;  %v19308_v54 = vunpack.c.l.b16 %v12738_v36  ;;  %v1195_v49 = vsel %vm11696_vm8, %v12690_v57, %v1194_v24  ;;  %v1801_v41 = vcombine.high %v11375_v12, %v11375_v12  ;;  %v1808_v38 = vrot.slane %v11375_v12, %v11755_v20 }
  0xd3   :  { %19304 = vst [vmem:[#allocation125_spill] sm:$0xff] %v12776_v27  ;;  %19305 = vst [vmem:[#allocation126_spill] sm:$0xff] %v12778_v21  ;;  %v9966_v43 = vsel %vm3561_vm9, %v9965_v56, %v19307_v33  ;;  %v9981_v61 = vrot.slane %v12770_v60, 6  ;;  %v9983_v46 = vrot.slane %v12772_v51, 5  ;;  %v9985_v35 = vrot.slane %v12774_v18, 4 }
  0xd4   :  { %19306 = vst [vmem:[#allocation127_spill] sm:$0xff] %v12780_v2  ;;  %v9968_v17 = vsel %vm3564_vm10, %v9967_v47, %v9966_v43  ;;  %v9987_v29 = vrot.slane %v12776_v27, 3  ;;  %v9989_v62 = vrot.slane %v12778_v21, 2  ;;  %v9980_v56 = vsel %vm3561_vm9, %v9979_v3, %v19308_v54  ;;  %1196 = vst [vmem:[#allocation2 + $0x54] sm:$0xf] %v1195_v49 }
  0xd5   :  { %v9970_v39 = vsel %vm3567_vm11, %v9969_v44, %v9968_v17  ;;  %v9991_v33 = vrot.slane %v12780_v2, 1  ;;  %v9982_v47 = vsel %vm3564_vm10, %v9981_v61, %v9980_v56  ;;  %v1825_v3 = vcombine.high %v11376_v63, %v11376_v63 }
  0xd6   :  { %v9972_v43 = vsel %vm3570_vm12, %v9971_v37, %v9970_v39  ;;  %v9984_v44 = vsel %vm3567_vm11, %v9983_v46, %v9982_v47  ;;  %v1832_v54 = vrot.slane %v11376_v63, %v11755_v20  ;;  %v1815_v39 = vrot.slane %v1801_v41, %v11755_v20 }
  0xd7   :  { %v9974_v17 = vsel %vm3573_vm13, %v9973_v19, %v9972_v43  ;;  %v9986_v57 = vsel %vm3570_vm12, %v9985_v35, %v9984_v44  ;;  %v1816_v24 = vcombine.high %v1808_v38, %v1808_v38  ;;  %v1839_v12 = vrot.slane %v1825_v3, %v11755_v20 }
  0xd8   :  { %v9976_v22 = vsel %vm3576_vm14, %v9975_v25, %v9974_v17  ;;  %v9988_v61 = vsel %vm3573_vm13, %v9987_v29, %v9986_v57  ;;  %v1840_v37 = vcombine.high %v1832_v54, %v1832_v54  ;;  %v1817_v19 = vcombine.high %v1815_v39, %v1815_v39 }
  0xd9   :  { %v9978_v49 = vsel %vm3579_vm15, %v9977_v52, %v9976_v22  ;;  %v9990_v46 = vsel %vm3576_vm14, %v9989_v62, %v9988_v61  ;;  %v1949_v56 = vcombine.high %v11382_v15, %v11382_v15  ;;  %v1956_v63 = vrot.slane %v11382_v15, %v11755_v20 }
  0xda   :  { %v12822_v25 = vsel %vm3579_vm15, %v9991_v33, %v9990_v46  ;;  %v1841_v35 = vcombine.high %v1839_v12, %v1839_v12  ;;  %v4357_v41 = vrot.slane %v1808_v38, %v11755_v20  ;;  %v4371_v43 = vrot.slane %v1815_v39, %v11755_v20 }
  0xdb   :  { %19309 = vst [vmem:[#allocation128_spill] sm:$0xff] %v12822_v25  ;;  %v10077_v22 = vpack.c.b16 %v12822_v25, %v9978_v49  ;;  %v1963_v29 = vrot.slane %v1949_v56, %v11755_v20  ;;  %v1964_v52 = vcombine.high %v1956_v63, %v1956_v63  ;;  %v4385_v47 = vrot.slane %v1816_v24, %v11755_v20  ;;  %v11381_v62 = vld.sshfl [vmem:[#allocation2 + $0x54] sm:$0x33 pattern:$0x75316420] }
  0xdc   :  { %v12830_v17 = vrot.slane %v4357_v41, %v11755_v20  ;;  %v4378_v15 = vrot.slane %v4371_v43, %v11755_v20  ;;  %v4399_v33 = vrot.slane %v1817_v19, %v11755_v20  ;;  %v4413_v44 = vrot.slane %v1832_v54, %v11755_v20 }
  0xdd   :  { %10081 = vrot.lane.b32.xlu1 %v10077_v22, %s11613_s5  ;;  %v1925_v38 = vcombine.high %v11381_v62, %v11381_v62  ;;  %v1932_v3 = vrot.slane %v11381_v62, %v11755_v20  ;;  %v1965_v57 = vcombine.high %v1963_v29, %v1963_v29  ;;  %v4392_v39 = vrot.slane %v4385_v47, %v11755_v20 }
  0xde   :  { %v4406_v24 = vrot.slane %v4399_v33, %v11755_v20  ;;  %v4420_v49 = vrot.slane %v4413_v44, %v11755_v20  ;;  %v4427_v61 = vrot.slane %v1839_v12, %v11755_v20  ;;  %v4441_v46 = vrot.slane %v1840_v37, %v11755_v20 }
  0xdf   :  { %v1939_v19 = vrot.slane %v1925_v38, %v11755_v20  ;;  %v1940_v56 = vcombine.high %v1932_v3, %v1932_v3  ;;  %v4455_v54 = vrot.slane %v1841_v35, %v11755_v20  ;;  %v4469_v41 = vrot.slane %v1932_v3, %v11755_v20 }
  0xe0   :  { %v4434_v43 = vrot.slane %v4427_v61, %v11755_v20  ;;  %v4448_v22 = vrot.slane %v4441_v46, %v11755_v20  ;;  %v4525_v47 = vrot.slane %v1956_v63, %v11755_v20  ;;  %v4539_v62 = vrot.slane %v1963_v29, %v11755_v20 }
  0xe1   :  { %v1941_v33 = vcombine.high %v1939_v19, %v1939_v19  ;;  %v4462_v12 = vrot.slane %v4455_v54, %v11755_v20  ;;  %v12851_v37 = vrot.slane %v4469_v41, %v11755_v20  ;;  %v4483_v44 = vrot.slane %v1939_v19, %v11755_v20 }
  0xe2   :  { %v4497_v35 = vrot.slane %v1940_v56, %v11755_v20  ;;  %v4532_v38 = vrot.slane %v4525_v47, %v11755_v20  ;;  %v4546_v3 = vrot.slane %v4539_v62, %v11755_v20  ;;  %v4553_v61 = vrot.slane %v1964_v52, %v11755_v20 }
  0xe3   :  { %v4490_v63 = vrot.slane %v4483_v44, %v11755_v20  ;;  %v4511_v29 = vrot.slane %v1941_v33, %v11755_v20  ;;  %v4567_v46 = vrot.slane %v1965_v57, %v11755_v20  ;;  %v12864_v25 = vunpack.c.l.b16 %v4378_v15 }
  0xe4   :  { %v4504_v41 = vrot.slane %v4497_v35, %v11755_v20  ;;  %v4560_v19 = vrot.slane %v4553_v61, %v11755_v20  ;;  %v12866_v56 = vunpack.c.l.b16 %v4392_v39  ;;  %v12870_v62 = vunpack.c.l.b16 %v4406_v24 }
  0xe5   :  { %19310 = vst [vmem:[#allocation129_spill] sm:$0xff] %v12864_v25  ;;  %v4518_v47 = vrot.slane %v4511_v29, %v11755_v20  ;;  %v4574_v52 = vrot.slane %v4567_v46, %v11755_v20  ;;  %v12872_v44 = vunpack.c.l.b16 %v4420_v49  ;;  %v12874_v33 = vunpack.c.l.b16 %v4434_v43 }
  0xe6   :  { %19311 = vst [vmem:[#allocation130_spill] sm:$0xff] %v12866_v56  ;;  %19312 = vst [vmem:[#allocation131_spill] sm:$0xff] %v12870_v62  ;;  %v12876_v57 = vunpack.c.l.b16 %v4448_v22  ;;  %v12878_v54 = vunpack.c.l.b16 %v4462_v12  ;;  %v12881_v15 = vunpack.c.l.b16 %v4490_v63  ;;  %v12883_v39 = vunpack.c.l.b16 %v4504_v41 }
  0xe7   :  { %19313 = vst [vmem:[#allocation132_spill] sm:$0xff] %v12872_v44  ;;  %19314 = vst [vmem:[#allocation133_spill] sm:$0xff] %v12874_v33  ;;  %v12885_v61 = vunpack.c.l.b16 %v4518_v47  ;;  %v12887_v29 = vunpack.c.l.b16 %v4532_v38  ;;  %v12889_v24 = vunpack.c.l.b16 %v4546_v3  ;;  %v12891_v49 = vunpack.c.l.b16 %v4560_v19 }
  0xe8   :  { %19315 = vst [vmem:[#allocation134_spill] sm:$0xff] %v12876_v57  ;;  %19316 = vst [vmem:[#allocation135_spill] sm:$0xff] %v12878_v54  ;;  %v12893_v43 = vunpack.c.l.b16 %v4574_v52  ;;  %v5115_v22 = vrot.slane %v12864_v25, 7  ;;  %v5117_v12 = vrot.slane %v12866_v56, 6  ;;  %v5119_v46 = vrot.slane %v12870_v62, 5 }
  0xe9   :  { %19317 = vst [vmem:[#allocation136_spill] sm:$0xff] %v12881_v15  ;;  %19318 = vst [vmem:[#allocation137_spill] sm:$0xff] %v12883_v39  ;;  %v5121_v63 = vrot.slane %v12872_v44, 4  ;;  %v5123_v41 = vrot.slane %v12874_v33, 3  ;;  %v19324_v47 = vunpack.c.l.b16 %v12830_v17  ;;  %v5125_v3 = vrot.slane %v12876_v57, 2 }
  0xea   :  { %19319 = vst [vmem:[#allocation138_spill] sm:$0xff] %v12885_v61  ;;  %19320 = vst [vmem:[#allocation139_spill] sm:$0xff] %v12887_v29  ;;  %v5127_v19 = vrot.slane %v12878_v54, 1  ;;  %v5129_v52 = vrot.slane %v12881_v15, 7  ;;  %v5131_v50 = vrot.slane %v12883_v39, 6  ;;  %v5133_v7 = vrot.slane %v12885_v61, 5 }
  0xeb   :  { %19321 = vst [vmem:[#allocation140_spill] sm:$0xff] %v12889_v24  ;;  %19322 = vst [vmem:[#allocation141_spill] sm:$0xff] %v12891_v49  ;;  %v5116_v38 = vsel %vm3561_vm9, %v5115_v22, %v19324_v47  ;;  %v5135_v20 = vrot.slane %v12887_v29, 4  ;;  %v19325_v25 = vunpack.c.l.b16 %v12851_v37  ;;  %v5137_v47 = vrot.slane %v12889_v24, 3 }
  0xec   :  { %19323 = vst [vmem:[#allocation142_spill] sm:$0xff] %v12893_v43  ;;  %v5118_v35 = vsel %vm3564_vm10, %v5117_v12, %v5116_v38  ;;  %v5139_v54 = vrot.slane %v12891_v49, 2  ;;  %v5141_v38 = vrot.slane %v12893_v43, 1  ;;  %v19326_v61 = vrot.slane %v12435_v28, 6 }
  0xed   :  { %v5120_v33 = vsel %vm3567_vm11, %v5119_v46, %v5118_v35  ;;  %v5130_v22 = vsel %vm3561_vm9, %v5129_v52, %v19325_v25  ;;  %v18558_v25 = vrot.slane %v12437_v0, 5  ;;  %v18557_v52 = vrot.slane %v12439_v42, 4  ;;  %v19454_v0 = vld [vmem:[#allocation23_spill] sm:$0xff] }
  0xee   :  { %v5122_v15 = vsel %vm3570_vm12, %v5121_v63, %v5120_v33  ;;  %v5132_v12 = vsel %vm3564_vm10, %v5131_v50, %v5130_v22  ;;  %v5216_v29 = vsel %vm3567_vm11, %v19326_v61, %v12699_v13  ;;  %v18556_v50 = vrot.slane %v12441_v58, 3  ;;  %v19449_v58 = vld [vmem:[#allocation25_spill] sm:$0xff] }
  0xef   :  { %v5124_v35 = vsel %vm3573_vm13, %v5123_v41, %v5122_v15  ;;  %v5134_v46 = vsel %vm3567_vm11, %v5133_v7, %v5132_v12  ;;  %v18555_v63 = vrot.slane %v12443_v5, 2  ;;  %v5218_v7 = vsel %vm3570_vm12, %v18558_v25, %v5216_v29  ;;  %v108_v12 = vld [vmem:[#allocation2 + $0x12c] sm:$0x1]  ;;  %v19445_v5 = vld [vmem:[#allocation71_spill] sm:$0xff] }
  0xf0   :  { %v5126_v49 = vsel %vm3576_vm14, %v5125_v3, %v5124_v35  ;;  %v5136_v33 = vsel %vm3570_vm12, %v5135_v20, %v5134_v46  ;;  %v19328_v15 = vunpack.c.l.b16 %v12417_v8  ;;  %v5220_v20 = vsel %vm3573_vm13, %v18557_v52, %v5218_v7  ;;  %v291_v35 = vld [vmem:[%s18361_s0 + $0x140] sm:$0xff]  ;;  %v292_v46 = vld [vmem:[%s18361_s0 + $0x148] sm:$0xff] }
  0xf1   :  { %v12932_v22 = vsel %vm3579_vm15, %v5127_v19, %v5126_v49  ;;  %v5138_v13 = vsel %vm3573_vm13, %v5137_v47, %v5136_v33  ;;  %v18560_v3 = vrot.slane %v12448_v9, 7  ;;  %v18559_v49 = vrot.slane %v12450_v10, 6  ;;  %v102_v19 = vld [vmem:[#allocation2 + $0x114] sm:$0x1] }
  0xf2   :  { %19327 = vst [vmem:[#allocation143_spill] sm:$0xff] %v12932_v22  ;;  %v5225_v61 = vrot.slane %v19328_v15, 1  ;;  %v5140_v41 = vsel %vm3576_vm14, %v5139_v54, %v5138_v13  ;;  %v5222_v29 = vsel %vm3576_vm14, %v18556_v50, %v5220_v20  ;;  %v18561_v54 = vrot.slane %v12452_v48, 5  ;;  %v295_v15 = vld [vmem:[%s18361_s0 + $0x160] sm:$0xff] }
  0xf3   :  { %v12947_v47 = vsel %vm3579_vm15, %v5141_v38, %v5140_v41  ;;  %v5224_v33 = vsel %vm3579_vm15, %v18555_v63, %v5222_v29  ;;  %v18562_v7 = vrot.slane %v12454_v14, 4  ;;  %v18565_v20 = vrot.slane %v12456_v26, 3 }
  0xf4   :  { %19329 = vst [vmem:[#allocation144_spill] sm:$0xff] %v12947_v47  ;;  %v5226_v8 = vsel %vm3561_vm9, %v12446_v4, %v5225_v61  ;;  %v5200_v38 = vpack.c.b16 %v12947_v47, %v12932_v22  ;;  %v296_v61 = vld [vmem:[%s18361_s0 + $0x168] sm:$0xff]  ;;  %v109_v50 = vsel %vm11649_vm2, 0, %v108_v12  ;;  %v11521_v52 = vpack.c.bf16 %v291_v35, %v291_v35  ;;  %v19457_v4 = vld [vmem:[#allocation95_spill] sm:$0xff] }
  0xf5   :  { %v5228_v13 = vsel %vm3564_vm10, %v18560_v3, %v5226_v8  ;;  %v103_v8 = vsel %vm11649_vm2, 0, %v102_v19  ;;  %v11522_v25 = vpack.c.bf16 %v292_v46, %v292_v46  ;;  %110 = vst [vmem:[#allocation2 + $0x12c] sm:$0x1] %v109_v50  ;;  %v11526_v3 = vpack.c.bf16 %v296_v61, %v296_v61 }
  0xf6   :  { %v5230_v41 = vsel %vm3567_vm11, %v18559_v49, %v5228_v13  ;;  %5205 = vrot.lane.b32.xlu0 %v5200_v38, %s11613_s5  ;;  %104 = vst [vmem:[#allocation2 + $0x114] sm:$0x1] %v103_v8  ;;  %v11525_v49 = vpack.c.bf16 %v295_v15, %v295_v15  ;;  %v19330_v19 = vunpack.c.l.b16 %v12715_v11  ;;  %v850_v8 = vshrl.u32 %v11521_v52, 16 }
  0xf7   :  { %v5232_v63 = vsel %vm3570_vm12, %v18561_v54, %v5230_v41  ;;  %v853_v54 = vshll.u32 %v11521_v52, 16  ;;  %v858_v29 = vshrl.u32 %v11522_v25, 16  ;;  %v19331_v12 = vrot.slane %v12458_v6, 2 }
  0xf8   :  { %v5234_v13 = vsel %vm3573_vm13, %v18562_v7, %v5232_v63  ;;  %v10089_v38 = vrot.slane %v19330_v19, 1  ;;  %v861_v46 = vshll.u32 %v11522_v25, 16  ;;  %v884_v63 = vshrl.u32 %v11525_v49, 16 }
  0xf9   :  { %v5236_v41 = vsel %vm3576_vm14, %v18565_v20, %v5234_v13  ;;  %v887_v50 = vshll.u32 %v11525_v49, 16  ;;  %v852_v61 = vrot.slane %v850_v8, 7  ;;  %v13003_v11 = vrot.slane %v858_v29, 7 }
  0xfa   :  { %v13000_v35 = vsel %vm3579_vm15, %v19331_v12, %v5236_v41  ;;  %v892_v19 = vshrl.u32 %v11526_v3, 16  ;;  %v886_v7 = vrot.slane %v884_v63, 7  ;;  %v895_v47 = vshll.u32 %v11526_v3, 16 }
  0xfb   :  { %19332 = vst [vmem:[#allocation145_spill] sm:$0xff] %v13000_v35  ;;  %v5323_v15 = vpack.c.b16 %v13000_v35, %v5224_v33  ;;  %19333 = vst [vmem:[#allocation146_spill] sm:$0xff] %v13003_v11  ;;  %v10090_v52 = vsel %vm3561_vm9, %v12753_v32, %v10089_v38  ;;  %v18573_v13 = vrot.slane %v12755_v30, 7  ;;  %v855_v41 = vor.u32 %v853_v54, %v852_v61  ;;  %v19443_v30 = vld [vmem:[#allocation16_spill] sm:$0xff] }
  0xfc   :  { %v856_v25 = vrot.slane %v852_v61, 4  ;;  %v863_v49 = vor.u32 %v861_v46, %v13003_v11  ;;  %v13010_v12 = vrot.slane %v892_v19, 7  ;;  %v889_v33 = vor.u32 %v887_v50, %v886_v7  ;;  %v1306_v46 = vld [vmem:[#allocation2 + $0x12c] sm:$0xf] }
  0xfd   :  { %5327 = vrot.lane.b32.xlu1 %v5323_v15, %s11614_s21  ;;  %v890_v29 = vrot.slane %v886_v7, 4  ;;  %v1292_v8 = vld [vmem:[#allocation2 + $0x114] sm:$0xf]  ;;  %v10092_v3 = vsel %vm3564_vm10, %v18573_v13, %v10090_v52  ;;  %v18569_v38 = vrot.slane %v12757_v16, 6  ;;  %v18567_v61 = vrot.slane %v12759_v45, 5 }
  0xfe   :  { %19334 = vst [vmem:[#allocation147_spill] sm:$0xff] %v13010_v12  ;;  %v864_v63 = vsel %vm11687_vm7, %v856_v25, %v863_v49  ;;  %v897_v15 = vor.u32 %v895_v47, %v13010_v12  ;;  %v1293_v54 = vsel %vm11696_vm8, %v855_v41, %v1292_v8  ;;  %v1307_v7 = vsel %vm11696_vm8, %v889_v33, %v1306_v46 }
  0xff   :  { %1294 = vst [vmem:[#allocation2 + $0x114] sm:$0xf] %v1293_v54  ;;  %1295 = vst.msk [vmem:[#allocation2 + $0x118] sm:$0xf] %vm15_vm5, %v864_v63  ;;  %v10094_v50 = vsel %vm3567_vm11, %v18569_v38, %v10092_v3  ;;  %v18566_v19 = vrot.slane %v12761_v23, 4  ;;  %v18564_v47 = vrot.slane %v12763_v55, 3  ;;  %v19335_v49 = vunpack.c.l.b16 %v12738_v36 }
 0x100   :  { %v898_v52 = vsel %vm11687_vm7, %v890_v29, %v897_v15  ;;  %1308 = vst [vmem:[#allocation2 + $0x12c] sm:$0xf] %v1307_v7  ;;  %v10096_v41 = vsel %vm3570_vm12, %v18567_v61, %v10094_v50  ;;  %v18570_v25 = vrot.slane %v12765_v53, 2  ;;  %v18571_v3 = vrot.slane %v12770_v60, 7 }
 0x101   :  { %v10103_v33 = vrot.slane %v19335_v49, 1  ;;  %1309 = vst.msk [vmem:[#allocation2 + $0x130] sm:$0xf] %vm15_vm5, %v898_v52  ;;  %v10098_v8 = vsel %vm3573_vm13, %v18566_v19, %v10096_v41  ;;  %v18568_v29 = vrot.slane %v12772_v51, 6  ;;  %v18572_v63 = vrot.slane %v12774_v18, 5  ;;  %v19338_v19 = vld [vmem:[#allocation133_spill] sm:$0xff] }
 0x102   :  { %v10100_v54 = vsel %vm3576_vm14, %v18564_v47, %v10098_v8  ;;  %v18574_v46 = vrot.slane %v12776_v27, 4  ;;  %v18576_v50 = vrot.slane %v12778_v21, 3  ;;  %v18580_v52 = vrot.slane %v12780_v2, 2  ;;  %v19436_v51 = vld [vmem:[#allocation70_spill] sm:$0xff] }
 0x103   :  { %v10104_v36 = vsel %vm3561_vm9, %v12768_v34, %v10103_v33  ;;  %v19336_v41 = vunpack.c.l.b16 %v12830_v17  ;;  %v18575_v15 = vrot.slane %v12866_v56, 7  ;;  %v18577_v33 = vrot.slane %v12870_v62, 6 }
 0x104   :  { %v10106_v7 = vsel %vm3564_vm10, %v18571_v3, %v10104_v36  ;;  %v18583_v47 = vrot.slane %v12872_v44, 5  ;;  %v13068_v36 = vsel %vm3579_vm15, %v18570_v25, %v10100_v54  ;;  %v19339_v25 = vunpack.c.l.b16 %v12851_v37 }
 0x105   :  { %v5239_v49 = vrot.slane %v19336_v41, 1  ;;  %v10108_v8 = vsel %vm3567_vm11, %v18568_v29, %v10106_v7  ;;  %v19337_v41 = vld [vmem:[#allocation129_spill] sm:$0xff]  ;;  %v19437_v16 = vrot.slane %v19436_v51, 3  ;;  %v19446_v14 = vrot.slane %v19445_v5, 2 }
 0x106   :  { %v10110_v17 = vsel %vm3570_vm12, %v18572_v63, %v10108_v8  ;;  %v11429_v61 = vld.sshfl [vmem:[#allocation2 + $0x114] sm:$0x33 pattern:$0x75316420]  ;;  %v13085_v3 = vrot.slane %v19339_v25, 1  ;;  %v19458_v28 = vrot.slane %v19457_v4, 7 }
 0x107   :  { %v5240_v20 = vsel %vm3561_vm9, %v19337_v41, %v5239_v49  ;;  %v10112_v29 = vsel %vm3573_vm13, %v18574_v46, %v10110_v17  ;;  %v11430_v8 = vld.sshfl [vmem:[#allocation2 + $0x118] sm:$0x33 pattern:$0x75316420]  ;;  %v6686_v63 = vcombine.high %v11429_v61, %v11429_v61  ;;  %v19340_v49 = vld [vmem:[#allocation10_spill] sm:$0xff] }
 0x108   :  { %v5242_v38 = vsel %vm3564_vm10, %v18575_v15, %v5240_v20  ;;  %v6693_v13 = vrot.slane %v11429_v61, %v19340_v49  ;;  %v10114_v7 = vsel %vm3576_vm14, %v18576_v50, %v10112_v29  ;;  %v11435_v46 = vld.sshfl [vmem:[#allocation2 + $0x12c] sm:$0x33 pattern:$0x75316420]  ;;  %v6710_v20 = vcombine.high %v11430_v8, %v11430_v8 }
 0x109   :  { %v5244_v17 = vsel %vm3567_vm11, %v18577_v33, %v5242_v38  ;;  %v6717_v15 = vrot.slane %v11430_v8, %v19340_v49  ;;  %v13098_v37 = vsel %vm3579_vm15, %v18580_v52, %v10114_v7  ;;  %v11436_v25 = vld.sshfl [vmem:[#allocation2 + $0x130] sm:$0x33 pattern:$0x75316420]  ;;  %v6700_v29 = vrot.slane %v6686_v63, %v19340_v49 }
 0x10a   :  { %19341 = vst [vmem:[#allocation10_spill] sm:$0xff] %v13098_v37  ;;  %v13103_v61 = vsel %vm3570_vm12, %v18583_v47, %v5244_v17  ;;  %v6701_v50 = vcombine.high %v6693_v13, %v6693_v13  ;;  %v6810_v54 = vcombine.high %v11435_v46, %v11435_v46  ;;  %v6817_v38 = vrot.slane %v11435_v46, %v19340_v49 }
 0x10b   :  { %v6724_v33 = vrot.slane %v6710_v20, %v19340_v49  ;;  %v6725_v8 = vcombine.high %v6717_v15, %v6717_v15  ;;  %v6834_v35 = vcombine.high %v11436_v25, %v11436_v25  ;;  %v6841_v22 = vrot.slane %v11436_v25, %v19340_v49 }
 0x10c   :  { %v6702_v7 = vcombine.high %v6700_v29, %v6700_v29  ;;  %v6824_v52 = vrot.slane %v6810_v54, %v19340_v49  ;;  %v6825_v40 = vcombine.high %v6817_v38, %v6817_v38  ;;  %v9235_v17 = vrot.slane %v6693_v13, %v19340_v49 }
 0x10d   :  { %v6726_v47 = vcombine.high %v6724_v33, %v6724_v33  ;;  %v6848_v31 = vrot.slane %v6834_v35, %v19340_v49  ;;  %v6849_v63 = vcombine.high %v6841_v22, %v6841_v22  ;;  %v9249_v59 = vrot.slane %v6700_v29, %v19340_v49 }
 0x10e   :  { %v6826_v12 = vcombine.high %v6824_v52, %v6824_v52  ;;  %v13114_v46 = vrot.slane %v9235_v17, %v19340_v49  ;;  %v9263_v20 = vrot.slane %v6701_v50, %v19340_v49  ;;  %v9277_v25 = vrot.slane %v6702_v7, %v19340_v49 }
 0x10f   :  { %v6850_v11 = vcombine.high %v6848_v31, %v6848_v31  ;;  %v9256_v54 = vrot.slane %v9249_v59, %v19340_v49  ;;  %v9291_v2 = vrot.slane %v6717_v15, %v19340_v49  ;;  %v9305_v13 = vrot.slane %v6724_v33, %v19340_v49 }
 0x110   :  { %v9270_v35 = vrot.slane %v9263_v20, %v19340_v49  ;;  %v9284_v53 = vrot.slane %v9277_v25, %v19340_v49  ;;  %v9319_v29 = vrot.slane %v6725_v8, %v19340_v49  ;;  %v9333_v17 = vrot.slane %v6726_v47, %v19340_v49 }
 0x111   :  { %v9298_v6 = vrot.slane %v9291_v2, %v19340_v49  ;;  %v9312_v50 = vrot.slane %v9305_v13, %v19340_v49  ;;  %v9347_v7 = vrot.slane %v6817_v38, %v19340_v49  ;;  %v9361_v59 = vrot.slane %v6824_v52, %v19340_v49 }
 0x112   :  { %v9326_v15 = vrot.slane %v9319_v29, %v19340_v49  ;;  %v9340_v33 = vrot.slane %v9333_v17, %v19340_v49  ;;  %v9375_v20 = vrot.slane %v6825_v40, %v19340_v49  ;;  %v9389_v25 = vrot.slane %v6826_v12, %v19340_v49 }
 0x113   :  { %v13134_v8 = vrot.slane %v9347_v7, %v19340_v49  ;;  %v9368_v47 = vrot.slane %v9361_v59, %v19340_v49  ;;  %v9403_v2 = vrot.slane %v6841_v22, %v19340_v49  ;;  %v9417_v13 = vrot.slane %v6848_v31, %v19340_v49 }
 0x114   :  { %v9382_v38 = vrot.slane %v9375_v20, %v19340_v49  ;;  %v9396_v52 = vrot.slane %v9389_v25, %v19340_v49  ;;  %v9431_v29 = vrot.slane %v6849_v63, %v19340_v49  ;;  %v9445_v17 = vrot.slane %v6850_v11, %v19340_v49 }
 0x115   :  { %v9410_v40 = vrot.slane %v9403_v2, %v19340_v49  ;;  %v9424_v12 = vrot.slane %v9417_v13, %v19340_v49  ;;  %v13146_v44 = vunpack.c.l.b16 %v9256_v54  ;;  %v13150_v59 = vunpack.c.l.b16 %v9270_v35 }
 0x116   :  { %v9438_v22 = vrot.slane %v9431_v29, %v19340_v49  ;;  %v9452_v31 = vrot.slane %v9445_v17, %v19340_v49  ;;  %v13152_v20 = vunpack.c.l.b16 %v9284_v53  ;;  %v13154_v25 = vunpack.c.l.b16 %v9298_v6 }
 0x117   :  { %19342 = vst [vmem:[#allocation148_spill] sm:$0xff] %v13146_v44  ;;  %19343 = vst [vmem:[#allocation149_spill] sm:$0xff] %v13150_v59  ;;  %v13156_v63 = vunpack.c.l.b16 %v9312_v50  ;;  %v13158_v11 = vunpack.c.l.b16 %v9326_v15  ;;  %v13160_v2 = vunpack.c.l.b16 %v9340_v33  ;;  %v13163_v54 = vunpack.c.l.b16 %v9368_v47 }
 0x118   :  { %19344 = vst [vmem:[#allocation150_spill] sm:$0xff] %v13152_v20  ;;  %19345 = vst [vmem:[#allocation151_spill] sm:$0xff] %v13154_v25  ;;  %v13165_v7 = vunpack.c.l.b16 %v9382_v38  ;;  %v13167_v29 = vunpack.c.l.b16 %v9396_v52  ;;  %v13169_v35 = vunpack.c.l.b16 %v9410_v40  ;;  %v13171_v53 = vunpack.c.l.b16 %v9424_v12 }
 0x119   :  { %19346 = vst [vmem:[#allocation152_spill] sm:$0xff] %v13156_v63  ;;  %19347 = vst [vmem:[#allocation153_spill] sm:$0xff] %v13158_v11  ;;  %v13173_v6 = vunpack.c.l.b16 %v9438_v22  ;;  %v13175_v50 = vunpack.c.l.b16 %v9452_v31  ;;  %v9993_v15 = vrot.slane %v13146_v44, 7  ;;  %v9995_v33 = vrot.slane %v13150_v59, 6 }
 0x11a   :  { %19348 = vst [vmem:[#allocation154_spill] sm:$0xff] %v13160_v2  ;;  %19349 = vst [vmem:[#allocation155_spill] sm:$0xff] %v13163_v54  ;;  %v9997_v17 = vrot.slane %v13152_v20, 5  ;;  %v9999_v47 = vrot.slane %v13154_v25, 4  ;;  %v10001_v38 = vrot.slane %v13156_v63, 3  ;;  %v10003_v52 = vrot.slane %v13158_v11, 2 }
 0x11b   :  { %19350 = vst [vmem:[#allocation156_spill] sm:$0xff] %v13165_v7  ;;  %19351 = vst [vmem:[#allocation157_spill] sm:$0xff] %v13167_v29  ;;  %v10005_v40 = vrot.slane %v13160_v2, 1  ;;  %v10007_v12 = vrot.slane %v13163_v54, 7  ;;  %v19356_v22 = vunpack.c.l.b16 %v13114_v46  ;;  %v10009_v13 = vrot.slane %v13165_v7, 6 }
 0x11c   :  { %19352 = vst [vmem:[#allocation158_spill] sm:$0xff] %v13169_v35  ;;  %19353 = vst [vmem:[#allocation159_spill] sm:$0xff] %v13171_v53  ;;  %v10011_v62 = vrot.slane %v13167_v29, 5  ;;  %v10013_v56 = vrot.slane %v13169_v35, 4  ;;  %v19357_v21 = vunpack.c.l.b16 %v13134_v8  ;;  %v10015_v26 = vrot.slane %v13171_v53, 3 }
 0x11d   :  { %19354 = vst [vmem:[#allocation160_spill] sm:$0xff] %v13173_v6  ;;  %19355 = vst [vmem:[#allocation161_spill] sm:$0xff] %v13175_v50  ;;  %v9994_v31 = vsel %vm3561_vm9, %v9993_v15, %v19356_v22  ;;  %v10017_v27 = vrot.slane %v13173_v6, 2  ;;  %v10019_v22 = vrot.slane %v13175_v50, 1  ;;  %v10201_v18 = vpack.c.b16 %v13098_v37, %v13068_v36  ;;  %v19360_v36 = vld [vmem:[#allocation135_spill] sm:$0xff] }
 0x11e   :  { %v9996_v41 = vsel %vm3564_vm10, %v9995_v33, %v9994_v31  ;;  %v10008_v55 = vsel %vm3561_vm9, %v10007_v12, %v19357_v21  ;;  %v19358_v21 = vrot.slane %v19338_v19, 4  ;;  %v19359_v31 = vld [vmem:[#allocation136_spill] sm:$0xff]  ;;  %v143_v37 = vld [vmem:[#allocation2 + $0x8] sm:$0x1] }
 0x11f   :  { %v9998_v23 = vsel %vm3567_vm11, %v9997_v17, %v9996_v41  ;;  %v10010_v15 = vsel %vm3564_vm10, %v10009_v13, %v10008_v55  ;;  %v5254_v41 = vsel %vm3561_vm9, %v19359_v31, %v13085_v3  ;;  %10205 = vrot.lane.b32.xlu1 %v10201_v18, %s11614_s21  ;;  %v18620_v17 = vrot.slane %v19360_v36, 2  ;;  %v19380_v36 = vld [vmem:[#allocation39_spill] sm:$0xff] }
 0x120   :  { %v10000_v45 = vsel %vm3570_vm12, %v9999_v47, %v9998_v23  ;;  %v10012_v33 = vsel %vm3567_vm11, %v10011_v62, %v10010_v15  ;;  %v5248_v12 = vsel %vm3573_vm13, %v19358_v21, %v13103_v61  ;;  %v18619_v23 = vrot.slane %v12883_v39, 7  ;;  %v19362_v21 = vld [vmem:[#allocation138_spill] sm:$0xff] }
 0x121   :  { %v10002_v55 = vsel %vm3573_vm13, %v10001_v38, %v10000_v45  ;;  %v10014_v13 = vsel %vm3570_vm12, %v10013_v56, %v10012_v33  ;;  %v19361_v61 = vrot.slane %v12876_v57, 3  ;;  %v18617_v3 = vrot.slane %v19362_v21, 6  ;;  %v19364_v38 = vld [vmem:[#allocation139_spill] sm:$0xff]  ;;  %v149_v33 = vld [vmem:[#allocation2 + $0x20] sm:$0x1] }
 0x122   :  { %v10004_v62 = vsel %vm3576_vm14, %v10003_v52, %v10002_v55  ;;  %v10016_v47 = vsel %vm3573_vm13, %v10015_v26, %v10014_v13  ;;  %v5256_v56 = vsel %vm3564_vm10, %v18619_v23, %v5254_v41  ;;  %v18618_v52 = vrot.slane %v19364_v38, 5  ;;  %v19386_v57 = vld [vmem:[#allocation51_spill] sm:$0xff] }
 0x123   :  { %v5250_v15 = vsel %vm3576_vm14, %v19361_v61, %v5248_v12  ;;  %v13223_v45 = vsel %vm3579_vm15, %v10005_v40, %v10004_v62  ;;  %v10018_v18 = vsel %vm3576_vm14, %v10017_v27, %v10016_v47  ;;  %v5258_v12 = vsel %vm3567_vm11, %v18617_v3, %v5256_v56  ;;  %v19366_v40 = vld [vmem:[#allocation141_spill] sm:$0xff]  ;;  %v19400_v38 = vld [vmem:[#allocation59_spill] sm:$0xff]  ;;  %v19620_v47 = vld [vmem:[#allocation30_spill] sm:$0xff] }
 0x124   :  { %19363 = vst [vmem:[#allocation162_spill] sm:$0xff] %v13223_v45  ;;  %v13231_v26 = vsel %vm3579_vm15, %v10019_v22, %v10018_v18  ;;  %v18621_v55 = vrot.slane %v12889_v24, 4  ;;  %v18625_v13 = vrot.slane %v19366_v40, 3  ;;  %v5260_v41 = vsel %vm3570_vm12, %v18618_v52, %v5258_v12  ;;  %v19369_v3 = vld [vmem:[#allocation45_spill] sm:$0xff]  ;;  %v19370_v12 = vld [vmem:[#allocation46_spill] sm:$0xff] }
 0x125   :  { %19365 = vst [vmem:[#allocation163_spill] sm:$0xff] %v13231_v26  ;;  %v10078_v27 = vpack.c.b16 %v13231_v26, %v13223_v45  ;;  %v144_v22 = vsel %vm11661_vm4, 0, %v143_v37  ;;  %v13249_v61 = vsel %vm3579_vm15, %v18620_v17, %v5250_v15  ;;  %v150_v56 = vsel %vm11661_vm4, 0, %v149_v33  ;;  %v19372_v15 = vld [vmem:[#allocation47_spill] sm:$0xff] }
 0x126   :  { %19368 = vst [vmem:[#allocation164_spill] sm:$0xff] %v13249_v61  ;;  %v5262_v18 = vsel %vm3573_vm13, %v18621_v55, %v5260_v41  ;;  %145 = vst [vmem:[#allocation2 + $0x8] sm:$0x1] %v144_v22  ;;  %v19371_v52 = vrot.slane %v19370_v12, 7  ;;  %v19373_v17 = vrot.slane %v19372_v15, 6  ;;  %v19374_v22 = vld [vmem:[#allocation48_spill] sm:$0xff]  ;;  %v19377_v26 = vunpack.c.l.b16 %v13114_v46 }
 0x127   :  { %10083 = vrot.lane.b32.xlu0 %v10078_v27, %s11613_s5  ;;  %v5264_v37 = vsel %vm3576_vm14, %v18625_v13, %v5262_v18  ;;  %151 = vst [vmem:[#allocation2 + $0x20] sm:$0x1] %v150_v56  ;;  %v19375_v55 = vld [vmem:[#allocation49_spill] sm:$0xff]  ;;  %v19381_v18 = vrot.slane %v19380_v36, 5  ;;  %v19382_v13 = vld [vmem:[#allocation50_spill] sm:$0xff]  ;;  %v19384_v46 = vld [vmem:[#allocation40_spill] sm:$0xff] }
 0x128   :  { %v3927_v23 = vsel %vm3561_vm9, %v19371_v52, %v19369_v3  ;;  %v19376_v62 = vrot.slane %v19375_v55, 7  ;;  %v10117_v45 = vrot.slane %v19377_v26, 1  ;;  %v19378_v52 = vrot.slane %v12893_v43, 2 }
 0x129   :  { %v3928_v41 = vsel %vm3564_vm10, %v19373_v17, %v3927_v23  ;;  %v19383_v40 = vrot.slane %v19382_v13, 6  ;;  %v19385_v26 = vrot.slane %v19384_v46, 4  ;;  %v4003_v9 = vrot.slane %v19369_v3, 1  ;;  %v19461_v3 = vld [vmem:[#allocation24_spill] sm:$0xff] }
 0x12a   :  { %v3935_v33 = vsel %vm3561_vm9, %v19376_v62, %v19374_v22  ;;  %v13276_v27 = vsel %vm3579_vm15, %v19378_v52, %v5264_v37  ;;  %v3929_v56 = vsel %vm3567_vm11, %v19381_v18, %v3928_v41  ;;  %v19387_v37 = vrot.slane %v19386_v57, 5  ;;  %v19388_v18 = vld [vmem:[#allocation31_spill] sm:$0xff] }
 0x12b   :  { %19379 = vst [vmem:[#allocation165_spill] sm:$0xff] %v13276_v27  ;;  %v3936_v17 = vsel %vm3564_vm10, %v19383_v40, %v3935_v33  ;;  %v5324_v62 = vpack.c.b16 %v13276_v27, %v13249_v61  ;;  %v3930_v43 = vsel %vm3570_vm12, %v19385_v26, %v3929_v56  ;;  %v10118_v41 = vsel %vm3561_vm9, %v13146_v44, %v10117_v45  ;;  %v19390_v40 = vld [vmem:[#allocation41_spill] sm:$0xff]  ;;  %v19393_v26 = vld [vmem:[#allocation11_spill] sm:$0xff]  ;;  %v19396_v44 = vld [vmem:[#allocation42_spill] sm:$0xff] }
 0x12c   :  { %v3937_v52 = vsel %vm3567_vm11, %v19387_v37, %v3936_v17  ;;  %v13296_v24 = vunpack.c.l.b16 %v19388_v18  ;;  %v19391_v33 = vrot.slane %v19390_v40, 3  ;;  %v19392_v27 = vrot.slane %v13150_v59, 7  ;;  %v19394_v37 = vld [vmem:[#allocation52_spill] sm:$0xff] }
 0x12d   :  { %v18644_v56 = vrot.slane %v13152_v20, 6  ;;  %5329 = vrot.lane.b32.xlu0 %v5324_v62, %s11614_s21  ;;  %v542_v17 = vrot.slane %v19393_v26, 4  ;;  %v19395_v19 = vrot.slane %v19394_v37, 4  ;;  %v18648_v18 = vrot.slane %v13154_v25, 5  ;;  %v203_v26 = vld [vmem:[#allocation2 + $0xf8] sm:$0x1] }
 0x12e   :  { %19389 = vst [vmem:[#allocation31_spill] sm:$0xff] %v13296_v24  ;;  %v3931_v23 = vsel %vm3573_vm13, %v19391_v33, %v3930_v43  ;;  %v10120_v61 = vsel %vm3564_vm10, %v19392_v27, %v10118_v41  ;;  %v19397_v43 = vrot.slane %v19396_v44, 2  ;;  %v11362_v59 = vld.sshfl [vmem:[#allocation2 + $0x8] sm:$0x1 pattern:$0x75316420] }
 0x12f   :  { %v3938_v45 = vsel %vm3570_vm12, %v19395_v19, %v3937_v52  ;;  %v10122_v27 = vsel %vm3567_vm11, %v18644_v56, %v10120_v61  ;;  %v19398_v52 = vunpack.c.l.b16 %v13134_v8  ;;  %v19401_v20 = vrot.slane %v19400_v38, 7  ;;  %v1163_v56 = vld [vmem:[#allocation2 + $0x20] sm:$0x1] }
 0x130   :  { %v13315_v33 = vsel %vm3576_vm14, %v19397_v43, %v3931_v23  ;;  %v10124_v19 = vsel %vm3570_vm12, %v18648_v18, %v10122_v27  ;;  %v19399_v43 = vld [vmem:[#allocation58_spill] sm:$0xff]  ;;  %v1545_v62 = vrot.slane %v11362_v59, %v19340_v49  ;;  %v19402_v41 = vrot.slane %v13156_v63, 4  ;;  %v197_v8 = vld [vmem:[#allocation2 + $0xe0] sm:$0x1] }
 0x131   :  { %v10131_v24 = vrot.slane %v19398_v52, 1  ;;  %v8805_v61 = vsel %vm3561_vm9, %v19401_v20, %v19399_v43  ;;  %v1164_v52 = vsel %vm11649_vm2, %v542_v17, %v1163_v56  ;;  %v19403_v18 = vrot.slane %v13158_v11, 3  ;;  %v155_v11 = vld [vmem:[#allocation2 + $0x38] sm:$0x1] }
 0x132   :  { %v10126_v21 = vsel %vm3573_vm13, %v19402_v41, %v10124_v19  ;;  %v18659_v59 = vrot.slane %v13171_v53, 4  ;;  %1165 = vst [vmem:[#allocation2 + $0x20] sm:$0x1] %v1164_v52  ;;  %v3813_v41 = vrot.slane %v1545_v62, %v19340_v49  ;;  %v19404_v19 = vld [vmem:[#allocation53_spill] sm:$0xff]  ;;  %v19406_v63 = vrot.slane %v13165_v7, 7  ;;  %v19421_v53 = vld [vmem:[#allocation67_spill] sm:$0xff] }
 0x133   :  { %v10128_v23 = vsel %vm3576_vm14, %v19403_v18, %v10126_v21  ;;  %v10132_v20 = vsel %vm3561_vm9, %v13163_v54, %v10131_v24  ;;  %v19405_v25 = vrot.slane %v19404_v19, 3  ;;  %v19407_v21 = vrot.slane %v13167_v29, 6  ;;  %v161_v18 = vld [vmem:[#allocation2 + $0x50] sm:$0x1]  ;;  %v19416_v29 = vld [vmem:[#allocation66_spill] sm:$0xff]  ;;  %v19427_v54 = vld [vmem:[#allocation68_spill] sm:$0xff] }
 0x134   :  { %v10134_v56 = vsel %vm3564_vm10, %v19406_v63, %v10132_v20  ;;  %v198_v62 = vsel %vm11661_vm4, 0, %v197_v8  ;;  %v204_v52 = vsel %vm11661_vm4, 0, %v203_v26  ;;  %v19410_v20 = vrot.slane %v13169_v35, 5 }
 0x135   :  { %v3939_v27 = vsel %vm3573_vm13, %v19405_v25, %v3938_v45  ;;  %v10136_v24 = vsel %vm3567_vm11, %v19407_v21, %v10134_v56  ;;  %v3820_v25 = vrot.slane %v3813_v41, %v19340_v49  ;;  %v19408_v45 = vrot.slane %v13160_v2, 2  ;;  %199 = vst [vmem:[#allocation2 + $0xe0] sm:$0x1] %v198_v62  ;;  %205 = vst [vmem:[#allocation2 + $0xf8] sm:$0x1] %v204_v52  ;;  %v19411_v56 = vld [vmem:[#allocation60_spill] sm:$0xff] }
 0x136   :  { %v10138_v17 = vsel %vm3570_vm12, %v19410_v20, %v10136_v24  ;;  %v19412_v21 = vrot.slane %v19411_v56, 6  ;;  %v19413_v41 = vld [vmem:[#allocation61_spill] sm:$0xff]  ;;  %v19417_v35 = vrot.slane %v19416_v29, 7  ;;  %v156_v62 = vsel %vm11661_vm4, 0, %v155_v11  ;;  %v19425_v11 = vld [vmem:[#allocation63_spill] sm:$0xff] }
 0x137   :  { %v13366_v63 = vsel %vm3579_vm15, %v19408_v45, %v10128_v23  ;;  %v10140_v26 = vsel %vm3573_vm13, %v18659_v59, %v10138_v17  ;;  %v19414_v2 = vrot.slane %v19413_v41, 5  ;;  %v19415_v45 = vld [vmem:[#allocation65_spill] sm:$0xff]  ;;  %v13386_v52 = vunpack.c.l.b16 %v3820_v25  ;;  %157 = vst [vmem:[#allocation2 + $0x38] sm:$0x1] %v156_v62  ;;  %v19429_v62 = vld [vmem:[#allocation38_spill] sm:$0xff] }
 0x138   :  { %19409 = vst [vmem:[#allocation11_spill] sm:$0xff] %v13366_v63  ;;  %v8806_v8 = vsel %vm3564_vm10, %v19412_v21, %v8805_v61  ;;  %v8813_v24 = vsel %vm3561_vm9, %v19417_v35, %v19415_v45  ;;  %v19418_v61 = vrot.slane %v13173_v6, 3  ;;  %v19419_v21 = vld [vmem:[#allocation62_spill] sm:$0xff]  ;;  %v19423_v35 = vrot.slane %v13175_v50, 2 }
 0x139   :  { %v8807_v23 = vsel %vm3567_vm11, %v19414_v2, %v8806_v8  ;;  %v19420_v17 = vrot.slane %v19419_v21, 4  ;;  %v19422_v2 = vrot.slane %v19421_v53, 6  ;;  %v19426_v25 = vrot.slane %v19425_v11, 3 }
 0x13a   :  { %v10142_v20 = vsel %vm3576_vm14, %v19418_v61, %v10140_v26  ;;  %v19428_v26 = vrot.slane %v19427_v54, 5 }
 0x13b   :  { %v8808_v59 = vsel %vm3570_vm12, %v19420_v17, %v8807_v23  ;;  %v8814_v8 = vsel %vm3564_vm10, %v19422_v2, %v8813_v24  ;;  %v13400_v7 = vsel %vm3579_vm15, %v19423_v35, %v10142_v20  ;;  %v162_v23 = vsel %vm11661_vm4, 0, %v161_v18  ;;  %v19430_v20 = vld [vmem:[#allocation69_spill] sm:$0xff] }
 0x13c   :  { %19424 = vst [vmem:[#allocation166_spill] sm:$0xff] %v13400_v7  ;;  %v8809_v6 = vsel %vm3573_vm13, %v19426_v25, %v8808_v59  ;;  %v8815_v61 = vsel %vm3567_vm11, %v19428_v26, %v8814_v8  ;;  %v3933_v17 = vrot.slane %v13386_v52, 1  ;;  %v10202_v24 = vpack.c.b16 %v13400_v7, %v13366_v63  ;;  %163 = vst [vmem:[#allocation2 + $0x50] sm:$0x1] %v162_v23  ;;  %v19432_v25 = vld [vmem:[#allocation54_spill] sm:$0xff]  ;;  %v19434_v26 = vld [vmem:[#allocation64_spill] sm:$0xff] }
 0x13d   :  { %v814_v2 = vrot.slane %v19429_v62, 4  ;;  %v19431_v35 = vrot.slane %v19430_v20, 4  ;;  %v11368_v59 = vld.sshfl [vmem:[#allocation2 + $0x20] sm:$0x1 pattern:$0x75316420] }
 0x13e   :  { %v19433_v39 = vrot.slane %v19432_v25, 2  ;;  %v19435_v31 = vrot.slane %v19434_v26, 2  ;;  %v19438_v62 = vld [vmem:[#allocation18_spill] sm:$0xff]  ;;  %v1669_v23 = vrot.slane %v11368_v59, %v19340_v49  ;;  %10207 = vrot.lane.b32.xlu0 %v10202_v24, %s11614_s21  ;;  %v19447_v59 = vld [vmem:[#allocation17_spill] sm:$0xff] }
 0x13f   :  { %v8816_v50 = vsel %vm3570_vm12, %v19431_v35, %v8815_v61  ;;  %v19439_v63 = vld [vmem:[#allocation14_spill] sm:$0xff]  ;;  %v19441_v35 = vld [vmem:[#allocation5_spill] sm:$0xff]  ;;  %v19448_v24 = vrot.slane %v19447_v59, 5 }
 0x140   :  { %v3940_v8 = vsel %vm3576_vm14, %v19433_v39, %v3939_v27  ;;  %v13423_v18 = vsel %vm3576_vm14, %v19435_v31, %v8809_v6  ;;  %v8817_v7 = vsel %vm3573_vm13, %v19437_v16, %v8816_v50  ;;  %v19440_v60 = vrot.slane %v19439_v63, 7  ;;  %v19442_v27 = vld [vmem:[#allocation7_spill] sm:$0xff]  ;;  %v1275_v50 = vld [vmem:[#allocation2 + $0xf8] sm:$0x1] }
 0x141   :  { %v576_v39 = vrot.slane %v19441_v35, 4  ;;  %v610_v34 = vrot.slane %v19442_v27, 4  ;;  %v19444_v6 = vrot.slane %v19443_v30, 6  ;;  %v3934_v16 = vsel %vm3579_vm15, %v3933_v17, %v13315_v33  ;;  %v19450_v27 = vld [vmem:[#allocation20_spill] sm:$0xff] }
 0x142   :  { %v3943_v61 = vsel %vm3561_vm9, %v19440_v60, %v19438_v62  ;;  %v11416_v32 = vld.sshfl [vmem:[#allocation2 + $0xe0] sm:$0x1 pattern:$0x75316420]  ;;  %v13444_v60 = vsel %vm3576_vm14, %v19446_v14, %v8817_v7  ;;  %v19451_v48 = vrot.slane %v19450_v27, 7  ;;  %v1276_v33 = vsel %vm11649_vm2, %v814_v2, %v1275_v50 }
 0x143   :  { %v3944_v31 = vsel %vm3564_vm10, %v19444_v6, %v3943_v61  ;;  %v3827_v61 = vrot.slane %v1669_v23, %v19340_v49  ;;  %v6430_v17 = vrot.slane %v11416_v32, %v19340_v49  ;;  %v19452_v6 = vld [vmem:[#allocation19_spill] sm:$0xff]  ;;  %1277 = vst [vmem:[#allocation2 + $0xf8] sm:$0x1] %v1276_v33  ;;  %v1177_v7 = vld [vmem:[#allocation2 + $0x38] sm:$0x1]  ;;  %v19456_v23 = vld [vmem:[#allocation94_spill] sm:$0xff] }
 0x144   :  { %v3945_v35 = vsel %vm3567_vm11, %v19448_v24, %v3944_v31  ;;  %v3951_v42 = vsel %vm3561_vm9, %v19451_v48, %v19449_v58  ;;  %v19453_v10 = vrot.slane %v19452_v6, 4  ;;  %v19455_v31 = vrot.slane %v19454_v0, 6 }
 0x145   :  { %v4005_v48 = vrot.slane %v19372_v15, 7  ;;  %v8821_v2 = vsel %vm3561_vm9, %v19458_v28, %v19456_v23  ;;  %v3834_v32 = vrot.slane %v3827_v61, %v19340_v49  ;;  %v8691_v50 = vrot.slane %v6430_v17, %v19340_v49  ;;  %v19465_v23 = vld [vmem:[#allocation27_spill] sm:$0xff] }
 0x146   :  { %v3946_v14 = vsel %vm3570_vm12, %v19453_v10, %v3945_v35  ;;  %v3952_v24 = vsel %vm3564_vm10, %v19455_v31, %v3951_v42  ;;  %v1178_v10 = vsel %vm11649_vm2, %v576_v39, %v1177_v7  ;;  %v19459_v35 = vld [vmem:[#allocation21_spill] sm:$0xff]  ;;  %v1191_v31 = vld [vmem:[#allocation2 + $0x50] sm:$0x1]  ;;  %v19462_v15 = vrot.slane %v19461_v3, 5 }
 0x147   :  { %v19460_v33 = vrot.slane %v19459_v35, 3  ;;  %1179 = vst [vmem:[#allocation2 + $0x38] sm:$0x1] %v1178_v10  ;;  %v4004_v28 = vsel %vm3561_vm9, %v19370_v12, %v4003_v9  ;;  %v4007_v61 = vrot.slane %v19380_v36, 6  ;;  %v4009_v17 = vrot.slane %v19384_v46, 5  ;;  %v19467_v46 = vld [vmem:[#allocation101_spill] sm:$0xff] }
 0x148   :  { %v3953_v27 = vsel %vm3567_vm11, %v19462_v15, %v3952_v24  ;;  %v3920_v4 = vunpack.c.l.b16 %v3834_v32  ;;  %v8698_v39 = vrot.slane %v8691_v50, %v19340_v49  ;;  %v1192_v7 = vsel %vm11649_vm2, %v610_v34, %v1191_v31  ;;  %v19468_v32 = vld [vmem:[#allocation102_spill] sm:$0xff] }
 0x149   :  { %v3947_v42 = vsel %vm3573_vm13, %v19460_v33, %v3946_v14  ;;  %v19463_v14 = vld [vmem:[#allocation26_spill] sm:$0xff]  ;;  %1193 = vst [vmem:[#allocation2 + $0x50] sm:$0x1] %v1192_v7  ;;  %v19466_v15 = vrot.slane %v19465_v23, 3  ;;  %v4006_v9 = vsel %vm3564_vm10, %v4005_v48, %v4004_v28  ;;  %v4011_v36 = vrot.slane %v19390_v40, 4  ;;  %v19473_v40 = vld [vmem:[#allocation28_spill] sm:$0xff] }
 0x14a   :  { %v19464_v10 = vrot.slane %v19463_v14, 4  ;;  %v19469_v12 = vrot.slane %v19468_v32, 7  ;;  %v3941_v3 = vrot.slane %v3920_v4, 1  ;;  %v13498_v34 = vunpack.c.l.b16 %v8698_v39  ;;  %v19470_v7 = vld [vmem:[#allocation22_spill] sm:$0xff] }
 0x14b   :  { %v4008_v31 = vsel %vm3567_vm11, %v4007_v61, %v4006_v9  ;;  %v4017_v28 = vrot.slane %v19374_v22, 1  ;;  %v11422_v39 = vld.sshfl [vmem:[#allocation2 + $0xf8] sm:$0x1 pattern:$0x75316420]  ;;  %v19474_v32 = vrot.slane %v19473_v40, 2 }
 0x14c   :  { %v3954_v33 = vsel %vm3570_vm12, %v19464_v10, %v3953_v27  ;;  %v8829_v50 = vsel %vm3561_vm9, %v19469_v12, %v19467_v46  ;;  %v4013_v27 = vrot.slane %v19396_v44, 3  ;;  %v19471_v10 = vrot.slane %v19470_v7, 2 }
 0x14d   :  { %v3955_v24 = vsel %vm3573_vm13, %v19466_v15, %v3954_v33  ;;  %v4010_v48 = vsel %vm3570_vm12, %v4009_v17, %v4008_v31  ;;  %v4019_v15 = vrot.slane %v19382_v13, 7  ;;  %v13511_v12 = vsel %vm3579_vm15, %v3941_v3, %v3940_v8 }
 0x14e   :  { %v13505_v33 = vsel %vm3576_vm14, %v19471_v10, %v3947_v42  ;;  %19472 = vst [vmem:[#allocation38_spill] sm:$0xff] %v13511_v12  ;;  %v13516_v61 = vsel %vm3576_vm14, %v19474_v32, %v3955_v24  ;;  %v4012_v9 = vsel %vm3573_vm13, %v4011_v36, %v4010_v48  ;;  %v4021_v42 = vrot.slane %v19386_v57, 6  ;;  %v11374_v44 = vld.sshfl [vmem:[#allocation2 + $0x38] sm:$0x1 pattern:$0x75316420] }
 0x14f   :  { %v3991_v10 = vpack.c.b16 %v13511_v12, %v3934_v16  ;;  %v6554_v17 = vrot.slane %v11422_v39, %v19340_v49  ;;  %v4015_v31 = vrot.slane %v13386_v52, 2  ;;  %v4018_v3 = vsel %vm3561_vm9, %v19375_v55, %v4017_v28  ;;  %v209_v28 = vld [vmem:[#allocation2 + $0x110] sm:$0x1]  ;;  %v215_v39 = vld [vmem:[#allocation2 + $0x128] sm:$0x1] }
 0x150   :  { %v8811_v8 = vrot.slane %v13498_v34, 1  ;;  %v4014_v13 = vsel %vm3576_vm14, %v4013_v27, %v4012_v9  ;;  %v4020_v24 = vsel %vm3564_vm10, %v4019_v15, %v4018_v3  ;;  %v4023_v36 = vrot.slane %v19394_v37, 5  ;;  %v11380_v12 = vld.sshfl [vmem:[#allocation2 + $0x50] sm:$0x1 pattern:$0x75316420] }
 0x151   :  { %3995 = vrot.lane.b32.xlu1 %v3991_v10, %s11615_s22  ;;  %v8705_v16 = vrot.slane %v6554_v17, %v19340_v49  ;;  %v1793_v32 = vrot.slane %v11374_v44, %v19340_v49  ;;  %v4022_v52 = vsel %vm3567_vm11, %v4021_v42, %v4020_v24  ;;  %v4025_v48 = vrot.slane %v19404_v19, 4  ;;  %v19475_v3 = vld [vmem:[#allocation96_spill] sm:$0xff] }
 0x152   :  { %v4024_v27 = vsel %vm3570_vm12, %v4023_v36, %v4022_v52  ;;  %v4027_v15 = vrot.slane %v19432_v25, 3  ;;  %v4029_v9 = vrot.slane %v3920_v4, 2  ;;  %v19476_v37 = vrot.slane %v19475_v3, 6  ;;  %v19489_v25 = vld [vmem:[#allocation103_spill] sm:$0xff] }
 0x153   :  { %v8712_v17 = vrot.slane %v8705_v16, %v19340_v49  ;;  %v1917_v44 = vrot.slane %v11380_v12, %v19340_v49  ;;  %v3841_v42 = vrot.slane %v1793_v32, %v19340_v49  ;;  %v4026_v24 = vsel %vm3573_vm13, %v4025_v48, %v4024_v27  ;;  %v19479_v48 = vld [vmem:[#allocation97_spill] sm:$0xff] }
 0x154   :  { %v8822_v10 = vsel %vm3564_vm10, %v19476_v37, %v8821_v2  ;;  %v8812_v19 = vsel %vm3579_vm15, %v8811_v8, %v13423_v18  ;;  %v4028_v36 = vsel %vm3576_vm14, %v4027_v15, %v4026_v24  ;;  %v210_v4 = vsel %vm11661_vm4, 0, %v209_v28  ;;  %v19478_v8 = vld [vmem:[#allocation75_spill] sm:$0xff] }
 0x155   :  { %v216_v52 = vsel %vm11661_vm4, 0, %v215_v39  ;;  %v13550_v37 = vunpack.c.l.b16 %v8712_v17  ;;  %v3848_v2 = vrot.slane %v3841_v42, %v19340_v49  ;;  %v3855_v12 = vrot.slane %v1917_v44, %v19340_v49  ;;  %211 = vst [vmem:[#allocation2 + $0x110] sm:$0x1] %v210_v4  ;;  %v19481_v39 = vld [vmem:[#allocation105_spill] sm:$0xff] }
 0x156   :  { %v4016_v16 = vsel %vm3579_vm15, %v4015_v31, %v4014_v13  ;;  %217 = vst [vmem:[#allocation2 + $0x128] sm:$0x1] %v216_v52  ;;  %v13556_v18 = vsel %vm3579_vm15, %v4029_v9, %v4028_v36  ;;  %v848_v32 = vrot.slane %v19478_v8, 4  ;;  %v19480_v28 = vrot.slane %v19479_v48, 5  ;;  %v19483_v31 = vld [vmem:[#allocation98_spill] sm:$0xff]  ;;  %v19485_v36 = vld [vmem:[#allocation76_spill] sm:$0xff] }
 0x157   :  { %19477 = vst [vmem:[#allocation5_spill] sm:$0xff] %v13556_v18  ;;  %v19482_v15 = vrot.slane %v19481_v39, 6  ;;  %v8819_v42 = vrot.slane %v13550_v37, 1  ;;  %v3862_v44 = vrot.slane %v3855_v12, %v19340_v49  ;;  %v13567_v13 = vunpack.c.l.b16 %v3848_v2  ;;  %v19486_v52 = vld [vmem:[#allocation99_spill] sm:$0xff] }
 0x158   :  { %v8823_v27 = vsel %vm3567_vm11, %v19480_v28, %v8822_v10  ;;  %v19484_v24 = vrot.slane %v19483_v31, 4  ;;  %v882_v4 = vrot.slane %v19485_v36, 4  ;;  %v19487_v8 = vrot.slane %v19486_v52, 3 }
 0x159   :  { %v8830_v17 = vsel %vm3564_vm10, %v19482_v15, %v8829_v50  ;;  %v8881_v28 = vrot.slane %v19399_v43, 1  ;;  %v8883_v50 = vrot.slane %v19411_v56, 7  ;;  %v13580_v15 = vsel %vm3579_vm15, %v8819_v42, %v13444_v60 }
 0x15a   :  { %v8824_v9 = vsel %vm3570_vm12, %v19484_v24, %v8823_v27  ;;  %19488 = vst [vmem:[#allocation7_spill] sm:$0xff] %v13580_v15  ;;  %v13582_v2 = vunpack.c.l.b16 %v3862_v44  ;;  %v3949_v12 = vrot.slane %v13567_v13, 1  ;;  %v19490_v27 = vrot.slane %v19489_v25, 5  ;;  %v19492_v44 = vld [vmem:[#allocation100_spill] sm:$0xff] }
 0x15b   :  { %v8825_v10 = vsel %vm3573_vm13, %v19487_v8, %v8824_v9  ;;  %v8869_v36 = vpack.c.b16 %v13580_v15, %v8812_v19  ;;  %v4115_v9 = vpack.c.b16 %v13556_v18, %v4016_v16  ;;  %v8882_v8 = vsel %vm3561_vm9, %v19400_v38, %v8881_v28  ;;  %v19494_v28 = vld [vmem:[#allocation104_spill] sm:$0xff] }
 0x15c   :  { %v8831_v24 = vsel %vm3567_vm11, %v19490_v27, %v8830_v17  ;;  %v8885_v56 = vrot.slane %v19413_v41, 6  ;;  %v13595_v60 = vsel %vm3579_vm15, %v3949_v12, %v13505_v33  ;;  %v3957_v42 = vrot.slane %v13582_v2, 1  ;;  %v1289_v16 = vld [vmem:[#allocation2 + $0x110] sm:$0x1] }
 0x15d   :  { %19491 = vst [vmem:[#allocation75_spill] sm:$0xff] %v13595_v60  ;;  %v19493_v43 = vrot.slane %v19492_v44, 2  ;;  %v8884_v19 = vsel %vm3564_vm10, %v8883_v50, %v8882_v8  ;;  %8873 = vrot.lane.b32.xlu1 %v8869_v36, %s11615_s22  ;;  %v1303_v17 = vld [vmem:[#allocation2 + $0x128] sm:$0x1]  ;;  %v19495_v27 = vrot.slane %v19494_v28, 4  ;;  %v8887_v12 = vrot.slane %v19419_v21, 5 }
 0x15e   :  { %v8886_v33 = vsel %vm3567_vm11, %v8885_v56, %v8884_v19  ;;  %v8889_v38 = vrot.slane %v19425_v11, 4  ;;  %v1304_v50 = vsel %vm11649_vm2, %v882_v4, %v1303_v17  ;;  %v8891_v36 = vrot.slane %v19434_v26, 3 }
 0x15f   :  { %v13601_v57 = vsel %vm3576_vm14, %v19493_v43, %v8825_v10  ;;  %v8832_v41 = vsel %vm3570_vm12, %v19495_v27, %v8831_v24  ;;  %v13613_v43 = vsel %vm3579_vm15, %v3957_v42, %v13516_v61  ;;  %v1290_v10 = vsel %vm11649_vm2, %v848_v32, %v1289_v16  ;;  %1305 = vst [vmem:[#allocation2 + $0x128] sm:$0x1] %v1304_v50  ;;  %v19497_v16 = vld [vmem:[#allocation106_spill] sm:$0xff] }
 0x160   :  { %19496 = vst [vmem:[#allocation76_spill] sm:$0xff] %v13613_v43  ;;  %v3992_v24 = vpack.c.b16 %v13613_v43, %v13595_v60  ;;  %1291 = vst [vmem:[#allocation2 + $0x110] sm:$0x1] %v1290_v10  ;;  %v8888_v56 = vsel %vm3570_vm12, %v8887_v12, %v8886_v33  ;;  %v8893_v8 = vrot.slane %v13498_v34, 2  ;;  %v8895_v61 = vrot.slane %v19415_v45, 1  ;;  %v19576_v45 = vld [vmem:[#allocation138_spill] sm:$0xff] }
 0x161   :  { %v8890_v42 = vsel %vm3573_vm13, %v8889_v38, %v8888_v56  ;;  %v8897_v32 = vrot.slane %v19421_v53, 7  ;;  %v8899_v19 = vrot.slane %v19427_v54, 6  ;;  %v8901_v4 = vrot.slane %v19430_v20, 5  ;;  %4119 = vrot.lane.b32.xlu1 %v4115_v9, %s11616_s23  ;;  %v19571_v53 = vld [vmem:[#allocation136_spill] sm:$0xff] }
 0x162   :  { %3997 = vrot.lane.b32.xlu0 %v3992_v24, %s11615_s22  ;;  %v19498_v17 = vrot.slane %v19497_v16, 3  ;;  %v8892_v34 = vsel %vm3576_vm14, %v8891_v36, %v8890_v42  ;;  %v8896_v38 = vsel %vm3561_vm9, %v19416_v29, %v8895_v61  ;;  %v8903_v33 = vrot.slane %v19436_v51, 4  ;;  %v19564_v51 = vld [vmem:[#allocation126_spill] sm:$0xff] }
 0x163   :  { %v8898_v12 = vsel %vm3564_vm10, %v8897_v32, %v8896_v38  ;;  %v8905_v10 = vrot.slane %v19445_v5, 3  ;;  %v8907_v50 = vrot.slane %v13550_v37, 2  ;;  %v4031_v24 = vrot.slane %v19438_v62, 1 }
 0x164   :  { %v8833_v27 = vsel %vm3573_vm13, %v19498_v17, %v8832_v41  ;;  %v8900_v9 = vsel %vm3567_vm11, %v8899_v19, %v8898_v12  ;;  %v4033_v56 = vrot.slane %v19443_v30, 7  ;;  %v4035_v41 = vrot.slane %v19447_v59, 6 }
 0x165   :  { %v4037_v36 = vrot.slane %v19452_v6, 5  ;;  %v8894_v61 = vsel %vm3579_vm15, %v8893_v8, %v8892_v34  ;;  %v8902_v42 = vsel %vm3570_vm12, %v8901_v4, %v8900_v9  ;;  %v4032_v32 = vsel %vm3561_vm9, %v19439_v63, %v4031_v24  ;;  %v19499_v34 = vld [vmem:[#allocation24_spill] sm:$0xff] }
 0x166   :  { %v4039_v17 = vrot.slane %v19459_v35, 4  ;;  %v8904_v37 = vsel %vm3573_vm13, %v8903_v33, %v8902_v42  ;;  %v4034_v38 = vsel %vm3564_vm10, %v4033_v56, %v4032_v32  ;;  %v4041_v19 = vrot.slane %v19470_v7, 3  ;;  %v11434_v24 = vld.sshfl [vmem:[#allocation2 + $0x128] sm:$0x1 pattern:$0x75316420] }
 0x167   :  { %v4045_v12 = vrot.slane %v19449_v58, 1  ;;  %v11428_v26 = vld.sshfl [vmem:[#allocation2 + $0x110] sm:$0x1 pattern:$0x75316420]  ;;  %v8906_v11 = vsel %vm3576_vm14, %v8905_v10, %v8904_v37  ;;  %v4036_v8 = vsel %vm3567_vm11, %v4035_v41, %v4034_v38  ;;  %v4047_v4 = vrot.slane %v19454_v0, 7 }
 0x168   :  { %v4049_v9 = vrot.slane %v19499_v34, 6  ;;  %v6678_v21 = vrot.slane %v11428_v26, %v19340_v49  ;;  %v13661_v33 = vsel %vm3579_vm15, %v8907_v50, %v8906_v11  ;;  %v4038_v56 = vsel %vm3570_vm12, %v4037_v36, %v4036_v8  ;;  %v19501_v42 = vld [vmem:[#allocation20_spill] sm:$0xff]  ;;  %v146_v38 = vld [vmem:[#allocation2 + $0x14] sm:$0x1]  ;;  %v152_v36 = vld [vmem:[#allocation2 + $0x2c] sm:$0x1] }
 0x169   :  { %19500 = vst [vmem:[#allocation167_spill] sm:$0xff] %v13661_v33  ;;  %v4046_v32 = vsel %vm3561_vm9, %v19501_v42, %v4045_v12  ;;  %v6802_v18 = vrot.slane %v11434_v24, %v19340_v49  ;;  %v8993_v10 = vpack.c.b16 %v13661_v33, %v8894_v61  ;;  %v4040_v41 = vsel %vm3573_vm13, %v4039_v17, %v4038_v56  ;;  %v19524_v34 = vld [vmem:[#allocation15_spill] sm:$0xff]  ;;  %v19578_v6 = vld [vmem:[#allocation132_spill] sm:$0xff] }
 0x16a   :  { %v4048_v37 = vsel %vm3564_vm10, %v4047_v4, %v4046_v32  ;;  %v8719_v43 = vrot.slane %v6678_v21, %v19340_v49  ;;  %v4043_v26 = vrot.slane %v13567_v13, 2  ;;  %v4051_v50 = vrot.slane %v19463_v14, 5 }
 0x16b   :  { %v4050_v11 = vsel %vm3567_vm11, %v4049_v9, %v4048_v37  ;;  %v8733_v12 = vrot.slane %v6802_v18, %v19340_v49  ;;  %8997 = vrot.lane.b32.xlu1 %v8993_v10, %s11616_s23  ;;  %v4042_v61 = vsel %vm3576_vm14, %v4041_v19, %v4040_v41  ;;  %v4053_v17 = vrot.slane %v19465_v23, 4  ;;  %v19502_v18 = vld [vmem:[#allocation107_spill] sm:$0xff]  ;;  %v19505_v37 = vld [vmem:[#allocation77_spill] sm:$0xff] }
 0x16c   :  { %v4055_v8 = vrot.slane %v19473_v40, 3  ;;  %v8726_v4 = vrot.slane %v8719_v43, %v19340_v49  ;;  %v4052_v21 = vsel %vm3570_vm12, %v4051_v50, %v4050_v11  ;;  %v4057_v13 = vrot.slane %v13582_v2, 2  ;;  %v19521_v23 = vld [vmem:[#allocation87_spill] sm:$0xff] }
 0x16d   :  { %v147_v9 = vsel %vm11661_vm4, 0, %v146_v38  ;;  %v8740_v24 = vrot.slane %v8733_v12, %v19340_v49  ;;  %v19503_v56 = vrot.slane %v19502_v18, 2  ;;  %v4054_v19 = vsel %vm3573_vm13, %v4053_v17, %v4052_v21  ;;  %v19506_v38 = vld [vmem:[#allocation78_spill] sm:$0xff]  ;;  %v19509_v21 = vld [vmem:[#allocation79_spill] sm:$0xff] }
 0x16e   :  { %148 = vst [vmem:[#allocation2 + $0x14] sm:$0x1] %v147_v9  ;;  %v153_v10 = vsel %vm11661_vm4, 0, %v152_v36  ;;  %v8799_v43 = vunpack.c.l.b16 %v8726_v4  ;;  %v13692_v41 = vsel %vm3579_vm15, %v4043_v26, %v4042_v61  ;;  %v4056_v2 = vsel %vm3576_vm14, %v4055_v8, %v4054_v19  ;;  %v19511_v4 = vld [vmem:[#allocation84_spill] sm:$0xff] }
 0x16f   :  { %v8834_v32 = vsel %vm3576_vm14, %v19503_v56, %v8833_v27  ;;  %19504 = vst [vmem:[#allocation168_spill] sm:$0xff] %v13692_v41  ;;  %154 = vst [vmem:[#allocation2 + $0x2c] sm:$0x1] %v153_v10  ;;  %v19507_v11 = vrot.slane %v19506_v38, 7  ;;  %v13699_v12 = vunpack.c.l.b16 %v8740_v24  ;;  %v19508_v27 = vld [vmem:[#allocation72_spill] sm:$0xff]  ;;  %v19510_v9 = vrot.slane %v19509_v21, 6 }
 0x170   :  { %v525_v17 = vrot.slane %v19508_v27, 4  ;;  %v19512_v56 = vld [vmem:[#allocation85_spill] sm:$0xff]  ;;  %v8827_v8 = vrot.slane %v8799_v43, 1  ;;  %v13710_v19 = vsel %vm3579_vm15, %v4057_v13, %v4056_v2  ;;  %v19515_v10 = vld [vmem:[#allocation80_spill] sm:$0xff]  ;;  %v19523_v13 = vld [vmem:[#allocation94_spill] sm:$0xff]  ;;  %v19525_v0 = vrot.slane %v19524_v34, %v19340_v49 }
 0x171   :  { %v5455_v50 = vsel %vm3561_vm9, %v19507_v11, %v19505_v37  ;;  %v19513_v26 = vrot.slane %v19512_v56, 7  ;;  %19514 = vst [vmem:[#allocation77_spill] sm:$0xff] %v13710_v19  ;;  %v19516_v33 = vrot.slane %v19515_v10, 5  ;;  %v19517_v11 = vld [vmem:[#allocation86_spill] sm:$0xff]  ;;  %v8835_v60 = vrot.slane %v13699_v12, 1 }
 0x172   :  { %v5456_v36 = vsel %vm3564_vm10, %v19510_v9, %v5455_v50  ;;  %v19518_v15 = vrot.slane %v19517_v11, 6  ;;  %v19519_v50 = vld [vmem:[#allocation81_spill] sm:$0xff]  ;;  %v8909_v2 = vrot.slane %v19523_v13, 1  ;;  %v8911_v42 = vrot.slane %v19475_v3, 7  ;;  %v19562_v13 = vld [vmem:[#allocation119_spill] sm:$0xff] }
 0x173   :  { %v5463_v61 = vsel %vm3561_vm9, %v19513_v26, %v19511_v4  ;;  %v5457_v24 = vsel %vm3567_vm11, %v19516_v33, %v5456_v36  ;;  %v19520_v9 = vrot.slane %v19519_v50, 4  ;;  %v19522_v26 = vrot.slane %v19521_v23, 5  ;;  %v19528_v36 = vld [vmem:[#allocation74_spill] sm:$0xff] }
 0x174   :  { %v5464_v27 = vsel %vm3564_vm10, %v19518_v15, %v5463_v61  ;;  %v13729_v33 = vunpack.c.l.b16 %v19525_v0  ;;  %v13733_v15 = vsel %vm3579_vm15, %v8827_v8, %v13601_v57  ;;  %v559_v61 = vrot.slane %v19528_v36, 4  ;;  %v19532_v0 = vld [vmem:[#allocation95_spill] sm:$0xff]  ;;  %v19533_v36 = vld [vmem:[#allocation88_spill] sm:$0xff] }
 0x175   :  { %v5458_v40 = vsel %vm3570_vm12, %v19520_v9, %v5457_v24  ;;  %v5465_v14 = vsel %vm3567_vm11, %v19522_v26, %v5464_v27  ;;  %19527 = vst [vmem:[#allocation72_spill] sm:$0xff] %v13733_v15  ;;  %v13738_v24 = vsel %vm3579_vm15, %v8835_v60, %v8834_v32  ;;  %v4116_v27 = vpack.c.b16 %v13710_v19, %v13692_v41  ;;  %v19530_v9 = vld [vmem:[#allocation82_spill] sm:$0xff]  ;;  %v1156_v8 = vld [vmem:[#allocation2 + $0x14] sm:$0x1] }
 0x176   :  { %19526 = vst [vmem:[#allocation78_spill] sm:$0xff] %v13729_v33  ;;  %19529 = vst [vmem:[#allocation79_spill] sm:$0xff] %v13738_v24  ;;  %v19531_v26 = vrot.slane %v19530_v9, 3  ;;  %v8910_v58 = vsel %vm3561_vm9, %v19532_v0, %v8909_v2  ;;  %v8870_v57 = vpack.c.b16 %v13738_v24, %v13733_v15  ;;  %v19534_v5 = vrot.slane %v19533_v36, 4  ;;  %v1170_v41 = vld [vmem:[#allocation2 + $0x2c] sm:$0x1] }
 0x177   :  { %v8912_v60 = vsel %vm3564_vm10, %v8911_v42, %v8910_v58  ;;  %v8913_v32 = vrot.slane %v19479_v48, 6  ;;  %v1157_v19 = vsel %vm11649_vm2, %v525_v17, %v1156_v8  ;;  %v8917_v2 = vrot.slane %v19486_v52, 4  ;;  %v200_v24 = vld [vmem:[#allocation2 + $0xec] sm:$0x1]  ;;  %v19557_v48 = vld [vmem:[#allocation125_spill] sm:$0xff] }
 0x178   :  { %v5459_v34 = vsel %vm3573_vm13, %v19531_v26, %v5458_v40  ;;  %v5466_v3 = vsel %vm3570_vm12, %v19534_v5, %v5465_v14  ;;  %v8915_v40 = vrot.slane %v19483_v31, 5  ;;  %v8919_v26 = vrot.slane %v19492_v44, 3  ;;  %8875 = vrot.lane.b32.xlu0 %v8870_v57, %s11615_s22  ;;  %1158 = vst [vmem:[#allocation2 + $0x14] sm:$0x1] %v1157_v19  ;;  %v206_v57 = vld [vmem:[#allocation2 + $0x104] sm:$0x1] }
 0x179   :  { %v1171_v5 = vsel %vm11649_vm2, %v559_v61, %v1170_v41  ;;  %v8914_v58 = vsel %vm3567_vm11, %v8913_v32, %v8912_v60  ;;  %v8921_v14 = vrot.slane %v8799_v43, 2  ;;  %v8923_v42 = vrot.slane %v19467_v46, 1  ;;  %v19535_v19 = vld [vmem:[#allocation83_spill] sm:$0xff]  ;;  %v19537_v61 = vld [vmem:[#allocation102_spill] sm:$0xff]  ;;  %v19552_v31 = vld [vmem:[#allocation124_spill] sm:$0xff] }
 0x17a   :  { %1172 = vst [vmem:[#allocation2 + $0x2c] sm:$0x1] %v1171_v5  ;;  %v8916_v17 = vsel %vm3570_vm12, %v8915_v40, %v8914_v58  ;;  %v8925_v8 = vrot.slane %v19481_v39, 7  ;;  %v8927_v15 = vrot.slane %v19489_v25, 6  ;;  %v8929_v44 = vrot.slane %v19494_v28, 5 }
 0x17b   :  { %v19536_v52 = vrot.slane %v19535_v19, 2  ;;  %v8918_v43 = vsel %vm3573_vm13, %v8917_v2, %v8916_v17  ;;  %v8924_v60 = vsel %vm3561_vm9, %v19537_v61, %v8923_v42  ;;  %v8931_v32 = vrot.slane %v19497_v16, 4  ;;  %v158_v25 = vld [vmem:[#allocation2 + $0x44] sm:$0x1]  ;;  %v164_v42 = vld [vmem:[#allocation2 + $0x5c] sm:$0x1] }
 0x17c   :  { %v8920_v40 = vsel %vm3576_vm14, %v8919_v26, %v8918_v43  ;;  %v8926_v5 = vsel %vm3564_vm10, %v8925_v8, %v8924_v60  ;;  %v8933_v58 = vrot.slane %v19502_v18, 3  ;;  %v201_v28 = vsel %vm11661_vm4, 0, %v200_v24  ;;  %4121 = vrot.lane.b32.xlu0 %v4116_v27, %s11616_s23  ;;  %v19539_v8 = vld [vmem:[#allocation109_spill] sm:$0xff]  ;;  %v19540_v43 = vld [vmem:[#allocation114_spill] sm:$0xff]  ;;  %v19541_v60 = vld [vmem:[#allocation115_spill] sm:$0xff] }
 0x17d   :  { %v13771_v41 = vsel %vm3576_vm14, %v19536_v52, %v5459_v34  ;;  %v13784_v52 = vsel %vm3579_vm15, %v8921_v14, %v8920_v40  ;;  %v8928_v34 = vsel %vm3567_vm11, %v8927_v15, %v8926_v5  ;;  %v8935_v2 = vrot.slane %v13699_v12, 2  ;;  %202 = vst [vmem:[#allocation2 + $0xec] sm:$0x1] %v201_v28  ;;  %v19543_v40 = vld [vmem:[#allocation121_spill] sm:$0xff]  ;;  %v19544_v18 = vld [vmem:[#allocation122_spill] sm:$0xff]  ;;  %v19546_v5 = vld [vmem:[#allocation116_spill] sm:$0xff] }
 0x17e   :  { %19538 = vst [vmem:[#allocation84_spill] sm:$0xff] %v13784_v52  ;;  %v207_v26 = vsel %vm11661_vm4, 0, %v206_v57  ;;  %v8930_v17 = vsel %vm3570_vm12, %v8929_v44, %v8928_v34  ;;  %v797_v24 = vrot.slane %v19539_v8, 4  ;;  %v19542_v27 = vrot.slane %v19541_v60, 7  ;;  %v19548_v44 = vld [vmem:[#allocation123_spill] sm:$0xff]  ;;  %v19550_v61 = vld [vmem:[#allocation117_spill] sm:$0xff] }
 0x17f   :  { %208 = vst [vmem:[#allocation2 + $0x104] sm:$0x1] %v207_v26  ;;  %v19545_v15 = vrot.slane %v19544_v18, 7  ;;  %v8932_v28 = vsel %vm3573_vm13, %v8931_v32, %v8930_v17  ;;  %v19547_v57 = vrot.slane %v19546_v5, 6  ;;  %v19549_v34 = vrot.slane %v19548_v44, 6 }
 0x180   :  { %v10333_v14 = vsel %vm3561_vm9, %v19542_v27, %v19540_v43  ;;  %v159_v8 = vsel %vm11661_vm4, 0, %v158_v25  ;;  %v11365_v39 = vld.sshfl [vmem:[#allocation2 + $0x14] sm:$0x1 pattern:$0x75316420]  ;;  %v8934_v27 = vsel %vm3576_vm14, %v8933_v58, %v8932_v28  ;;  %v19551_v46 = vrot.slane %v19550_v61, 5 }
 0x181   :  { %v10341_v12 = vsel %vm3561_vm9, %v19545_v15, %v19543_v40  ;;  %v10334_v16 = vsel %vm3564_vm10, %v19547_v57, %v10333_v14  ;;  %v19553_v32 = vrot.slane %v19552_v31, 5  ;;  %160 = vst [vmem:[#allocation2 + $0x44] sm:$0x1] %v159_v8  ;;  %v165_v14 = vsel %vm11661_vm4, 0, %v164_v42  ;;  %v19559_v8 = vld [vmem:[#allocation89_spill] sm:$0xff] }
 0x182   :  { %v10342_v26 = vsel %vm3564_vm10, %v19549_v34, %v10341_v12  ;;  %v10335_v15 = vsel %vm3567_vm11, %v19551_v46, %v10334_v16  ;;  %v11371_v57 = vld.sshfl [vmem:[#allocation2 + $0x2c] sm:$0x1 pattern:$0x75316420]  ;;  %v1607_v12 = vrot.slane %v11365_v39, %v19340_v49  ;;  %v13820_v25 = vsel %vm3579_vm15, %v8935_v2, %v8934_v27  ;;  %166 = vst [vmem:[#allocation2 + $0x5c] sm:$0x1] %v165_v14 }
 0x183   :  { %v10343_v17 = vsel %vm3567_vm11, %v19553_v32, %v10342_v26  ;;  %19554 = vst [vmem:[#allocation85_spill] sm:$0xff] %v13820_v25  ;;  %v19555_v34 = vld [vmem:[#allocation118_spill] sm:$0xff]  ;;  %v19558_v46 = vrot.slane %v19557_v48, 4  ;;  %v1731_v26 = vrot.slane %v11371_v57, %v19340_v49  ;;  %v19560_v32 = vrot.slane %v19559_v8, 3  ;;  %v19561_v2 = vld [vmem:[#allocation111_spill] sm:$0xff]  ;;  %v19566_v57 = vld [vmem:[#allocation112_spill] sm:$0xff] }
 0x184   :  { %v19556_v58 = vrot.slane %v19555_v34, 4  ;;  %v8994_v39 = vpack.c.b16 %v13820_v25, %v13784_v52  ;;  %v831_v27 = vrot.slane %v19561_v2, 4  ;;  %v5341_v0 = vrot.slane %v1607_v12, %v19340_v49  ;;  %v19568_v2 = vld [vmem:[#allocation129_spill] sm:$0xff]  ;;  %v19569_v52 = vld [vmem:[#allocation130_spill] sm:$0xff] }
 0x185   :  { %v10344_v16 = vsel %vm3570_vm12, %v19558_v46, %v10343_v17  ;;  %v5467_v42 = vsel %vm3573_vm13, %v19560_v32, %v5466_v3  ;;  %v19565_v17 = vrot.slane %v19564_v51, 3  ;;  %v593_v46 = vrot.slane %v19566_v57, 4  ;;  %v1268_v3 = vld [vmem:[#allocation2 + $0xec] sm:$0x1]  ;;  %v19567_v32 = vld [vmem:[#allocation113_spill] sm:$0xff] }
 0x186   :  { %v10336_v28 = vsel %vm3570_vm12, %v19556_v58, %v10335_v15  ;;  %v19563_v15 = vrot.slane %v19562_v13, 3  ;;  %v5355_v20 = vrot.slane %v1731_v26, %v19340_v49  ;;  %8999 = vrot.lane.b32.xlu0 %v8994_v39, %s11616_s23  ;;  %v627_v25 = vrot.slane %v19567_v32, 4  ;;  %v19574_v39 = vld [vmem:[#allocation131_spill] sm:$0xff] }
 0x187   :  { %v10345_v14 = vsel %vm3573_vm13, %v19565_v17, %v10344_v16  ;;  %v19570_v12 = vrot.slane %v19569_v52, 7  ;;  %v5348_v16 = vrot.slane %v5341_v0, %v19340_v49  ;;  %v1269_v26 = vsel %vm11649_vm2, %v797_v24, %v1268_v3  ;;  %v1282_v17 = vld [vmem:[#allocation2 + $0x104] sm:$0x1]  ;;  %v19580_v24 = vld [vmem:[#allocation139_spill] sm:$0xff] }
 0x188   :  { %v10337_v58 = vsel %vm3573_vm13, %v19563_v15, %v10336_v28  ;;  %v19572_v28 = vld [vmem:[#allocation137_spill] sm:$0xff]  ;;  %v19575_v57 = vrot.slane %v19574_v39, 6  ;;  %v19577_v7 = vrot.slane %v19576_v45, 6  ;;  %1270 = vst [vmem:[#allocation2 + $0xec] sm:$0x1] %v1269_v26  ;;  %v19579_v0 = vrot.slane %v19578_v6, 5 }
 0x189   :  { %v5471_v54 = vsel %vm3561_vm9, %v19570_v12, %v19568_v2  ;;  %v19573_v15 = vrot.slane %v19572_v28, 7  ;;  %v5362_v12 = vrot.slane %v5355_v20, %v19340_v49  ;;  %v19581_v3 = vrot.slane %v19580_v24, 5  ;;  %v1184_v20 = vld [vmem:[#allocation2 + $0x44] sm:$0x1] }
 0x18a   :  { %v5472_v32 = vsel %vm3564_vm10, %v19575_v57, %v5471_v54  ;;  %v13872_v63 = vunpack.c.l.b16 %v5348_v16  ;;  %v19582_v54 = vld [vmem:[#allocation90_spill] sm:$0xff]  ;;  %v1185_v16 = vsel %vm11649_vm2, %v593_v46, %v1184_v20  ;;  %v5535_v22 = vrot.slane %v19515_v10, 6 }
 0x18b   :  { %v5479_v29 = vsel %vm3561_vm9, %v19573_v15, %v19571_v53  ;;  %v1283_v15 = vsel %vm11649_vm2, %v831_v27, %v1282_v17  ;;  %v5473_v59 = vsel %vm3567_vm11, %v19579_v0, %v5472_v32  ;;  %v19583_v57 = vrot.slane %v19582_v54, 2  ;;  %v19586_v32 = vld [vmem:[#allocation120_spill] sm:$0xff]  ;;  %1186 = vst [vmem:[#allocation2 + $0x44] sm:$0x1] %v1185_v16  ;;  %v19594_v16 = vld [vmem:[#allocation141_spill] sm:$0xff] }
 0x18c   :  { %v5480_v35 = vsel %vm3564_vm10, %v19577_v7, %v5479_v29  ;;  %1284 = vst [vmem:[#allocation2 + $0x104] sm:$0x1] %v1283_v15  ;;  %v19584_v7 = vld [vmem:[#allocation133_spill] sm:$0xff]  ;;  %v5531_v17 = vrot.slane %v19505_v37, 1  ;;  %v13881_v62 = vunpack.c.l.b16 %v5362_v12  ;;  %v19587_v0 = vrot.slane %v19586_v32, 2  ;;  %v19592_v12 = vld [vmem:[#allocation134_spill] sm:$0xff] }
 0x18d   :  { %v5481_v30 = vsel %vm3567_vm11, %v19581_v3, %v5480_v35  ;;  %v5468_v29 = vsel %vm3576_vm14, %v19583_v57, %v5467_v42  ;;  %v19585_v26 = vrot.slane %v19584_v7, 4  ;;  %v1198_v3 = vld [vmem:[#allocation2 + $0x5c] sm:$0x1]  ;;  %v5461_v55 = vrot.slane %v13872_v63, 1 }
 0x18e   :  { %v13886_v35 = vsel %vm3576_vm14, %v19587_v0, %v10337_v58  ;;  %v19588_v42 = vld [vmem:[#allocation140_spill] sm:$0xff]  ;;  %v1199_v58 = vsel %vm11649_vm2, %v627_v25, %v1198_v3  ;;  %v19593_v0 = vrot.slane %v19592_v12, 3  ;;  %v5469_v20 = vrot.slane %v13881_v62, 1 }
 0x18f   :  { %v5474_v27 = vsel %vm3570_vm12, %v19585_v26, %v5473_v59  ;;  %v19589_v15 = vrot.slane %v19588_v42, 4  ;;  %v19590_v59 = vld [vmem:[#allocation127_spill] sm:$0xff]  ;;  %1200 = vst [vmem:[#allocation2 + $0x5c] sm:$0x1] %v1199_v58  ;;  %v5537_v3 = vrot.slane %v19519_v50, 5  ;;  %v5545_v10 = vrot.slane %v19511_v4, 1 }
 0x190   :  { %v19591_v26 = vrot.slane %v19590_v59, 2  ;;  %v5475_v46 = vsel %vm3573_vm13, %v19593_v0, %v5474_v27  ;;  %v5539_v27 = vrot.slane %v19530_v9, 4  ;;  %v13917_v58 = vsel %vm3579_vm15, %v5469_v20, %v5468_v29 }
 0x191   :  { %v5482_v57 = vsel %vm3570_vm12, %v19589_v15, %v5481_v30  ;;  %v5532_v30 = vsel %vm3561_vm9, %v19506_v38, %v5531_v17  ;;  %v5533_v15 = vrot.slane %v19509_v21, 7  ;;  %19596 = vst [vmem:[#allocation80_spill] sm:$0xff] %v13917_v58  ;;  %v5541_v21 = vrot.slane %v19535_v19, 3 }
 0x192   :  { %v13897_v37 = vsel %vm3576_vm14, %v19591_v26, %v10345_v14  ;;  %v5462_v14 = vsel %vm3579_vm15, %v5461_v55, %v13771_v41  ;;  %v19595_v26 = vrot.slane %v19594_v16, 3  ;;  %v11419_v55 = vld.sshfl [vmem:[#allocation2 + $0xec] sm:$0x1 pattern:$0x75316420]  ;;  %v5549_v50 = vrot.slane %v19521_v23, 6 }
 0x193   :  { %v5534_v38 = vsel %vm3564_vm10, %v5533_v15, %v5532_v30  ;;  %v5519_v17 = vpack.c.b16 %v13917_v58, %v5462_v14  ;;  %v11425_v0 = vld.sshfl [vmem:[#allocation2 + $0x104] sm:$0x1 pattern:$0x75316420]  ;;  %v6492_v9 = vrot.slane %v11419_v55, %v19340_v49  ;;  %v5546_v20 = vsel %vm3561_vm9, %v19512_v56, %v5545_v10  ;;  %v212_v30 = vld [vmem:[#allocation2 + $0x11c] sm:$0x1] }
 0x194   :  { %v5483_v25 = vsel %vm3573_vm13, %v19595_v26, %v5482_v57  ;;  %v5536_v41 = vsel %vm3567_vm11, %v5535_v22, %v5534_v38  ;;  %v5547_v57 = vrot.slane %v19517_v11, 7  ;;  %v5551_v19 = vrot.slane %v19533_v36, 5  ;;  %v11377_v14 = vld.sshfl [vmem:[#allocation2 + $0x44] sm:$0x1 pattern:$0x75316420] }
 0x195   :  { %v5538_v29 = vsel %vm3570_vm12, %v5537_v3, %v5536_v41  ;;  %5523 = vrot.lane.b32.xlu1 %v5519_v17, %s11617_s24  ;;  %v6616_v4 = vrot.slane %v11425_v0, %v19340_v49  ;;  %v5553_v23 = vrot.slane %v19559_v8, 4  ;;  %v10219_v15 = vrot.slane %v6492_v9, %v19340_v49  ;;  %v218_v8 = vld [vmem:[#allocation2 + $0x134] sm:$0x1] }
 0x196   :  { %v5540_v22 = vsel %vm3573_vm13, %v5539_v27, %v5538_v29  ;;  %v5548_v11 = vsel %vm3564_vm10, %v5547_v57, %v5546_v20  ;;  %v5543_v26 = vrot.slane %v13872_v63, 2  ;;  %v5555_v36 = vrot.slane %v19582_v54, 3  ;;  %v11383_v38 = vld.sshfl [vmem:[#allocation2 + $0x5c] sm:$0x1 pattern:$0x75316420] }
 0x197   :  { %v5550_v56 = vsel %vm3567_vm11, %v5549_v50, %v5548_v11  ;;  %v10233_v3 = vrot.slane %v6616_v4, %v19340_v49  ;;  %v1855_v10 = vrot.slane %v11377_v14, %v19340_v49  ;;  %v5542_v27 = vsel %vm3576_vm14, %v5541_v21, %v5540_v22  ;;  %v19597_v20 = vld [vmem:[#allocation135_spill] sm:$0xff] }
 0x198   :  { %v5552_v17 = vsel %vm3570_vm12, %v5551_v19, %v5550_v56  ;;  %v10226_v55 = vrot.slane %v10219_v15, %v19340_v49  ;;  %v1979_v41 = vrot.slane %v11383_v38, %v19340_v49  ;;  %v5557_v57 = vrot.slane %v13881_v62, 2  ;;  %v19603_v38 = vld [vmem:[#allocation149_spill] sm:$0xff] }
 0x199   :  { %v5554_v63 = vsel %vm3573_vm13, %v5553_v23, %v5552_v17  ;;  %v10240_v54 = vrot.slane %v10233_v3, %v19340_v49  ;;  %v5369_v50 = vrot.slane %v1855_v10, %v19340_v49  ;;  %v213_v21 = vsel %vm11661_vm4, 0, %v212_v30  ;;  %v19599_v23 = vld [vmem:[#allocation142_spill] sm:$0xff]  ;;  %v19602_v3 = vld [vmem:[#allocation148_spill] sm:$0xff] }
 0x19a   :  { %v5556_v0 = vsel %vm3576_vm14, %v5555_v36, %v5554_v63  ;;  %v13953_v9 = vunpack.c.l.b16 %v10226_v55  ;;  %v5383_v29 = vrot.slane %v1979_v41, %v19340_v49  ;;  %v19598_v19 = vrot.slane %v19597_v20, 2  ;;  %214 = vst [vmem:[#allocation2 + $0x11c] sm:$0x1] %v213_v21  ;;  %v19608_v63 = vld [vmem:[#allocation156_spill] sm:$0xff]  ;;  %v19610_v21 = vld [vmem:[#allocation146_spill] sm:$0xff] }
 0x19b   :  { %v219_v62 = vsel %vm11661_vm4, 0, %v218_v8  ;;  %v13961_v22 = vunpack.c.l.b16 %v10240_v54  ;;  %v5376_v11 = vrot.slane %v5369_v50, %v19340_v49  ;;  %v19600_v15 = vrot.slane %v19599_v23, 2 }
 0x19c   :  { %v5476_v4 = vsel %vm3576_vm14, %v19598_v19, %v5475_v46  ;;  %v5544_v14 = vsel %vm3579_vm15, %v5543_v26, %v5542_v27  ;;  %220 = vst [vmem:[#allocation2 + $0x134] sm:$0x1] %v219_v62  ;;  %v10339_v56 = vrot.slane %v13953_v9, 1  ;;  %v5390_v36 = vrot.slane %v5383_v29, %v19340_v49  ;;  %v19607_v27 = vld [vmem:[#allocation155_spill] sm:$0xff] }
 0x19d   :  { %v5484_v30 = vsel %vm3576_vm14, %v19600_v15, %v5483_v25  ;;  %v13971_v46 = vsel %vm3579_vm15, %v5557_v57, %v5556_v0  ;;  %v19604_v10 = vrot.slane %v19603_v38, 7  ;;  %v10347_v8 = vrot.slane %v13961_v22, 1  ;;  %v19605_v25 = vld [vmem:[#allocation150_spill] sm:$0xff]  ;;  %v19611_v19 = vld [vmem:[#allocation151_spill] sm:$0xff] }
 0x19e   :  { %19601 = vst [vmem:[#allocation86_spill] sm:$0xff] %v13971_v46  ;;  %v13978_v55 = vunpack.c.l.b16 %v5376_v11  ;;  %v19606_v41 = vrot.slane %v19605_v25, 6  ;;  %v19609_v54 = vrot.slane %v19608_v63, 7  ;;  %v10340_v57 = vsel %vm3579_vm15, %v10339_v56, %v13886_v35  ;;  %v19617_v56 = vld [vmem:[#allocation29_spill] sm:$0xff] }
 0x19f   :  { %v10349_v17 = vsel %vm3561_vm9, %v19604_v10, %v19602_v3  ;;  %v13989_v0 = vunpack.c.l.b16 %v5390_v36  ;;  %v865_v29 = vrot.slane %v19610_v21, 4  ;;  %v19612_v62 = vrot.slane %v19611_v19, 5 }
 0x1a0   :  { %v10350_v26 = vsel %vm3564_vm10, %v19606_v41, %v10349_v17  ;;  %v10357_v50 = vsel %vm3561_vm9, %v19609_v54, %v19607_v27  ;;  %v13997_v15 = vsel %vm3579_vm15, %v10347_v8, %v13897_v37  ;;  %v5477_v10 = vrot.slane %v13978_v55, 1  ;;  %v19614_v17 = vld [vmem:[#allocation147_spill] sm:$0xff]  ;;  %v19615_v54 = vld [vmem:[#allocation157_spill] sm:$0xff] }
 0x1a1   :  { %v10351_v11 = vsel %vm3567_vm11, %v19612_v62, %v10350_v26  ;;  %19613 = vst [vmem:[#allocation81_spill] sm:$0xff] %v13997_v15  ;;  %v899_v41 = vrot.slane %v19614_v17, 4  ;;  %v19616_v58 = vrot.slane %v19615_v54, 6  ;;  %v19618_v36 = vrot.slane %v19617_v56, %v19340_v49  ;;  %v1296_v54 = vld [vmem:[#allocation2 + $0x11c] sm:$0x1] }
 0x1a2   :  { %v19621_v63 = vunpack.c.l.b16 %v19620_v47  ;;  %v10397_v37 = vpack.c.b16 %v13997_v15, %v10340_v57  ;;  %v5485_v8 = vrot.slane %v13989_v0, 1  ;;  %v14016_v62 = vsel %vm3579_vm15, %v5477_v10, %v5476_v4  ;;  %v19626_v4 = vld [vmem:[#allocation158_spill] sm:$0xff] }
 0x1a3   :  { %v10358_v35 = vsel %vm3564_vm10, %v19616_v58, %v10357_v50  ;;  %v14007_v21 = vunpack.c.l.b16 %v19618_v36  ;;  %19622 = vst [vmem:[#allocation15_spill] sm:$0xff] %v14016_v62  ;;  %v5643_v17 = vpack.c.b16 %v13971_v46, %v5544_v14  ;;  %v19623_v58 = vld [vmem:[#allocation152_spill] sm:$0xff]  ;;  %v10409_v36 = vrot.slane %v19540_v43, 1  ;;  %v1310_v15 = vld [vmem:[#allocation2 + $0x134] sm:$0x1] }
 0x1a4   :  { %v14011_v26 = vrot.slane %v19621_v63, 1  ;;  %v19624_v50 = vrot.slane %v19623_v58, 4  ;;  %10401 = vrot.lane.b32.xlu1 %v10397_v37, %s11617_s24  ;;  %v14025_v63 = vsel %vm3579_vm15, %v5485_v8, %v5484_v30  ;;  %v1297_v57 = vsel %vm11649_vm2, %v865_v29, %v1296_v54  ;;  %v19628_v8 = vld [vmem:[#allocation153_spill] sm:$0xff] }
 0x1a5   :  { %19619 = vst [vmem:[#allocation87_spill] sm:$0xff] %v14007_v21  ;;  %19625 = vst [vmem:[#allocation74_spill] sm:$0xff] %v14025_v63  ;;  %v19627_v10 = vrot.slane %v19626_v4, 5  ;;  %v10411_v46 = vrot.slane %v19546_v5, 7  ;;  %v1311_v43 = vsel %vm11649_vm2, %v899_v41, %v1310_v15  ;;  %v10410_v30 = vsel %vm3561_vm9, %v19541_v60, %v10409_v36 }
 0x1a6   :  { %v10352_v56 = vsel %vm3570_vm12, %v19624_v50, %v10351_v11  ;;  %v5520_v11 = vpack.c.b16 %v14025_v63, %v14016_v62  ;;  %1298 = vst [vmem:[#allocation2 + $0x11c] sm:$0x1] %v1297_v57  ;;  %v10413_v37 = vrot.slane %v19550_v61, 6  ;;  %1312 = vst [vmem:[#allocation2 + $0x134] sm:$0x1] %v1311_v43  ;;  %v10415_v54 = vrot.slane %v19555_v34, 5 }
 0x1a7   :  { %v10359_v14 = vsel %vm3567_vm11, %v19627_v10, %v10358_v35  ;;  %v10412_v29 = vsel %vm3564_vm10, %v10411_v46, %v10410_v30  ;;  %v10417_v35 = vrot.slane %v19562_v13, 4  ;;  %v10419_v5 = vrot.slane %v19586_v32, 3  ;;  %v173_v63 = vld [vmem:[#allocation2 + $0x80] sm:$0x1] }
 0x1a8   :  { %5525 = vrot.lane.b32.xlu0 %v5520_v11, %s11617_s24  ;;  %v19629_v50 = vrot.slane %v19628_v8, 3  ;;  %v10414_v41 = vsel %vm3567_vm11, %v10413_v37, %v10412_v29  ;;  %v10423_v60 = vrot.slane %v19543_v40, 1  ;;  %v10425_v61 = vrot.slane %v19548_v44, 7  ;;  %5647 = vrot.lane.b32.xlu1 %v5643_v17, %s11618_s25 }
 0x1a9   :  { %v10416_v34 = vsel %vm3570_vm12, %v10415_v54, %v10414_v41  ;;  %v10421_v13 = vrot.slane %v13953_v9, 2  ;;  %v10427_v32 = vrot.slane %v19552_v31, 6  ;;  %v10429_v46 = vrot.slane %v19557_v48, 5 }
 0x1aa   :  { %v10353_v15 = vsel %vm3573_vm13, %v19629_v50, %v10352_v56  ;;  %v10418_v36 = vsel %vm3573_vm13, %v10417_v35, %v10416_v34  ;;  %v10424_v56 = vsel %vm3561_vm9, %v19544_v18, %v10423_v60  ;;  %v10431_v40 = vrot.slane %v19564_v51, 4  ;;  %v19630_v51 = vld [vmem:[#allocation159_spill] sm:$0xff] }
 0x1ab   :  { %v10433_v44 = vrot.slane %v19590_v59, 3  ;;  %v10420_v57 = vsel %vm3576_vm14, %v10419_v5, %v10418_v36  ;;  %v10426_v17 = vsel %vm3564_vm10, %v10425_v61, %v10424_v56  ;;  %v5559_v10 = vrot.slane %v19568_v2, 1 }
 0x1ac   :  { %v5561_v9 = vrot.slane %v19574_v39, 7  ;;  %v10428_v31 = vsel %vm3567_vm11, %v10427_v32, %v10426_v17  ;;  %v10435_v48 = vrot.slane %v13961_v22, 2  ;;  %v5563_v11 = vrot.slane %v19578_v6, 6 }
 0x1ad   :  { %v5565_v18 = vrot.slane %v19584_v7, 5  ;;  %v11431_v43 = vld.sshfl [vmem:[#allocation2 + $0x11c] sm:$0x1 pattern:$0x75316420]  ;;  %v19631_v30 = vrot.slane %v19630_v51, 4  ;;  %v10422_v37 = vsel %vm3579_vm15, %v10421_v13, %v10420_v57  ;;  %v10430_v29 = vsel %vm3570_vm12, %v10429_v46, %v10428_v31 }
 0x1ae   :  { %v5560_v2 = vsel %vm3561_vm9, %v19569_v52, %v5559_v10  ;;  %v11437_v39 = vld.sshfl [vmem:[#allocation2 + $0x134] sm:$0x1 pattern:$0x75316420]  ;;  %v6740_v54 = vrot.slane %v11431_v43, %v19340_v49  ;;  %v10432_v22 = vsel %vm3573_vm13, %v10431_v40, %v10430_v29  ;;  %v5567_v7 = vrot.slane %v19592_v12, 4  ;;  %v19633_v12 = vld [vmem:[#allocation160_spill] sm:$0xff] }
 0x1af   :  { %v10360_v59 = vsel %vm3570_vm12, %v19631_v30, %v10359_v14  ;;  %v5562_v6 = vsel %vm3564_vm10, %v5561_v9, %v5560_v2  ;;  %v6864_v35 = vrot.slane %v11437_v39, %v19340_v49  ;;  %v10434_v14 = vsel %vm3576_vm14, %v10433_v44, %v10432_v22  ;;  %v19637_v30 = vld [vmem:[#allocation161_spill] sm:$0xff]  ;;  %v19639_v2 = vld [vmem:[#allocation35_spill] sm:$0xff] }
 0x1b0   :  { %v5564_v5 = vsel %vm3567_vm11, %v5563_v11, %v5562_v6  ;;  %v5573_v50 = vrot.slane %v19571_v53, 1  ;;  %v10247_v41 = vrot.slane %v6740_v54, %v19340_v49  ;;  %v14086_v52 = vsel %vm3579_vm15, %v10435_v48, %v10434_v14  ;;  %v19642_v6 = vld [vmem:[#allocation37_spill] sm:$0xff] }
 0x1b1   :  { %19632 = vst [vmem:[#allocation82_spill] sm:$0xff] %v14086_v52  ;;  %v5566_v60 = vsel %vm3570_vm12, %v5565_v18, %v5564_v5  ;;  %v5575_v61 = vrot.slane %v19576_v45, 7  ;;  %v10261_v34 = vrot.slane %v6864_v35, %v19340_v49  ;;  %v19634_v13 = vrot.slane %v19633_v12, 3  ;;  %v19644_v35 = vld [vmem:[#allocation31_spill] sm:$0xff] }
 0x1b2   :  { %v10521_v46 = vpack.c.b16 %v14086_v52, %v10422_v37  ;;  %v5574_v53 = vsel %vm3561_vm9, %v19572_v28, %v5573_v50  ;;  %v10254_v36 = vrot.slane %v10247_v41, %v19340_v49  ;;  %v5569_v56 = vrot.slane %v19597_v20, 3  ;;  %v19635_v28 = vld [vmem:[#allocation154_spill] sm:$0xff]  ;;  %v19646_v50 = vld [vmem:[#allocation33_spill] sm:$0xff] }
 0x1b3   :  { %v10361_v32 = vsel %vm3573_vm13, %v19634_v13, %v10360_v59  ;;  %v5576_v40 = vsel %vm3564_vm10, %v5575_v61, %v5574_v53  ;;  %v5577_v44 = vrot.slane %v19580_v24, 6  ;;  %v10268_v45 = vrot.slane %v10261_v34, %v19340_v49  ;;  %v167_v52 = vld [vmem:[#allocation2 + $0x68] sm:$0x1] }
 0x1b4   :  { %10525 = vrot.lane.b32.xlu1 %v10521_v46, %s11618_s25  ;;  %v5568_v57 = vsel %vm3573_vm13, %v5567_v7, %v5566_v60  ;;  %v5579_v17 = vrot.slane %v19588_v42, 5  ;;  %v5581_v10 = vrot.slane %v19594_v16, 4  ;;  %v14106_v9 = vunpack.c.l.b16 %v10254_v36  ;;  %v19652_v46 = vld [vmem:[#allocation48_spill] sm:$0xff]  ;;  %v19653_v36 = vld [vmem:[#allocation49_spill] sm:$0xff] }
 0x1b5   :  { %v19636_v31 = vrot.slane %v19635_v28, 2  ;;  %v5578_v48 = vsel %vm3567_vm11, %v5577_v44, %v5576_v40  ;;  %v5583_v24 = vrot.slane %v19599_v23, 3  ;;  %v14113_v11 = vunpack.c.l.b16 %v10268_v45  ;;  %v19654_v45 = vld [vmem:[#allocation50_spill] sm:$0xff] }
 0x1b6   :  { %v5571_v18 = vrot.slane %v13978_v55, 2  ;;  %v5580_v43 = vsel %vm3570_vm12, %v5579_v17, %v5578_v48  ;;  %v5585_v42 = vrot.slane %v13989_v0, 2  ;;  %v10355_v16 = vrot.slane %v14106_v9, 1  ;;  %v19641_v0 = vld [vmem:[#allocation36_spill] sm:$0xff]  ;;  %v19655_v17 = vld [vmem:[#allocation51_spill] sm:$0xff] }
 0x1b7   :  { %v10354_v20 = vsel %vm3576_vm14, %v19636_v31, %v10353_v15  ;;  %v19638_v59 = vrot.slane %v19637_v30, 2  ;;  %v5570_v15 = vsel %vm3576_vm14, %v5569_v56, %v5568_v57  ;;  %v5582_v29 = vsel %vm3573_vm13, %v5581_v10, %v5580_v43 }
 0x1b8   :  { %v14125_v23 = vunpack.c.l.b16 %v19639_v2  ;;  %v18780_v39 = vrot.slane %v13729_v33, 7  ;;  %v10363_v55 = vrot.slane %v14113_v11, 1  ;;  %v5584_v54 = vsel %vm3576_vm14, %v5583_v24, %v5582_v29  ;;  %v19661_v29 = vld [vmem:[#allocation18_spill] sm:$0xff] }
 0x1b9   :  { %v10362_v37 = vsel %vm3576_vm14, %v19638_v59, %v10361_v32  ;;  %v3159_v22 = vrot.slane %v19641_v0, %v19340_v49  ;;  %v14133_v7 = vunpack.c.l.b16 %v19642_v6  ;;  %v3740_v14 = vsel %vm3561_vm9, %v19644_v35, %v14011_v26  ;;  %v19678_v0 = vld [vmem:[#allocation66_spill] sm:$0xff] }
 0x1ba   :  { %19640 = vst [vmem:[#allocation88_spill] sm:$0xff] %v14125_v23  ;;  %v14139_v5 = vsel %vm3579_vm15, %v10355_v16, %v10354_v20  ;;  %v19647_v41 = vrot.slane %v19646_v50, %v19340_v49  ;;  %v14147_v61 = vsel %vm3579_vm15, %v10363_v55, %v10362_v37  ;;  %v14150_v34 = vsel %vm3579_vm15, %v5571_v18, %v5570_v15  ;;  %v19656_v20 = vld [vmem:[#allocation44_spill] sm:$0xff]  ;;  %v19660_v37 = vld [vmem:[#allocation54_spill] sm:$0xff] }
 0x1bb   :  { %19643 = vst [vmem:[#allocation83_spill] sm:$0xff] %v14133_v7  ;;  %19645 = vst [vmem:[#allocation109_spill] sm:$0xff] %v14139_v5  ;;  %v14153_v13 = vsel %vm3579_vm15, %v5585_v42, %v5584_v54  ;;  %v18779_v32 = vrot.slane %v14007_v21, 6  ;;  %v10398_v26 = vpack.c.b16 %v14147_v61, %v14139_v5  ;;  %v3581_v53 = vrot.slane %v19652_v46, 7  ;;  %v19658_v18 = vld [vmem:[#allocation52_spill] sm:$0xff]  ;;  %v19659_v42 = vld [vmem:[#allocation53_spill] sm:$0xff] }
 0x1bc   :  { %v14144_v60 = vunpack.c.l.b16 %v19647_v41  ;;  %19649 = vst [vmem:[#allocation115_spill] sm:$0xff] %v14147_v61  ;;  %19650 = vst [vmem:[#allocation121_spill] sm:$0xff] %v14150_v34  ;;  %v3583_v56 = vrot.slane %v19653_v36, 6  ;;  %v3742_v40 = vsel %vm3564_vm10, %v18780_v39, %v3740_v14  ;;  %v18777_v44 = vrot.slane %v14125_v23, 5  ;;  %v19662_v55 = vld [vmem:[#allocation14_spill] sm:$0xff]  ;;  %v19663_v14 = vld [vmem:[#allocation16_spill] sm:$0xff] }
 0x1bd   :  { %19651 = vst [vmem:[#allocation122_spill] sm:$0xff] %v14153_v13  ;;  %v3585_v57 = vrot.slane %v19654_v45, 5  ;;  %v3587_v10 = vrot.slane %v19655_v17, 4  ;;  %10403 = vrot.lane.b32.xlu0 %v10398_v26, %s11617_s24  ;;  %v5644_v31 = vpack.c.b16 %v14153_v13, %v14150_v34  ;;  %v19657_v48 = vunpack.c.l.b16 %v19656_v20  ;;  %v19664_v41 = vld [vmem:[#allocation17_spill] sm:$0xff]  ;;  %v19665_v46 = vld [vmem:[#allocation19_spill] sm:$0xff]  ;;  %v19666_v45 = vld [vmem:[#allocation12_spill] sm:$0xff] }
 0x1be   :  { %19648 = vst [vmem:[#allocation114_spill] sm:$0xff] %v14144_v60  ;;  %v3589_v43 = vrot.slane %v19658_v18, 3  ;;  %v3591_v16 = vrot.slane %v19659_v42, 2  ;;  %v3593_v15 = vrot.slane %v19660_v37, 1  ;;  %v3595_v2 = vrot.slane %v19661_v29, 7  ;;  %v19668_v20 = vld [vmem:[#allocation21_spill] sm:$0xff] }
 0x1bf   :  { %v3582_v24 = vsel %vm3561_vm9, %v3581_v53, %v19657_v48  ;;  %v3597_v54 = vrot.slane %v19662_v55, 6  ;;  %v3599_v50 = vrot.slane %v19663_v14, 5  ;;  %v3601_v26 = vrot.slane %v19664_v41, 4 }
 0x1c0   :  { %v3584_v59 = vsel %vm3564_vm10, %v3583_v56, %v3582_v24  ;;  %v3603_v53 = vrot.slane %v19665_v46, 3  ;;  %v19667_v17 = vunpack.c.l.b16 %v19666_v45  ;;  %v3605_v48 = vrot.slane %v19668_v20, 2  ;;  %v19669_v24 = vld [vmem:[#allocation22_spill] sm:$0xff] }
 0x1c1   :  { %v3586_v6 = vsel %vm3567_vm11, %v3585_v57, %v3584_v59  ;;  %v3607_v18 = vrot.slane %v19669_v24, 1  ;;  %5649 = vrot.lane.b32.xlu0 %v5644_v31, %s11618_s25  ;;  %v10437_v59 = vrot.slane %v19602_v3, 1  ;;  %v10439_v37 = vrot.slane %v19605_v25, 7 }
 0x1c2   :  { %v3588_v36 = vsel %vm3570_vm12, %v3587_v10, %v3586_v6  ;;  %v3596_v56 = vsel %vm3561_vm9, %v3595_v2, %v19667_v17  ;;  %v10441_v2 = vrot.slane %v19611_v19, 6  ;;  %v10443_v55 = vrot.slane %v19623_v58, 5 }
 0x1c3   :  { %v3590_v57 = vsel %vm3573_vm13, %v3589_v43, %v3588_v36  ;;  %v3598_v42 = vsel %vm3564_vm10, %v3597_v54, %v3596_v56  ;;  %v3744_v31 = vsel %vm3567_vm11, %v18779_v32, %v3742_v40  ;;  %v10438_v54 = vsel %vm3561_vm9, %v19603_v38, %v10437_v59  ;;  %v19726_v32 = vld [vmem:[#allocation103_spill] sm:$0xff] }
 0x1c4   :  { %v3592_v10 = vsel %vm3576_vm14, %v3591_v16, %v3590_v57  ;;  %v3600_v29 = vsel %vm3567_vm11, %v3599_v50, %v3598_v42  ;;  %v10445_v3 = vrot.slane %v19628_v8, 4  ;;  %v10440_v19 = vsel %vm3564_vm10, %v10439_v37, %v10438_v54  ;;  %v19676_v42 = vld [vmem:[#allocation65_spill] sm:$0xff] }
 0x1c5   :  { %v3602_v43 = vsel %vm3570_vm12, %v3601_v26, %v3600_v29  ;;  %v14205_v25 = vsel %vm3579_vm15, %v3593_v15, %v3592_v10  ;;  %v10447_v58 = vrot.slane %v19635_v28, 3  ;;  %v10442_v40 = vsel %vm3567_vm11, %v10441_v2, %v10440_v19  ;;  %v19672_v15 = vld [vmem:[#allocation157_spill] sm:$0xff]  ;;  %v19679_v29 = vld [vmem:[#allocation67_spill] sm:$0xff] }
 0x1c6   :  { %19670 = vst [vmem:[#allocation116_spill] sm:$0xff] %v14205_v25  ;;  %v3604_v16 = vsel %vm3573_vm13, %v3603_v53, %v3602_v43  ;;  %v10449_v14 = vrot.slane %v14106_v9, 2  ;;  %v10451_v50 = vrot.slane %v19607_v27, 1  ;;  %v10444_v8 = vsel %vm3570_vm12, %v10443_v55, %v10442_v40  ;;  %v19673_v53 = vld [vmem:[#allocation156_spill] sm:$0xff] }
 0x1c7   :  { %v3606_v6 = vsel %vm3576_vm14, %v3605_v48, %v3604_v16  ;;  %v10453_v41 = vrot.slane %v19672_v15, 7  ;;  %v10455_v26 = vrot.slane %v19626_v4, 6  ;;  %v10446_v46 = vsel %vm3573_vm13, %v10445_v3, %v10444_v8  ;;  %v19682_v3 = vld [vmem:[#allocation68_spill] sm:$0xff] }
 0x1c8   :  { %v14215_v38 = vsel %vm3579_vm15, %v3607_v18, %v3606_v6  ;;  %v10452_v36 = vsel %vm3561_vm9, %v19673_v53, %v10451_v50  ;;  %v10457_v9 = vrot.slane %v19630_v51, 5  ;;  %v10448_v27 = vsel %vm3576_vm14, %v10447_v58, %v10446_v46  ;;  %v19683_v6 = vld [vmem:[#allocation69_spill] sm:$0xff]  ;;  %v19686_v46 = vld [vmem:[#allocation71_spill] sm:$0xff] }
 0x1c9   :  { %19671 = vst [vmem:[#allocation123_spill] sm:$0xff] %v14215_v38  ;;  %v5789_v28 = vpack.c.b16 %v14215_v38, %v14205_v25  ;;  %v10454_v45 = vsel %vm3564_vm10, %v10453_v41, %v10452_v36  ;;  %v10459_v17 = vrot.slane %v19633_v12, 4  ;;  %v10461_v56 = vrot.slane %v19637_v30, 3  ;;  %v19685_v41 = vld [vmem:[#allocation94_spill] sm:$0xff]  ;;  %v19687_v36 = vld [vmem:[#allocation95_spill] sm:$0xff] }
 0x1ca   :  { %v18776_v4 = vrot.slane %v14133_v7, 4  ;;  %v10456_v20 = vsel %vm3567_vm11, %v10455_v26, %v10454_v45  ;;  %v10463_v48 = vrot.slane %v14113_v11, 2  ;;  %v3746_v51 = vsel %vm3570_vm12, %v18777_v44, %v3744_v31  ;;  %v19680_v31 = vld [vmem:[#allocation57_spill] sm:$0xff] }
 0x1cb   :  { %5793 = vrot.lane.b32.xlu1 %v5789_v28, %s11619_s26  ;;  %v10458_v24 = vsel %vm3570_vm12, %v10457_v9, %v10456_v20  ;;  %v14241_v12 = vunpack.c.l.b16 %v3159_v22  ;;  %v14244_v30 = vsel %vm3579_vm15, %v10449_v14, %v10448_v27  ;;  %v18775_v57 = vrot.slane %v14144_v60, 3  ;;  %v19684_v14 = vld [vmem:[#allocation70_spill] sm:$0xff]  ;;  %v19688_v27 = vld [vmem:[#allocation96_spill] sm:$0xff] }
 0x1cc   :  { %19675 = vst [vmem:[#allocation124_spill] sm:$0xff] %v14244_v30  ;;  %v10460_v18 = vsel %vm3573_vm13, %v10459_v17, %v10458_v24  ;;  %v8459_v59 = vrot.slane %v19676_v42, 7  ;;  %v3748_v37 = vsel %vm3573_vm13, %v18776_v4, %v3746_v51  ;;  %v8461_v22 = vrot.slane %v19678_v0, 6  ;;  %v63_v17 = vld [vmem:[#allocation2 + $0x78] sm:$0x1]  ;;  %v19692_v42 = vld [vmem:[#allocation98_spill] sm:$0xff] }
 0x1cd   :  { %19674 = vst [vmem:[#allocation117_spill] sm:$0xff] %v14241_v12  ;;  %v10462_v11 = vsel %vm3576_vm14, %v10461_v56, %v10460_v18  ;;  %v8463_v2 = vrot.slane %v19679_v29, 5  ;;  %v19681_v43 = vunpack.c.l.b16 %v19680_v31  ;;  %v8465_v16 = vrot.slane %v19682_v3, 4  ;;  %v269_v56 = vld [vmem:[%s18361_s0 + $0x90] sm:$0xff]  ;;  %v19691_v18 = vld [vmem:[#allocation97_spill] sm:$0xff] }
 0x1ce   :  { %v14254_v10 = vsel %vm3579_vm15, %v10463_v48, %v10462_v11  ;;  %v18774_v19 = vrot.slane %v14241_v12, 2  ;;  %v8467_v40 = vrot.slane %v19683_v6, 3  ;;  %v8469_v50 = vrot.slane %v19684_v14, 2  ;;  %v19689_v48 = vld [vmem:[#allocation92_spill] sm:$0xff]  ;;  %v19696_v14 = vld [vmem:[#allocation25_spill] sm:$0xff] }
 0x1cf   :  { %19677 = vst [vmem:[#allocation118_spill] sm:$0xff] %v14254_v10  ;;  %v10522_v55 = vpack.c.b16 %v14254_v10, %v14244_v30  ;;  %v8460_v54 = vsel %vm3561_vm9, %v8459_v59, %v19681_v43  ;;  %v3750_v8 = vsel %vm3576_vm14, %v18775_v57, %v3748_v37  ;;  %v8473_v26 = vrot.slane %v19685_v41, 7  ;;  %v270_v37 = vld [vmem:[%s18361_s0 + $0x98] sm:$0xff] }
 0x1d0   :  { %v8462_v58 = vsel %vm3564_vm10, %v8461_v22, %v8460_v54  ;;  %v8471_v53 = vrot.slane %v19686_v46, 1  ;;  %v8475_v9 = vrot.slane %v19687_v36, 6  ;;  %v8477_v45 = vrot.slane %v19688_v27, 5  ;;  %v19694_v43 = vld [vmem:[#allocation100_spill] sm:$0xff]  ;;  %v19698_v27 = vld [vmem:[#allocation13_spill] sm:$0xff] }
 0x1d1   :  { %10527 = vrot.lane.b32.xlu0 %v10522_v55, %s11618_s25  ;;  %v8464_v15 = vsel %vm3567_vm11, %v8463_v2, %v8462_v58  ;;  %v19690_v51 = vunpack.c.l.b16 %v19689_v48  ;;  %v8479_v11 = vrot.slane %v19691_v18, 4  ;;  %v8481_v59 = vrot.slane %v19692_v42, 3  ;;  %v19693_v2 = vld [vmem:[#allocation99_spill] sm:$0xff] }
 0x1d2   :  { %v8466_v28 = vsel %vm3570_vm12, %v8465_v16, %v8464_v15  ;;  %v14293_v0 = vsel %vm3579_vm15, %v18774_v19, %v3750_v8  ;;  %v8483_v55 = vrot.slane %v19693_v2, 2  ;;  %v8485_v54 = vrot.slane %v19694_v43, 1  ;;  %v19701_v48 = vld [vmem:[#allocation23_spill] sm:$0xff] }
 0x1d3   :  { %v8468_v20 = vsel %vm3573_vm13, %v8467_v40, %v8466_v28  ;;  %v8474_v24 = vsel %vm3561_vm9, %v8473_v26, %v19690_v51  ;;  %v64_v3 = vsel %vm11649_vm2, 0, %v63_v17  ;;  %v11499_v16 = vpack.c.bf16 %v269_v56, %v269_v56  ;;  %v19697_v26 = vld [vmem:[#allocation20_spill] sm:$0xff] }
 0x1d4   :  { %v8470_v22 = vsel %vm3576_vm14, %v8469_v50, %v8468_v20  ;;  %v8476_v29 = vsel %vm3564_vm10, %v8475_v9, %v8474_v24  ;;  %65 = vst [vmem:[#allocation2 + $0x78] sm:$0x1] %v64_v3  ;;  %v11500_v40 = vpack.c.bf16 %v270_v37, %v270_v37  ;;  %v3609_v50 = vrot.slane %v19696_v14, 7  ;;  %v19705_v3 = vld [vmem:[#allocation28_spill] sm:$0xff] }
 0x1d5   :  { %v8478_v31 = vsel %vm3567_vm11, %v8477_v45, %v8476_v29  ;;  %v14303_v58 = vsel %vm3579_vm15, %v8471_v53, %v8470_v22  ;;  %v663_v15 = vshrl.u32 %v11499_v16, 16  ;;  %v666_v41 = vshll.u32 %v11499_v16, 16 }
 0x1d6   :  { %19695 = vst [vmem:[#allocation125_spill] sm:$0xff] %v14303_v58  ;;  %v8480_v6 = vsel %vm3570_vm12, %v8479_v11, %v8478_v31  ;;  %v3611_v28 = vrot.slane %v19697_v26, 6  ;;  %v671_v36 = vshrl.u32 %v11500_v40, 16  ;;  %v674_v9 = vshll.u32 %v11500_v40, 16  ;;  %v19702_v11 = vld [vmem:[#allocation24_spill] sm:$0xff] }
 0x1d7   :  { %v8482_v8 = vsel %vm3573_vm13, %v8481_v59, %v8480_v6  ;;  %v19699_v45 = vunpack.c.l.b16 %v19698_v27  ;;  %v665_v56 = vrot.slane %v663_v15, 7  ;;  %v3613_v51 = vrot.slane %v19701_v48, 5  ;;  %v19703_v59 = vld [vmem:[#allocation26_spill] sm:$0xff]  ;;  %v111_v40 = vld [vmem:[#allocation2 + $0x138] sm:$0x1] }
 0x1d8   :  { %v8484_v46 = vsel %vm3576_vm14, %v8483_v55, %v8482_v8  ;;  %v14320_v18 = vrot.slane %v671_v36, 7  ;;  %v3615_v42 = vrot.slane %v19702_v11, 4  ;;  %v3617_v37 = vrot.slane %v19703_v59, 3  ;;  %v19704_v55 = vld [vmem:[#allocation27_spill] sm:$0xff] }
 0x1d9   :  { %v3610_v53 = vsel %vm3561_vm9, %v3609_v50, %v19699_v45  ;;  %v14314_v17 = vsel %vm3579_vm15, %v8485_v54, %v8484_v46  ;;  %v668_v22 = vor.u32 %v666_v41, %v665_v56  ;;  %v669_v29 = vrot.slane %v665_v56, 4  ;;  %v297_v56 = vld [vmem:[%s18361_s0 + $0x170] sm:$0xff] }
 0x1da   :  { %19700 = vst [vmem:[#allocation89_spill] sm:$0xff] %v14314_v17  ;;  %v3612_v20 = vsel %vm3564_vm10, %v3611_v28, %v3610_v53  ;;  %v10667_v24 = vpack.c.b16 %v14314_v17, %v14303_v58  ;;  %v3619_v31 = vrot.slane %v19704_v55, 2  ;;  %v676_v43 = vor.u32 %v674_v9, %v14320_v18  ;;  %v117_v53 = vld [vmem:[#allocation2 + $0x150] sm:$0x1] }
 0x1db   :  { %v3614_v2 = vsel %vm3567_vm11, %v3613_v51, %v3612_v20  ;;  %v3621_v16 = vrot.slane %v19705_v3, 1  ;;  %v3623_v6 = vrot.slane %v19644_v35, 7  ;;  %v1215_v14 = vld [vmem:[#allocation2 + $0x78] sm:$0xf]  ;;  %v3625_v8 = vrot.slane %v13729_v33, 6  ;;  %v301_v11 = vld [vmem:[%s18361_s0 + $0x190] sm:$0xff] }
 0x1dc   :  { %10671 = vrot.lane.b32.xlu1 %v10667_v24, %s11619_s26  ;;  %v3616_v54 = vsel %vm3570_vm12, %v3615_v42, %v3614_v2  ;;  %v3627_v15 = vrot.slane %v14007_v21, 5  ;;  %v3629_v41 = vrot.slane %v14125_v23, 4  ;;  %v677_v28 = vsel %vm11687_vm7, %v669_v29, %v676_v43  ;;  %v298_v20 = vld [vmem:[%s18361_s0 + $0x178] sm:$0xff] }
 0x1dd   :  { %v3618_v50 = vsel %vm3573_vm13, %v3617_v37, %v3616_v54  ;;  %v1216_v36 = vsel %vm11696_vm8, %v668_v22, %v1215_v14  ;;  %v19708_v27 = vunpack.c.l.b16 %v19620_v47  ;;  %1218 = vst.msk [vmem:[#allocation2 + $0x7c] sm:$0xf] %vm15_vm5, %v677_v28  ;;  %v3631_v47 = vrot.slane %v14133_v7, 3  ;;  %v302_v42 = vld [vmem:[%s18361_s0 + $0x198] sm:$0xff] }
 0x1de   :  { %v3620_v9 = vsel %vm3576_vm14, %v3619_v31, %v3618_v50  ;;  %1217 = vst [vmem:[#allocation2 + $0x78] sm:$0xf] %v1216_v36  ;;  %v3633_v24 = vrot.slane %v14144_v60, 2  ;;  %v3635_v37 = vrot.slane %v14241_v12, 1  ;;  %v112_v29 = vsel %vm11649_vm2, 0, %v111_v40 }
 0x1df   :  { %v3624_v45 = vsel %vm3561_vm9, %v3623_v6, %v19708_v27  ;;  %v14351_v48 = vsel %vm3579_vm15, %v3621_v16, %v3620_v9  ;;  %113 = vst [vmem:[#allocation2 + $0x138] sm:$0x1] %v112_v29  ;;  %v118_v55 = vsel %vm11649_vm2, 0, %v117_v53  ;;  %v11527_v31 = vpack.c.bf16 %v297_v56, %v297_v56  ;;  %v19710_v6 = vld [vmem:[#allocation101_spill] sm:$0xff] }
 0x1e0   :  { %19709 = vst [vmem:[#allocation111_spill] sm:$0xff] %v14351_v48  ;;  %v3626_v51 = vsel %vm3564_vm10, %v3625_v8, %v3624_v45  ;;  %v11528_v43 = vpack.c.bf16 %v298_v20, %v298_v20  ;;  %119 = vst [vmem:[#allocation2 + $0x150] sm:$0x1] %v118_v55  ;;  %v11531_v3 = vpack.c.bf16 %v301_v11, %v301_v11  ;;  %v8487_v14 = vrot.slane %v19710_v6, 7 }
 0x1e1   :  { %v3628_v59 = vsel %vm3567_vm11, %v3627_v15, %v3626_v51  ;;  %v14372_v16 = vpack.c.bf16 %v302_v42, %v302_v42  ;;  %v901_v8 = vshrl.u32 %v11527_v31, 16  ;;  %v904_v40 = vshll.u32 %v11527_v31, 16 }
 0x1e2   :  { %v3630_v2 = vsel %vm3570_vm12, %v3629_v41, %v3628_v59  ;;  %v909_v15 = vshrl.u32 %v11528_v43, 16  ;;  %v912_v28 = vshll.u32 %v11528_v43, 16  ;;  %v935_v36 = vshrl.u32 %v11531_v3, 16  ;;  %v19714_v59 = vld [vmem:[#allocation73_spill] sm:$0xff] }
 0x1e3   :  { %v3632_v54 = vsel %vm3573_vm13, %v3631_v47, %v3630_v2  ;;  %v938_v9 = vshll.u32 %v11531_v3, 16  ;;  %v903_v45 = vrot.slane %v901_v8, 7  ;;  %v943_v56 = vshrl.u32 %v14372_v16, 16 }
 0x1e4   :  { %v3634_v50 = vsel %vm3576_vm14, %v3633_v24, %v3632_v54  ;;  %v14381_v53 = vrot.slane %v909_v15, 7  ;;  %v14384_v51 = vrot.slane %v935_v36, 7  ;;  %v946_v47 = vshll.u32 %v14372_v16, 16  ;;  %v19712_v24 = vld [vmem:[#allocation93_spill] sm:$0xff] }
 0x1e5   :  { %v14377_v41 = vsel %vm3579_vm15, %v3635_v37, %v3634_v50  ;;  %v11390_v20 = vld.sshfl [vmem:[#allocation2 + $0x78] sm:$0x33 pattern:$0x75316420]  ;;  %v19713_v11 = vunpack.c.l.b16 %v19712_v24  ;;  %v906_v43 = vor.u32 %v904_v40, %v903_v45  ;;  %v907_v54 = vrot.slane %v903_v45, 4 }
 0x1e6   :  { %19711 = vst [vmem:[#allocation119_spill] sm:$0xff] %v14377_v41  ;;  %v5790_v27 = vpack.c.b16 %v14377_v41, %v14351_v48  ;;  %v19715_v37 = vld [vmem:[#allocation108_spill] sm:$0xff]  ;;  %v2111_v55 = vcombine.high %v11390_v20, %v11390_v20  ;;  %v2118_v31 = vrot.slane %v11390_v20, %v19340_v49  ;;  %v914_v16 = vor.u32 %v912_v28, %v14381_v53 }
 0x1e7   :  { %v14390_v42 = vsel %vm3561_vm9, %v8487_v14, %v19713_v11  ;;  %v11391_v2 = vld.sshfl [vmem:[#allocation2 + $0x7c] sm:$0x33 pattern:$0x75316420]  ;;  %v940_v50 = vor.u32 %v938_v9, %v14384_v51  ;;  %v941_v36 = vrot.slane %v14384_v51, 4  ;;  %v8493_v39 = vrot.slane %v19726_v32, 4 }
 0x1e8   :  { %5795 = vrot.lane.b32.xlu1 %v5790_v27, %s11619_s26  ;;  %v2135_v3 = vcombine.high %v11391_v2, %v11391_v2  ;;  %v2142_v6 = vrot.slane %v11391_v2, %v19340_v49  ;;  %v2125_v14 = vrot.slane %v2111_v55, %v19340_v49  ;;  %v2126_v8 = vcombine.high %v2118_v31, %v2118_v31 }
 0x1e9   :  { %v3166_v15 = vrot.slane %v2118_v31, %v19340_v49  ;;  %v915_v27 = vsel %vm11687_vm7, %v907_v54, %v914_v16 }
 0x1ea   :  { %v2149_v20 = vrot.slane %v2135_v3, %v19340_v49  ;;  %v2150_v24 = vcombine.high %v2142_v6, %v2142_v6  ;;  %v3222_v40 = vrot.slane %v2142_v6, %v19340_v49  ;;  %v2127_v45 = vcombine.high %v2125_v14, %v2125_v14  ;;  %1316 = vst.msk [vmem:[#allocation2 + $0x13c] sm:$0xf] %vm15_vm5, %v915_v27 }
 0x1eb   :  { %v14407_v28 = vrot.slane %v3166_v15, %v19340_v49  ;;  %v3180_v9 = vrot.slane %v2125_v14, %v19340_v49  ;;  %v3194_v11 = vrot.slane %v2126_v8, %v19340_v49 }
 0x1ec   :  { %v2151_v2 = vcombine.high %v2149_v20, %v2149_v20  ;;  %v3229_v51 = vrot.slane %v3222_v40, %v19340_v49  ;;  %v3236_v55 = vrot.slane %v2149_v20, %v19340_v49  ;;  %v3250_v31 = vrot.slane %v2150_v24, %v19340_v49 }
 0x1ed   :  { %19716 = vst [vmem:[#allocation126_spill] sm:$0xff] %v14407_v28  ;;  %v3187_v3 = vrot.slane %v3180_v9, %v19340_v49  ;;  %v3201_v54 = vrot.slane %v3194_v11, %v19340_v49  ;;  %v3208_v6 = vrot.slane %v2127_v45, %v19340_v49  ;;  %v18773_v16 = vunpack.c.l.b16 %v14407_v28  ;;  %v1313_v45 = vld [vmem:[#allocation2 + $0x138] sm:$0xf] }
 0x1ee   :  { %v3243_v14 = vrot.slane %v3236_v55, %v19340_v49  ;;  %v3257_v8 = vrot.slane %v3250_v31, %v19340_v49  ;;  %v3264_v15 = vrot.slane %v2151_v2, %v19340_v49  ;;  %v14422_v27 = vunpack.c.l.b16 %v3229_v51  ;;  %v1327_v51 = vld [vmem:[#allocation2 + $0x150] sm:$0xf] }
 0x1ef   :  { %v3215_v20 = vrot.slane %v3208_v6, %v19340_v49  ;;  %v14425_v40 = vunpack.c.l.b16 %v3187_v3  ;;  %v14427_v24 = vunpack.c.l.b16 %v3201_v54  ;;  %v3753_v9 = vrot.slane %v18773_v16, 1 }
 0x1f0   :  { %19717 = vst [vmem:[#allocation112_spill] sm:$0xff] %v14422_v27  ;;  %v3271_v11 = vrot.slane %v3264_v15, %v19340_v49  ;;  %v14432_v22 = vunpack.c.l.b16 %v3243_v14  ;;  %v14434_v55 = vunpack.c.l.b16 %v3257_v8  ;;  %v18782_v2 = vrot.slane %v14422_v27, 5 }
 0x1f1   :  { %19718 = vst [vmem:[#allocation113_spill] sm:$0xff] %v14425_v40  ;;  %19719 = vst [vmem:[#allocation129_spill] sm:$0xff] %v14427_v24  ;;  %v14437_v31 = vunpack.c.l.b16 %v3215_v20  ;;  %v3754_v3 = vsel %vm3561_vm9, %v14425_v40, %v3753_v9  ;;  %v18778_v54 = vrot.slane %v14427_v24, 7  ;;  %v14442_v6 = vrot.slane %v943_v56, 7 }
 0x1f2   :  { %19720 = vst [vmem:[#allocation130_spill] sm:$0xff] %v14432_v22  ;;  %19721 = vst [vmem:[#allocation136_spill] sm:$0xff] %v14434_v55  ;;  %v14444_v16 = vunpack.c.l.b16 %v3271_v11  ;;  %v18781_v15 = vrot.slane %v14432_v22, 4  ;;  %v18784_v14 = vrot.slane %v14434_v55, 3  ;;  %v1314_v8 = vsel %vm11696_vm8, %v906_v43, %v1313_v45  ;;  %v19724_v43 = vld [vmem:[#allocation102_spill] sm:$0xff] }
 0x1f3   :  { %19722 = vst [vmem:[#allocation137_spill] sm:$0xff] %v14437_v31  ;;  %v11439_v19 = vld.sshfl [vmem:[#allocation2 + $0x13c] sm:$0x33 pattern:$0x75316420]  ;;  %v3756_v20 = vsel %vm3564_vm10, %v18778_v54, %v3754_v3  ;;  %v18783_v9 = vrot.slane %v14437_v31, 6  ;;  %v948_v57 = vor.u32 %v946_v47, %v14442_v6  ;;  %v1328_v56 = vsel %vm11696_vm8, %v940_v50, %v1327_v51 }
 0x1f4   :  { %19723 = vst [vmem:[#allocation131_spill] sm:$0xff] %v14444_v16  ;;  %1315 = vst [vmem:[#allocation2 + $0x138] sm:$0xf] %v1314_v8  ;;  %v18785_v11 = vrot.slane %v14444_v16, 2  ;;  %v6896_v4 = vcombine.high %v11439_v19, %v11439_v19  ;;  %v6903_v44 = vrot.slane %v11439_v19, %v19340_v49  ;;  %v8489_v45 = vrot.slane %v19724_v43, 6  ;;  %v19725_v47 = vld [vmem:[#allocation105_spill] sm:$0xff] }
 0x1f5   :  { %1329 = vst [vmem:[#allocation2 + $0x150] sm:$0xf] %v1328_v56  ;;  %v3758_v3 = vsel %vm3567_vm11, %v18783_v9, %v3756_v20  ;;  %v949_v54 = vsel %vm11687_vm7, %v941_v36, %v948_v57  ;;  %v8491_v8 = vrot.slane %v19725_v47, 5  ;;  %v19727_v36 = vld [vmem:[#allocation104_spill] sm:$0xff]  ;;  %v19728_v43 = vld [vmem:[#allocation106_spill] sm:$0xff] }
 0x1f6   :  { %v3760_v50 = vsel %vm3570_vm12, %v18782_v2, %v3758_v3  ;;  %1330 = vst.msk [vmem:[#allocation2 + $0x154] sm:$0xf] %vm15_vm5, %v949_v54  ;;  %v6910_v19 = vrot.slane %v6896_v4, %v19340_v49  ;;  %v6911_v51 = vcombine.high %v6903_v44, %v6903_v44  ;;  %v7995_v56 = vrot.slane %v6903_v44, %v19340_v49 }
 0x1f7   :  { %v3762_v20 = vsel %vm3573_vm13, %v18781_v15, %v3760_v50  ;;  %v8490_v57 = vsel %vm3564_vm10, %v8489_v45, %v14390_v42  ;;  %v19730_v15 = vld [vmem:[#allocation107_spill] sm:$0xff] }
 0x1f8   :  { %v3764_v54 = vsel %vm3576_vm14, %v18784_v14, %v3762_v20  ;;  %v6912_v3 = vcombine.high %v6910_v19, %v6910_v19  ;;  %v8002_v4 = vrot.slane %v7995_v56, %v19340_v49  ;;  %v8009_v44 = vrot.slane %v6910_v19, %v19340_v49 }
 0x1f9   :  { %v14488_v50 = vsel %vm3579_vm15, %v18785_v11, %v3764_v54  ;;  %v8023_v42 = vrot.slane %v6911_v51, %v19340_v49  ;;  %v8492_v45 = vsel %vm3567_vm11, %v8491_v8, %v8490_v57 }
 0x1fa   :  { %19729 = vst [vmem:[#allocation138_spill] sm:$0xff] %v14488_v50  ;;  %v3797_v9 = vpack.c.b16 %v14488_v50, %v14293_v0  ;;  %v8016_v14 = vrot.slane %v8009_v44, %v19340_v49  ;;  %v8037_v56 = vrot.slane %v6912_v3, %v19340_v49  ;;  %v14497_v19 = vunpack.c.l.b16 %v8002_v4 }
 0x1fb   :  { %v11438_v20 = vld.sshfl [vmem:[#allocation2 + $0x138] sm:$0x33 pattern:$0x75316420]  ;;  %v8030_v51 = vrot.slane %v8023_v42, %v19340_v49  ;;  %v14502_v8 = vsel %vm3570_vm12, %v8493_v39, %v8492_v45 }
 0x1fc   :  { %v11444_v29 = vld.sshfl [vmem:[#allocation2 + $0x150] sm:$0x33 pattern:$0x75316420]  ;;  %v6872_v47 = vcombine.high %v11438_v20, %v11438_v20  ;;  %v6879_v54 = vrot.slane %v11438_v20, %v19340_v49  ;;  %3803 = vrot.lane.b32.xlu0 %v3797_v9, %s11612_s9  ;;  %v8044_v44 = vrot.slane %v8037_v56, %v19340_v49  ;;  %v14507_v2 = vunpack.c.l.b16 %v8016_v14 }
 0x1fd   :  { %v6996_v57 = vcombine.high %v11444_v29, %v11444_v29  ;;  %v7003_v11 = vrot.slane %v11444_v29, %v19340_v49  ;;  %v11445_v3 = vld.sshfl [vmem:[#allocation2 + $0x154] sm:$0x33 pattern:$0x75316420]  ;;  %v14511_v38 = vunpack.c.l.b16 %v8030_v51 }
 0x1fe   :  { %v6886_v4 = vrot.slane %v6872_v47, %v19340_v49  ;;  %v6887_v32 = vcombine.high %v6879_v54, %v6879_v54  ;;  %v7939_v20 = vrot.slane %v6879_v54, %v19340_v49  ;;  %v7020_v45 = vcombine.high %v11445_v3, %v11445_v3  ;;  %v19731_v47 = vld [vmem:[#allocation32_spill] sm:$0xff]  ;;  %v19732_v54 = vld [vmem:[#allocation55_spill] sm:$0xff] }
 0x1ff   :  { %v7010_v39 = vrot.slane %v6996_v57, %v19340_v49  ;;  %v7011_v42 = vcombine.high %v7003_v11, %v7003_v11  ;;  %v7027_v9 = vrot.slane %v11445_v3, %v19340_v49  ;;  %v19733_v51 = vpack.c.b16 %v19731_v47, %v19732_v54 }
 0x200   :  { %v6888_v48 = vcombine.high %v6886_v4, %v6886_v4  ;;  %v14516_v29 = vrot.slane %v7939_v20, %v19340_v49  ;;  %v7953_v14 = vrot.slane %v6886_v4, %v19340_v49  ;;  %v7967_v56 = vrot.slane %v6887_v32, %v19340_v49 }
 0x201   :  { %5819 = vrot.lane.b32.xlu0 %v19733_v51, %s11620_s14  ;;  %v7012_v41 = vcombine.high %v7010_v39, %v7010_v39  ;;  %v7034_v57 = vrot.slane %v7020_v45, %v19340_v49  ;;  %v7035_v50 = vcombine.high %v7027_v9, %v7027_v9  ;;  %v8051_v3 = vrot.slane %v7003_v11, %v19340_v49 }
 0x202   :  { %v7960_v10 = vrot.slane %v7953_v14, %v19340_v49  ;;  %v7974_v20 = vrot.slane %v7967_v56, %v19340_v49  ;;  %v7981_v4 = vrot.slane %v6888_v48, %v19340_v49  ;;  %v8065_v32 = vrot.slane %v7010_v39, %v19340_v49 }
 0x203   :  { %v7036_v13 = vcombine.high %v7034_v57, %v7034_v57  ;;  %v14531_v28 = vrot.slane %v8051_v3, %v19340_v49  ;;  %v8079_v47 = vrot.slane %v7011_v42, %v19340_v49  ;;  %v8093_v54 = vrot.slane %v7012_v41, %v19340_v49 }
 0x204   :  { %v7988_v45 = vrot.slane %v7981_v4, %v19340_v49  ;;  %v8072_v11 = vrot.slane %v8065_v32, %v19340_v49  ;;  %v8107_v14 = vrot.slane %v7027_v9, %v19340_v49  ;;  %v8121_v56 = vrot.slane %v7034_v57, %v19340_v49 }
 0x205   :  { %19734 = vst [vmem:[#allocation132_spill] sm:$0xff] %v14531_v28  ;;  %v8086_v48 = vrot.slane %v8079_v47, %v19340_v49  ;;  %v8100_v39 = vrot.slane %v8093_v54, %v19340_v49  ;;  %v8135_v51 = vrot.slane %v7035_v50, %v19340_v49  ;;  %v8149_v3 = vrot.slane %v7036_v13, %v19340_v49 }
 0x206   :  { %v8114_v42 = vrot.slane %v8107_v14, %v19340_v49  ;;  %v8128_v41 = vrot.slane %v8121_v56, %v19340_v49  ;;  %v8413_v4 = vunpack.c.l.b16 %v14516_v29  ;;  %v14546_v61 = vunpack.c.l.b16 %v7960_v10 }
 0x207   :  { %v8142_v9 = vrot.slane %v8135_v51, %v19340_v49  ;;  %v8156_v57 = vrot.slane %v8149_v3, %v19340_v49  ;;  %v14550_v32 = vunpack.c.l.b16 %v7974_v20  ;;  %v14552_v47 = vunpack.c.l.b16 %v7988_v45 }
 0x208   :  { %19735 = vst [vmem:[#allocation139_spill] sm:$0xff] %v14546_v61  ;;  %v14554_v54 = vunpack.c.l.b16 %v8044_v44  ;;  %v18795_v13 = vunpack.c.l.b16 %v14531_v28  ;;  %v14557_v50 = vunpack.c.l.b16 %v8072_v11  ;;  %v14559_v14 = vunpack.c.l.b16 %v8086_v48  ;;  %v75_v28 = vld [vmem:[#allocation2 + $0xa8] sm:$0x1] }
 0x209   :  { %19736 = vst [vmem:[#allocation90_spill] sm:$0xff] %v14550_v32  ;;  %v14561_v56 = vunpack.c.l.b16 %v8100_v39  ;;  %v14563_v10 = vunpack.c.l.b16 %v8114_v42  ;;  %v14565_v29 = vunpack.c.l.b16 %v8128_v41  ;;  %v14567_v51 = vunpack.c.l.b16 %v8142_v9 }
 0x20a   :  { %19737 = vst [vmem:[#allocation133_spill] sm:$0xff] %v14554_v54  ;;  %19738 = vst [vmem:[#allocation120_spill] sm:$0xff] %v14557_v50  ;;  %v14569_v20 = vunpack.c.l.b16 %v8156_v57  ;;  %v8617_v45 = vrot.slane %v8413_v4, 1  ;;  %v8631_v9 = vrot.slane %v18795_v13, 1  ;;  %v19745_v3 = vrot.slane %v14550_v32, 7 }
 0x20b   :  { %19739 = vst [vmem:[#allocation140_spill] sm:$0xff] %v14559_v14  ;;  %19740 = vst [vmem:[#allocation127_spill] sm:$0xff] %v14561_v56  ;;  %v19746_v30 = vrot.slane %v14552_v47, 6  ;;  %v19747_v44 = vrot.slane %v19727_v36, 3  ;;  %v19749_v42 = vrot.slane %v14559_v14, 7  ;;  %v19751_v57 = vrot.slane %v14507_v2, 4 }
 0x20c   :  { %19741 = vst [vmem:[#allocation134_spill] sm:$0xff] %v14563_v10  ;;  %19742 = vst [vmem:[#allocation141_spill] sm:$0xff] %v14565_v29  ;;  %v8618_v41 = vsel %vm3561_vm9, %v14546_v61, %v8617_v45  ;;  %v8632_v13 = vsel %vm3561_vm9, %v14557_v50, %v8631_v9  ;;  %v8501_v9 = vrot.slane %v14546_v61, 7 }
 0x20d   :  { %19743 = vst [vmem:[#allocation135_spill] sm:$0xff] %v14567_v51  ;;  %19744 = vst [vmem:[#allocation142_spill] sm:$0xff] %v14569_v20  ;;  %v8620_v11 = vsel %vm3564_vm10, %v19745_v3, %v8618_v41  ;;  %v8496_v3 = vsel %vm3573_vm13, %v19747_v44, %v14502_v8  ;;  %v19748_v41 = vrot.slane %v14497_v19, 5  ;;  %v8634_v48 = vsel %vm3564_vm10, %v19749_v42, %v8632_v13 }
 0x20e   :  { %v8622_v45 = vsel %vm3567_vm11, %v19746_v30, %v8620_v11  ;;  %v19750_v30 = vrot.slane %v19728_v43, 2  ;;  %v19752_v8 = vrot.slane %v14561_v56, 6  ;;  %v8503_v13 = vrot.slane %v14550_v32, 6 }
 0x20f   :  { %v8624_v39 = vsel %vm3570_vm12, %v19748_v41, %v8622_v45  ;;  %v19753_v45 = vrot.slane %v19730_v15, 1  ;;  %v19755_v43 = vrot.slane %v14511_v38, 3 }
 0x210   :  { %v8498_v11 = vsel %vm3576_vm14, %v19750_v30, %v8496_v3  ;;  %v8626_v36 = vsel %vm3573_vm13, %v19751_v57, %v8624_v39  ;;  %v8636_v44 = vsel %vm3567_vm11, %v19752_v8, %v8634_v48  ;;  %v19756_v3 = vrot.slane %v14563_v10, 5 }
 0x211   :  { %v14618_v41 = vsel %vm3579_vm15, %v19753_v45, %v8498_v11  ;;  %v8628_v42 = vsel %vm3576_vm14, %v19755_v43, %v8626_v36  ;;  %v8502_v39 = vsel %vm3561_vm9, %v8501_v9, %v8413_v4  ;;  %v8505_v57 = vrot.slane %v14552_v47, 5  ;;  %v69_v43 = vld [vmem:[#allocation2 + $0x90] sm:$0x1] }
 0x212   :  { %19754 = vst [vmem:[#allocation148_spill] sm:$0xff] %v14618_v41  ;;  %v8638_v30 = vsel %vm3570_vm12, %v19756_v3, %v8636_v44  ;;  %v19757_v48 = vrot.slane %v14554_v54, 2  ;;  %v19758_v11 = vrot.slane %v14565_v29, 4  ;;  %v8504_v45 = vsel %vm3564_vm10, %v8503_v13, %v8502_v39  ;;  %v274_v13 = vld [vmem:[%s18361_s0 + $0xb8] sm:$0xff]  ;;  %v277_v39 = vld [vmem:[%s18361_s0 + $0xd0] sm:$0xff] }
 0x213   :  { %v8507_v36 = vrot.slane %v14497_v19, 4  ;;  %v19759_v44 = vrot.slane %v14567_v51, 3  ;;  %v8506_v9 = vsel %vm3567_vm11, %v8505_v57, %v8504_v45  ;;  %v8509_v3 = vrot.slane %v14507_v2, 3 }
 0x214   :  { %v14632_v15 = vsel %vm3579_vm15, %v19757_v48, %v8628_v42  ;;  %v8640_v8 = vsel %vm3573_vm13, %v19758_v11, %v8638_v30  ;;  %v8511_v42 = vrot.slane %v14511_v38, 2  ;;  %v273_v30 = vld [vmem:[%s18361_s0 + $0xb0] sm:$0xff]  ;;  %v19760_v48 = vrot.slane %v14569_v20, 2 }
 0x215   :  { %v8642_v4 = vsel %vm3576_vm14, %v19759_v44, %v8640_v8  ;;  %v8508_v11 = vsel %vm3570_vm12, %v8507_v36, %v8506_v9  ;;  %v8513_v8 = vrot.slane %v14554_v54, 1  ;;  %v278_v44 = vld [vmem:[%s18361_s0 + $0xd8] sm:$0xff]  ;;  %v76_v36 = vsel %vm11649_vm2, 0, %v75_v28 }
 0x216   :  { %v14657_v57 = vsel %vm3579_vm15, %v19760_v48, %v8642_v4  ;;  %v8510_v5 = vsel %vm3573_vm13, %v8509_v3, %v8508_v11  ;;  %v70_v4 = vsel %vm11649_vm2, 0, %v69_v43  ;;  %77 = vst [vmem:[#allocation2 + $0xa8] sm:$0x1] %v76_v36  ;;  %v11503_v48 = vpack.c.bf16 %v273_v30, %v273_v30  ;;  %v19764_v36 = vld [vmem:[#allocation9_spill] sm:$0xff] }
 0x217   :  { %19761 = vst [vmem:[#allocation149_spill] sm:$0xff] %v14657_v57  ;;  %v8675_v34 = vpack.c.b16 %v14657_v57, %v14632_v15  ;;  %v8512_v9 = vsel %vm3576_vm14, %v8511_v42, %v8510_v5  ;;  %71 = vst [vmem:[#allocation2 + $0x90] sm:$0x1] %v70_v4  ;;  %v11504_v45 = vpack.c.bf16 %v274_v13, %v274_v13  ;;  %v168_v11 = vsel %vm11661_vm4, 0, %v167_v52 }
 0x218   :  { %v11507_v17 = vpack.c.bf16 %v277_v39, %v277_v39  ;;  %v14676_v62 = vsel %vm3579_vm15, %v8513_v8, %v8512_v9  ;;  %v11508_v57 = vpack.c.bf16 %v278_v44, %v278_v44  ;;  %v174_v43 = vsel %vm11661_vm4, 0, %v173_v63  ;;  %169 = vst [vmem:[#allocation2 + $0x68] sm:$0x1] %v168_v11 }
 0x219   :  { %8681 = vrot.lane.b32.xlu1 %v8675_v34, %s11612_s9  ;;  %19762 = vst [vmem:[#allocation150_spill] sm:$0xff] %v14676_v62  ;;  %v10668_v5 = vpack.c.b16 %v14676_v62, %v14618_v41  ;;  %v697_v28 = vshrl.u32 %v11503_v48, 16  ;;  %v700_v42 = vshll.u32 %v11503_v48, 16  ;;  %v705_v30 = vshrl.u32 %v11504_v45, 16  ;;  %175 = vst [vmem:[#allocation2 + $0x80] sm:$0x1] %v174_v43 }
 0x21a   :  { %v708_v13 = vshll.u32 %v11504_v45, 16  ;;  %v731_v34 = vshrl.u32 %v11507_v17, 16  ;;  %v734_v39 = vshll.u32 %v11507_v17, 16  ;;  %v739_v8 = vshrl.u32 %v11508_v57, 16 }
 0x21b   :  { %10673 = vrot.lane.b32.xlu0 %v10668_v5, %s11619_s26  ;;  %v699_v44 = vrot.slane %v697_v28, 7  ;;  %v14685_v4 = vrot.slane %v705_v30, 7  ;;  %v742_v52 = vshll.u32 %v11508_v57, 16  ;;  %v644_v63 = vrot.slane %v19764_v36, 4 }
 0x21c   :  { %v19765_v9 = vpack.c.b16 %v19715_v37, %v19714_v59  ;;  %v733_v48 = vrot.slane %v731_v34, 7  ;;  %v14692_v11 = vrot.slane %v739_v8, 7  ;;  %v678_v45 = vrot.slane %v14320_v18, 4  ;;  %v123_v59 = vld [vmem:[#allocation2 + $0x168] sm:$0x1] }
 0x21d   :  { %v19766_v17 = vrot.slane %v13729_v33, 7  ;;  %v702_v5 = vor.u32 %v700_v42, %v699_v44  ;;  %v703_v28 = vrot.slane %v699_v44, 4  ;;  %v710_v57 = vor.u32 %v708_v13, %v14685_v4  ;;  %v1243_v18 = vld [vmem:[#allocation2 + $0xa8] sm:$0xf] }
 0x21e   :  { %10697 = vrot.lane.b32.xlu1 %v19765_v9, %s11620_s14  ;;  %v19767_v30 = vrot.slane %v14007_v21, 6  ;;  %v736_v37 = vor.u32 %v734_v39, %v733_v48  ;;  %v737_v34 = vrot.slane %v733_v48, 4  ;;  %v744_v8 = vor.u32 %v742_v52, %v14692_v11  ;;  %v1229_v9 = vld [vmem:[#allocation2 + $0x90] sm:$0xf]  ;;  %v129_v48 = vld [vmem:[#allocation2 + $0x180] sm:$0x1] }
 0x21f   :  { %v3959_v43 = vsel %vm3561_vm9, %v19766_v17, %v19644_v35  ;;  %v19768_v41 = vrot.slane %v14125_v23, 5  ;;  %v711_v42 = vsel %vm11687_vm7, %v703_v28, %v710_v57  ;;  %v1230_v13 = vsel %vm11696_vm8, %v702_v5, %v1229_v9  ;;  %v1205_v28 = vld [vmem:[#allocation2 + $0x68] sm:$0x1] }
 0x220   :  { %v3960_v36 = vsel %vm3564_vm10, %v19767_v30, %v3959_v43  ;;  %v19769_v44 = vrot.slane %v14133_v7, 4  ;;  %v19770_v39 = vrot.slane %v14427_v24, 7  ;;  %v309_v43 = vld [vmem:[%s18361_s0 + $0x1d0] sm:$0xff]  ;;  %v745_v5 = vsel %vm11687_vm7, %v737_v34, %v744_v8  ;;  %1231 = vst [vmem:[#allocation2 + $0x90] sm:$0xf] %v1230_v13  ;;  %v306_v34 = vld [vmem:[%s18361_s0 + $0x1b8] sm:$0xff] }
 0x221   :  { %v3961_v62 = vsel %vm3567_vm11, %v19768_v41, %v3960_v36  ;;  %v305_v41 = vld [vmem:[%s18361_s0 + $0x1b0] sm:$0xff]  ;;  %1232 = vst.msk [vmem:[#allocation2 + $0x94] sm:$0xf] %vm15_vm5, %v711_v42  ;;  %v1219_v57 = vld [vmem:[#allocation2 + $0x80] sm:$0x1]  ;;  %v19771_v30 = vrot.slane %v14144_v60, 3 }
 0x222   :  { %v3962_v17 = vsel %vm3570_vm12, %v19769_v44, %v3961_v62  ;;  %v3967_v52 = vsel %vm3561_vm9, %v19770_v39, %v14425_v40  ;;  %v1244_v62 = vsel %vm11696_vm8, %v736_v37, %v1243_v18  ;;  %v19772_v9 = vrot.slane %v14437_v31, 6  ;;  %v19773_v8 = vld [vmem:[#allocation34_spill] sm:$0xff]  ;;  %1246 = vst.msk [vmem:[#allocation2 + $0xac] sm:$0xf] %vm15_vm5, %v745_v5  ;;  %v310_v39 = vld [vmem:[%s18361_s0 + $0x1d8] sm:$0xff] }
 0x223   :  { %v3963_v36 = vsel %vm3573_vm13, %v19771_v30, %v3962_v17  ;;  %1245 = vst [vmem:[#allocation2 + $0xa8] sm:$0xf] %v1244_v62  ;;  %v1206_v37 = vsel %vm11649_vm2, %v644_v63, %v1205_v28  ;;  %v1220_v18 = vsel %vm11649_vm2, %v678_v45, %v1219_v57  ;;  %v19774_v13 = vrot.slane %v14422_v27, 5  ;;  %v227_v30 = vld [vmem:[#allocation2 + $0x158] sm:$0x1] }
 0x224   :  { %v3968_v44 = vsel %vm3564_vm10, %v19772_v9, %v3967_v52  ;;  %v221_v52 = vld [vmem:[#allocation2 + $0x140] sm:$0x1]  ;;  %1207 = vst [vmem:[#allocation2 + $0x68] sm:$0x1] %v1206_v37  ;;  %1221 = vst [vmem:[#allocation2 + $0x80] sm:$0x1] %v1220_v18  ;;  %v11535_v37 = vpack.c.bf16 %v305_v41, %v305_v41  ;;  %v14766_v18 = vpack.c.bf16 %v306_v34, %v306_v34 }
 0x225   :  { %v3969_v17 = vsel %vm3567_vm11, %v19774_v13, %v3968_v44  ;;  %v19775_v5 = vrot.slane %v14241_v12, 2  ;;  %v19776_v63 = vrot.slane %v14432_v22, 4  ;;  %v124_v28 = vsel %vm11649_vm2, 0, %v123_v59 }
 0x226   :  { %v130_v57 = vsel %vm11649_vm2, 0, %v129_v48  ;;  %v19777_v9 = vrot.slane %v14434_v55, 3  ;;  %125 = vst [vmem:[#allocation2 + $0x168] sm:$0x1] %v124_v28  ;;  %v19778_v13 = vrot.slane %v14444_v16, 2  ;;  %v14775_v59 = vpack.c.bf16 %v310_v39, %v310_v39 }
 0x227   :  { %v14754_v62 = vsel %vm3576_vm14, %v19775_v5, %v3963_v36  ;;  %v3970_v45 = vsel %vm3570_vm12, %v19776_v63, %v3969_v17  ;;  %131 = vst [vmem:[#allocation2 + $0x180] sm:$0x1] %v130_v57  ;;  %v14768_v36 = vpack.c.bf16 %v309_v43, %v309_v43  ;;  %v222_v48 = vsel %vm11661_vm4, 0, %v221_v52 }
 0x228   :  { %v3971_v44 = vsel %vm3573_vm13, %v19777_v9, %v3970_v45  ;;  %v228_v5 = vsel %vm11661_vm4, 0, %v227_v30  ;;  %v969_v63 = vshrl.u32 %v11535_v37, 16  ;;  %v972_v45 = vshll.u32 %v11535_v37, 16  ;;  %223 = vst [vmem:[#allocation2 + $0x140] sm:$0x1] %v222_v48 }
 0x229   :  { %v14773_v17 = vsel %vm3576_vm14, %v19778_v13, %v3971_v44  ;;  %v977_v41 = vshrl.u32 %v14766_v18, 16  ;;  %229 = vst [vmem:[#allocation2 + $0x158] sm:$0x1] %v228_v5  ;;  %v1003_v34 = vshrl.u32 %v14768_v36, 16  ;;  %v1011_v39 = vshrl.u32 %v14775_v59, 16 }
 0x22a   :  { %v11396_v52 = vld.sshfl [vmem:[#allocation2 + $0x90] sm:$0x33 pattern:$0x75316420]  ;;  %v14787_v9 = vrot.slane %v969_v63, 7  ;;  %v19780_v44 = vrot.slane %v14550_v32, 7 }
 0x22b   :  { %v14789_v30 = vrot.slane %v977_v41, 7  ;;  %v19781_v13 = vrot.slane %v14559_v14, 7  ;;  %v11397_v5 = vld.sshfl [vmem:[#allocation2 + $0x94] sm:$0x33 pattern:$0x75316420]  ;;  %v2235_v42 = vcombine.high %v11396_v52, %v11396_v52  ;;  %v2242_v57 = vrot.slane %v11396_v52, %v19340_v49 }
 0x22c   :  { %v14795_v37 = vsel %vm3561_vm9, %v19780_v44, %v14546_v61  ;;  %v14804_v63 = vrot.slane %v1003_v34, 7  ;;  %v14806_v41 = vrot.slane %v1011_v39, 7  ;;  %v11402_v28 = vld.sshfl [vmem:[#allocation2 + $0xa8] sm:$0x33 pattern:$0x75316420]  ;;  %v2259_v43 = vcombine.high %v11397_v5, %v11397_v5 }
 0x22d   :  { %19779 = vst [vmem:[#allocation155_spill] sm:$0xff] %v14789_v30  ;;  %v14801_v48 = vsel %vm3561_vm9, %v19781_v13, %v14557_v50  ;;  %v2266_v58 = vrot.slane %v11397_v5, %v19340_v49  ;;  %v14810_v44 = vor.u32 %v972_v45, %v14787_v9  ;;  %v11403_v14 = vld.sshfl [vmem:[#allocation2 + $0xac] sm:$0x33 pattern:$0x75316420]  ;;  %v2249_v13 = vrot.slane %v2235_v42, %v19340_v49 }
 0x22e   :  { %v2250_v50 = vcombine.high %v2242_v57, %v2242_v57  ;;  %v2359_v32 = vcombine.high %v11402_v28, %v11402_v28  ;;  %v2366_v52 = vrot.slane %v11402_v28, %v19340_v49  ;;  %v2273_v34 = vrot.slane %v2259_v43, %v19340_v49 }
 0x22f   :  { %v2274_v39 = vcombine.high %v2266_v58, %v2266_v58  ;;  %v2383_v61 = vcombine.high %v11403_v14, %v11403_v14  ;;  %v2390_v16 = vrot.slane %v11403_v14, %v19340_v49  ;;  %v2251_v55 = vcombine.high %v2249_v13, %v2249_v13 }
 0x230   :  { %v2373_v5 = vrot.slane %v2359_v32, %v19340_v49  ;;  %v2374_v45 = vcombine.high %v2366_v52, %v2366_v52  ;;  %v3278_v22 = vrot.slane %v2242_v57, %v19340_v49  ;;  %v2275_v25 = vcombine.high %v2273_v34, %v2273_v34 }
 0x231   :  { %v2397_v27 = vrot.slane %v2383_v61, %v19340_v49  ;;  %v2398_v42 = vcombine.high %v2390_v16, %v2390_v16  ;;  %v3292_v12 = vrot.slane %v2249_v13, %v19340_v49  ;;  %v3306_v43 = vrot.slane %v2250_v50, %v19340_v49 }
 0x232   :  { %v2375_v24 = vcombine.high %v2373_v5, %v2373_v5  ;;  %v14822_v28 = vrot.slane %v3278_v22, %v19340_v49  ;;  %v3320_v14 = vrot.slane %v2251_v55, %v19340_v49  ;;  %v3334_v60 = vrot.slane %v2266_v58, %v19340_v49 }
 0x233   :  { %v2399_v31 = vcombine.high %v2397_v27, %v2397_v27  ;;  %v3299_v32 = vrot.slane %v3292_v12, %v19340_v49  ;;  %v3348_v57 = vrot.slane %v2273_v34, %v19340_v49  ;;  %v3313_v61 = vrot.slane %v3306_v43, %v19340_v49 }
 0x234   :  { %19782 = vst [vmem:[#allocation146_spill] sm:$0xff] %v14822_v28  ;;  %v3327_v40 = vrot.slane %v3320_v14, %v19340_v49  ;;  %v3362_v13 = vrot.slane %v2274_v39, %v19340_v49  ;;  %v3376_v22 = vrot.slane %v2275_v25, %v19340_v49  ;;  %v3341_v7 = vrot.slane %v3334_v60, %v19340_v49 }
 0x235   :  { %v3355_v50 = vrot.slane %v3348_v57, %v19340_v49  ;;  %v3390_v55 = vrot.slane %v2366_v52, %v19340_v49  ;;  %v3404_v12 = vrot.slane %v2373_v5, %v19340_v49  ;;  %v3418_v43 = vrot.slane %v2374_v45, %v19340_v49 }
 0x236   :  { %v3369_v58 = vrot.slane %v3362_v13, %v19340_v49  ;;  %v3383_v34 = vrot.slane %v3376_v22, %v19340_v49  ;;  %v3432_v14 = vrot.slane %v2375_v24, %v19340_v49  ;;  %v3446_v60 = vrot.slane %v2390_v16, %v19340_v49 }
 0x237   :  { %v14842_v39 = vrot.slane %v3390_v55, %v19340_v49  ;;  %v3411_v25 = vrot.slane %v3404_v12, %v19340_v49  ;;  %v3460_v57 = vrot.slane %v2397_v27, %v19340_v49  ;;  %v3425_v52 = vrot.slane %v3418_v43, %v19340_v49 }
 0x238   :  { %v3439_v5 = vrot.slane %v3432_v14, %v19340_v49  ;;  %v3474_v13 = vrot.slane %v2398_v42, %v19340_v49  ;;  %v3488_v22 = vrot.slane %v2399_v31, %v19340_v49  ;;  %v3453_v45 = vrot.slane %v3446_v60, %v19340_v49 }
 0x239   :  { %19783 = vst [vmem:[#allocation151_spill] sm:$0xff] %v14842_v39  ;;  %v3467_v24 = vrot.slane %v3460_v57, %v19340_v49  ;;  %v14854_v23 = vunpack.c.l.b16 %v3299_v32  ;;  %v14858_v12 = vunpack.c.l.b16 %v3313_v61  ;;  %v14860_v43 = vunpack.c.l.b16 %v3327_v40 }
 0x23a   :  { %v3481_v16 = vrot.slane %v3474_v13, %v19340_v49  ;;  %v3495_v27 = vrot.slane %v3488_v22, %v19340_v49  ;;  %v14862_v14 = vunpack.c.l.b16 %v3341_v7  ;;  %v14864_v42 = vunpack.c.l.b16 %v3355_v50 }
 0x23b   :  { %19784 = vst [vmem:[#allocation147_spill] sm:$0xff] %v14854_v23  ;;  %19785 = vst [vmem:[#allocation29_spill] sm:$0xff] %v14858_v12  ;;  %v14866_v31 = vunpack.c.l.b16 %v3369_v58  ;;  %v14868_v60 = vunpack.c.l.b16 %v3383_v34  ;;  %v14871_v32 = vunpack.c.l.b16 %v3411_v25  ;;  %v14873_v55 = vunpack.c.l.b16 %v3425_v52  ;;  %v11386_v58 = vld.sshfl [vmem:[#allocation2 + $0x68] sm:$0x1 pattern:$0x75316420] }
 0x23c   :  { %19786 = vst [vmem:[#allocation30_spill] sm:$0xff] %v14860_v43  ;;  %19787 = vst [vmem:[#allocation152_spill] sm:$0xff] %v14862_v14  ;;  %v14875_v13 = vunpack.c.l.b16 %v3439_v5  ;;  %v14877_v61 = vunpack.c.l.b16 %v3453_v45  ;;  %v14879_v40 = vunpack.c.l.b16 %v3467_v24  ;;  %v14881_v7 = vunpack.c.l.b16 %v3481_v16  ;;  %v11392_v5 = vld.sshfl [vmem:[#allocation2 + $0x80] sm:$0x1 pattern:$0x75316420] }
 0x23d   :  { %19788 = vst [vmem:[#allocation158_spill] sm:$0xff] %v14864_v42  ;;  %19789 = vst [vmem:[#allocation153_spill] sm:$0xff] %v14866_v31  ;;  %v14883_v50 = vunpack.c.l.b16 %v3495_v27  ;;  %v19798_v34 = vunpack.c.l.b16 %v14822_v28  ;;  %v19799_v27 = vunpack.c.l.b16 %v14842_v39  ;;  %v19800_v52 = vrot.slane %v14858_v12, 7 }
 0x23e   :  { %19790 = vst [vmem:[#allocation159_spill] sm:$0xff] %v14868_v60  ;;  %19791 = vst [vmem:[#allocation160_spill] sm:$0xff] %v14871_v32  ;;  %v19801_v39 = vrot.slane %v14860_v43, 6  ;;  %v2041_v21 = vrot.slane %v11386_v58, %v19340_v49  ;;  %v2165_v16 = vrot.slane %v11392_v5, %v19340_v49  ;;  %v19806_v58 = vrot.slane %v14877_v61, 5 }
 0x23f   :  { %19792 = vst [vmem:[#allocation154_spill] sm:$0xff] %v14873_v55  ;;  %19793 = vst [vmem:[#allocation161_spill] sm:$0xff] %v14875_v13  ;;  %v3767_v22 = vrot.slane %v19798_v34, 1  ;;  %v3781_v33 = vrot.slane %v19799_v27, 1  ;;  %v18838_v34 = vrot.slane %v14873_v55, 7  ;;  %v19808_v5 = vrot.slane %v14866_v31, 3 }
 0x240   :  { %19794 = vst [vmem:[#allocation35_spill] sm:$0xff] %v14877_v61  ;;  %19795 = vst [vmem:[#allocation36_spill] sm:$0xff] %v14879_v40 }
 0x241   :  { %19796 = vst [vmem:[#allocation37_spill] sm:$0xff] %v14881_v7  ;;  %19797 = vst [vmem:[#allocation31_spill] sm:$0xff] %v14883_v50  ;;  %v3768_v28 = vsel %vm3561_vm9, %v14854_v23, %v3767_v22  ;;  %v3782_v24 = vsel %vm3561_vm9, %v14871_v32, %v3781_v33 }
 0x242   :  { %v3770_v45 = vsel %vm3564_vm10, %v19800_v52, %v3768_v28  ;;  %v3784_v57 = vsel %vm3564_vm10, %v18838_v34, %v3782_v24  ;;  %v19802_v28 = vrot.slane %v14862_v14, 5  ;;  %v19803_v52 = vrot.slane %v14875_v13, 6 }
 0x243   :  { %v3772_v22 = vsel %vm3567_vm11, %v19801_v39, %v3770_v45  ;;  %v19804_v39 = vshll.u32 %v14766_v18, 16  ;;  %v19805_v24 = vrot.slane %v14864_v42, 4 }
 0x244   :  { %v3774_v33 = vsel %vm3570_vm12, %v19802_v28, %v3772_v22  ;;  %v3786_v27 = vsel %vm3567_vm11, %v19803_v52, %v3784_v57  ;;  %v3869_v22 = vrot.slane %v2041_v21, %v19340_v49  ;;  %v19807_v28 = vshll.u32 %v14768_v36, 16  ;;  %v1341_v52 = vld [vmem:[#allocation2 + $0x168] sm:$0xf] }
 0x245   :  { %v982_v45 = vor.u32 %v19804_v39, %v14789_v30  ;;  %v3776_v34 = vsel %vm3573_vm13, %v19805_v24, %v3774_v33  ;;  %v3788_v25 = vsel %vm3570_vm12, %v19806_v58, %v3786_v27  ;;  %v19809_v39 = vrot.slane %v14879_v40, 4  ;;  %v1355_v27 = vld [vmem:[#allocation2 + $0x180] sm:$0xf] }
 0x246   :  { %v1008_v57 = vor.u32 %v19807_v28, %v14804_v63  ;;  %v3778_v18 = vsel %vm3576_vm14, %v19808_v5, %v3776_v34  ;;  %v3883_v33 = vrot.slane %v2165_v16, %v19340_v49  ;;  %v19810_v24 = vrot.slane %v14787_v9, 4 }
 0x247   :  { %v3790_v30 = vsel %vm3573_vm13, %v19809_v39, %v3788_v25  ;;  %v19811_v36 = vrot.slane %v14868_v60, 2  ;;  %v19813_v28 = vrot.slane %v14881_v7, 3  ;;  %v3876_v5 = vrot.slane %v3869_v22, %v19340_v49  ;;  %v1317_v22 = vld [vmem:[#allocation2 + $0x140] sm:$0x1] }
 0x248   :  { %v983_v21 = vsel %vm11687_vm7, %v19810_v24, %v982_v45  ;;  %v1009_v25 = vrot.slane %v14804_v63, 4  ;;  %v19814_v9 = vrot.slane %v14883_v50, 2  ;;  %v3890_v45 = vrot.slane %v3883_v33, %v19340_v49 }
 0x249   :  { %v14949_v58 = vsel %vm3579_vm15, %v19811_v36, %v3778_v18  ;;  %v3792_v34 = vsel %vm3576_vm14, %v19813_v28, %v3790_v30  ;;  %1344 = vst.msk [vmem:[#allocation2 + $0x16c] sm:$0xf] %vm15_vm5, %v983_v21  ;;  %v19816_v18 = vshll.u32 %v14775_v59, 16  ;;  %v1342_v30 = vsel %vm11696_vm8, %v14810_v44, %v1341_v52  ;;  %v1331_v36 = vld [vmem:[#allocation2 + $0x158] sm:$0x1] }
 0x24a   :  { %19812 = vst [vmem:[#allocation33_spill] sm:$0xff] %v14949_v58  ;;  %v14960_v16 = vsel %vm3579_vm15, %v19814_v9, %v3792_v34  ;;  %v14971_v24 = vunpack.c.l.b16 %v3876_v5  ;;  %1343 = vst [vmem:[#allocation2 + $0x168] sm:$0xf] %v1342_v30  ;;  %v1356_v21 = vsel %vm11696_vm8, %v1008_v57, %v1355_v27  ;;  %v916_v33 = vrot.slane %v14381_v53, 4 }
 0x24b   :  { %19815 = vst [vmem:[#allocation48_spill] sm:$0xff] %v14960_v16  ;;  %v1016_v39 = vor.u32 %v19816_v18, %v14806_v41  ;;  %v3798_v63 = vpack.c.b16 %v14960_v16, %v14949_v58  ;;  %v14976_v28 = vunpack.c.l.b16 %v3890_v45  ;;  %1357 = vst [vmem:[#allocation2 + $0x180] sm:$0xf] %v1356_v21  ;;  %v950_v44 = vrot.slane %v14442_v6, 4 }
 0x24c   :  { %v19817_v52 = vrot.slane %v14552_v47, 6  ;;  %v3965_v57 = vrot.slane %v14971_v24, 1  ;;  %v1318_v53 = vsel %vm11649_vm2, %v916_v33, %v1317_v22  ;;  %v19818_v27 = vrot.slane %v14497_v19, 5  ;;  %v179_v22 = vld [vmem:[#allocation2 + $0x98] sm:$0x1] }
 0x24d   :  { %v1017_v59 = vsel %vm11687_vm7, %v1009_v25, %v1016_v39  ;;  %3805 = vrot.lane.b32.xlu0 %v3798_v63, %s11612_s9  ;;  %v19819_v6 = vrot.slane %v14561_v56, 6  ;;  %1319 = vst [vmem:[#allocation2 + $0x140] sm:$0x1] %v1318_v53  ;;  %v1332_v9 = vsel %vm11649_vm2, %v950_v44, %v1331_v36  ;;  %v19820_v45 = vrot.slane %v14507_v2, 4  ;;  %v281_v44 = vld [vmem:[%s18361_s0 + $0xf0] sm:$0xff] }
 0x24e   :  { %v8838_v34 = vsel %vm3564_vm10, %v19817_v52, %v14795_v37  ;;  %1358 = vst.msk [vmem:[#allocation2 + $0x184] sm:$0xf] %vm15_vm5, %v1017_v59  ;;  %v3973_v37 = vrot.slane %v14976_v28, 1  ;;  %v19821_v39 = vrot.slane %v14563_v10, 5  ;;  %v15008_v63 = vsel %vm3579_vm15, %v3965_v57, %v14754_v62  ;;  %1333 = vst [vmem:[#allocation2 + $0x158] sm:$0x1] %v1332_v9 }
 0x24f   :  { %v8839_v5 = vsel %vm3567_vm11, %v19818_v27, %v8838_v34  ;;  %v8846_v25 = vsel %vm3564_vm10, %v19819_v6, %v14801_v48  ;;  %v19822_v48 = vrot.slane %v14511_v38, 3  ;;  %v19823_v33 = vrot.slane %v14565_v29, 4  ;;  %v81_v59 = vld [vmem:[#allocation2 + $0xc0] sm:$0x1]  ;;  %v282_v52 = vld [vmem:[%s18361_s0 + $0xf8] sm:$0xff]  ;;  %v19825_v34 = vld [vmem:[#allocation38_spill] sm:$0xff] }
 0x250   :  { %v8840_v18 = vsel %vm3570_vm12, %v19820_v45, %v8839_v5  ;;  %v8847_v30 = vsel %vm3567_vm11, %v19821_v39, %v8846_v25  ;;  %v15024_v62 = vsel %vm3579_vm15, %v3973_v37, %v14773_v17  ;;  %v19826_v57 = vld [vmem:[#allocation75_spill] sm:$0xff]  ;;  %v11451_v27 = vld.sshfl [vmem:[#allocation2 + $0x16c] sm:$0x33 pattern:$0x75316420]  ;;  %v19827_v5 = vrot.slane %v14554_v54, 2 }
 0x251   :  { %v8841_v21 = vsel %vm3573_vm13, %v19822_v48, %v8840_v18  ;;  %v8848_v36 = vsel %vm3570_vm12, %v19823_v33, %v8847_v30  ;;  %19824 = vst [vmem:[#allocation49_spill] sm:$0xff] %v15024_v62  ;;  %v5850_v53 = vpack.c.b16 %v19826_v57, %v19825_v34  ;;  %v19828_v25 = vrot.slane %v14567_v51, 3  ;;  %v185_v48 = vld [vmem:[#allocation2 + $0xb0] sm:$0x1]  ;;  %v191_v54 = vld [vmem:[#allocation2 + $0xc8] sm:$0x1] }
 0x252   :  { %v15031_v6 = vsel %vm3576_vm14, %v19827_v5, %v8841_v21  ;;  %v3993_v45 = vpack.c.b16 %v15024_v62, %v15008_v63  ;;  %v19829_v17 = vpack.c.b16 %v14293_v0, %v19773_v8  ;;  %v7144_v37 = vcombine.high %v11451_v27, %v11451_v27  ;;  %v11450_v21 = vld.sshfl [vmem:[#allocation2 + $0x168] sm:$0x33 pattern:$0x75316420] }
 0x253   :  { %v8849_v9 = vsel %vm3573_vm13, %v19828_v25, %v8848_v36  ;;  %v7151_v18 = vrot.slane %v11451_v27, %v19340_v49  ;;  %v19830_v39 = vrot.slane %v14569_v20, 2  ;;  %v82_v33 = vsel %vm11649_vm2, 0, %v81_v59  ;;  %v11456_v8 = vld.sshfl [vmem:[#allocation2 + $0x180] sm:$0x33 pattern:$0x75316420] }
 0x254   :  { %5821 = vrot.lane.b32.xlu0 %v19829_v17, %s11620_s14  ;;  %v180_v36 = vsel %vm11661_vm4, 0, %v179_v22  ;;  %v15052_v34 = vpack.c.bf16 %v281_v44, %v281_v44  ;;  %v15054_v0 = vpack.c.bf16 %v282_v52, %v282_v52  ;;  %3999 = vrot.lane.b32.xlu1 %v3993_v45, %s11615_s22  ;;  %v7120_v57 = vcombine.high %v11450_v21, %v11450_v21 }
 0x255   :  { %v15046_v30 = vsel %vm3576_vm14, %v19830_v39, %v8849_v9  ;;  %v7127_v27 = vrot.slane %v11450_v21, %v19340_v49  ;;  %v7158_v5 = vrot.slane %v7144_v37, %v19340_v49  ;;  %v7159_v25 = vcombine.high %v7151_v18, %v7151_v18  ;;  %83 = vst [vmem:[#allocation2 + $0xc0] sm:$0x1] %v82_v33  ;;  %v11457_v9 = vld.sshfl [vmem:[#allocation2 + $0x184] sm:$0x33 pattern:$0x75316420] }
 0x256   :  { %181 = vst [vmem:[#allocation2 + $0x98] sm:$0x1] %v180_v36  ;;  %v7244_v59 = vcombine.high %v11456_v8, %v11456_v8  ;;  %v7251_v17 = vrot.slane %v11456_v8, %v19340_v49  ;;  %v8219_v22 = vrot.slane %v7151_v18, %v19340_v49  ;;  %v186_v44 = vsel %vm11661_vm4, 0, %v185_v48 }
 0x257   :  { %v7134_v52 = vrot.slane %v7120_v57, %v19340_v49  ;;  %v7135_v45 = vcombine.high %v7127_v27, %v7127_v27  ;;  %v7160_v39 = vcombine.high %v7158_v5, %v7158_v5  ;;  %v7268_v16 = vcombine.high %v11457_v9, %v11457_v9  ;;  %187 = vst [vmem:[#allocation2 + $0xb0] sm:$0x1] %v186_v44 }
 0x258   :  { %v7258_v37 = vrot.slane %v7244_v59, %v19340_v49  ;;  %v7259_v21 = vcombine.high %v7251_v17, %v7251_v17  ;;  %v7275_v33 = vrot.slane %v11457_v9, %v19340_v49  ;;  %v8163_v36 = vrot.slane %v7127_v27, %v19340_v49  ;;  %5854 = vrot.lane.b32.xlu1 %v5850_v53, %s11621_s17 }
 0x259   :  { %v7136_v18 = vcombine.high %v7134_v52, %v7134_v52  ;;  %v7282_v8 = vrot.slane %v7268_v16, %v19340_v49  ;;  %v8177_v48 = vrot.slane %v7134_v52, %v19340_v49  ;;  %v8191_v57 = vrot.slane %v7135_v45, %v19340_v49 }
 0x25a   :  { %v7260_v62 = vcombine.high %v7258_v37, %v7258_v37  ;;  %v7283_v58 = vcombine.high %v7275_v33, %v7275_v33  ;;  %v15072_v44 = vrot.slane %v8163_v36, %v19340_v49  ;;  %v8226_v59 = vrot.slane %v8219_v22, %v19340_v49 }
 0x25b   :  { %v7284_v9 = vcombine.high %v7282_v8, %v7282_v8  ;;  %v8184_v27 = vrot.slane %v8177_v48, %v19340_v49  ;;  %v8198_v20 = vrot.slane %v8191_v57, %v19340_v49  ;;  %v8205_v53 = vrot.slane %v7136_v18, %v19340_v49 }
 0x25c   :  { %19831 = vst [vmem:[#allocation50_spill] sm:$0xff] %v15072_v44  ;;  %v8233_v16 = vrot.slane %v7158_v5, %v19340_v49  ;;  %v8247_v52 = vrot.slane %v7159_v25, %v19340_v49  ;;  %v8261_v45 = vrot.slane %v7160_v39, %v19340_v49  ;;  %v8275_v51 = vrot.slane %v7251_v17, %v19340_v49 }
 0x25d   :  { %v8212_v36 = vrot.slane %v8205_v53, %v19340_v49  ;;  %v8289_v29 = vrot.slane %v7258_v37, %v19340_v49  ;;  %v8303_v22 = vrot.slane %v7259_v21, %v19340_v49  ;;  %v8317_v48 = vrot.slane %v7260_v62, %v19340_v49 }
 0x25e   :  { %v8240_v57 = vrot.slane %v8233_v16, %v19340_v49  ;;  %v8254_v18 = vrot.slane %v8247_v52, %v19340_v49  ;;  %v8268_v5 = vrot.slane %v8261_v45, %v19340_v49  ;;  %v15090_v25 = vrot.slane %v8275_v51, %v19340_v49 }
 0x25f   :  { %v8296_v39 = vrot.slane %v8289_v29, %v19340_v49  ;;  %v8310_v17 = vrot.slane %v8303_v22, %v19340_v49  ;;  %v8324_v53 = vrot.slane %v8317_v48, %v19340_v49  ;;  %v8331_v37 = vrot.slane %v7275_v33, %v19340_v49 }
 0x260   :  { %19832 = vst [vmem:[#allocation51_spill] sm:$0xff] %v15090_v25  ;;  %v8345_v21 = vrot.slane %v7282_v8, %v19340_v49  ;;  %v8359_v62 = vrot.slane %v7283_v58, %v19340_v49  ;;  %v8373_v16 = vrot.slane %v7284_v9, %v19340_v49  ;;  %v15101_v51 = vunpack.c.l.b16 %v8184_v27 }
 0x261   :  { %v8338_v45 = vrot.slane %v8331_v37, %v19340_v49  ;;  %v15103_v10 = vunpack.c.l.b16 %v8198_v20  ;;  %v15105_v29 = vunpack.c.l.b16 %v8212_v36  ;;  %v15110_v48 = vunpack.c.l.b16 %v8226_v59 }
 0x262   :  { %19833 = vst [vmem:[#allocation44_spill] sm:$0xff] %v15101_v51  ;;  %v8352_v22 = vrot.slane %v8345_v21, %v19340_v49  ;;  %v8366_v33 = vrot.slane %v8359_v62, %v19340_v49  ;;  %v8380_v8 = vrot.slane %v8373_v16, %v19340_v49  ;;  %v15112_v58 = vunpack.c.l.b16 %v8240_v57  ;;  %v11440_v16 = vld.sshfl [vmem:[#allocation2 + $0x140] sm:$0x1 pattern:$0x75316420] }
 0x263   :  { %19834 = vst [vmem:[#allocation52_spill] sm:$0xff] %v15103_v10  ;;  %19835 = vst [vmem:[#allocation53_spill] sm:$0xff] %v15105_v29  ;;  %v15114_v9 = vunpack.c.l.b16 %v8254_v18  ;;  %v15116_v52 = vunpack.c.l.b16 %v8268_v5  ;;  %v15119_v20 = vunpack.c.l.b16 %v8296_v39  ;;  %v15121_v36 = vunpack.c.l.b16 %v8310_v17 }
 0x264   :  { %19836 = vst [vmem:[#allocation54_spill] sm:$0xff] %v15110_v48  ;;  %19837 = vst [vmem:[#allocation18_spill] sm:$0xff] %v15112_v58  ;;  %v15123_v37 = vunpack.c.l.b16 %v8324_v53  ;;  %v15125_v21 = vunpack.c.l.b16 %v8338_v45  ;;  %v15127_v62 = vunpack.c.l.b16 %v8352_v22  ;;  %v15129_v59 = vunpack.c.l.b16 %v8366_v33  ;;  %v11446_v45 = vld.sshfl [vmem:[#allocation2 + $0x158] sm:$0x1 pattern:$0x75316420] }
 0x265   :  { %19838 = vst [vmem:[#allocation14_spill] sm:$0xff] %v15114_v9  ;;  %19839 = vst [vmem:[#allocation16_spill] sm:$0xff] %v15116_v52  ;;  %v15131_v57 = vunpack.c.l.b16 %v8380_v8  ;;  %v19847_v18 = vunpack.c.l.b16 %v15072_v44  ;;  %v18856_v27 = vrot.slane %v15103_v10, 7  ;;  %v19848_v44 = vunpack.c.l.b16 %v15090_v25 }
 0x266   :  { %19840 = vst [vmem:[#allocation17_spill] sm:$0xff] %v15119_v20  ;;  %19841 = vst [vmem:[#allocation19_spill] sm:$0xff] %v15121_v36  ;;  %v18859_v39 = vrot.slane %v15121_v36, 7 }
 0x267   :  { %19842 = vst [vmem:[#allocation12_spill] sm:$0xff] %v15123_v37  ;;  %19843 = vst [vmem:[#allocation21_spill] sm:$0xff] %v15125_v21  ;;  %v8645_v5 = vrot.slane %v19847_v18, 1  ;;  %v8659_v18 = vrot.slane %v19848_v44, 1  ;;  %v7050_v44 = vrot.slane %v11446_v45, %v19340_v49 }
 0x268   :  { %19844 = vst [vmem:[#allocation22_spill] sm:$0xff] %v15127_v62  ;;  %19845 = vst [vmem:[#allocation157_spill] sm:$0xff] %v15129_v59 }
 0x269   :  { %19846 = vst [vmem:[#allocation156_spill] sm:$0xff] %v15131_v57  ;;  %v8646_v22 = vsel %vm3561_vm9, %v15101_v51, %v8645_v5  ;;  %v19849_v5 = vrot.slane %v15105_v29, 6  ;;  %v8660_v8 = vsel %vm3561_vm9, %v15119_v20, %v8659_v18  ;;  %v6926_v29 = vrot.slane %v11440_v16, %v19340_v49 }
 0x26a   :  { %v8648_v56 = vsel %vm3564_vm10, %v18856_v27, %v8646_v22  ;;  %v19850_v22 = vrot.slane %v15110_v48, 5  ;;  %v8662_v53 = vsel %vm3564_vm10, %v18859_v39, %v8660_v8  ;;  %v19854_v39 = vrot.slane %v15125_v21, 5 }
 0x26b   :  { %v8650_v33 = vsel %vm3567_vm11, %v19849_v5, %v8648_v56  ;;  %v19851_v56 = vrot.slane %v15112_v58, 4  ;;  %v19852_v5 = vrot.slane %v15123_v37, 6  ;;  %v8747_v17 = vrot.slane %v6926_v29, %v19340_v49 }
 0x26c   :  { %v8652_v27 = vsel %vm3570_vm12, %v19850_v22, %v8650_v33  ;;  %v192_v33 = vsel %vm11661_vm4, 0, %v191_v54  ;;  %v19853_v22 = vrot.slane %v15114_v9, 3  ;;  %v19857_v54 = vrot.slane %v15127_v62, 4 }
 0x26d   :  { %v8654_v18 = vsel %vm3573_vm13, %v19851_v56, %v8652_v27  ;;  %v8664_v25 = vsel %vm3567_vm11, %v19852_v5, %v8662_v53  ;;  %193 = vst [vmem:[#allocation2 + $0xc8] sm:$0x1] %v192_v33  ;;  %v712_v27 = vrot.slane %v14685_v4, 4  ;;  %v19855_v53 = vrot.slane %v15116_v52, 2 }
 0x26e   :  { %v8656_v8 = vsel %vm3576_vm14, %v19853_v22, %v8654_v18  ;;  %v8666_v16 = vsel %vm3570_vm12, %v19854_v39, %v8664_v25  ;;  %v8761_v18 = vrot.slane %v7050_v44, %v19340_v49  ;;  %v746_v5 = vrot.slane %v14692_v11, 4  ;;  %v1233_v22 = vld [vmem:[#allocation2 + $0x98] sm:$0x1] }
 0x26f   :  { %v15186_v45 = vsel %vm3579_vm15, %v19855_v53, %v8656_v8  ;;  %v8668_v56 = vsel %vm3573_vm13, %v19857_v54, %v8666_v16  ;;  %v19858_v25 = vrot.slane %v15129_v59, 3  ;;  %v8754_v4 = vrot.slane %v8747_v17, %v19340_v49  ;;  %v1247_v8 = vld [vmem:[#allocation2 + $0xb0] sm:$0x1] }
 0x270   :  { %19856 = vst [vmem:[#allocation65_spill] sm:$0xff] %v15186_v45  ;;  %v765_v39 = vshrl.u32 %v15052_v34, 16  ;;  %v768_v33 = vshll.u32 %v15052_v34, 16  ;;  %v19859_v53 = vrot.slane %v15131_v57, 2  ;;  %v8768_v44 = vrot.slane %v8761_v18, %v19340_v49 }
 0x271   :  { %v8670_v29 = vsel %vm3576_vm14, %v19858_v25, %v8668_v56  ;;  %v773_v11 = vshrl.u32 %v15054_v0, 16  ;;  %v776_v54 = vshll.u32 %v15054_v0, 16  ;;  %v15209_v17 = vunpack.c.l.b16 %v8754_v4 }
 0x272   :  { %v15202_v16 = vsel %vm3579_vm15, %v19859_v53, %v8670_v29  ;;  %v767_v25 = vrot.slane %v765_v39, 7  ;;  %v1234_v34 = vsel %vm11649_vm2, %v712_v27, %v1233_v22  ;;  %v15213_v52 = vunpack.c.l.b16 %v8768_v44  ;;  %v1257_v29 = vld [vmem:[#allocation2 + $0xc0] sm:$0xf]  ;;  %v19862_v39 = vld [vmem:[#allocation110_spill] sm:$0xff] }
 0x273   :  { %19860 = vst [vmem:[#allocation66_spill] sm:$0xff] %v15202_v16  ;;  %v8676_v56 = vpack.c.b16 %v15202_v16, %v15186_v45  ;;  %v775_v57 = vrot.slane %v773_v11, 7  ;;  %1235 = vst [vmem:[#allocation2 + $0x98] sm:$0x1] %v1234_v34  ;;  %v1248_v18 = vsel %vm11649_vm2, %v746_v5, %v1247_v8  ;;  %v19861_v0 = vrot.slane %v14858_v12, 7 }
 0x274   :  { %v8843_v4 = vrot.slane %v15209_v17, 1  ;;  %v10694_v27 = vpack.c.b16 %v14632_v15, %v19862_v39  ;;  %v770_v22 = vor.u32 %v768_v33, %v767_v25  ;;  %v771_v44 = vrot.slane %v767_v25, 4  ;;  %1249 = vst [vmem:[#allocation2 + $0xb0] sm:$0x1] %v1248_v18  ;;  %v1261_v8 = vld [vmem:[#allocation2 + $0xc8] sm:$0x1] }
 0x275   :  { %v3975_v53 = vsel %vm3561_vm9, %v19861_v0, %v14854_v23  ;;  %8683 = vrot.lane.b32.xlu0 %v8676_v56, %s11612_s9  ;;  %v8851_v11 = vrot.slane %v15213_v52, 1  ;;  %v778_v34 = vor.u32 %v776_v54, %v775_v57  ;;  %v780_v5 = vrot.slane %v775_v57, 4  ;;  %v19868_v39 = vld [vmem:[#allocation7_spill] sm:$0xff] }
 0x276   :  { %v15228_v16 = vsel %vm3579_vm15, %v8843_v4, %v15031_v6  ;;  %v1258_v56 = vsel %vm11696_vm8, %v770_v22, %v1257_v29  ;;  %v19863_v0 = vrot.slane %v14860_v43, 6  ;;  %v19864_v15 = vrot.slane %v14873_v55, 7  ;;  %v19869_v22 = vld [vmem:[#allocation72_spill] sm:$0xff] }
 0x277   :  { %v15241_v57 = vsel %vm3579_vm15, %v8851_v11, %v15046_v30  ;;  %v779_v6 = vsel %vm11687_vm7, %v771_v44, %v778_v34  ;;  %1259 = vst [vmem:[#allocation2 + $0xc0] sm:$0xf] %v1258_v56  ;;  %v1262_v54 = vsel %vm11649_vm2, %v780_v5, %v1261_v8  ;;  %v19866_v18 = vrot.slane %v14875_v13, 6  ;;  %v19871_v56 = vld [vmem:[#allocation87_spill] sm:$0xff] }
 0x278   :  { %v3976_v45 = vsel %vm3564_vm10, %v19863_v0, %v3975_v53  ;;  %v3983_v33 = vsel %vm3561_vm9, %v19864_v15, %v14871_v32  ;;  %19865 = vst [vmem:[#allocation67_spill] sm:$0xff] %v15241_v57  ;;  %v8871_v25 = vpack.c.b16 %v15241_v57, %v15228_v16  ;;  %1260 = vst.msk [vmem:[#allocation2 + $0xc4] sm:$0xf] %vm15_vm5, %v779_v6  ;;  %v4059_v29 = vrot.slane %v19644_v35, 1  ;;  %v19888_v57 = vld [vmem:[#allocation112_spill] sm:$0xff] }
 0x279   :  { %10699 = vrot.lane.b32.xlu0 %v10694_v27, %s11620_s14  ;;  %1263 = vst [vmem:[#allocation2 + $0xc8] sm:$0x1] %v1262_v54  ;;  %v3984_v30 = vsel %vm3564_vm10, %v19866_v18, %v3983_v33  ;;  %v19867_v53 = vrot.slane %v14862_v14, 5  ;;  %v10728_v44 = vpack.c.b16 %v19869_v22, %v19868_v39  ;;  %v19870_v27 = vrot.slane %v14877_v61, 5  ;;  %v19873_v33 = vld [vmem:[#allocation78_spill] sm:$0xff] }
 0x27a   :  { %8877 = vrot.lane.b32.xlu1 %v8871_v25, %s11615_s22  ;;  %v11398_v11 = vld.sshfl [vmem:[#allocation2 + $0x98] sm:$0x1 pattern:$0x75316420]  ;;  %v4061_v0 = vrot.slane %v19871_v56, 7  ;;  %v19872_v15 = vrot.slane %v14864_v42, 4  ;;  %v4060_v6 = vsel %vm3561_vm9, %v19873_v33, %v4059_v29 }
 0x27b   :  { %v3977_v4 = vsel %vm3567_vm11, %v19867_v53, %v3976_v45  ;;  %v3985_v34 = vsel %vm3567_vm11, %v19870_v27, %v3984_v30  ;;  %v11404_v5 = vld.sshfl [vmem:[#allocation2 + $0xb0] sm:$0x1 pattern:$0x75316420]  ;;  %v2289_v8 = vrot.slane %v11398_v11, %v19340_v49  ;;  %v19874_v25 = vrot.slane %v14879_v40, 4  ;;  %v19875_v53 = vld [vmem:[#allocation88_spill] sm:$0xff] }
 0x27c   :  { %v2413_v35 = vrot.slane %v11404_v5, %v19340_v49  ;;  %v3978_v45 = vsel %vm3570_vm12, %v19872_v15, %v3977_v4  ;;  %v4063_v39 = vrot.slane %v19875_v53, 6  ;;  %v19876_v11 = vrot.slane %v14866_v31, 3  ;;  %v19882_v53 = vld [vmem:[#allocation114_spill] sm:$0xff] }
 0x27d   :  { %v3897_v54 = vrot.slane %v2289_v8, %v19340_v49  ;;  %v3986_v18 = vsel %vm3570_vm12, %v19874_v25, %v3985_v34  ;;  %v4062_v29 = vsel %vm3564_vm10, %v4061_v0, %v4060_v6  ;;  %v19877_v5 = vrot.slane %v14881_v7, 3 }
 0x27e   :  { %10732 = vrot.lane.b32.xlu1 %v10728_v44, %s11621_s17  ;;  %v3911_v30 = vrot.slane %v2413_v35, %v19340_v49  ;;  %v3979_v4 = vsel %vm3573_vm13, %v19876_v11, %v3978_v45  ;;  %v19878_v44 = vld [vmem:[#allocation83_spill] sm:$0xff]  ;;  %v19879_v15 = vrot.slane %v14868_v60, 2  ;;  %v4064_v45 = vsel %vm3567_vm11, %v4063_v39, %v4062_v29  ;;  %v19886_v29 = vld [vmem:[#allocation129_spill] sm:$0xff] }
 0x27f   :  { %v3904_v22 = vrot.slane %v3897_v54, %v19340_v49  ;;  %v3987_v34 = vsel %vm3573_vm13, %v19877_v5, %v3986_v18  ;;  %v4065_v56 = vrot.slane %v19878_v44, 5  ;;  %v19880_v54 = vld [vmem:[#allocation113_spill] sm:$0xff]  ;;  %v19881_v25 = vrot.slane %v14883_v50, 2 }
 0x280   :  { %v3918_v27 = vrot.slane %v3911_v30, %v19340_v49  ;;  %v3980_v33 = vsel %vm3576_vm14, %v19879_v15, %v3979_v4  ;;  %v4073_v0 = vrot.slane %v19880_v54, 1  ;;  %v19884_v4 = vld [vmem:[#allocation137_spill] sm:$0xff] }
 0x281   :  { %v15288_v8 = vunpack.c.l.b16 %v3904_v22  ;;  %v3988_v18 = vsel %vm3576_vm14, %v19881_v25, %v3987_v34  ;;  %v4067_v22 = vrot.slane %v19882_v53, 4  ;;  %v4075_v5 = vrot.slane %v19884_v4, 7  ;;  %v19887_v15 = vld [vmem:[#allocation117_spill] sm:$0xff]  ;;  %v135_v4 = vld [vmem:[#allocation2 + $0x198] sm:$0x1] }
 0x282   :  { %v15291_v35 = vunpack.c.l.b16 %v3918_v27  ;;  %v4066_v27 = vsel %vm3570_vm12, %v4065_v56, %v4064_v45  ;;  %v4074_v44 = vsel %vm3561_vm9, %v19886_v29, %v4073_v0  ;;  %v4069_v25 = vrot.slane %v19887_v15, 3 }
 0x283   :  { %v3981_v6 = vrot.slane %v15288_v8, 1  ;;  %v4077_v53 = vrot.slane %v19888_v57, 6  ;;  %v4076_v56 = vsel %vm3564_vm10, %v4075_v5, %v4074_v44  ;;  %v4071_v45 = vrot.slane %v14971_v24, 2  ;;  %v19891_v57 = vld [vmem:[#allocation131_spill] sm:$0xff]  ;;  %v19892_v5 = vld [vmem:[#allocation76_spill] sm:$0xff] }
 0x284   :  { %v3989_v30 = vrot.slane %v15291_v35, 1  ;;  %v4083_v29 = vrot.slane %v19891_v57, 3  ;;  %v5851_v44 = vpack.c.b16 %v15008_v63, %v19892_v5  ;;  %v19897_v57 = vld [vmem:[#allocation139_spill] sm:$0xff] }
 0x285   :  { %v15305_v11 = vsel %vm3579_vm15, %v3981_v6, %v3980_v33  ;;  %v4068_v33 = vsel %vm3573_vm13, %v4067_v22, %v4066_v27  ;;  %v19889_v6 = vld [vmem:[#allocation130_spill] sm:$0xff]  ;;  %v4078_v0 = vsel %vm3567_vm11, %v4077_v53, %v4076_v56  ;;  %v4085_v22 = vrot.slane %v14976_v28, 2  ;;  %v233_v27 = vld [vmem:[#allocation2 + $0x170] sm:$0x1] }
 0x286   :  { %19883 = vst [vmem:[#allocation57_spill] sm:$0xff] %v15305_v11  ;;  %v15310_v39 = vsel %vm3579_vm15, %v3989_v30, %v3988_v18  ;;  %v4079_v54 = vrot.slane %v19889_v6, 5  ;;  %v4070_v18 = vsel %vm3576_vm14, %v4069_v25, %v4068_v33  ;;  %v239_v6 = vld [vmem:[#allocation2 + $0x188] sm:$0x1]  ;;  %v245_v25 = vld [vmem:[#allocation2 + $0x1a0] sm:$0x1] }
 0x287   :  { %19885 = vst [vmem:[#allocation68_spill] sm:$0xff] %v15310_v39  ;;  %v3994_v34 = vpack.c.b16 %v15310_v39, %v15305_v11  ;;  %v19890_v11 = vld [vmem:[#allocation136_spill] sm:$0xff]  ;;  %v136_v28 = vsel %vm11649_vm2, 0, %v135_v4  ;;  %v234_v63 = vsel %vm11661_vm4, 0, %v233_v27  ;;  %v246_v4 = vsel %vm11661_vm4, 0, %v245_v25 }
 0x288   :  { %v4080_v30 = vsel %vm3570_vm12, %v4079_v54, %v4078_v0  ;;  %v4081_v15 = vrot.slane %v19890_v11, 4  ;;  %v313_v54 = vld [vmem:[%s18361_s0 + $0x1f0] sm:$0xff]  ;;  %v314_v33 = vld [vmem:[%s18361_s0 + $0x1f8] sm:$0xff]  ;;  %137 = vst [vmem:[#allocation2 + $0x198] sm:$0x1] %v136_v28  ;;  %v1018_v28 = vrot.slane %v14806_v41, 4 }
 0x289   :  { %4001 = vrot.lane.b32.xlu0 %v3994_v34, %s11615_s22  ;;  %v15330_v34 = vsel %vm3579_vm15, %v4071_v45, %v4070_v18  ;;  %v240_v45 = vsel %vm11661_vm4, 0, %v239_v6  ;;  %235 = vst [vmem:[#allocation2 + $0x170] sm:$0x1] %v234_v63  ;;  %v11543_v18 = vpack.c.bf16 %v313_v54, %v313_v54  ;;  %247 = vst [vmem:[#allocation2 + $0x1a0] sm:$0x1] %v246_v4  ;;  %v8937_v25 = vrot.slane %v19897_v57, 1 }
 0x28a   :  { %v4082_v24 = vsel %vm3573_vm13, %v4081_v15, %v4080_v30  ;;  %241 = vst [vmem:[#allocation2 + $0x188] sm:$0x1] %v240_v45  ;;  %v11544_v0 = vpack.c.bf16 %v314_v33, %v314_v33  ;;  %v19894_v30 = vld [vmem:[#allocation5_spill] sm:$0xff]  ;;  %v19895_v15 = vld [vmem:[#allocation168_spill] sm:$0xff]  ;;  %v8939_v4 = vrot.slane %v14552_v47, 7  ;;  %v19899_v47 = vrot.slane %v15121_v36, 7 }
 0x28b   :  { %v4084_v53 = vsel %vm3576_vm14, %v4083_v29, %v4082_v24  ;;  %v1037_v27 = vshrl.u32 %v11543_v18, 16  ;;  %v1040_v24 = vshll.u32 %v11543_v18, 16 }
 0x28c   :  { %v15345_v56 = vsel %vm3579_vm15, %v4085_v22, %v4084_v53  ;;  %v5876_v22 = vpack.c.b16 %v19895_v15, %v19894_v30  ;;  %v1045_v5 = vshrl.u32 %v11544_v0, 16  ;;  %v1048_v6 = vshll.u32 %v11544_v0, 16 }
 0x28d   :  { %19893 = vst [vmem:[#allocation69_spill] sm:$0xff] %v15345_v56  ;;  %5856 = vrot.lane.b32.xlu0 %v5851_v44, %s11621_s17  ;;  %v4117_v29 = vpack.c.b16 %v15345_v56, %v15330_v34  ;;  %v19896_v44 = vld [vmem:[#allocation155_spill] sm:$0xff]  ;;  %v1039_v63 = vrot.slane %v1037_v27, 7 }
 0x28e   :  { %v984_v53 = vrot.slane %v19896_v44, 4  ;;  %v1047_v45 = vrot.slane %v1045_v5, 7  ;;  %v19898_v44 = vrot.slane %v15103_v10, 7  ;;  %v8861_v5 = vsel %vm3561_vm9, %v19899_v47, %v15119_v20  ;;  %v19907_v47 = vld [vmem:[#allocation134_spill] sm:$0xff] }
 0x28f   :  { %4123 = vrot.lane.b32.xlu1 %v4117_v29, %s11616_s23  ;;  %v1042_v54 = vor.u32 %v1040_v24, %v1039_v63  ;;  %v1043_v33 = vrot.slane %v1039_v63, 4  ;;  %v1369_v29 = vld [vmem:[#allocation2 + $0x198] sm:$0xf]  ;;  %v19900_v63 = vld [vmem:[#allocation90_spill] sm:$0xff] }
 0x290   :  { %v1050_v30 = vor.u32 %v1048_v6, %v1047_v45  ;;  %v1052_v18 = vrot.slane %v1047_v45, 4  ;;  %v1345_v15 = vld [vmem:[#allocation2 + $0x170] sm:$0x1]  ;;  %v8853_v41 = vsel %vm3561_vm9, %v19898_v44, %v15101_v51  ;;  %v1373_v24 = vld [vmem:[#allocation2 + $0x1a0] sm:$0x1]  ;;  %v8941_v45 = vrot.slane %v14497_v19, 6 }
 0x291   :  { %v1359_v0 = vld [vmem:[#allocation2 + $0x188] sm:$0x1]  ;;  %v1346_v57 = vsel %vm11649_vm2, %v984_v53, %v1345_v15  ;;  %v1370_v27 = vsel %vm11696_vm8, %v1042_v54, %v1369_v29  ;;  %v8943_v29 = vrot.slane %v14507_v2, 5  ;;  %v19905_v19 = vld [vmem:[#allocation127_spill] sm:$0xff] }
 0x292   :  { %v1051_v6 = vsel %vm11687_vm7, %v1043_v33, %v1050_v30  ;;  %1347 = vst [vmem:[#allocation2 + $0x170] sm:$0x1] %v1346_v57  ;;  %1371 = vst [vmem:[#allocation2 + $0x198] sm:$0xf] %v1370_v27  ;;  %v1374_v53 = vsel %vm11649_vm2, %v1052_v18, %v1373_v24  ;;  %v8945_v33 = vrot.slane %v14511_v38, 4  ;;  %v19901_v30 = vld [vmem:[#allocation133_spill] sm:$0xff] }
 0x293   :  { %5880 = vrot.lane.b32.xlu1 %v5876_v22, %s11622_s27  ;;  %v1360_v22 = vsel %vm11649_vm2, %v1018_v28, %v1359_v0  ;;  %v8938_v28 = vsel %vm3561_vm9, %v19900_v63, %v8937_v25  ;;  %1372 = vst.msk [vmem:[#allocation2 + $0x19c] sm:$0xf] %vm15_vm5, %v1051_v6  ;;  %1375 = vst [vmem:[#allocation2 + $0x1a0] sm:$0x1] %v1374_v53  ;;  %v8947_v15 = vrot.slane %v19901_v30, 3  ;;  %v19902_v0 = vld [vmem:[#allocation53_spill] sm:$0xff] }
 0x294   :  { %1361 = vst [vmem:[#allocation2 + $0x188] sm:$0x1] %v1360_v22  ;;  %v8940_v54 = vsel %vm3564_vm10, %v8939_v4, %v8938_v28  ;;  %v19903_v44 = vrot.slane %v19902_v0, 6  ;;  %v19904_v25 = vld [vmem:[#allocation120_spill] sm:$0xff]  ;;  %v8953_v27 = vrot.slane %v19905_v19, 7  ;;  %v19906_v24 = vrot.slane %v15123_v37, 6 }
 0x295   :  { %v8942_v57 = vsel %vm3567_vm11, %v8941_v45, %v8940_v54  ;;  %v8951_v22 = vrot.slane %v19904_v25, 1  ;;  %v8955_v38 = vrot.slane %v19907_v47, 6  ;;  %v19908_v6 = vld [vmem:[#allocation141_spill] sm:$0xff]  ;;  %v19909_v28 = vld [vmem:[#allocation140_spill] sm:$0xff]  ;;  %v19910_v54 = vld [vmem:[#allocation135_spill] sm:$0xff] }
 0x296   :  { %v8854_v18 = vsel %vm3564_vm10, %v19903_v44, %v8853_v41  ;;  %v8862_v4 = vsel %vm3564_vm10, %v19906_v24, %v8861_v5  ;;  %v8944_v2 = vsel %vm3570_vm12, %v8943_v29, %v8942_v57  ;;  %v8957_v53 = vrot.slane %v19908_v6, 5  ;;  %v19911_v5 = vld [vmem:[#allocation142_spill] sm:$0xff] }
 0x297   :  { %v8946_v63 = vsel %vm3573_vm13, %v8945_v33, %v8944_v2  ;;  %v8949_v41 = vrot.slane %v15209_v17, 2  ;;  %v8952_v45 = vsel %vm3561_vm9, %v19909_v28, %v8951_v22  ;;  %v8959_v30 = vrot.slane %v19910_v54, 4  ;;  %v120_v28 = vld [vmem:[#allocation2 + $0x15c] sm:$0x1] }
 0x298   :  { %v8948_v44 = vsel %vm3576_vm14, %v8947_v15, %v8946_v63  ;;  %v8954_v19 = vsel %vm3564_vm10, %v8953_v27, %v8952_v45  ;;  %v8961_v24 = vrot.slane %v19911_v5, 3  ;;  %v19912_v29 = vrot.slane %v15110_v48, 5 }
 0x299   :  { %v8956_v6 = vsel %vm3567_vm11, %v8955_v38, %v8954_v19  ;;  %v8963_v33 = vrot.slane %v15213_v52, 2  ;;  %v11452_v17 = vld.sshfl [vmem:[#allocation2 + $0x170] sm:$0x1 pattern:$0x75316420]  ;;  %v19913_v2 = vrot.slane %v15125_v21, 5  ;;  %v15421_v63 = vsel %vm3579_vm15, %v8949_v41, %v8948_v44 }
 0x29a   :  { %v8855_v57 = vsel %vm3567_vm11, %v19912_v29, %v8854_v18  ;;  %v8958_v54 = vsel %vm3570_vm12, %v8957_v53, %v8956_v6  ;;  %v7174_v27 = vrot.slane %v11452_v17, %v19340_v49  ;;  %v19914_v19 = vrot.slane %v15112_v58, 4 }
 0x29b   :  { %v8863_v22 = vsel %vm3567_vm11, %v19913_v2, %v8862_v4  ;;  %v11458_v15 = vld.sshfl [vmem:[#allocation2 + $0x188] sm:$0x1 pattern:$0x75316420]  ;;  %v8960_v45 = vsel %vm3573_vm13, %v8959_v30, %v8958_v54  ;;  %v19915_v6 = vrot.slane %v15127_v62, 4  ;;  %v19917_v44 = vrot.slane %v15114_v9, 3 }
 0x29c   :  { %v7298_v18 = vrot.slane %v11458_v15, %v19340_v49  ;;  %v8856_v52 = vsel %vm3570_vm12, %v19914_v19, %v8855_v57  ;;  %v8962_v38 = vsel %vm3576_vm14, %v8961_v24, %v8960_v45  ;;  %v8775_v4 = vrot.slane %v7174_v27, %v19340_v49  ;;  %v19920_v15 = vld [vmem:[#allocation84_spill] sm:$0xff] }
 0x29d   :  { %v8864_v53 = vsel %vm3570_vm12, %v19915_v6, %v8863_v22  ;;  %v15434_v29 = vsel %vm3579_vm15, %v8963_v33, %v8962_v38  ;;  %v8857_v24 = vsel %vm3573_vm13, %v19917_v44, %v8856_v52  ;;  %v4087_v57 = vrot.slane %v14854_v23, 1  ;;  %v19919_v22 = vld [vmem:[#allocation167_spill] sm:$0xff]  ;;  %v19921_v19 = vld [vmem:[#allocation16_spill] sm:$0xff] }
 0x29e   :  { %19916 = vst [vmem:[#allocation70_spill] sm:$0xff] %v15434_v29  ;;  %v8789_v41 = vrot.slane %v7298_v18, %v19340_v49  ;;  %v8995_v54 = vpack.c.b16 %v15434_v29, %v15421_v63  ;;  %v8782_v30 = vrot.slane %v8775_v4, %v19340_v49  ;;  %v19918_v2 = vrot.slane %v15129_v59, 3 }
 0x29f   :  { %v10754_v27 = vpack.c.b16 %v19920_v15, %v19919_v22  ;;  %v19922_v38 = vrot.slane %v19921_v19, 2  ;;  %v4089_v4 = vrot.slane %v14860_v43, 7  ;;  %v4093_v15 = vrot.slane %v14864_v42, 5  ;;  %v276_v42 = vld [vmem:[%s18361_s0 + $0xc8] sm:$0xff] }
 0x2a0   :  { %v8796_v17 = vrot.slane %v8789_v41, %v19340_v49  ;;  %v8865_v33 = vsel %vm3573_vm13, %v19918_v2, %v8864_v53  ;;  %9001 = vrot.lane.b32.xlu1 %v8995_v54, %s11616_s23  ;;  %v15451_v45 = vunpack.c.l.b16 %v8782_v30  ;;  %v19923_v41 = vld [vmem:[#allocation156_spill] sm:$0xff]  ;;  %v4088_v54 = vsel %vm3561_vm9, %v14858_v12, %v4087_v57 }
 0x2a1   :  { %v8858_v52 = vsel %vm3576_vm14, %v19922_v38, %v8857_v24  ;;  %v19924_v44 = vrot.slane %v19923_v41, 2  ;;  %v4091_v24 = vrot.slane %v14862_v14, 6  ;;  %v4090_v22 = vsel %vm3564_vm10, %v4089_v4, %v4088_v54 }
 0x2a2   :  { %v15453_v18 = vunpack.c.l.b16 %v8796_v17  ;;  %v8859_v6 = vrot.slane %v15451_v45, 1  ;;  %v4095_v57 = vrot.slane %v14866_v31, 4  ;;  %v4103_v54 = vrot.slane %v14875_v13, 7 }
 0x2a3   :  { %v8866_v53 = vsel %vm3576_vm14, %v19924_v44, %v8865_v33  ;;  %v4097_v44 = vrot.slane %v14868_v60, 3  ;;  %v78_v60 = vld [vmem:[#allocation2 + $0xb4] sm:$0x1] }
 0x2a4   :  { %v8867_v30 = vrot.slane %v15453_v18, 1  ;;  %10758 = vrot.lane.b32.xlu1 %v10754_v27, %s11622_s27  ;;  %v15468_v17 = vsel %vm3579_vm15, %v8859_v6, %v8858_v52  ;;  %v19927_v27 = vld [vmem:[#allocation79_spill] sm:$0xff]  ;;  %v4092_v52 = vsel %vm3567_vm11, %v4091_v24, %v4090_v22 }
 0x2a5   :  { %19925 = vst [vmem:[#allocation94_spill] sm:$0xff] %v15468_v17  ;;  %v10729_v38 = vpack.c.b16 %v15228_v16, %v19927_v27  ;;  %v4094_v6 = vsel %vm3570_vm12, %v4093_v15, %v4092_v52  ;;  %v4105_v16 = vrot.slane %v14877_v61, 6  ;;  %v4107_v15 = vrot.slane %v14879_v40, 5 }
 0x2a6   :  { %v15472_v2 = vsel %vm3579_vm15, %v8867_v30, %v8866_v53  ;;  %v4096_v4 = vsel %vm3573_vm13, %v4095_v57, %v4094_v6  ;;  %v4101_v53 = vrot.slane %v14871_v32, 1  ;;  %v4099_v30 = vrot.slane %v15288_v8, 2  ;;  %v267_v8 = vld [vmem:[%s18361_s0 + $0x80] sm:$0xff] }
 0x2a7   :  { %19926 = vst [vmem:[#allocation71_spill] sm:$0xff] %v15472_v2  ;;  %v8872_v33 = vpack.c.b16 %v15472_v2, %v15468_v17  ;;  %v4098_v24 = vsel %vm3576_vm14, %v4097_v44, %v4096_v4  ;;  %v4109_v27 = vrot.slane %v14881_v7, 4  ;;  %v4111_v52 = vrot.slane %v14883_v50, 3 }
 0x2a8   :  { %v4113_v6 = vrot.slane %v15291_v35, 2  ;;  %v15505_v44 = vsel %vm3579_vm15, %v4099_v30, %v4098_v24  ;;  %v272_v30 = vld [vmem:[%s18361_s0 + $0xa8] sm:$0xff] }
 0x2a9   :  { %8879 = vrot.lane.b32.xlu0 %v8872_v33, %s11615_s22  ;;  %v4102_v33 = vsel %vm3561_vm9, %v14873_v55, %v4101_v53  ;;  %19928 = vst [vmem:[#allocation95_spill] sm:$0xff] %v15505_v44  ;;  %v60_v53 = vld [vmem:[#allocation2 + $0x6c] sm:$0x1] }
 0x2aa   :  { %v4104_v22 = vsel %vm3564_vm10, %v4103_v54, %v4102_v33  ;;  %v66_v33 = vld [vmem:[#allocation2 + $0x84] sm:$0x1] }
 0x2ab   :  { %v4106_v57 = vsel %vm3567_vm11, %v4105_v16, %v4104_v22  ;;  %v268_v16 = vld [vmem:[%s18361_s0 + $0x88] sm:$0xff]  ;;  %v271_v22 = vld [vmem:[%s18361_s0 + $0xa0] sm:$0xff] }
 0x2ad   :  { %10734 = vrot.lane.b32.xlu0 %v10729_v38, %s11621_s17  ;;  %v4108_v38 = vsel %vm3570_vm12, %v4107_v15, %v4106_v57  ;;  %v11497_v15 = vpack.c.bf16 %v267_v8, %v267_v8  ;;  %v11498_v8 = vpack.c.bf16 %v268_v16, %v268_v16 }
 0x2ae   :  { %v4110_v4 = vsel %vm3573_vm13, %v4109_v27, %v4108_v38  ;;  %v61_v27 = vsel %vm11649_vm2, 0, %v60_v53  ;;  %v11501_v38 = vpack.c.bf16 %v271_v22, %v271_v22  ;;  %v19932_v22 = vld [vmem:[#allocation77_spill] sm:$0xff] }
 0x2af   :  { %v4112_v54 = vsel %vm3576_vm14, %v4111_v52, %v4110_v4  ;;  %62 = vst [vmem:[#allocation2 + $0x6c] sm:$0x1] %v61_v27  ;;  %v67_v52 = vsel %vm11649_vm2, 0, %v66_v33  ;;  %v646_v4 = vshrl.u32 %v11497_v15, 16  ;;  %v654_v17 = vshrl.u32 %v11498_v8, 16 }
 0x2b0   :  { %v15516_v35 = vsel %vm3579_vm15, %v4113_v6, %v4112_v54  ;;  %68 = vst [vmem:[#allocation2 + $0x84] sm:$0x1] %v67_v52  ;;  %v11502_v6 = vpack.c.bf16 %v272_v30, %v272_v30  ;;  %v649_v54 = vshll.u32 %v11497_v15, 16  ;;  %v680_v50 = vshrl.u32 %v11501_v38, 16 }
 0x2b1   :  { %19929 = vst [vmem:[#allocation96_spill] sm:$0xff] %v15516_v35  ;;  %v4118_v24 = vpack.c.b16 %v15516_v35, %v15505_v44  ;;  %v657_v35 = vshll.u32 %v11498_v8, 16  ;;  %v648_v7 = vrot.slane %v646_v4, 7  ;;  %v683_v57 = vshll.u32 %v11501_v38, 16 }
 0x2b2   :  { %v688_v56 = vshrl.u32 %v11502_v6, 16  ;;  %v15530_v44 = vrot.slane %v654_v17, 7  ;;  %v682_v53 = vrot.slane %v680_v50, 7  ;;  %v691_v27 = vshll.u32 %v11502_v6, 16 }
 0x2b3   :  { %4125 = vrot.lane.b32.xlu0 %v4118_v24, %s11616_s23  ;;  %v651_v40 = vor.u32 %v649_v54, %v648_v7  ;;  %v652_v33 = vrot.slane %v648_v7, 4  ;;  %v5877_v24 = vpack.c.b16 %v15330_v34, %v19932_v22  ;;  %v8965_v17 = vrot.slane %v15101_v51, 1 }
 0x2b4   :  { %19930 = vst [vmem:[#allocation92_spill] sm:$0xff] %v15530_v44  ;;  %v15532_v16 = vrot.slane %v688_v56, 7  ;;  %v659_v30 = vor.u32 %v657_v35, %v15530_v44  ;;  %v685_v15 = vor.u32 %v683_v57, %v682_v53  ;;  %v686_v52 = vrot.slane %v682_v53, 4 }
 0x2b5   :  { %v8967_v50 = vrot.slane %v19902_v0, 7  ;;  %v8969_v7 = vrot.slane %v15110_v48, 6  ;;  %v8971_v57 = vrot.slane %v15112_v58, 5  ;;  %v8966_v54 = vsel %vm3561_vm9, %v15103_v10, %v8965_v17  ;;  %v114_v10 = vld [vmem:[#allocation2 + $0x144] sm:$0x1] }
 0x2b6   :  { %19931 = vst [vmem:[#allocation97_spill] sm:$0xff] %v15532_v16  ;;  %v693_v8 = vor.u32 %v691_v27, %v15532_v16  ;;  %v1208_v4 = vld [vmem:[#allocation2 + $0x6c] sm:$0xf]  ;;  %v660_v56 = vsel %vm11687_vm7, %v652_v33, %v659_v30  ;;  %v8973_v53 = vrot.slane %v15114_v9, 4  ;;  %v19933_v27 = vld [vmem:[#allocation45_spill] sm:$0xff]  ;;  %v8979_v22 = vrot.slane %v15119_v20, 1 }
 0x2b7   :  { %5882 = vrot.lane.b32.xlu0 %v5877_v24, %s11622_s27  ;;  %v1209_v34 = vsel %vm11696_vm8, %v651_v40, %v1208_v4  ;;  %v1222_v35 = vld [vmem:[#allocation2 + $0x84] sm:$0xf]  ;;  %1211 = vst.msk [vmem:[#allocation2 + $0x70] sm:$0xf] %vm15_vm5, %v660_v56  ;;  %v3560_v33 = vrot.slane %v19933_v27, 7  ;;  %v8968_v40 = vsel %vm3564_vm10, %v8967_v50, %v8966_v54  ;;  %v8981_v24 = vrot.slane %v15123_v37, 7 }
 0x2b8   :  { %v694_v38 = vsel %vm11687_vm7, %v686_v52, %v693_v8  ;;  %1210 = vst [vmem:[#allocation2 + $0x6c] sm:$0xf] %v1209_v34  ;;  %v1223_v6 = vsel %vm11696_vm8, %v685_v15, %v1222_v35  ;;  %v8970_v30 = vsel %vm3567_vm11, %v8969_v7, %v8968_v40  ;;  %v8975_v15 = vrot.slane %v19921_v19, 3  ;;  %v19934_v50 = vld [vmem:[#allocation46_spill] sm:$0xff] }
 0x2b9   :  { %1224 = vst [vmem:[#allocation2 + $0x84] sm:$0xf] %v1223_v6  ;;  %1225 = vst.msk [vmem:[#allocation2 + $0x88] sm:$0xf] %vm15_vm5, %v694_v38  ;;  %v8983_v52 = vrot.slane %v15125_v21, 6  ;;  %v8985_v8 = vrot.slane %v15127_v62, 5  ;;  %v8972_v4 = vsel %vm3570_vm12, %v8971_v57, %v8970_v30  ;;  %v8980_v17 = vsel %vm3561_vm9, %v15121_v36, %v8979_v22 }
 0x2ba   :  { %v8987_v56 = vrot.slane %v15129_v59, 4  ;;  %v3563_v34 = vrot.slane %v19934_v50, 6  ;;  %v8974_v35 = vsel %vm3573_vm13, %v8973_v53, %v8972_v4  ;;  %v8982_v38 = vsel %vm3564_vm10, %v8981_v24, %v8980_v17  ;;  %v19935_v6 = vld [vmem:[#allocation43_spill] sm:$0xff]  ;;  %v19939_v4 = vld [vmem:[#allocation40_spill] sm:$0xff]  ;;  %v19940_v59 = vld [vmem:[#allocation41_spill] sm:$0xff] }
 0x2bb   :  { %v8989_v7 = vrot.slane %v19923_v41, 3  ;;  %v19936_v54 = vunpack.c.l.b16 %v19935_v6  ;;  %v8977_v40 = vrot.slane %v15451_v45, 2  ;;  %v8984_v57 = vsel %vm3567_vm11, %v8983_v52, %v8982_v38  ;;  %v19937_v30 = vld [vmem:[#allocation47_spill] sm:$0xff] }
 0x2bc   :  { %v19938_v62 = vld [vmem:[#allocation39_spill] sm:$0xff]  ;;  %v8976_v50 = vsel %vm3576_vm14, %v8975_v15, %v8974_v35  ;;  %v8986_v53 = vsel %vm3570_vm12, %v8985_v8, %v8984_v57  ;;  %v8991_v6 = vrot.slane %v15453_v18, 2 }
 0x2bd   :  { %v3562_v27 = vsel %vm3561_vm9, %v3560_v33, %v19936_v54  ;;  %v8988_v41 = vsel %vm3573_vm13, %v8987_v56, %v8986_v53  ;;  %v15592_v24 = vsel %vm3579_vm15, %v8977_v40, %v8976_v50 }
 0x2be   :  { %v15585_v33 = vsel %vm3564_vm10, %v3563_v34, %v3562_v27  ;;  %v11388_v45 = vld.sshfl [vmem:[#allocation2 + $0x70] sm:$0x33 pattern:$0x75316420]  ;;  %v8990_v54 = vsel %vm3576_vm14, %v8989_v7, %v8988_v41  ;;  %19941 = vst [vmem:[#allocation98_spill] sm:$0xff] %v15592_v24 }
 0x2bf   :  { %v11387_v17 = vld.sshfl [vmem:[#allocation2 + $0x6c] sm:$0x33 pattern:$0x75316420]  ;;  %v2073_v8 = vcombine.high %v11388_v45, %v11388_v45  ;;  %v2080_v57 = vrot.slane %v11388_v45, %v19340_v49  ;;  %v15599_v7 = vsel %vm3579_vm15, %v8991_v6, %v8990_v54 }
 0x2c0   :  { %v2049_v52 = vcombine.high %v11387_v17, %v11387_v17  ;;  %v2056_v38 = vrot.slane %v11387_v17, %v19340_v49  ;;  %v11393_v35 = vld.sshfl [vmem:[#allocation2 + $0x84] sm:$0x33 pattern:$0x75316420]  ;;  %19942 = vst [vmem:[#allocation99_spill] sm:$0xff] %v15599_v7  ;;  %v8996_v47 = vpack.c.b16 %v15599_v7, %v15592_v24 }
 0x2c1   :  { %v11394_v56 = vld.sshfl [vmem:[#allocation2 + $0x88] sm:$0x33 pattern:$0x75316420]  ;;  %v2173_v27 = vcombine.high %v11393_v35, %v11393_v35  ;;  %v2180_v53 = vrot.slane %v11393_v35, %v19340_v49  ;;  %v2087_v17 = vrot.slane %v2073_v8, %v19340_v49  ;;  %v2088_v45 = vcombine.high %v2080_v57, %v2080_v57 }
 0x2c2   :  { %v2063_v18 = vrot.slane %v2049_v52, %v19340_v49  ;;  %v2064_v34 = vcombine.high %v2056_v38, %v2056_v38  ;;  %v2197_v22 = vcombine.high %v11394_v56, %v11394_v56  ;;  %v2204_v41 = vrot.slane %v11394_v56, %v19340_v49  ;;  %9003 = vrot.lane.b32.xlu0 %v8996_v47, %s11616_s23 }
 0x2c3   :  { %v2187_v40 = vrot.slane %v2173_v27, %v19340_v49  ;;  %v4581_v50 = vrot.slane %v2056_v38, %v19340_v49  ;;  %v2089_v21 = vcombine.high %v2087_v17, %v2087_v17  ;;  %v2188_v52 = vcombine.high %v2180_v53, %v2180_v53 }
 0x2c4   :  { %v2065_v15 = vcombine.high %v2063_v18, %v2063_v18  ;;  %v2211_v37 = vrot.slane %v2197_v22, %v19340_v49  ;;  %v4595_v35 = vrot.slane %v2063_v18, %v19340_v49  ;;  %v2212_v8 = vcombine.high %v2204_v41, %v2204_v41 }
 0x2c5   :  { %v2189_v36 = vcombine.high %v2187_v40, %v2187_v40  ;;  %v4609_v20 = vrot.slane %v2064_v34, %v19340_v49  ;;  %v15608_v54 = vrot.slane %v4581_v50, %v19340_v49  ;;  %v4637_v27 = vrot.slane %v2080_v57, %v19340_v49 }
 0x2c6   :  { %v4623_v56 = vrot.slane %v2065_v15, %v19340_v49  ;;  %v2213_v6 = vcombine.high %v2211_v37, %v2211_v37  ;;  %v4651_v38 = vrot.slane %v2087_v17, %v19340_v49  ;;  %v4602_v61 = vrot.slane %v4595_v35, %v19340_v49 }
 0x2c7   :  { %v4616_v22 = vrot.slane %v4609_v20, %v19340_v49  ;;  %v4665_v18 = vrot.slane %v2088_v45, %v19340_v49  ;;  %v4679_v13 = vrot.slane %v2089_v21, %v19340_v49  ;;  %v4644_v15 = vrot.slane %v4637_v27, %v19340_v49 }
 0x2c8   :  { %v4630_v34 = vrot.slane %v4623_v56, %v19340_v49  ;;  %v4693_v55 = vrot.slane %v2180_v53, %v19340_v49  ;;  %v4707_v50 = vrot.slane %v2187_v40, %v19340_v49  ;;  %v4658_v57 = vrot.slane %v4651_v38, %v19340_v49 }
 0x2c9   :  { %v4672_v17 = vrot.slane %v4665_v18, %v19340_v49  ;;  %v4721_v35 = vrot.slane %v2188_v52, %v19340_v49  ;;  %v4735_v20 = vrot.slane %v2189_v36, %v19340_v49  ;;  %v4686_v45 = vrot.slane %v4679_v13, %v19340_v49 }
 0x2ca   :  { %v4714_v21 = vrot.slane %v4707_v50, %v19340_v49  ;;  %v4749_v56 = vrot.slane %v2204_v41, %v19340_v49  ;;  %v4763_v27 = vrot.slane %v2211_v37, %v19340_v49  ;;  %v4777_v38 = vrot.slane %v2212_v8, %v19340_v49 }
 0x2cb   :  { %v4728_v53 = vrot.slane %v4721_v35, %v19340_v49  ;;  %v4742_v40 = vrot.slane %v4735_v20, %v19340_v49  ;;  %v4791_v18 = vrot.slane %v2213_v6, %v19340_v49  ;;  %v15633_v52 = vrot.slane %v4693_v55, %v19340_v49 }
 0x2cc   :  { %v4756_v36 = vrot.slane %v4749_v56, %v19340_v49  ;;  %v4770_v13 = vrot.slane %v4763_v27, %v19340_v49  ;;  %v15637_v50 = vunpack.c.l.b16 %v4602_v61  ;;  %v4784_v41 = vrot.slane %v4777_v38, %v19340_v49 }
 0x2cd   :  { %v4798_v37 = vrot.slane %v4791_v18, %v19340_v49  ;;  %v15641_v35 = vunpack.c.l.b16 %v4616_v22  ;;  %v15643_v20 = vunpack.c.l.b16 %v4630_v34  ;;  %v18893_v8 = vunpack.c.l.b16 %v15608_v54 }
 0x2ce   :  { %19943 = vst [vmem:[#allocation100_spill] sm:$0xff] %v15637_v50  ;;  %v15646_v6 = vunpack.c.l.b16 %v4644_v15  ;;  %v15648_v55 = vunpack.c.l.b16 %v4658_v57  ;;  %v15650_v19 = vunpack.c.l.b16 %v4672_v17  ;;  %v15652_v56 = vunpack.c.l.b16 %v4686_v45 }
 0x2cf   :  { %19944 = vst [vmem:[#allocation25_spill] sm:$0xff] %v15641_v35  ;;  %19945 = vst [vmem:[#allocation20_spill] sm:$0xff] %v15643_v20  ;;  %v15654_v61 = vunpack.c.l.b16 %v4714_v21  ;;  %v15656_v27 = vunpack.c.l.b16 %v4728_v53  ;;  %v15658_v38 = vunpack.c.l.b16 %v4742_v40  ;;  %v15661_v34 = vunpack.c.l.b16 %v4756_v36 }
 0x2d0   :  { %19946 = vst [vmem:[#allocation13_spill] sm:$0xff] %v15646_v6  ;;  %19947 = vst [vmem:[#allocation23_spill] sm:$0xff] %v15648_v55  ;;  %v15663_v18 = vunpack.c.l.b16 %v4770_v13  ;;  %v15665_v15 = vunpack.c.l.b16 %v4784_v41  ;;  %v15667_v57 = vunpack.c.l.b16 %v4798_v37  ;;  %v5143_v17 = vrot.slane %v15637_v50, 7 }
 0x2d1   :  { %19948 = vst [vmem:[#allocation24_spill] sm:$0xff] %v15650_v19  ;;  %19949 = vst [vmem:[#allocation26_spill] sm:$0xff] %v15652_v56  ;;  %v5145_v45 = vrot.slane %v15641_v35, 6  ;;  %v5147_v21 = vrot.slane %v15643_v20, 5  ;;  %v5149_v53 = vrot.slane %v15646_v6, 4  ;;  %v5151_v40 = vrot.slane %v15648_v55, 3 }
 0x2d2   :  { %19950 = vst [vmem:[#allocation27_spill] sm:$0xff] %v15654_v61  ;;  %19951 = vst [vmem:[#allocation28_spill] sm:$0xff] %v15656_v27  ;;  %v5153_v22 = vrot.slane %v15650_v19, 2  ;;  %v5157_v36 = vrot.slane %v15654_v61, 7  ;;  %v5144_v13 = vsel %vm3561_vm9, %v5143_v17, %v18893_v8  ;;  %v5159_v41 = vrot.slane %v15656_v27, 6 }
 0x2d3   :  { %19952 = vst [vmem:[#allocation6_spill] sm:$0xff] %v15658_v38  ;;  %19953 = vst [vmem:[#allocation8_spill] sm:$0xff] %v15661_v34  ;;  %v5161_v37 = vrot.slane %v15658_v38, 5  ;;  %v5163_v32 = vrot.slane %v15661_v34, 4  ;;  %v5146_v9 = vsel %vm3564_vm10, %v5145_v45, %v5144_v13  ;;  %v5155_v58 = vrot.slane %v15652_v56, 1 }
 0x2d4   :  { %19954 = vst [vmem:[#allocation101_spill] sm:$0xff] %v15663_v18  ;;  %19955 = vst [vmem:[#allocation93_spill] sm:$0xff] %v15665_v15  ;;  %v19957_v48 = vunpack.c.l.b16 %v15633_v52  ;;  %v5165_v0 = vrot.slane %v15663_v18, 3  ;;  %v5148_v51 = vsel %vm3567_vm11, %v5147_v21, %v5146_v9  ;;  %v5167_v8 = vrot.slane %v15665_v15, 2  ;;  %v299_v9 = vld [vmem:[%s18361_s0 + $0x180] sm:$0xff] }
 0x2d5   :  { %19956 = vst [vmem:[#allocation73_spill] sm:$0xff] %v15667_v57  ;;  %v5150_v45 = vsel %vm3570_vm12, %v5149_v53, %v5148_v51  ;;  %v5169_v25 = vrot.slane %v15667_v57, 1  ;;  %v115_v53 = vsel %vm11649_vm2, 0, %v114_v10  ;;  %v121_v10 = vsel %vm11649_vm2, 0, %v120_v28 }
 0x2d6   :  { %v5158_v5 = vsel %vm3561_vm9, %v5157_v36, %v19957_v48  ;;  %v5152_v36 = vsel %vm3573_vm13, %v5151_v40, %v5150_v45  ;;  %116 = vst [vmem:[#allocation2 + $0x144] sm:$0x1] %v115_v53  ;;  %122 = vst [vmem:[#allocation2 + $0x15c] sm:$0x1] %v121_v10  ;;  %v11529_v48 = vpack.c.bf16 %v299_v9, %v299_v9 }
 0x2d7   :  { %v5160_v17 = vsel %vm3564_vm10, %v5159_v41, %v5158_v5  ;;  %v19958_v5 = vrot.slane %v19937_v30, 5  ;;  %v300_v41 = vld [vmem:[%s18361_s0 + $0x188] sm:$0xff]  ;;  %v11408_v28 = vld.sshfl [vmem:[#allocation2 + $0xc0] sm:$0x33 pattern:$0x75316420] }
 0x2d8   :  { %v5162_v13 = vsel %vm3567_vm11, %v5161_v37, %v5160_v17  ;;  %v303_v37 = vld [vmem:[%s18361_s0 + $0x1a0] sm:$0xff]  ;;  %v304_v30 = vld [vmem:[%s18361_s0 + $0x1a8] sm:$0xff]  ;;  %v19960_v17 = vld [vmem:[#allocation59_spill] sm:$0xff]  ;;  %v918_v53 = vshrl.u32 %v11529_v48, 16 }
 0x2d9   :  { %v3568_v21 = vsel %vm3567_vm11, %v19958_v5, %v15585_v33  ;;  %v5164_v51 = vsel %vm3570_vm12, %v5163_v32, %v5162_v13  ;;  %v19959_v33 = vld [vmem:[#allocation58_spill] sm:$0xff]  ;;  %v5154_v32 = vsel %vm3576_vm14, %v5153_v22, %v5152_v36  ;;  %v11533_v22 = vpack.c.bf16 %v303_v37, %v303_v37 }
 0x2da   :  { %v8445_v40 = vrot.slane %v19959_v33, 7  ;;  %v5166_v47 = vsel %vm3573_vm13, %v5165_v0, %v5164_v51  ;;  %v15726_v13 = vsel %vm3579_vm15, %v5155_v58, %v5154_v32  ;;  %v11530_v33 = vpack.c.bf16 %v300_v41, %v300_v41  ;;  %v19964_v41 = vld [vmem:[#allocation143_spill] sm:$0xff] }
 0x2db   :  { %v5168_v5 = vsel %vm3576_vm14, %v5167_v8, %v5166_v47  ;;  %v11534_v36 = vpack.c.bf16 %v304_v30, %v304_v30  ;;  %v19962_v0 = vrot.slane %v19938_v62, 4  ;;  %v921_v32 = vshll.u32 %v11529_v48, 16 }
 0x2dc   :  { %v15730_v7 = vsel %vm3579_vm15, %v5169_v25, %v5168_v5  ;;  %v926_v8 = vshrl.u32 %v11530_v33, 16  ;;  %v929_v47 = vshll.u32 %v11530_v33, 16  ;;  %v952_v9 = vshrl.u32 %v11533_v22, 16  ;;  %v19963_v25 = vld [vmem:[#allocation91_spill] sm:$0xff]  ;;  %v19968_v33 = vld [vmem:[#allocation85_spill] sm:$0xff] }
 0x2dd   :  { %19961 = vst [vmem:[#allocation108_spill] sm:$0xff] %v15730_v7  ;;  %v15735_v51 = vsel %vm3570_vm12, %v19962_v0, %v3568_v21  ;;  %v5201_v58 = vpack.c.b16 %v15730_v7, %v15726_v13  ;;  %v955_v10 = vshll.u32 %v11533_v22, 16  ;;  %v6022_v37 = vpack.c.b16 %v19964_v41, %v19963_v25  ;;  %v72_v21 = vld [vmem:[#allocation2 + $0x9c] sm:$0x1] }
 0x2de   :  { %v920_v30 = vrot.slane %v918_v53, 7  ;;  %v960_v62 = vshrl.u32 %v11534_v36, 16  ;;  %v963_v5 = vshll.u32 %v11534_v36, 16  ;;  %v19965_v0 = vld [vmem:[#allocation56_spill] sm:$0xff]  ;;  %v15747_v24 = vrot.slane %v926_v8, 7  ;;  %v279_v36 = vld [vmem:[%s18361_s0 + $0xe0] sm:$0xff] }
 0x2df   :  { %5207 = vrot.lane.b32.xlu1 %v5201_v58, %s11613_s5  ;;  %v19966_v45 = vunpack.c.l.b16 %v19965_v0  ;;  %v954_v48 = vrot.slane %v952_v9, 7  ;;  %v10755_v22 = vpack.c.b16 %v15421_v63, %v19968_v33  ;;  %v275_v58 = vld [vmem:[%s18361_s0 + $0xc0] sm:$0xff]  ;;  %v2483_v53 = vcombine.high %v11408_v28, %v11408_v28  ;;  %v84_v8 = vld [vmem:[#allocation2 + $0xcc] sm:$0x1]  ;;  %v1334_v31 = vld [vmem:[#allocation2 + $0x15c] sm:$0xf] }
 0x2e0   :  { %19967 = vst [vmem:[#allocation102_spill] sm:$0xff] %v15747_v24  ;;  %v923_v25 = vor.u32 %v921_v32, %v920_v30  ;;  %v924_v41 = vrot.slane %v920_v30, 4  ;;  %v15760_v9 = vrot.slane %v11408_v28, %v19340_v49  ;;  %v931_v63 = vor.u32 %v929_v47, %v15747_v24  ;;  %v280_v32 = vld [vmem:[%s18361_s0 + $0xe8] sm:$0xff] }
 0x2e1   :  { %v15745_v29 = vsel %vm3561_vm9, %v8445_v40, %v19966_v45  ;;  %v15757_v40 = vrot.slane %v960_v62, 7  ;;  %v1320_v45 = vld [vmem:[#allocation2 + $0x144] sm:$0xf]  ;;  %v957_v0 = vor.u32 %v955_v10, %v954_v48  ;;  %v958_v33 = vrot.slane %v954_v48, 4  ;;  %10760 = vrot.lane.b32.xlu0 %v10755_v22, %s11622_s27 }
 0x2e2   :  { %19970 = vst [vmem:[#allocation103_spill] sm:$0xff] %v15760_v9  ;;  %v15770_v30 = vld.sshfl [vmem:[#allocation2 + $0xc4] sm:$0x33 pattern:$0x75316420]  ;;  %v1321_v47 = vsel %vm11696_vm8, %v923_v25, %v1320_v45  ;;  %v73_v10 = vsel %vm11649_vm2, 0, %v72_v21  ;;  %v932_v48 = vsel %vm11687_vm7, %v924_v41, %v931_v63  ;;  %v11509_v21 = vpack.c.bf16 %v279_v36, %v279_v36 }
 0x2e3   :  { %19969 = vst [vmem:[#allocation105_spill] sm:$0xff] %v15757_v40  ;;  %6026 = vrot.lane.b32.xlu1 %v6022_v37, %s11623_s6  ;;  %v965_v28 = vor.u32 %v963_v5, %v15757_v40  ;;  %v79_v62 = vsel %vm11649_vm2, 0, %v78_v60  ;;  %1322 = vst [vmem:[#allocation2 + $0x144] sm:$0xf] %v1321_v47  ;;  %v1335_v22 = vsel %vm11696_vm8, %v957_v0, %v1334_v31  ;;  %v85_v37 = vsel %vm11649_vm2, 0, %v84_v8 }
 0x2e4   :  { %74 = vst [vmem:[#allocation2 + $0x9c] sm:$0x1] %v73_v10  ;;  %80 = vst [vmem:[#allocation2 + $0xb4] sm:$0x1] %v79_v62  ;;  %v11505_v5 = vpack.c.bf16 %v275_v58, %v275_v58  ;;  %v11506_v60 = vpack.c.bf16 %v276_v42, %v276_v42  ;;  %v11510_v41 = vpack.c.bf16 %v280_v32, %v280_v32  ;;  %v748_v42 = vshrl.u32 %v11509_v21, 16 }
 0x2e5   :  { %v966_v25 = vsel %vm11687_vm7, %v958_v33, %v965_v28  ;;  %1323 = vst.msk [vmem:[#allocation2 + $0x148] sm:$0xf] %vm15_vm5, %v932_v48  ;;  %1336 = vst [vmem:[#allocation2 + $0x15c] sm:$0xf] %v1335_v22  ;;  %v15792_v31 = vrot.slane %v2483_v53, %v19340_v49  ;;  %v2498_v0 = vcombine.high %v15760_v9, %v15760_v9  ;;  %v751_v32 = vshll.u32 %v11509_v21, 16 }
 0x2e6   :  { %86 = vst [vmem:[#allocation2 + $0xcc] sm:$0x1] %v85_v37  ;;  %v15789_v45 = vld.sshfl [vmem:[#allocation2 + $0xc8] sm:$0x1 pattern:$0x75316420]  ;;  %v15801_v53 = vrot.slane %v15770_v30, %v19340_v49 }
 0x2e7   :  { %1337 = vst.msk [vmem:[#allocation2 + $0x160] sm:$0xf] %vm15_vm5, %v966_v25  ;;  %v714_v58 = vshrl.u32 %v11505_v5, 16  ;;  %v717_v8 = vshll.u32 %v11505_v5, 16  ;;  %v722_v33 = vshrl.u32 %v11506_v60, 16  ;;  %v725_v28 = vshll.u32 %v11506_v60, 16 }
 0x2e8   :  { %v756_v47 = vshrl.u32 %v11510_v41, 16  ;;  %v759_v10 = vshll.u32 %v11510_v41, 16  ;;  %v15807_v22 = vrot.slane %v748_v42, 7  ;;  %v15816_v41 = vrot.slane %v2498_v0, %v19340_v49 }
 0x2e9   :  { %v716_v36 = vrot.slane %v714_v58, 7  ;;  %v15805_v48 = vrot.slane %v722_v33, 7 }
 0x2ea   :  { %v15811_v60 = vrot.slane %v756_v47, 7  ;;  %v11441_v58 = vld.sshfl [vmem:[#allocation2 + $0x144] sm:$0x33 pattern:$0x75316420] }
 0x2eb   :  { %19971 = vst [vmem:[#allocation104_spill] sm:$0xff] %v15805_v48  ;;  %v719_v5 = vor.u32 %v717_v8, %v716_v36  ;;  %v720_v25 = vrot.slane %v716_v36, 4  ;;  %v727_v62 = vor.u32 %v725_v28, %v15805_v48  ;;  %v6934_v63 = vcombine.high %v11441_v58, %v11441_v58  ;;  %v1236_v47 = vld [vmem:[#allocation2 + $0x9c] sm:$0xf] }
 0x2ec   :  { %19972 = vst [vmem:[#allocation106_spill] sm:$0xff] %v15811_v60  ;;  %v11442_v42 = vld.sshfl [vmem:[#allocation2 + $0x148] sm:$0x33 pattern:$0x75316420]  ;;  %v6941_v9 = vrot.slane %v11441_v58, %v19340_v49  ;;  %v15822_v8 = vor.u32 %v751_v32, %v15807_v22  ;;  %v15825_v36 = vor.u32 %v759_v10, %v15811_v60 }
 0x2ed   :  { %v11447_v37 = vld.sshfl [vmem:[#allocation2 + $0x15c] sm:$0x33 pattern:$0x75316420]  ;;  %v6958_v21 = vcombine.high %v11442_v42, %v11442_v42  ;;  %v6965_v0 = vrot.slane %v11442_v42, %v19340_v49  ;;  %v728_v28 = vsel %vm11687_vm7, %v720_v25, %v727_v62  ;;  %v1237_v33 = vsel %vm11696_vm8, %v719_v5, %v1236_v47 }
 0x2ee   :  { %v11448_v14 = vld.sshfl [vmem:[#allocation2 + $0x160] sm:$0x33 pattern:$0x75316420]  ;;  %v6948_v58 = vrot.slane %v6934_v63, %v19340_v49  ;;  %v6949_v43 = vcombine.high %v6941_v9, %v6941_v9  ;;  %v7058_v32 = vcombine.high %v11447_v37, %v11447_v37  ;;  %v7065_v12 = vrot.slane %v11447_v37, %v19340_v49  ;;  %1238 = vst [vmem:[#allocation2 + $0x9c] sm:$0xf] %v1237_v33 }
 0x2ef   :  { %1239 = vst.msk [vmem:[#allocation2 + $0xa0] sm:$0xf] %vm15_vm5, %v728_v28  ;;  %v6972_v10 = vrot.slane %v6958_v21, %v19340_v49  ;;  %v6973_v11 = vcombine.high %v6965_v0, %v6965_v0  ;;  %v7082_v42 = vcombine.high %v11448_v14, %v11448_v14  ;;  %v7089_v23 = vrot.slane %v11448_v14, %v19340_v49 }
 0x2f0   :  { %v6950_v62 = vcombine.high %v6948_v58, %v6948_v58  ;;  %v7072_v25 = vrot.slane %v7058_v32, %v19340_v49  ;;  %v7073_v5 = vcombine.high %v7065_v12, %v7065_v12  ;;  %v9459_v47 = vrot.slane %v6941_v9, %v19340_v49 }
 0x2f1   :  { %v6974_v63 = vcombine.high %v6972_v10, %v6972_v10  ;;  %v7096_v7 = vrot.slane %v7082_v42, %v19340_v49  ;;  %v7097_v60 = vcombine.high %v7089_v23, %v7089_v23  ;;  %v9473_v37 = vrot.slane %v6948_v58, %v19340_v49 }
 0x2f2   :  { %v7074_v33 = vcombine.high %v7072_v25, %v7072_v25  ;;  %v15842_v28 = vrot.slane %v9459_v47, %v19340_v49  ;;  %v9487_v21 = vrot.slane %v6949_v43, %v19340_v49  ;;  %v9501_v14 = vrot.slane %v6950_v62, %v19340_v49 }
 0x2f3   :  { %v7098_v48 = vcombine.high %v7096_v7, %v7096_v7  ;;  %v9480_v32 = vrot.slane %v9473_v37, %v19340_v49  ;;  %v9515_v40 = vrot.slane %v6965_v0, %v19340_v49  ;;  %v9529_v9 = vrot.slane %v6972_v10, %v19340_v49 }
 0x2f4   :  { %v9494_v42 = vrot.slane %v9487_v21, %v19340_v49  ;;  %v9508_v24 = vrot.slane %v9501_v14, %v19340_v49  ;;  %v9543_v58 = vrot.slane %v6973_v11, %v19340_v49  ;;  %v9557_v47 = vrot.slane %v6974_v63, %v19340_v49 }
 0x2f5   :  { %v9522_v2 = vrot.slane %v9515_v40, %v19340_v49  ;;  %v9536_v43 = vrot.slane %v9529_v9, %v19340_v49  ;;  %v9571_v62 = vrot.slane %v7065_v12, %v19340_v49  ;;  %v9585_v37 = vrot.slane %v7072_v25, %v19340_v49 }
 0x2f6   :  { %v9550_v0 = vrot.slane %v9543_v58, %v19340_v49  ;;  %v9564_v10 = vrot.slane %v9557_v47, %v19340_v49  ;;  %v9599_v21 = vrot.slane %v7073_v5, %v19340_v49  ;;  %v9613_v14 = vrot.slane %v7074_v33, %v19340_v49 }
 0x2f7   :  { %v15862_v11 = vrot.slane %v9571_v62, %v19340_v49  ;;  %v9592_v63 = vrot.slane %v9585_v37, %v19340_v49  ;;  %v9627_v40 = vrot.slane %v7089_v23, %v19340_v49  ;;  %v9641_v9 = vrot.slane %v7096_v7, %v19340_v49 }
 0x2f8   :  { %v9606_v12 = vrot.slane %v9599_v21, %v19340_v49  ;;  %v9620_v25 = vrot.slane %v9613_v14, %v19340_v49  ;;  %v9655_v58 = vrot.slane %v7097_v60, %v19340_v49  ;;  %v9669_v47 = vrot.slane %v7098_v48, %v19340_v49 }
 0x2f9   :  { %v9634_v5 = vrot.slane %v9627_v40, %v19340_v49  ;;  %v9648_v33 = vrot.slane %v9641_v9, %v19340_v49  ;;  %v15874_v39 = vunpack.c.l.b16 %v9480_v32  ;;  %v15878_v37 = vunpack.c.l.b16 %v9494_v42 }
 0x2fa   :  { %v9662_v23 = vrot.slane %v9655_v58, %v19340_v49  ;;  %v9676_v7 = vrot.slane %v9669_v47, %v19340_v49  ;;  %v15880_v21 = vunpack.c.l.b16 %v9508_v24  ;;  %v15882_v14 = vunpack.c.l.b16 %v9522_v2 }
 0x2fb   :  { %19973 = vst [vmem:[#allocation107_spill] sm:$0xff] %v15874_v39  ;;  %19974 = vst [vmem:[#allocation32_spill] sm:$0xff] %v15878_v37  ;;  %v15884_v60 = vunpack.c.l.b16 %v9536_v43  ;;  %v15886_v48 = vunpack.c.l.b16 %v9550_v0  ;;  %v15888_v40 = vunpack.c.l.b16 %v9564_v10  ;;  %v15891_v32 = vunpack.c.l.b16 %v9592_v63 }
 0x2fc   :  { %19975 = vst [vmem:[#allocation55_spill] sm:$0xff] %v15880_v21  ;;  %19976 = vst [vmem:[#allocation9_spill] sm:$0xff] %v15882_v14  ;;  %v15893_v62 = vunpack.c.l.b16 %v9606_v12  ;;  %v15895_v58 = vunpack.c.l.b16 %v9620_v25  ;;  %v15897_v42 = vunpack.c.l.b16 %v9634_v5  ;;  %v15899_v24 = vunpack.c.l.b16 %v9648_v33  ;;  %v11399_v12 = vld.sshfl [vmem:[#allocation2 + $0x9c] sm:$0x33 pattern:$0x75316420] }
 0x2fd   :  { %19977 = vst [vmem:[#allocation34_spill] sm:$0xff] %v15884_v60  ;;  %19978 = vst [vmem:[#allocation38_spill] sm:$0xff] %v15886_v48  ;;  %v15901_v2 = vunpack.c.l.b16 %v9662_v23  ;;  %v15903_v43 = vunpack.c.l.b16 %v9676_v7  ;;  %v10021_v0 = vrot.slane %v15874_v39, 7  ;;  %v10023_v10 = vrot.slane %v15878_v37, 6 }
 0x2fe   :  { %19979 = vst [vmem:[#allocation75_spill] sm:$0xff] %v15888_v40  ;;  %19980 = vst [vmem:[#allocation110_spill] sm:$0xff] %v15891_v32  ;;  %v10025_v47 = vrot.slane %v15880_v21, 5  ;;  %v10027_v63 = vrot.slane %v15882_v14, 4  ;;  %v10029_v25 = vrot.slane %v15884_v60, 3  ;;  %v10031_v5 = vrot.slane %v15886_v48, 2 }
 0x2ff   :  { %19981 = vst [vmem:[#allocation7_spill] sm:$0xff] %v15893_v62  ;;  %19982 = vst [vmem:[#allocation72_spill] sm:$0xff] %v15895_v58  ;;  %v10033_v33 = vrot.slane %v15888_v40, 1  ;;  %v10035_v23 = vrot.slane %v15891_v32, 7  ;;  %v19987_v7 = vunpack.c.l.b16 %v15842_v28  ;;  %v10037_v16 = vrot.slane %v15893_v62, 6 }
 0x300   :  { %19983 = vst [vmem:[#allocation87_spill] sm:$0xff] %v15897_v42  ;;  %19984 = vst [vmem:[#allocation78_spill] sm:$0xff] %v15899_v24  ;;  %v10039_v44 = vrot.slane %v15895_v58, 5  ;;  %v10041_v3 = vrot.slane %v15897_v42, 4  ;;  %v1250_v14 = vld [vmem:[#allocation2 + $0xb4] sm:$0xf]  ;;  %v19988_v60 = vunpack.c.l.b16 %v15862_v11 }
 0x301   :  { %19985 = vst [vmem:[#allocation88_spill] sm:$0xff] %v15901_v2  ;;  %19986 = vst [vmem:[#allocation83_spill] sm:$0xff] %v15903_v43  ;;  %v10022_v9 = vsel %vm3561_vm9, %v10021_v0, %v19987_v7  ;;  %v10043_v40 = vrot.slane %v15899_v24, 3  ;;  %v10045_v32 = vrot.slane %v15901_v2, 2  ;;  %v10047_v58 = vrot.slane %v15903_v43, 1 }
 0x302   :  { %v10024_v21 = vsel %vm3564_vm10, %v10023_v10, %v10022_v9  ;;  %v10036_v48 = vsel %vm3561_vm9, %v10035_v23, %v19988_v60  ;;  %v11400_v37 = vld.sshfl [vmem:[#allocation2 + $0xa0] sm:$0x33 pattern:$0x75316420]  ;;  %v19989_v42 = vrot.slane %v15807_v22, 4  ;;  %v1251_v23 = vsel %vm11696_vm8, %v15822_v8, %v1250_v14 }
 0x303   :  { %v10026_v0 = vsel %vm3567_vm11, %v10025_v47, %v10024_v21  ;;  %v10038_v7 = vsel %vm3564_vm10, %v10037_v16, %v10036_v48  ;;  %v2297_v21 = vcombine.high %v11399_v12, %v11399_v12  ;;  %1252 = vst [vmem:[#allocation2 + $0xb4] sm:$0xf] %v1251_v23  ;;  %v2304_v22 = vrot.slane %v11399_v12, %v19340_v49 }
 0x304   :  { %v762_v9 = vsel %vm11687_vm7, %v19989_v42, %v15825_v36  ;;  %v10028_v10 = vsel %vm3570_vm12, %v10027_v63, %v10026_v0  ;;  %v10040_v60 = vsel %vm3567_vm11, %v10039_v44, %v10038_v7  ;;  %v2321_v47 = vcombine.high %v11400_v37, %v11400_v37 }
 0x305   :  { %1253 = vst.msk [vmem:[#allocation2 + $0xb8] sm:$0xf] %vm15_vm5, %v762_v9  ;;  %v10030_v16 = vsel %vm3573_vm13, %v10029_v25, %v10028_v10  ;;  %v10042_v48 = vsel %vm3570_vm12, %v10041_v3, %v10040_v60  ;;  %v2311_v44 = vrot.slane %v2297_v21, %v19340_v49  ;;  %v2328_v63 = vrot.slane %v11400_v37, %v19340_v49 }
 0x306   :  { %v10032_v36 = vsel %vm3576_vm14, %v10031_v5, %v10030_v16  ;;  %v10044_v42 = vsel %vm3573_vm13, %v10043_v40, %v10042_v48  ;;  %v2312_v25 = vcombine.high %v2304_v22, %v2304_v22  ;;  %v2335_v3 = vrot.slane %v2321_v47, %v19340_v49  ;;  %v19994_v48 = vld [vmem:[#allocation128_spill] sm:$0xff]  ;;  %v19995_v47 = vld [vmem:[#allocation162_spill] sm:$0xff] }
 0x307   :  { %v15947_v8 = vsel %vm3579_vm15, %v10033_v33, %v10032_v36  ;;  %v10046_v14 = vsel %vm3576_vm14, %v10045_v32, %v10044_v42  ;;  %v19990_v12 = vcombine.high %v15770_v30, %v15770_v30  ;;  %v2313_v37 = vcombine.high %v2311_v44, %v2311_v44 }
 0x308   :  { %v15960_v5 = vsel %vm3579_vm15, %v10047_v58, %v10046_v14  ;;  %v19992_v32 = vrot.slane %v15792_v31, %v19340_v49  ;;  %v4805_v9 = vrot.slane %v2304_v22, %v19340_v49  ;;  %v4819_v58 = vrot.slane %v2311_v44, %v19340_v49 }
 0x309   :  { %v15955_v0 = vrot.slane %v19990_v12, %v19340_v49  ;;  %19991 = vst [vmem:[#allocation114_spill] sm:$0xff] %v15960_v5  ;;  %v10079_v30 = vpack.c.b16 %v15960_v5, %v15947_v8  ;;  %v4833_v60 = vrot.slane %v2312_v25, %v19340_v49  ;;  %v4847_v23 = vrot.slane %v2313_v37, %v19340_v49 }
 0x30a   :  { %v15966_v33 = vrot.slane %v19992_v32, %v19340_v49  ;;  %v19993_v21 = vcombine.high %v15792_v31, %v15792_v31  ;;  %v10900_v22 = vpack.c.b16 %v19995_v47, %v19994_v48  ;;  %v2336_v42 = vcombine.high %v2328_v63, %v2328_v63  ;;  %v11405_v12 = vld.sshfl [vmem:[#allocation2 + $0xb4] sm:$0x33 pattern:$0x75316420] }
 0x30b   :  { %10085 = vrot.lane.b32.xlu1 %v10079_v30, %s11613_s5  ;;  %v2337_v14 = vcombine.high %v2335_v3, %v2335_v3  ;;  %v15989_v37 = vrot.slane %v4805_v9, %v19340_v49  ;;  %v4861_v32 = vrot.slane %v2328_v63, %v19340_v49  ;;  %v2421_v31 = vcombine.high %v11405_v12, %v11405_v12 }
 0x30c   :  { %v15982_v16 = vrot.slane %v19993_v21, %v19340_v49  ;;  %v11406_v36 = vld.sshfl [vmem:[#allocation2 + $0xb8] sm:$0x33 pattern:$0x75316420]  ;;  %v2428_v21 = vrot.slane %v11405_v12, %v19340_v49  ;;  %v4826_v30 = vrot.slane %v4819_v58, %v19340_v49  ;;  %v4875_v40 = vrot.slane %v2335_v3, %v19340_v49 }
 0x30d   :  { %v2445_v44 = vcombine.high %v11406_v36, %v11406_v36  ;;  %v2452_v25 = vrot.slane %v11406_v36, %v19340_v49  ;;  %v4840_v7 = vrot.slane %v4833_v60, %v19340_v49  ;;  %v4854_v10 = vrot.slane %v4847_v23, %v19340_v49 }
 0x30e   :  { %v2435_v9 = vrot.slane %v2421_v31, %v19340_v49  ;;  %v2436_v36 = vcombine.high %v2428_v21, %v2428_v21  ;;  %v4889_v63 = vrot.slane %v2336_v42, %v19340_v49  ;;  %v4903_v12 = vrot.slane %v2337_v14, %v19340_v49 }
 0x30f   :  { %v2459_v48 = vrot.slane %v2445_v44, %v19340_v49  ;;  %v2460_v47 = vcombine.high %v2452_v25, %v2452_v25  ;;  %10904 = vrot.lane.b32.xlu1 %v10900_v22, %s11623_s6  ;;  %v4917_v58 = vrot.slane %v2428_v21, %v19340_v49  ;;  %v4973_v3 = vrot.slane %v2452_v25, %v19340_v49 }
 0x310   :  { %v2437_v43 = vcombine.high %v2435_v9, %v2435_v9  ;;  %v4868_v60 = vrot.slane %v4861_v32, %v19340_v49  ;;  %v4882_v23 = vrot.slane %v4875_v40, %v19340_v49  ;;  %v4931_v22 = vrot.slane %v2435_v9, %v19340_v49 }
 0x311   :  { %v2461_v5 = vcombine.high %v2459_v48, %v2459_v48  ;;  %v4987_v44 = vrot.slane %v2459_v48, %v19340_v49  ;;  %v4896_v31 = vrot.slane %v4889_v63, %v19340_v49  ;;  %v4910_v42 = vrot.slane %v4903_v12, %v19340_v49 }
 0x312   :  { %v16011_v14 = vrot.slane %v4917_v58, %v19340_v49  ;;  %v4945_v21 = vrot.slane %v2436_v36, %v19340_v49  ;;  %v4938_v25 = vrot.slane %v4931_v22, %v19340_v49  ;;  %v4959_v48 = vrot.slane %v2437_v43, %v19340_v49 }
 0x313   :  { %v5001_v2 = vrot.slane %v2460_v47, %v19340_v49  ;;  %v5015_v32 = vrot.slane %v2461_v5, %v19340_v49  ;;  %v4980_v9 = vrot.slane %v4973_v3, %v19340_v49  ;;  %v4994_v63 = vrot.slane %v4987_v44, %v19340_v49 }
 0x314   :  { %v4952_v40 = vrot.slane %v4945_v21, %v19340_v49  ;;  %v16021_v12 = vunpack.c.l.b16 %v4826_v30  ;;  %v4966_v58 = vrot.slane %v4959_v48, %v19340_v49  ;;  %v16025_v24 = vunpack.c.l.b16 %v4840_v7 }
 0x315   :  { %v5008_v36 = vrot.slane %v5001_v2, %v19340_v49  ;;  %v16027_v22 = vunpack.c.l.b16 %v4854_v10  ;;  %v5022_v43 = vrot.slane %v5015_v32, %v19340_v49  ;;  %v18955_v5 = vunpack.c.l.b16 %v15989_v37 }
 0x316   :  { %19996 = vst [vmem:[#allocation117_spill] sm:$0xff] %v16021_v12  ;;  %19997 = vst [vmem:[#allocation76_spill] sm:$0xff] %v16025_v24  ;;  %v16031_v47 = vunpack.c.l.b16 %v4868_v60  ;;  %v16033_v21 = vunpack.c.l.b16 %v4882_v23  ;;  %v16035_v3 = vunpack.c.l.b16 %v4896_v31  ;;  %v16037_v30 = vunpack.c.l.b16 %v4938_v25 }
 0x317   :  { %19998 = vst [vmem:[#allocation5_spill] sm:$0xff] %v16027_v22  ;;  %v16039_v44 = vunpack.c.l.b16 %v4952_v40  ;;  %v16041_v48 = vunpack.c.l.b16 %v4966_v58  ;;  %v16043_v2 = vunpack.c.l.b16 %v4910_v42  ;;  %v16046_v10 = vunpack.c.l.b16 %v4980_v9 }
 0x318   :  { %19999 = vst [vmem:[#allocation168_spill] sm:$0xff] %v16031_v47  ;;  %20000 = vst [vmem:[#allocation155_spill] sm:$0xff] %v16033_v21  ;;  %v16048_v32 = vunpack.c.l.b16 %v4994_v63  ;;  %v16050_v60 = vunpack.c.l.b16 %v5008_v36  ;;  %v5171_v23 = vrot.slane %v16021_v12, 7  ;;  %v5173_v31 = vrot.slane %v16025_v24, 6 }
 0x319   :  { %20001 = vst [vmem:[#allocation139_spill] sm:$0xff] %v16035_v3  ;;  %20002 = vst [vmem:[#allocation90_spill] sm:$0xff] %v16037_v30  ;;  %v5175_v25 = vrot.slane %v16027_v22, 5  ;;  %v16055_v40 = vunpack.c.l.b16 %v5022_v43  ;;  %v5177_v58 = vrot.slane %v16031_v47, 4  ;;  %v5179_v42 = vrot.slane %v16033_v21, 3 }
 0x31a   :  { %20003 = vst [vmem:[#allocation133_spill] sm:$0xff] %v16039_v44  ;;  %20004 = vst [vmem:[#allocation167_spill] sm:$0xff] %v16041_v48  ;;  %v5185_v7 = vrot.slane %v16037_v30, 7  ;;  %v5172_v9 = vsel %vm3561_vm9, %v5171_v23, %v18955_v5  ;;  %v5187_v63 = vrot.slane %v16039_v44, 6  ;;  %v5189_v36 = vrot.slane %v16041_v48, 5 }
 0x31b   :  { %20005 = vst [vmem:[#allocation84_spill] sm:$0xff] %v16046_v10  ;;  %v5191_v12 = vrot.slane %v16046_v10, 4  ;;  %v5174_v22 = vsel %vm3564_vm10, %v5173_v31, %v5172_v9  ;;  %v5181_v43 = vrot.slane %v16035_v3, 2  ;;  %v20006_v47 = vunpack.c.l.b16 %v16011_v14 }
 0x31c   :  { %v5193_v30 = vrot.slane %v16048_v32, 3  ;;  %v5176_v24 = vsel %vm3567_vm11, %v5175_v25, %v5174_v22  ;;  %v5183_v23 = vrot.slane %v16043_v2, 1  ;;  %v5195_v48 = vrot.slane %v16050_v60, 2 }
 0x31d   :  { %v5186_v21 = vsel %vm3561_vm9, %v5185_v7, %v20006_v47  ;;  %v5710_v10 = vrot.slane %v15982_v16, %v19340_v49  ;;  %v5178_v31 = vsel %vm3570_vm12, %v5177_v58, %v5176_v24  ;;  %v5197_v44 = vrot.slane %v16055_v40, 1 }
 0x31e   :  { %v5188_v5 = vsel %vm3564_vm10, %v5187_v63, %v5186_v21  ;;  %v2523_v47 = vcombine.high %v15955_v0, %v15955_v0  ;;  %v20007_v22 = vrot.slane %v15816_v41, %v19340_v49  ;;  %v5180_v21 = vsel %vm3573_vm13, %v5179_v42, %v5178_v31 }
 0x31f   :  { %v5190_v9 = vsel %vm3567_vm11, %v5189_v36, %v5188_v5  ;;  %v20009_v24 = vrot.slane %v15801_v53, %v19340_v49  ;;  %v5731_v5 = vrot.slane %v15955_v0, %v19340_v49  ;;  %v5182_v58 = vsel %vm3576_vm14, %v5181_v43, %v5180_v21  ;;  %v20013_v0 = vld [vmem:[#allocation60_spill] sm:$0xff] }
 0x320   :  { %v16086_v7 = vunpack.c.l.b16 %v20007_v22  ;;  %v5192_v25 = vsel %vm3570_vm12, %v5191_v12, %v5190_v9  ;;  %v16099_v41 = vunpack.c.l.b16 %v15966_v33  ;;  %v16103_v42 = vsel %vm3579_vm15, %v5183_v23, %v5182_v58 }
 0x321   :  { %v5724_v16 = vrot.slane %v20009_v24, %v19340_v49  ;;  %v5194_v63 = vsel %vm3573_vm13, %v5193_v30, %v5192_v25  ;;  %20011 = vst [vmem:[#allocation45_spill] sm:$0xff] %v16103_v42  ;;  %v20012_v31 = vrot.slane %v19939_v4, 3  ;;  %v8449_v22 = vrot.slane %v20013_v0, 5  ;;  %v20019_v24 = vld [vmem:[#allocation42_spill] sm:$0xff] }
 0x322   :  { %20008 = vst [vmem:[#allocation79_spill] sm:$0xff] %v16086_v7  ;;  %20010 = vst [vmem:[#allocation77_spill] sm:$0xff] %v16099_v41  ;;  %v18962_v36 = vrot.slane %v16086_v7, 7  ;;  %v5196_v12 = vsel %vm3576_vm14, %v5195_v48, %v5194_v63  ;;  %v16111_v43 = vunpack.c.l.b16 %v5710_v10  ;;  %v20016_v33 = vrot.slane %v19960_v17, 6 }
 0x323   :  { %v3574_v9 = vsel %vm3573_vm13, %v20012_v31, %v15735_v51  ;;  %v16114_v30 = vsel %vm3579_vm15, %v5197_v44, %v5196_v12  ;;  %v5738_v51 = vrot.slane %v5731_v5, %v19340_v49  ;;  %v20017_v44 = vcombine.high %v15801_v53, %v15801_v53  ;;  %v20022_v12 = vld [vmem:[#allocation61_spill] sm:$0xff]  ;;  %v20023_v31 = vld [vmem:[#allocation62_spill] sm:$0xff]  ;;  %v11462_v0 = vld.sshfl [vmem:[#allocation2 + $0x198] sm:$0x33 pattern:$0x75316420] }
 0x324   :  { %20014 = vst [vmem:[#allocation46_spill] sm:$0xff] %v16111_v43  ;;  %20015 = vst [vmem:[#allocation43_spill] sm:$0xff] %v16114_v30  ;;  %v8448_v23 = vsel %vm3564_vm10, %v20016_v33, %v15745_v29  ;;  %v5842_v48 = vsel %vm3561_vm9, %v18962_v36, %v16099_v41  ;;  %v5202_v4 = vpack.c.b16 %v16114_v30, %v16103_v42  ;;  %v18963_v29 = vrot.slane %v16111_v43, 6 }
 0x325   :  { %v16131_v10 = vrot.slane %v20017_v44, %v19340_v49  ;;  %v16134_v17 = vrot.slane %v2523_v47, %v19340_v49  ;;  %v20018_v21 = vrot.slane %v19940_v59, 2  ;;  %v16143_v63 = vunpack.c.l.b16 %v5724_v16  ;;  %v16161_v44 = vpop.permute.xlu0 %3799 }
 0x326   :  { %v20021_v53 = vrot.slane %v15789_v45, %v19340_v49  ;;  %5209 = vrot.lane.b32.xlu0 %v5202_v4, %s11613_s5  ;;  %v16153_v47 = vsel %vm3567_vm11, %v8449_v22, %v8448_v23  ;;  %v5843_v16 = vsel %vm3564_vm10, %v18963_v29, %v5842_v48  ;;  %20024 = vst [vmem:[#allocation39_spill] sm:$0xff] %v16161_v44  ;;  %v20025_v45 = vunpack.c.l.b16 %v15608_v54  ;;  %v138_v44 = vld [vmem:[#allocation2 + $0x1a4] sm:$0x1] }
 0x327   :  { %v16140_v25 = vsel %vm3576_vm14, %v20018_v21, %v3574_v9  ;;  %20020 = vst [vmem:[#allocation47_spill] sm:$0xff] %v16143_v63  ;;  %v18964_v33 = vrot.slane %v16143_v63, 5  ;;  %v18965_v4 = vrot.slane %v15641_v35, 7  ;;  %v18966_v22 = vrot.slane %v15643_v20, 6 }
 0x328   :  { %v16149_v5 = vrot.slane %v20021_v53, %v19340_v49  ;;  %v5267_v21 = vrot.slane %v20025_v45, 1  ;;  %v16171_v36 = vunpack.c.l.b16 %v5738_v51  ;;  %v11463_v9 = vld.sshfl [vmem:[#allocation2 + $0x19c] sm:$0x33 pattern:$0x75316420]  ;;  %v7368_v23 = vcombine.high %v11462_v0, %v11462_v0 }
 0x329   :  { %v16179_v54 = vsel %vm3567_vm11, %v18964_v33, %v5843_v16  ;;  %v20027_v29 = vunpack.c.l.b16 %v15633_v52  ;;  %v16191_v48 = vrot.slane %v11462_v0, %v19340_v49  ;;  %v20029_v58 = vrot.slane %v15646_v6, 5  ;;  %v16205_v53 = vpop.permute.xlu0 %8677 }
 0x32a   :  { %20026 = vst [vmem:[#allocation40_spill] sm:$0xff] %v16171_v36  ;;  %v5268_v45 = vsel %vm3561_vm9, %v15637_v50, %v5267_v21  ;;  %v18968_v21 = vrot.slane %v15656_v27, 7  ;;  %v7392_v0 = vcombine.high %v11463_v9, %v11463_v9  ;;  %20030 = vst [vmem:[#allocation58_spill] sm:$0xff] %v16205_v53  ;;  %v20033_v30 = vrot.slane %v15658_v38, 6 }
 0x32b   :  { %v5270_v51 = vsel %vm3564_vm10, %v18965_v4, %v5268_v45  ;;  %v5281_v59 = vrot.slane %v20027_v29, 1  ;;  %20028 = vst [vmem:[#allocation41_spill] sm:$0xff] %v16191_v48  ;;  %v16215_v4 = vrot.slane %v11463_v9, %v19340_v49  ;;  %v7383_v9 = vcombine.high %v16191_v48, %v16191_v48 }
 0x32c   :  { %v5272_v16 = vsel %vm3567_vm11, %v18966_v22, %v5270_v51  ;;  %v20031_v51 = vrot.slane %v15648_v55, 4  ;;  %v20038_v55 = vrot.slane %v15665_v15, 3  ;;  %v16275_v15 = vpop.permute.xlu1 %3801  ;;  %v20052_v46 = vrot.slane %v16134_v17, %v19340_v49 }
 0x32d   :  { %v5274_v45 = vsel %vm3570_vm12, %v20029_v58, %v5272_v16  ;;  %v5282_v52 = vsel %vm3561_vm9, %v15654_v61, %v5281_v59  ;;  %v126_v16 = vld [vmem:[#allocation2 + $0x174] sm:$0x1]  ;;  %v20032_v59 = vrot.slane %v15650_v19, 3  ;;  %v20035_v58 = vrot.slane %v15652_v56, 2  ;;  %20042 = vst [vmem:[#allocation143_spill] sm:$0xff] %v16275_v15 }
 0x32e   :  { %v5276_v22 = vsel %vm3573_vm13, %v20031_v51, %v5274_v45  ;;  %v5284_v33 = vsel %vm3564_vm10, %v18968_v21, %v5282_v52  ;;  %v132_v51 = vld [vmem:[#allocation2 + $0x18c] sm:$0x1]  ;;  %v307_v52 = vld [vmem:[%s18361_s0 + $0x1c0] sm:$0xff]  ;;  %v16228_v21 = vrot.slane %v7368_v23, %v19340_v49  ;;  %v127_v19 = vsel %vm11649_vm2, 0, %v126_v16 }
 0x32f   :  { %v5278_v29 = vsel %vm3576_vm14, %v20032_v59, %v5276_v22  ;;  %v5286_v53 = vsel %vm3567_vm11, %v20033_v30, %v5284_v33  ;;  %v20034_v22 = vrot.slane %v15661_v34, 5  ;;  %v308_v33 = vld [vmem:[%s18361_s0 + $0x1c8] sm:$0xff]  ;;  %v311_v45 = vld [vmem:[%s18361_s0 + $0x1e0] sm:$0xff]  ;;  %v20037_v30 = vld [vmem:[#allocation144_spill] sm:$0xff]  ;;  %128 = vst [vmem:[#allocation2 + $0x174] sm:$0x1] %v127_v19  ;;  %v7406_v19 = vrot.slane %v7392_v0, %v19340_v49 }
 0x330   :  { %v312_v23 = vld [vmem:[%s18361_s0 + $0x1e8] sm:$0xff]  ;;  %v16248_v48 = vsel %vm3579_vm15, %v20035_v58, %v5278_v29  ;;  %v6023_v42 = vpack.c.b16 %v15726_v13, %v20037_v30  ;;  %v133_v56 = vsel %vm11649_vm2, 0, %v132_v51  ;;  %v139_v29 = vsel %vm11649_vm2, 0, %v138_v44  ;;  %v16273_v30 = vpop.permute.xlu0 %8679  ;;  %s11624_s0 = smov 52  }
 0x331   :  { %v5288_v59 = vsel %vm3570_vm12, %v20034_v22, %v5286_v53  ;;  %v20036_v53 = vrot.slane %v15663_v18, 4  ;;  %v11537_v58 = vpack.c.bf16 %v307_v52, %v307_v52  ;;  %134 = vst [vmem:[#allocation2 + $0x18c] sm:$0x1] %v133_v56  ;;  %140 = vst [vmem:[#allocation2 + $0x1a4] sm:$0x1] %v139_v29  ;;  %v11538_v13 = vpack.c.bf16 %v308_v33, %v308_v33  ;;  %v20043_v56 = vld [vmem:[#allocation145_spill] sm:$0xff] }
 0x332   :  { %6028 = vrot.lane.b32.xlu0 %v6023_v42, %s11623_s6  ;;  %v11541_v16 = vpack.c.bf16 %v311_v45, %v311_v45  ;;  %20041 = vst [vmem:[#allocation91_spill] sm:$0xff] %v16273_v30  ;;  %v20044_v42 = vld [vmem:[#allocation164_spill] sm:$0xff]  ;;  %v7384_v29 = vcombine.high %v16228_v21, %v16228_v21  ;;  %v7408_v38 = vcombine.high %v7406_v19, %v7406_v19 }
 0x333   :  { %v5290_v22 = vsel %vm3573_vm13, %v20036_v53, %v5288_v59  ;;  %v20039_v59 = vrot.slane %v15667_v57, 2  ;;  %v986_v44 = vshrl.u32 %v11537_v58, 16  ;;  %v989_v52 = vshll.u32 %v11537_v58, 16 }
 0x334   :  { %v5292_v34 = vsel %vm3576_vm14, %v20038_v55, %v5290_v22  ;;  %v11542_v55 = vpack.c.bf16 %v312_v23, %v312_v23  ;;  %v994_v22 = vshrl.u32 %v11538_v13, 16  ;;  %v997_v57 = vshll.u32 %v11538_v13, 16 }
 0x335   :  { %v16267_v53 = vsel %vm3579_vm15, %v20039_v59, %v5292_v34  ;;  %v1020_v34 = vshrl.u32 %v11541_v16, 16  ;;  %v1023_v59 = vshll.u32 %v11541_v16, 16  ;;  %v6048_v45 = vpack.c.b16 %v20044_v42, %v20043_v56 }
 0x336   :  { %20040 = vst [vmem:[#allocation59_spill] sm:$0xff] %v16267_v53  ;;  %v5325_v51 = vpack.c.b16 %v16267_v53, %v16248_v48  ;;  %v988_v33 = vrot.slane %v986_v44, 7  ;;  %v1028_v0 = vshrl.u32 %v11542_v55, 16  ;;  %v1031_v23 = vshll.u32 %v11542_v55, 16  ;;  %v1348_v6 = vld [vmem:[#allocation2 + $0x174] sm:$0xf] }
 0x337   :  { %v7407_v58 = vcombine.high %v16215_v4, %v16215_v4  ;;  %v16284_v30 = vrot.slane %v994_v22, 7  ;;  %v1022_v13 = vrot.slane %v1020_v34, 7  ;;  %v10553_v16 = vrot.slane %v16228_v21, %v19340_v49  ;;  %v16295_v34 = vpop.permute.xlu0 %5205 }
 0x338   :  { %5331 = vrot.lane.b32.xlu1 %v5325_v51, %s11614_s21  ;;  %v991_v15 = vor.u32 %v989_v52, %v988_v33  ;;  %v992_v51 = vrot.slane %v988_v33, 4  ;;  %v16288_v18 = vrot.slane %v1028_v0, 7  ;;  %v10567_v44 = vrot.slane %v7383_v9, %v19340_v49  ;;  %20047 = vst [vmem:[#allocation128_spill] sm:$0xff] %v16295_v34  ;;  %v1362_v9 = vld [vmem:[#allocation2 + $0x18c] sm:$0xf] }
 0x339   :  { %20045 = vst [vmem:[#allocation56_spill] sm:$0xff] %v16284_v30  ;;  %v999_v55 = vor.u32 %v997_v57, %v16284_v30  ;;  %v1025_v56 = vor.u32 %v1023_v59, %v1022_v13  ;;  %v1026_v42 = vrot.slane %v1022_v13, 4  ;;  %v10595_v22 = vrot.slane %v16215_v4, %v19340_v49  ;;  %v11464_v13 = vld.sshfl [vmem:[#allocation2 + $0x1a0] sm:$0x1 pattern:$0x75316420] }
 0x33a   :  { %20046 = vst [vmem:[#allocation85_spill] sm:$0xff] %v16288_v18  ;;  %v1033_v21 = vor.u32 %v1031_v23, %v16288_v18  ;;  %v1349_v52 = vsel %vm11696_vm8, %v991_v15, %v1348_v6  ;;  %v10581_v57 = vrot.slane %v7384_v29, %v19340_v49  ;;  %v10609_v59 = vrot.slane %v7406_v19, %v19340_v49  ;;  %v16316_v19 = vpop.permute.xlu1 %5203 }
 0x33b   :  { %v1000_v33 = vsel %vm11687_vm7, %v992_v51, %v999_v55  ;;  %1350 = vst [vmem:[#allocation2 + $0x174] sm:$0xf] %v1349_v52  ;;  %v1363_v4 = vsel %vm11696_vm8, %v1025_v56, %v1362_v9  ;;  %v20049_v6 = vrot.slane %v16131_v10, %v19340_v49  ;;  %v18991_v23 = vrot.slane %v16171_v36, 4  ;;  %20051 = vst [vmem:[#allocation60_spill] sm:$0xff] %v16316_v19 }
 0x33c   :  { %6052 = vrot.lane.b32.xlu1 %v6048_v45, %s11624_s0  ;;  %v20048_v45 = vrot.slane %v20022_v12, 4  ;;  %v1034_v29 = vsel %vm11687_vm7, %v1026_v42, %v1033_v21  ;;  %1351 = vst.msk [vmem:[#allocation2 + $0x178] sm:$0xf] %vm15_vm5, %v1000_v33  ;;  %1364 = vst [vmem:[#allocation2 + $0x18c] sm:$0xf] %v1363_v4  ;;  %v16324_v12 = vunpack.c.l.b16 %v20052_v46  ;;  %v20054_v10 = vrot.slane %v16149_v5, %v19340_v49  ;;  %v20056_v42 = vld [vmem:[#allocation63_spill] sm:$0xff]  ;;  %v16357_v4 = vpop.permute.xlu0 %10083 }
 0x33d   :  { %v16313_v15 = vunpack.c.l.b16 %v20049_v6  ;;  %v10560_v51 = vrot.slane %v10553_v16, %v19340_v49  ;;  %v10574_v55 = vrot.slane %v10567_v44, %v19340_v49  ;;  %1365 = vst.msk [vmem:[#allocation2 + $0x190] sm:$0xf] %vm15_vm5, %v1034_v29  ;;  %v5845_v26 = vsel %vm3570_vm12, %v18991_v23, %v16179_v54  ;;  %20059 = vst [vmem:[#allocation62_spill] sm:$0xff] %v16357_v4 }
 0x33e   :  { %v8452_v0 = vsel %vm3570_vm12, %v20048_v45, %v16153_v47  ;;  %20053 = vst [vmem:[#allocation42_spill] sm:$0xff] %v16324_v12  ;;  %v16329_v47 = vunpack.c.l.b16 %v20054_v10  ;;  %v10602_v17 = vrot.slane %v10595_v22, %v19340_v49  ;;  %v16340_v56 = vrot.slane %v7407_v58, %v19340_v49  ;;  %v20058_v22 = vld [vmem:[#allocation64_spill] sm:$0xff]  ;;  %v16375_v46 = vpop.permute.xlu1 %10081 }
 0x33f   :  { %20050 = vst [vmem:[#allocation162_spill] sm:$0xff] %v16313_v15  ;;  %v16343_v5 = vrot.slane %v7408_v38, %v19340_v49  ;;  %v18990_v16 = vrot.slane %v16313_v15, 3  ;;  %v10588_v44 = vrot.slane %v10581_v57, %v19340_v49  ;;  %v10616_v52 = vrot.slane %v10609_v59, %v19340_v49  ;;  %20063 = vst [vmem:[#allocation63_spill] sm:$0xff] %v16375_v46 }
 0x340   :  { %20055 = vst [vmem:[#allocation61_spill] sm:$0xff] %v16329_v47  ;;  %v20057_v9 = vrot.slane %v20023_v31, 3  ;;  %v7422_v38 = vrot.slane %v11464_v13, %v19340_v49  ;;  %v16365_v59 = vunpack.c.l.b16 %v10560_v51  ;;  %v16367_v31 = vunpack.c.l.b16 %v10574_v55  ;;  %v16397_v57 = vpop.permute.xlu0 %5329 }
 0x341   :  { %v16362_v45 = vsel %vm3573_vm13, %v18990_v16, %v5845_v26  ;;  %v16373_v29 = vunpack.c.l.b16 %v10602_v17  ;;  %v20064_v13 = vunpack.c.l.b16 %v15842_v28  ;;  %v16381_v51 = vunpack.c.l.b16 %v10616_v52  ;;  %20067 = vst [vmem:[#allocation170_spill] sm:$0xff] %v16397_v57 }
 0x342   :  { %v16352_v54 = vsel %vm3573_vm13, %v20057_v9, %v8452_v0  ;;  %20060 = vst [vmem:[#allocation144_spill] sm:$0xff] %v16365_v59  ;;  %20061 = vst [vmem:[#allocation145_spill] sm:$0xff] %v16367_v31  ;;  %v11453_v10 = vld.sshfl [vmem:[#allocation2 + $0x174] sm:$0x33 pattern:$0x75316420]  ;;  %v16379_v9 = vunpack.c.l.b16 %v10588_v44  ;;  %v16386_v33 = vrot.slane %v7422_v38, %v19340_v49  ;;  %v16401_v19 = vpop.permute.xlu1 %5327 }
 0x343   :  { %20062 = vst [vmem:[#allocation164_spill] sm:$0xff] %v16373_v29  ;;  %v10145_v26 = vrot.slane %v20064_v13, 1  ;;  %20066 = vst [vmem:[#allocation169_spill] sm:$0xff] %v16381_v51  ;;  %v7182_v16 = vcombine.high %v11453_v10, %v11453_v10  ;;  %v7189_v23 = vrot.slane %v11453_v10, %v19340_v49  ;;  %vm6170_vm5 = vcmask 195584  }
 0x344   :  { %20065 = vst [vmem:[#allocation64_spill] sm:$0xff] %v16379_v9  ;;  %v11454_v55 = vld.sshfl [vmem:[#allocation2 + $0x178] sm:$0x33 pattern:$0x75316420]  ;;  %20068 = vst [vmem:[#allocation171_spill] sm:$0xff] %v16401_v19  ;;  %v16420_v35 = vpop.permute.xlu0 %10207 }
 0x345   :  { %v11459_v17 = vld.sshfl [vmem:[#allocation2 + $0x18c] sm:$0x33 pattern:$0x75316420]  ;;  %v7206_v58 = vcombine.high %v11454_v55, %v11454_v55  ;;  %v7213_v21 = vrot.slane %v11454_v55, %v19340_v49  ;;  %v7196_v28 = vrot.slane %v7182_v16, %v19340_v49  ;;  %v7197_v44 = vcombine.high %v7189_v23, %v7189_v23  ;;  %20070 = vst [vmem:[#allocation172_spill] sm:$0xff] %v16420_v35 }
 0x346   :  { %v11460_v6 = vld.sshfl [vmem:[#allocation2 + $0x190] sm:$0x33 pattern:$0x75316420]  ;;  %v7306_v13 = vcombine.high %v11459_v17, %v11459_v17  ;;  %v7313_v52 = vrot.slane %v11459_v17, %v19340_v49  ;;  %v16395_v38 = vsel %vm3561_vm9, %v15874_v39, %v10145_v26  ;;  %v9683_v16 = vrot.slane %v7189_v23, %v19340_v49  ;;  %v16430_v50 = vpop.permute.xlu1 %10205 }
 0x347   :  { %v7220_v0 = vrot.slane %v7206_v58, %v19340_v49  ;;  %v7330_v4 = vcombine.high %v11460_v6, %v11460_v6  ;;  %v7337_v10 = vrot.slane %v11460_v6, %v19340_v49  ;;  %v7198_v34 = vcombine.high %v7196_v28, %v7196_v28  ;;  %v20069_v6 = vld [vmem:[#allocation32_spill] sm:$0xff]  ;;  %20071 = vst [vmem:[#allocation173_spill] sm:$0xff] %v16430_v50 }
 0x348   :  { %v7221_v55 = vcombine.high %v7213_v21, %v7213_v21  ;;  %v7320_v46 = vrot.slane %v7306_v13, %v19340_v49  ;;  %v9697_v18 = vrot.slane %v7196_v28, %v19340_v49  ;;  %v7321_v20 = vcombine.high %v7313_v52, %v7313_v52  ;;  %v16455_v50 = vpop.permute.xlu0 %3997 }
 0x349   :  { %v7222_v17 = vcombine.high %v7220_v0, %v7220_v0  ;;  %v7344_v58 = vrot.slane %v7330_v4, %v19340_v49  ;;  %v9711_v39 = vrot.slane %v7197_v44, %v19340_v49  ;;  %v9725_v57 = vrot.slane %v7198_v34, %v19340_v49  ;;  %20077 = vst [vmem:[#allocation179_spill] sm:$0xff] %v16455_v50 }
 0x34a   :  { %v7322_v26 = vcombine.high %v7320_v46, %v7320_v46  ;;  %v7345_v27 = vcombine.high %v7337_v10, %v7337_v10  ;;  %v16409_v13 = vrot.slane %v9683_v16, %v19340_v49  ;;  %v9739_v23 = vrot.slane %v7213_v21, %v19340_v49 }
 0x34b   :  { %v9753_v19 = vrot.slane %v7220_v0, %v19340_v49  ;;  %v7346_v61 = vcombine.high %v7344_v58, %v7344_v58  ;;  %v9704_v4 = vrot.slane %v9697_v18, %v19340_v49  ;;  %v9718_v28 = vrot.slane %v9711_v39, %v19340_v49 }
 0x34c   :  { %v9767_v30 = vrot.slane %v7221_v55, %v19340_v49  ;;  %v9732_v1 = vrot.slane %v9725_v57, %v19340_v49  ;;  %v9781_v44 = vrot.slane %v7222_v17, %v19340_v49  ;;  %v9795_v34 = vrot.slane %v7313_v52, %v19340_v49 }
 0x34d   :  { %v9809_v16 = vrot.slane %v7320_v46, %v19340_v49  ;;  %v9746_v21 = vrot.slane %v9739_v23, %v19340_v49  ;;  %v9760_v0 = vrot.slane %v9753_v19, %v19340_v49  ;;  %v9823_v18 = vrot.slane %v7321_v20, %v19340_v49 }
 0x34e   :  { %v9837_v39 = vrot.slane %v7322_v26, %v19340_v49  ;;  %v9774_v55 = vrot.slane %v9767_v30, %v19340_v49  ;;  %v9851_v17 = vrot.slane %v7337_v10, %v19340_v49  ;;  %v9865_v52 = vrot.slane %v7344_v58, %v19340_v49 }
 0x34f   :  { %v9816_v57 = vrot.slane %v9809_v16, %v19340_v49  ;;  %v9830_v46 = vrot.slane %v9823_v18, %v19340_v49  ;;  %v9879_v19 = vrot.slane %v7345_v27, %v19340_v49  ;;  %v9893_v20 = vrot.slane %v7346_v61, %v19340_v49 }
 0x350   :  { %v9844_v23 = vrot.slane %v9837_v39, %v19340_v49  ;;  %v9788_v26 = vrot.slane %v9781_v44, %v19340_v49  ;;  %v16438_v30 = vrot.slane %v9795_v34, %v19340_v49  ;;  %v9858_v16 = vrot.slane %v9851_v17, %v19340_v49 }
 0x351   :  { %v9872_v10 = vrot.slane %v9865_v52, %v19340_v49  ;;  %v9886_v58 = vrot.slane %v9879_v19, %v19340_v49  ;;  %v16443_v35 = vunpack.c.l.b16 %v9704_v4  ;;  %v16445_v18 = vunpack.c.l.b16 %v9718_v28 }
 0x352   :  { %v16447_v39 = vunpack.c.l.b16 %v9732_v1  ;;  %v9900_v27 = vrot.slane %v9893_v20, %v19340_v49  ;;  %v16451_v44 = vunpack.c.l.b16 %v9746_v21  ;;  %v16453_v34 = vunpack.c.l.b16 %v9760_v0  ;;  %v16472_v0 = vpop.permute.xlu1 %3995 }
 0x353   :  { %20072 = vst [vmem:[#allocation174_spill] sm:$0xff] %v16443_v35  ;;  %20073 = vst [vmem:[#allocation175_spill] sm:$0xff] %v16445_v18  ;;  %v16457_v17 = vunpack.c.l.b16 %v9774_v55  ;;  %v16459_v52 = vunpack.c.l.b16 %v9816_v57  ;;  %v16461_v4 = vunpack.c.l.b16 %v9830_v46  ;;  %v16463_v28 = vunpack.c.l.b16 %v9844_v23 }
 0x354   :  { %20074 = vst [vmem:[#allocation176_spill] sm:$0xff] %v16447_v39  ;;  %20075 = vst [vmem:[#allocation177_spill] sm:$0xff] %v16451_v44  ;;  %v16465_v1 = vunpack.c.l.b16 %v9788_v26  ;;  %v16468_v20 = vunpack.c.l.b16 %v9858_v16  ;;  %v16470_v21 = vunpack.c.l.b16 %v9872_v10  ;;  %v16474_v61 = vunpack.c.l.b16 %v9886_v58 }
 0x355   :  { %20076 = vst [vmem:[#allocation178_spill] sm:$0xff] %v16453_v34  ;;  %20078 = vst [vmem:[#allocation180_spill] sm:$0xff] %v16457_v17  ;;  %v10049_v55 = vrot.slane %v16443_v35, 7  ;;  %v10051_v57 = vrot.slane %v16445_v18, 6  ;;  %v10053_v46 = vrot.slane %v16447_v39, 5  ;;  %v16479_v23 = vunpack.c.l.b16 %v9900_v27  ;;  %v16496_v18 = vpop.permute.xlu0 %8875 }
 0x356   :  { %20079 = vst [vmem:[#allocation181_spill] sm:$0xff] %v16459_v52  ;;  %20080 = vst [vmem:[#allocation182_spill] sm:$0xff] %v16461_v4  ;;  %v10055_v26 = vrot.slane %v16451_v44, 4  ;;  %v10057_v19 = vrot.slane %v16453_v34, 3  ;;  %v10063_v16 = vrot.slane %v16459_v52, 7  ;;  %v20088_v10 = vunpack.c.l.b16 %v16409_v13 }
 0x357   :  { %20081 = vst [vmem:[#allocation183_spill] sm:$0xff] %v16463_v28  ;;  %20082 = vst [vmem:[#allocation184_spill] sm:$0xff] %v16465_v1  ;;  %v10065_v58 = vrot.slane %v16461_v4, 6  ;;  %v10069_v35 = vrot.slane %v16468_v20, 4  ;;  %v10059_v27 = vrot.slane %v16457_v17, 2  ;;  %v20089_v44 = vunpack.c.l.b16 %v16438_v30 }
 0x358   :  { %20083 = vst [vmem:[#allocation185_spill] sm:$0xff] %v16468_v20  ;;  %20084 = vst [vmem:[#allocation186_spill] sm:$0xff] %v16470_v21  ;;  %v10050_v50 = vsel %vm3561_vm9, %v10049_v55, %v20088_v10  ;;  %v10071_v52 = vrot.slane %v16470_v21, 3  ;;  %v10061_v10 = vrot.slane %v16465_v1, 1  ;;  %v10073_v20 = vrot.slane %v16474_v61, 2 }
 0x359   :  { %20085 = vst [vmem:[#allocation187_spill] sm:$0xff] %v16472_v0  ;;  %20086 = vst [vmem:[#allocation188_spill] sm:$0xff] %v16474_v61  ;;  %v10067_v0 = vrot.slane %v16463_v28, 5  ;;  %v10052_v39 = vsel %vm3564_vm10, %v10051_v57, %v10050_v50  ;;  %v10064_v34 = vsel %vm3561_vm9, %v10063_v16, %v20089_v44  ;;  %v20091_v50 = vrot.slane %v16367_v31, 7 }
 0x35a   :  { %20087 = vst [vmem:[#allocation189_spill] sm:$0xff] %v16479_v23  ;;  %20090 = vst [vmem:[#allocation190_spill] sm:$0xff] %v16496_v18  ;;  %v10054_v55 = vsel %vm3567_vm11, %v10053_v46, %v10052_v39  ;;  %v10066_v28 = vsel %vm3564_vm10, %v10065_v58, %v10064_v34  ;;  %v10075_v16 = vrot.slane %v16479_v23, 1  ;;  %v16509_v18 = vpop.permute.xlu1 %8873  ;;  %v20093_v58 = vrot.slane %v20069_v6, 7 }
 0x35b   :  { %v10720_v57 = vsel %vm3561_vm9, %v20091_v50, %v16365_v59  ;;  %v10056_v4 = vsel %vm3570_vm12, %v10055_v26, %v10054_v55  ;;  %v10068_v44 = vsel %vm3567_vm11, %v10067_v0, %v10066_v28  ;;  %20092 = vst [vmem:[#allocation191_spill] sm:$0xff] %v16509_v18  ;;  %v20094_v26 = vrot.slane %v16340_v56, %v19340_v49  ;;  %v20096_v50 = vld [vmem:[#allocation55_spill] sm:$0xff] }
 0x35c   :  { %v10058_v46 = vsel %vm3573_vm13, %v10057_v19, %v10056_v4  ;;  %v10070_v34 = vsel %vm3570_vm12, %v10069_v35, %v10068_v44  ;;  %v10148_v61 = vsel %vm3564_vm10, %v20093_v58, %v16395_v38  ;;  %v19029_v39 = vrot.slane %v20096_v50, 6  ;;  %v20099_v44 = vld [vmem:[#allocation9_spill] sm:$0xff] }
 0x35d   :  { %v16521_v55 = vunpack.c.l.b16 %v20094_v26  ;;  %v10060_v28 = vsel %vm3576_vm14, %v10059_v27, %v10058_v46  ;;  %v10072_v0 = vsel %vm3573_vm13, %v10071_v52, %v10070_v34  ;;  %v20097_v4 = vrot.slane %v16379_v9, 6  ;;  %v20104_v34 = vld [vmem:[#allocation34_spill] sm:$0xff] }
 0x35e   :  { %v16530_v19 = vsel %vm3579_vm15, %v10061_v10, %v10060_v28  ;;  %v10074_v38 = vsel %vm3576_vm14, %v10073_v20, %v10072_v0  ;;  %v19028_v58 = vrot.slane %v20099_v44, 5  ;;  %v20100_v56 = vrot.slane %v16343_v5, %v19340_v49  ;;  %v16546_v10 = vpop.permute.xlu0 %4121  ;;  %v20105_v0 = vld [vmem:[#allocation38_spill] sm:$0xff] }
 0x35f   :  { %20095 = vst [vmem:[#allocation192_spill] sm:$0xff] %v16521_v55  ;;  %v10721_v35 = vsel %vm3564_vm10, %v20097_v4, %v10720_v57  ;;  %20098 = vst [vmem:[#allocation55_spill] sm:$0xff] %v16530_v19  ;;  %v19030_v52 = vrot.slane %v16373_v29, 5  ;;  %v16541_v27 = vsel %vm3579_vm15, %v10075_v16, %v10074_v38  ;;  %v10150_v57 = vsel %vm3567_vm11, %v19029_v39, %v10148_v61  ;;  %v20108_v39 = vld [vmem:[#allocation72_spill] sm:$0xff]  ;;  %v20110_v4 = vld [vmem:[#allocation75_spill] sm:$0xff] }
 0x360   :  { %v16537_v26 = vunpack.c.l.b16 %v20100_v56  ;;  %20102 = vst [vmem:[#allocation194_spill] sm:$0xff] %v16541_v27  ;;  %20103 = vst [vmem:[#allocation195_spill] sm:$0xff] %v16546_v10  ;;  %v10718_v20 = vrot.slane %v16386_v33, %v19340_v49  ;;  %v10080_v46 = vpack.c.b16 %v16541_v27, %v16530_v19  ;;  %v10152_v5 = vsel %vm3570_vm12, %v19028_v58, %v10150_v57  ;;  %v16563_v56 = vpop.permute.xlu1 %4119  ;;  %v20109_v10 = vld [vmem:[#allocation163_spill] sm:$0xff] }
 0x361   :  { %v19032_v28 = vrot.slane %v20104_v34, 4  ;;  %v10722_v61 = vsel %vm3567_vm11, %v19030_v52, %v10721_v35  ;;  %v20106_v38 = vunpack.c.l.b16 %v15862_v11  ;;  %20107 = vst [vmem:[#allocation196_spill] sm:$0xff] %v16563_v56  ;;  %v19037_v58 = vrot.slane %v15893_v62, 7  ;;  %v20112_v27 = vld [vmem:[#allocation87_spill] sm:$0xff] }
 0x362   :  { %20101 = vst [vmem:[#allocation193_spill] sm:$0xff] %v16537_v26  ;;  %10087 = vrot.lane.b32.xlu0 %v10080_v46, %s11613_s5  ;;  %v10901_v35 = vpack.c.b16 %v15947_v8, %v20109_v10  ;;  %v16578_v56 = vunpack.c.l.b16 %v10718_v20  ;;  %v20115_v8 = vld [vmem:[#allocation78_spill] sm:$0xff]  ;;  %v20116_v52 = vrot.slane %v16381_v51, 4  ;;  %v20118_v20 = vld [vmem:[#allocation88_spill] sm:$0xff]  ;;  %v20119_v34 = vld [vmem:[#allocation83_spill] sm:$0xff]  ;;  %v16595_v44 = vpop.permute.xlu0 %8999  ;;  %s11625_s5 = smov 56  }
 0x363   :  { %v10159_v33 = vrot.slane %v20106_v38, 1  ;;  %v10154_v57 = vsel %vm3573_vm13, %v19032_v28, %v10152_v5  ;;  %v20111_v38 = vld [vmem:[#allocation110_spill] sm:$0xff]  ;;  %v20114_v5 = vrot.slane %v20105_v0, 3  ;;  %20120 = vst [vmem:[#allocation197_spill] sm:$0xff] %v16595_v44  ;;  %v20125_v0 = vrot.slane %v20115_v8, 4  ;;  %v20126_v44 = vld [vmem:[#allocation5_spill] sm:$0xff] }
 0x364   :  { %20113 = vst [vmem:[#allocation163_spill] sm:$0xff] %v16578_v56  ;;  %v10723_v11 = vsel %vm3570_vm12, %v20116_v52, %v10722_v61  ;;  %v20122_v52 = vunpack.c.l.b16 %v15989_v37  ;;  %v20129_v37 = vrot.slane %v20118_v20, 3  ;;  %v20132_v8 = vrot.slane %v20119_v34, 2 }
 0x365   :  { %v10160_v18 = vsel %vm3561_vm9, %v20111_v38, %v10159_v33  ;;  %v10156_v28 = vsel %vm3576_vm14, %v20114_v5, %v10154_v57  ;;  %v20117_v33 = vrot.slane %v20108_v39, 6  ;;  %v5862_v57 = vrot.slane %v16099_v41, 1 }
 0x366   :  { %v10162_v16 = vsel %vm3564_vm10, %v19037_v58, %v10160_v18  ;;  %v20121_v18 = vrot.slane %v20112_v27, 5  ;;  %10906 = vrot.lane.b32.xlu0 %v10901_v35, %s11623_s6  ;;  %v5295_v61 = vrot.slane %v20122_v52, 1  ;;  %v20123_v58 = vld [vmem:[#allocation76_spill] sm:$0xff]  ;;  %v20130_v52 = vld [vmem:[#allocation117_spill] sm:$0xff]  ;;  %vm6188_vm7 = vcmask 261120  }
 0x367   :  { %v10164_v46 = vsel %vm3567_vm11, %v20117_v33, %v10162_v16  ;;  %v20124_v16 = vrot.slane %v20110_v4, 2  ;;  %v20127_v27 = vld [vmem:[#allocation168_spill] sm:$0xff]  ;;  %v20131_v4 = vld [vmem:[#allocation155_spill] sm:$0xff]  ;;  %vm19131_vm8 = vcmask 293888  }
 0x368   :  { %v10166_v5 = vsel %vm3570_vm12, %v20121_v18, %v10164_v46  ;;  %v16615_v18 = vpop.permute.xlu1 %8997  ;;  %v5296_v10 = vsel %vm3561_vm9, %v20130_v52, %v5295_v61  ;;  %v20139_v20 = vrot.slane %v20127_v27, 5  ;;  %v16649_v52 = vpop.permute.xlu0 %5525 }
 0x369   :  { %v16608_v33 = vsel %vm3579_vm15, %v20124_v16, %v10156_v28  ;;  %v10168_v19 = vsel %vm3573_vm13, %v20125_v0, %v10166_v5  ;;  %20128 = vst [vmem:[#allocation198_spill] sm:$0xff] %v16615_v18  ;;  %v20134_v5 = vrot.slane %v20123_v58, 7  ;;  %v20136_v28 = vrot.slane %v20126_v44, 6  ;;  %v20137_v18 = vld [vmem:[#allocation133_spill] sm:$0xff] }
 0x36a   :  { %v10170_v35 = vsel %vm3576_vm14, %v20129_v37, %v10168_v19  ;;  %v20135_v19 = vunpack.c.l.b16 %v16011_v14  ;;  %v20141_v14 = vld [vmem:[#allocation84_spill] sm:$0xff] }
 0x36b   :  { %v16627_v0 = vsel %vm3579_vm15, %v20132_v8, %v10170_v35  ;;  %v5298_v46 = vsel %vm3564_vm10, %v20134_v5, %v5296_v10  ;;  %v20138_v8 = vld [vmem:[#allocation167_spill] sm:$0xff]  ;;  %v20140_v5 = vld [vmem:[#allocation90_spill] sm:$0xff]  ;;  %v20145_v35 = vrot.slane %v20131_v4, 4 }
 0x36c   :  { %20133 = vst [vmem:[#allocation155_spill] sm:$0xff] %v16627_v0  ;;  %v5309_v37 = vrot.slane %v20135_v19, 1  ;;  %v10203_v61 = vpack.c.b16 %v16627_v0, %v16608_v33  ;;  %v5300_v16 = vsel %vm3567_vm11, %v20136_v28, %v5298_v46  ;;  %20142 = vst [vmem:[#allocation167_spill] sm:$0xff] %v16649_v52  ;;  %v20143_v46 = vld [vmem:[#allocation10_spill] sm:$0xff]  ;;  %v20144_v28 = vld [vmem:[#allocation11_spill] sm:$0xff]  ;;  %v20147_v19 = vrot.slane %v16521_v55, 3 }
 0x36d   :  { %v5302_v10 = vsel %vm3570_vm12, %v20139_v20, %v5300_v16  ;;  %v10926_v34 = vpack.c.b16 %v20144_v28, %v20143_v46  ;;  %v20146_v20 = vrot.slane %v20137_v18, 7  ;;  %v20148_v52 = vrot.slane %v16035_v3, 3  ;;  %v176_v3 = vld [vmem:[#allocation2 + $0x8c] sm:$0x1]  ;;  %v20243_v55 = vld [vmem:[#allocation73_spill] sm:$0xff] }
 0x36e   :  { %v5310_v41 = vsel %vm3561_vm9, %v20140_v5, %v5309_v37  ;;  %10209 = vrot.lane.b32.xlu1 %v10203_v61, %s11614_s21  ;;  %v5304_v27 = vsel %vm3573_vm13, %v20145_v35, %v5302_v10  ;;  %v10724_v58 = vsel %vm3573_vm13, %v20147_v19, %v10723_v11  ;;  %v20149_v46 = vrot.slane %v20138_v8, 6  ;;  %v16671_v10 = vpop.permute.xlu1 %5523 }
 0x36f   :  { %v5312_v16 = vsel %vm3564_vm10, %v20146_v20, %v5310_v41  ;;  %v5306_v61 = vsel %vm3576_vm14, %v20148_v52, %v5304_v27  ;;  %20150 = vst [vmem:[#allocation90_spill] sm:$0xff] %v16671_v10  ;;  %v20151_v41 = vrot.slane %v20056_v42, 2  ;;  %v5864_v11 = vrot.slane %v16111_v43, 7  ;;  %v170_v52 = vld [vmem:[#allocation2 + $0x74] sm:$0x1] }
 0x370   :  { %v5314_v28 = vsel %vm3567_vm11, %v20149_v46, %v5312_v16  ;;  %v20152_v19 = vrot.slane %v20141_v14, 5  ;;  %v20153_v16 = vrot.slane %v16324_v12, 2  ;;  %v5863_v42 = vsel %vm3561_vm9, %v16086_v7, %v5862_v57  ;;  %v20209_v7 = vld [vmem:[#allocation188_spill] sm:$0xff] }
 0x371   :  { %v8456_v20 = vsel %vm3576_vm14, %v20151_v41, %v16352_v54  ;;  %v20154_v54 = vrot.slane %v16043_v2, 2  ;;  %v20156_v35 = vrot.slane %v16048_v32, 4  ;;  %v10726_v10 = vrot.slane %v16578_v56, 1  ;;  %v20196_v56 = vld [vmem:[#allocation182_spill] sm:$0xff] }
 0x372   :  { %v5316_v27 = vsel %vm3570_vm12, %v20152_v19, %v5314_v28  ;;  %v5847_v46 = vsel %vm3576_vm14, %v20153_v16, %v16362_v45  ;;  %v20157_v28 = vrot.slane %v16537_v26, 2  ;;  %10930 = vrot.lane.b32.xlu1 %v10926_v34, %s11624_s0  ;;  %v20158_v45 = vrot.slane %v16050_v60, 3 }
 0x373   :  { %v16691_v41 = vsel %vm3579_vm15, %v20154_v54, %v5306_v61  ;;  %v5318_v37 = vsel %vm3573_vm13, %v20156_v35, %v5316_v27  ;;  %v5866_v16 = vrot.slane %v16143_v63, 6  ;;  %v20159_v54 = vrot.slane %v16055_v40, 2 }
 0x374   :  { %20155 = vst [vmem:[#allocation84_spill] sm:$0xff] %v16691_v41  ;;  %v10725_v19 = vsel %vm3576_vm14, %v20157_v28, %v10724_v58  ;;  %v5320_v57 = vsel %vm3576_vm14, %v20158_v45, %v5318_v37  ;;  %v171_v58 = vsel %vm11661_vm4, 0, %v170_v52  ;;  %v177_v34 = vsel %vm11661_vm4, 0, %v176_v3  ;;  %v16716_v28 = vpop.permute.xlu0 %10403  ;;  %v16732_v3 = vpop.permute.xlu1 %10401 }
 0x375   :  { %v16710_v35 = vsel %vm3579_vm15, %v20159_v54, %v5320_v57  ;;  %20162 = vst [vmem:[#allocation11_spill] sm:$0xff] %v16716_v28  ;;  %v5865_v37 = vsel %vm3564_vm10, %v5864_v11, %v5863_v42  ;;  %172 = vst [vmem:[#allocation2 + $0x74] sm:$0x1] %v171_v58  ;;  %v20163_v61 = vrot.slane %v20019_v24, 1  ;;  %v20165_v52 = vrot.slane %v20058_v22, 1  ;;  %v20174_v28 = vld [vmem:[#allocation92_spill] sm:$0xff] }
 0x376   :  { %20160 = vst [vmem:[#allocation10_spill] sm:$0xff] %v16710_v35  ;;  %v5326_v45 = vpack.c.b16 %v16710_v35, %v16691_v41  ;;  %178 = vst [vmem:[#allocation2 + $0x8c] sm:$0x1] %v177_v34  ;;  %v20168_v11 = vrot.slane %v16329_v47, 1  ;;  %v16740_v58 = vsel %vm3579_vm15, %v10726_v10, %v10725_v19  ;;  %v5868_v24 = vrot.slane %v16171_v36, 5  ;;  %v20175_v19 = vld [vmem:[#allocation97_spill] sm:$0xff] }
 0x377   :  { %v16725_v57 = vsel %vm3579_vm15, %v20163_v61, %v16140_v25  ;;  %v16730_v54 = vsel %vm3579_vm15, %v20165_v52, %v8456_v20  ;;  %20167 = vst [vmem:[#allocation200_spill] sm:$0xff] %v16732_v3  ;;  %20170 = vst [vmem:[#allocation202_spill] sm:$0xff] %v16740_v58  ;;  %v20171_v25 = vld [vmem:[#allocation165_spill] sm:$0xff]  ;;  %v5867_v20 = vsel %vm3567_vm11, %v5866_v16, %v5865_v37  ;;  %v10740_v61 = vrot.slane %v16365_v59, 1  ;;  %v20184_v58 = vld [vmem:[#allocation176_spill] sm:$0xff] }
 0x378   :  { %20164 = vst [vmem:[#allocation4_spill] sm:$0xff] %v16725_v57  ;;  %20166 = vst [vmem:[#allocation199_spill] sm:$0xff] %v16730_v54  ;;  %v16737_v42 = vsel %vm3579_vm15, %v20168_v11, %v5847_v46  ;;  %5333 = vrot.lane.b32.xlu0 %v5326_v45, %s11614_s21  ;;  %v6049_v22 = vpack.c.b16 %v16248_v48, %v20171_v25  ;;  %v661_v10 = vrot.slane %v20174_v28, 4  ;;  %v695_v3 = vrot.slane %v20175_v19, 4  ;;  %v16760_v25 = vpop.permute.xlu0 %5649  ;;  %v20180_v46 = vld [vmem:[#allocation100_spill] sm:$0xff]  ;;  %v20181_v37 = vld [vmem:[#allocation25_spill] sm:$0xff]  ;;  %v16776_v34 = vpop.permute.xlu1 %5647 }
 0x379   :  { %20169 = vst [vmem:[#allocation201_spill] sm:$0xff] %v16737_v42  ;;  %v5870_v16 = vrot.slane %v16313_v15, 4  ;;  %20178 = vst [vmem:[#allocation165_spill] sm:$0xff] %v16760_v25  ;;  %v5869_v52 = vsel %vm3570_vm12, %v5868_v24, %v5867_v20  ;;  %v10742_v11 = vrot.slane %v16379_v9, 7  ;;  %v10744_v28 = vrot.slane %v16373_v29, 6  ;;  %v20183_v24 = vld [vmem:[#allocation175_spill] sm:$0xff] }
 0x37a   :  { %v20179_v19 = vunpack.c.l.b16 %v16409_v13  ;;  %v10741_v48 = vsel %vm3561_vm9, %v16367_v31, %v10740_v61  ;;  %v20182_v53 = vrot.slane %v20181_v37, 7  ;;  %20185 = vst [vmem:[#allocation92_spill] sm:$0xff] %v16776_v34  ;;  %v20187_v61 = vld [vmem:[#allocation174_spill] sm:$0xff]  ;;  %v20188_v42 = vld [vmem:[#allocation177_spill] sm:$0xff]  ;;  %v20190_v29 = vld [vmem:[#allocation28_spill] sm:$0xff]  ;;  %v20192_v34 = vrot.slane %v20183_v24, 7 }
 0x37b   :  { %v20191_v20 = vrot.slane %v20190_v29, 7  ;;  %v20197_v59 = vld [vmem:[#allocation183_spill] sm:$0xff]  ;;  %v20198_v36 = vrot.slane %v20188_v42, 5  ;;  %v20204_v31 = vld [vmem:[#allocation181_spill] sm:$0xff] }
 0x37c   :  { %6054 = vrot.lane.b32.xlu0 %v6049_v22, %s11624_s0  ;;  %v10173_v45 = vrot.slane %v20179_v19, 1  ;;  %v1212_v41 = vld [vmem:[#allocation2 + $0x74] sm:$0x1]  ;;  %v5487_v25 = vsel %vm3561_vm9, %v20182_v53, %v20180_v46  ;;  %v16807_v63 = vpop.permute.xlu0 %10527  ;;  %v20212_v42 = vld [vmem:[#allocation13_spill] sm:$0xff] }
 0x37d   :  { %v1226_v54 = vld [vmem:[#allocation2 + $0x8c] sm:$0x1]  ;;  %v1213_v13 = vsel %vm11649_vm2, %v661_v10, %v1212_v41  ;;  %v20189_v53 = vld [vmem:[#allocation27_spill] sm:$0xff]  ;;  %20200 = vst [vmem:[#allocation97_spill] sm:$0xff] %v16807_v63  ;;  %v20207_v63 = vrot.slane %v16457_v17, 3 }
 0x37e   :  { %v1227_v19 = vsel %vm11649_vm2, %v695_v3, %v1226_v54  ;;  %v10174_v35 = vsel %vm3561_vm9, %v20187_v61, %v10173_v45  ;;  %1214 = vst [vmem:[#allocation2 + $0x74] sm:$0x1] %v1213_v13  ;;  %v5495_v57 = vsel %vm3561_vm9, %v20191_v20, %v20189_v53  ;;  %v20193_v41 = vld [vmem:[#allocation178_spill] sm:$0xff]  ;;  %v20194_v3 = vrot.slane %v20184_v58, 6  ;;  %v20199_v54 = vld [vmem:[#allocation185_spill] sm:$0xff] }
 0x37f   :  { %1228 = vst [vmem:[#allocation2 + $0x8c] sm:$0x1] %v1227_v19  ;;  %v10176_v9 = vsel %vm3564_vm10, %v20192_v34, %v10174_v35  ;;  %v20195_v13 = vunpack.c.l.b16 %v16438_v30  ;;  %v10743_v20 = vsel %vm3564_vm10, %v10742_v11, %v10741_v48  ;;  %v224_v17 = vld [vmem:[#allocation2 + $0x14c] sm:$0x1] }
 0x380   :  { %v10178_v45 = vsel %vm3567_vm11, %v20194_v3, %v10176_v9  ;;  %v20201_v9 = vld [vmem:[#allocation20_spill] sm:$0xff] }
 0x381   :  { %v10187_v19 = vrot.slane %v20195_v13, 1  ;;  %v10180_v35 = vsel %vm3570_vm12, %v20198_v36, %v10178_v45  ;;  %v20202_v3 = vrot.slane %v20201_v9, 6  ;;  %v20203_v13 = vrot.slane %v20193_v41, 4  ;;  %v20205_v45 = vld [vmem:[#allocation6_spill] sm:$0xff] }
 0x382   :  { %v11411_v36 = vld.sshfl [vmem:[#allocation2 + $0xcc] sm:$0x33 pattern:$0x75316420]  ;;  %v20206_v34 = vrot.slane %v20205_v45, 6  ;;  %v20211_v41 = vrot.slane %v20197_v59, 6 }
 0x383   :  { %v5488_v30 = vsel %vm3564_vm10, %v20202_v3, %v5487_v25  ;;  %v10182_v15 = vsel %vm3573_vm13, %v20203_v13, %v10180_v35  ;;  %v10188_v11 = vsel %vm3561_vm9, %v20204_v31, %v10187_v19  ;;  %v20208_v25 = vrot.slane %v20196_v56, 7  ;;  %v16828_v13 = vpop.permute.xlu1 %10525 }
 0x384   :  { %v5496_v10 = vsel %vm3564_vm10, %v20206_v34, %v5495_v57  ;;  %v10184_v43 = vsel %vm3576_vm14, %v20207_v63, %v10182_v15  ;;  %20210 = vst [vmem:[#allocation100_spill] sm:$0xff] %v16828_v13  ;;  %v5871_v19 = vsel %vm3573_vm13, %v5870_v16, %v5869_v52  ;;  %v10746_v63 = vrot.slane %v16381_v51, 5  ;;  %v11412_v15 = vld.sshfl [vmem:[#allocation2 + $0xd0] sm:$0x33 pattern:$0x75316420] }
 0x385   :  { %v10190_v3 = vsel %vm3564_vm10, %v20208_v25, %v10188_v11  ;;  %v20213_v11 = vrot.slane %v20212_v42, 5  ;;  %v20214_v35 = vrot.slane %v16465_v1, 2  ;;  %v20216_v16 = vrot.slane %v20199_v54, 5  ;;  %v20217_v13 = vld [vmem:[#allocation8_spill] sm:$0xff] }
 0x386   :  { %v10192_v57 = vsel %vm3567_vm11, %v20211_v41, %v10190_v3  ;;  %v230_v41 = vld [vmem:[#allocation2 + $0x164] sm:$0x1]  ;;  %v10745_v3 = vsel %vm3567_vm11, %v10744_v28, %v10743_v20  ;;  %v11389_v34 = vld.sshfl [vmem:[#allocation2 + $0x74] sm:$0x1 pattern:$0x75316420] }
 0x387   :  { %v5489_v25 = vsel %vm3567_vm11, %v20213_v11, %v5488_v30  ;;  %v16843_v52 = vsel %vm3579_vm15, %v20214_v35, %v10184_v43  ;;  %v10194_v48 = vsel %vm3570_vm12, %v20216_v16, %v10192_v57  ;;  %v20218_v47 = vrot.slane %v20217_v13, 5  ;;  %v11395_v11 = vld.sshfl [vmem:[#allocation2 + $0x8c] sm:$0x1 pattern:$0x75316420]  ;;  %v16863_v16 = vpop.permute.xlu0 %3803 }
 0x388   :  { %20215 = vst [vmem:[#allocation25_spill] sm:$0xff] %v16843_v52  ;;  %v20219_v59 = vrot.slane %v16470_v21, 4  ;;  %v2545_v35 = vcombine.high %v11411_v36, %v11411_v36  ;;  %v2103_v1 = vrot.slane %v11389_v34, %v19340_v49  ;;  %v20220_v57 = vrot.slane %v20209_v7, 3  ;;  %20221 = vst [vmem:[#allocation175_spill] sm:$0xff] %v16863_v16  ;;  %v20246_v7 = vld [vmem:[#allocation166_spill] sm:$0xff] }
 0x389   :  { %v5497_v51 = vsel %vm3567_vm11, %v20218_v47, %v5496_v10  ;;  %v225_v20 = vsel %vm11661_vm4, 0, %v224_v17  ;;  %v2227_v47 = vrot.slane %v11395_v11, %v19340_v49  ;;  %v20222_v10 = vld [vmem:[#allocation23_spill] sm:$0xff]  ;;  %v20224_v43 = vrot.slane %v16479_v23, 2  ;;  %v188_v21 = vld [vmem:[#allocation2 + $0xbc] sm:$0x1] }
 0x38a   :  { %v10196_v30 = vsel %vm3573_vm13, %v20219_v59, %v10194_v48  ;;  %v20223_v59 = vrot.slane %v20222_v10, 4  ;;  %226 = vst [vmem:[#allocation2 + $0x14c] sm:$0x1] %v225_v20  ;;  %v231_v34 = vsel %vm11661_vm4, 0, %v230_v41  ;;  %v5397_v11 = vrot.slane %v2103_v1, %v19340_v49 }
 0x38b   :  { %v10198_v28 = vsel %vm3576_vm14, %v20220_v57, %v10196_v30  ;;  %v20226_v30 = vrot.slane %v16324_v12, 3  ;;  %v20228_v57 = vld [vmem:[#allocation101_spill] sm:$0xff]  ;;  %232 = vst [vmem:[#allocation2 + $0x164] sm:$0x1] %v231_v34  ;;  %v16891_v41 = vrot.slane %v11411_v36, %v19340_v49  ;;  %v2569_v20 = vcombine.high %v11412_v15, %v11412_v15 }
 0x38c   :  { %v5490_v48 = vsel %vm3570_vm12, %v20223_v59, %v5489_v25  ;;  %v16872_v0 = vsel %vm3579_vm15, %v20224_v43, %v10198_v28  ;;  %v20229_v16 = vrot.slane %v20228_v57, 4  ;;  %v16887_v43 = vpop.permute.xlu1 %5793  ;;  %v16895_v1 = vsel %vm3570_vm12, %v10746_v63, %v10745_v3  ;;  %v20236_v63 = vld [vmem:[#allocation102_spill] sm:$0xff] }
 0x38d   :  { %20225 = vst [vmem:[#allocation176_spill] sm:$0xff] %v16872_v0  ;;  %v16879_v17 = vsel %vm3576_vm14, %v20226_v30, %v5871_v19  ;;  %v10204_v59 = vpack.c.b16 %v16872_v0, %v16843_v52  ;;  %20230 = vst [vmem:[#allocation174_spill] sm:$0xff] %v16887_v43  ;;  %v5411_v19 = vrot.slane %v2227_v47, %v19340_v49  ;;  %v20234_v43 = vld [vmem:[#allocation93_spill] sm:$0xff]  ;;  %v933_v3 = vrot.slane %v20236_v63, 4 }
 0x38e   :  { %20227 = vst [vmem:[#allocation3_spill] sm:$0xff] %v16879_v17  ;;  %v5498_v25 = vsel %vm3570_vm12, %v20229_v16, %v5497_v51  ;;  %20231 = vst [vmem:[#allocation27_spill] sm:$0xff] %v16895_v1  ;;  %v5404_v51 = vrot.slane %v5397_v11, %v19340_v49  ;;  %v20232_v16 = vld [vmem:[#allocation24_spill] sm:$0xff]  ;;  %v2559_v28 = vrot.slane %v2545_v35, %v19340_v49  ;;  %v20235_v52 = vrot.slane %v20234_v43, 3  ;;  %v20237_v17 = vld [vmem:[#allocation105_spill] sm:$0xff] }
 0x38f   :  { %v20233_v0 = vrot.slane %v20232_v16, 3  ;;  %10211 = vrot.lane.b32.xlu0 %v10204_v59, %s11614_s21  ;;  %v5418_v36 = vrot.slane %v5411_v19, %v19340_v49  ;;  %v16910_v30 = vrot.slane %v11412_v15, %v19340_v49  ;;  %v967_v26 = vrot.slane %v20237_v17, 4  ;;  %v16919_v59 = vpop.permute.xlu0 %5819  ;;  %v20241_v15 = vld [vmem:[#allocation26_spill] sm:$0xff]  ;;  %v182_v17 = vld [vmem:[#allocation2 + $0xa4] sm:$0x1]  ;;  %s11626_s21 = smov 60  }
 0x390   :  { %v5499_v47 = vsel %vm3573_vm13, %v20235_v52, %v5498_v25  ;;  %v16912_v11 = vunpack.c.l.b16 %v5404_v51  ;;  %20240 = vst [vmem:[#allocation28_spill] sm:$0xff] %v16919_v59  ;;  %v2560_v19 = vcombine.high %v16891_v41, %v16891_v41  ;;  %v16924_v52 = vrot.slane %v2569_v20, %v19340_v49 }
 0x391   :  { %v5491_v34 = vsel %vm3573_vm13, %v20233_v0, %v5490_v48  ;;  %v20238_v0 = vld [vmem:[#allocation107_spill] sm:$0xff]  ;;  %v20239_v48 = vrot.slane %v20069_v6, 7  ;;  %v16926_v25 = vunpack.c.l.b16 %v5418_v36  ;;  %v20242_v51 = vrot.slane %v20241_v15, 2  ;;  %v1324_v59 = vld [vmem:[#allocation2 + $0x14c] sm:$0x1]  ;;  %v16941_v6 = vpop.permute.xlu1 %10671 }
 0x392   :  { %v5493_v12 = vrot.slane %v16912_v11, 1  ;;  %v20244_v1 = vrot.slane %v20243_v55, 2  ;;  %v20245_v23 = vrot.slane %v15893_v62, 7  ;;  %v10927_v36 = vpack.c.b16 %v16608_v33, %v20246_v7  ;;  %20247 = vst [vmem:[#allocation182_spill] sm:$0xff] %v16941_v6  ;;  %v194_v62 = vld [vmem:[#allocation2 + $0xd4] sm:$0x1] }
 0x393   :  { %v10365_v35 = vsel %vm3561_vm9, %v20239_v48, %v20238_v0  ;;  %v5492_v63 = vsel %vm3576_vm14, %v20242_v51, %v5491_v34  ;;  %v2561_v34 = vcombine.high %v2559_v28, %v2559_v28  ;;  %v5501_v51 = vrot.slane %v16926_v25, 1  ;;  %v1338_v0 = vld [vmem:[#allocation2 + $0x164] sm:$0x1] }
 0x394   :  { %v5500_v48 = vsel %vm3576_vm14, %v20244_v1, %v5499_v47  ;;  %v10373_v20 = vsel %vm3561_vm9, %v20245_v23, %v20111_v38  ;;  %v1325_v54 = vsel %vm11649_vm2, %v933_v3, %v1324_v59  ;;  %v20248_v1 = vrot.slane %v20096_v50, 6  ;;  %10932 = vrot.lane.b32.xlu0 %v10927_v36, %s11624_s0 }
 0x395   :  { %v5894_v23 = vrot.slane %v16891_v41, %v19340_v49  ;;  %v5950_v7 = vrot.slane %v16910_v30, %v19340_v49  ;;  %v16954_v33 = vsel %vm3579_vm15, %v5493_v12, %v5492_v63  ;;  %1326 = vst [vmem:[#allocation2 + $0x14c] sm:$0x1] %v1325_v54  ;;  %v1339_v6 = vsel %vm11649_vm2, %v967_v26, %v1338_v0  ;;  %v20251_v63 = vld [vmem:[#allocation9_spill] sm:$0xff] }
 0x396   :  { %v10366_v47 = vsel %vm3564_vm10, %v20248_v1, %v10365_v35  ;;  %v5908_v3 = vrot.slane %v2559_v28, %v19340_v49  ;;  %v16961_v35 = vsel %vm3579_vm15, %v5501_v51, %v5500_v48  ;;  %1340 = vst [vmem:[#allocation2 + $0x164] sm:$0x1] %v1339_v6  ;;  %v20250_v41 = vrot.slane %v20108_v39, 6  ;;  %v16977_v48 = vpop.permute.xlu0 %10673  ;;  %v20255_v1 = vld [vmem:[#allocation15_spill] sm:$0xff] }
 0x397   :  { %20249 = vst [vmem:[#allocation20_spill] sm:$0xff] %v16961_v35  ;;  %v183_v12 = vsel %vm11661_vm4, 0, %v182_v17  ;;  %v5521_v54 = vpack.c.b16 %v16961_v35, %v16954_v33  ;;  %v20252_v26 = vrot.slane %v20251_v63, 5  ;;  %v189_v28 = vsel %vm11661_vm4, 0, %v188_v21  ;;  %20253 = vst [vmem:[#allocation181_spill] sm:$0xff] %v16977_v48  ;;  %v20263_v48 = vld [vmem:[#allocation76_spill] sm:$0xff] }
 0x398   :  { %v10374_v59 = vsel %vm3564_vm10, %v20250_v41, %v10373_v20  ;;  %184 = vst [vmem:[#allocation2 + $0xa4] sm:$0x1] %v183_v12  ;;  %v195_v6 = vsel %vm11661_vm4, 0, %v194_v62  ;;  %v2584_v20 = vcombine.high %v16910_v30, %v16910_v30  ;;  %v16984_v36 = vrot.slane %v2560_v19, %v19340_v49  ;;  %190 = vst [vmem:[#allocation2 + $0xbc] sm:$0x1] %v189_v28  ;;  %v20254_v62 = vld [vmem:[#allocation80_spill] sm:$0xff] }
 0x399   :  { %v10367_v0 = vsel %vm3567_vm11, %v20252_v26, %v10366_v47  ;;  %v16987_v51 = vrot.slane %v2561_v34, %v19340_v49  ;;  %196 = vst [vmem:[#allocation2 + $0xd4] sm:$0x1] %v195_v6  ;;  %v5964_v21 = vrot.slane %v16924_v52, %v19340_v49  ;;  %5527 = vrot.lane.b32.xlu1 %v5521_v54, %s11617_s24  ;;  %v20256_v30 = vld [vmem:[#allocation87_spill] sm:$0xff]  ;;  %v5587_v19 = vrot.slane %v20180_v46, 1  ;;  %v16998_v26 = vpop.permute.xlu1 %5795  ;;  %v20259_v6 = vld [vmem:[#allocation34_spill] sm:$0xff]  ;;  %v20262_v46 = vld [vmem:[#allocation117_spill] sm:$0xff] }
 0x39a   :  { %v6083_v47 = vpack.c.b16 %v20255_v1, %v20254_v62  ;;  %v20257_v41 = vrot.slane %v20256_v30, 5  ;;  %20258 = vst [vmem:[#allocation6_spill] sm:$0xff] %v16998_v26  ;;  %v17001_v34 = vrot.slane %v5894_v23, %v19340_v49  ;;  %v17004_v28 = vrot.slane %v5950_v7, %v19340_v49 }
 0x39b   :  { %v20260_v17 = vrot.slane %v20259_v6, 4  ;;  %v5589_v62 = vrot.slane %v20201_v9, 7  ;;  %v17011_v1 = vrot.slane %v5908_v3, %v19340_v49  ;;  %v20264_v26 = vrot.slane %v20263_v48, 7 }
 0x39c   :  { %v10375_v12 = vsel %vm3567_vm11, %v20257_v41, %v10374_v59  ;;  %v20261_v59 = vld [vmem:[#allocation104_spill] sm:$0xff]  ;;  %v5588_v7 = vsel %vm3561_vm9, %v20181_v37, %v5587_v19  ;;  %v11443_v9 = vld.sshfl [vmem:[#allocation2 + $0x14c] sm:$0x1 pattern:$0x75316420]  ;;  %v17029_v48 = vrot.slane %v5964_v21, %v19340_v49  ;;  %v20271_v21 = vrot.slane %v20126_v44, 6 }
 0x39d   :  { %v10368_v54 = vsel %vm3570_vm12, %v20260_v17, %v10367_v0  ;;  %v729_v41 = vrot.slane %v20261_v59, 4  ;;  %v5503_v23 = vsel %vm3561_vm9, %v20264_v26, %v20262_v46  ;;  %v20265_v17 = vld [vmem:[#allocation78_spill] sm:$0xff]  ;;  %6087 = vrot.lane.b32.xlu1 %v6083_v47, %s11625_s5  ;;  %v11449_v37 = vld.sshfl [vmem:[#allocation2 + $0x164] sm:$0x1 pattern:$0x75316420]  ;;  %v6988_v19 = vrot.slane %v11443_v9, %v19340_v49 }
 0x39e   :  { %v20266_v3 = vrot.slane %v20265_v17, 4  ;;  %v20267_v59 = vld [vmem:[#allocation106_spill] sm:$0xff]  ;;  %v5590_v46 = vsel %vm3564_vm10, %v5589_v62, %v5588_v7  ;;  %v17037_v17 = vpop.permute.xlu0 %3805  ;;  %v20272_v47 = vrot.slane %v20137_v18, 7  ;;  %v5593_v44 = vrot.slane %v20222_v10, 5  ;;  %v20278_v10 = vld [vmem:[#allocation168_spill] sm:$0xff] }
 0x39f   :  { %v763_v38 = vrot.slane %v20267_v59, 4  ;;  %v20268_v26 = vld [vmem:[#allocation38_spill] sm:$0xff]  ;;  %20270 = vst [vmem:[#allocation13_spill] sm:$0xff] %v17037_v17  ;;  %v5504_v59 = vsel %vm3564_vm10, %v20271_v21, %v5503_v23  ;;  %v1254_v17 = vld [vmem:[#allocation2 + $0xbc] sm:$0x1]  ;;  %v17055_v23 = vpop.permute.xlu1 %8681  ;;  %v17058_v21 = vrot.slane %v2584_v20, %v19340_v49  ;;  %v20280_v18 = vrot.slane %v20138_v8, 6 }
 0x3a0   :  { %v10376_v39 = vsel %vm3570_vm12, %v20266_v3, %v10375_v12  ;;  %v20269_v30 = vrot.slane %v20268_v26, 3  ;;  %v7112_v12 = vrot.slane %v11449_v37, %v19340_v49  ;;  %v1240_v3 = vld [vmem:[#allocation2 + $0xa4] sm:$0x1]  ;;  %v5511_v9 = vsel %vm3561_vm9, %v20272_v47, %v20140_v5  ;;  %20275 = vst [vmem:[#allocation8_spill] sm:$0xff] %v17055_v23 }
 0x3a1   :  { %v5591_v26 = vrot.slane %v20212_v42, 6  ;;  %v1241_v37 = vsel %vm11649_vm2, %v729_v41, %v1240_v3  ;;  %v1255_v42 = vsel %vm11649_vm2, %v763_v38, %v1254_v17  ;;  %v20279_v23 = vrot.slane %v20278_v10, 5  ;;  %v20281_v38 = vld [vmem:[#allocation83_spill] sm:$0xff] }
 0x3a2   :  { %v10369_v0 = vsel %vm3573_vm13, %v20269_v30, %v10368_v54  ;;  %v10275_v30 = vrot.slane %v6988_v19, %v19340_v49  ;;  %v20273_v54 = vld [vmem:[#allocation88_spill] sm:$0xff]  ;;  %v10289_v47 = vrot.slane %v7112_v12, %v19340_v49  ;;  %1242 = vst [vmem:[#allocation2 + $0xa4] sm:$0x1] %v1241_v37  ;;  %1256 = vst [vmem:[#allocation2 + $0xbc] sm:$0x1] %v1255_v42  ;;  %v20282_v17 = vrot.slane %v20281_v38, 2 }
 0x3a3   :  { %v20274_v62 = vrot.slane %v20273_v54, 3  ;;  %v5592_v19 = vsel %vm3567_vm11, %v5591_v26, %v5590_v46  ;;  %v5505_v20 = vsel %vm3567_vm11, %v20279_v23, %v5504_v59  ;;  %v5512_v12 = vsel %vm3564_vm10, %v20280_v18, %v5511_v9 }
 0x3a4   :  { %v10296_v37 = vrot.slane %v10289_v47, %v19340_v49  ;;  %v5595_v26 = vrot.slane %v20232_v16, 4  ;;  %v5594_v42 = vsel %vm3570_vm12, %v5593_v44, %v5592_v19  ;;  %v5603_v59 = vrot.slane %v20205_v45, 7 }
 0x3a5   :  { %v10377_v7 = vsel %vm3573_vm13, %v20274_v62, %v10376_v39  ;;  %v10282_v39 = vrot.slane %v10275_v30, %v19340_v49  ;;  %v20276_v62 = vld [vmem:[#allocation75_spill] sm:$0xff]  ;;  %v5601_v30 = vrot.slane %v20189_v53, 1  ;;  %v5605_v23 = vrot.slane %v20217_v13, 6 }
 0x3a6   :  { %v20277_v41 = vrot.slane %v20276_v62, 2  ;;  %v10378_v46 = vsel %vm3576_vm14, %v20282_v17, %v10377_v7  ;;  %v17087_v18 = vunpack.c.l.b16 %v10296_v37  ;;  %v20284_v9 = vrot.slane %v20131_v4, 4 }
 0x3a7   :  { %v20285_v16 = vrot.slane %v20141_v14, 5  ;;  %v5602_v47 = vsel %vm3561_vm9, %v20190_v29, %v5601_v30  ;;  %v5597_v45 = vrot.slane %v20241_v15, 3  ;;  %v5607_v19 = vrot.slane %v20228_v57, 5 }
 0x3a8   :  { %v10370_v3 = vsel %vm3576_vm14, %v20277_v41, %v10369_v0  ;;  %v17080_v0 = vunpack.c.l.b16 %v10282_v39  ;;  %v17085_v41 = vpop.permute.xlu0 %5821  ;;  %v5506_v7 = vsel %vm3570_vm12, %v20284_v9, %v5505_v20  ;;  %v5604_v13 = vsel %vm3564_vm10, %v5603_v59, %v5602_v47  ;;  %v17101_v39 = vpop.permute.xlu1 %10697 }
 0x3a9   :  { %20283 = vst [vmem:[#allocation23_spill] sm:$0xff] %v17085_v41  ;;  %v5513_v53 = vsel %vm3567_vm11, %v20285_v16, %v5512_v12  ;;  %20286 = vst [vmem:[#allocation101_spill] sm:$0xff] %v17101_v39  ;;  %v10379_v37 = vrot.slane %v17087_v18, 1  ;;  %v5596_v20 = vsel %vm3573_vm13, %v5595_v26, %v5594_v42  ;;  %v5606_v17 = vsel %vm3567_vm11, %v5605_v23, %v5604_v13 }
 0x3aa   :  { %v10371_v44 = vrot.slane %v17080_v0, 1  ;;  %v5609_v12 = vrot.slane %v20234_v43, 4  ;;  %v11401_v30 = vld.sshfl [vmem:[#allocation2 + $0xa4] sm:$0x1 pattern:$0x75316420]  ;;  %v5608_v59 = vsel %vm3570_vm12, %v5607_v19, %v5606_v17 }
 0x3ab   :  { %v5599_v15 = vrot.slane %v16912_v11, 2  ;;  %v5611_v57 = vrot.slane %v20243_v55, 3  ;;  %v17114_v9 = vsel %vm3579_vm15, %v10379_v37, %v10378_v46  ;;  %v11407_v16 = vld.sshfl [vmem:[#allocation2 + $0xbc] sm:$0x1 pattern:$0x75316420]  ;;  %v2351_v26 = vrot.slane %v11401_v30, %v19340_v49 }
 0x3ac   :  { %v17108_v29 = vsel %vm3579_vm15, %v10371_v44, %v10370_v3  ;;  %20287 = vst [vmem:[#allocation24_spill] sm:$0xff] %v17114_v9  ;;  %v5610_v42 = vsel %vm3573_vm13, %v5609_v12, %v5608_v59  ;;  %v5613_v43 = vrot.slane %v16926_v25, 2  ;;  %v2475_v23 = vrot.slane %v11407_v16, %v19340_v49  ;;  %v236_v55 = vld [vmem:[#allocation2 + $0x17c] sm:$0x1]  ;;  %v17124_v44 = vpop.permute.xlu0 %8683  ;;  %v20292_v12 = vld [vmem:[#allocation81_spill] sm:$0xff] }
 0x3ad   :  { %v10399_v3 = vpack.c.b16 %v17114_v9, %v17108_v29  ;;  %v5598_v11 = vsel %vm3576_vm14, %v5597_v45, %v5596_v20  ;;  %v5612_v47 = vsel %vm3576_vm14, %v5611_v57, %v5610_v42  ;;  %20288 = vst [vmem:[#allocation93_spill] sm:$0xff] %v17124_v44  ;;  %v20289_v46 = vcombine.high %v16924_v52, %v16924_v52  ;;  %v242_v45 = vld [vmem:[#allocation2 + $0x194] sm:$0x1]  ;;  %v20293_v30 = vld [vmem:[#allocation109_spill] sm:$0xff] }
 0x3ae   :  { %v5425_v19 = vrot.slane %v2351_v26, %v19340_v49  ;;  %v20290_v37 = vrot.slane %v16048_v32, 4  ;;  %v17138_v20 = vunpack.c.l.b16 %v17011_v1  ;;  %v10961_v59 = vpack.c.b16 %v20293_v30, %v20292_v12  ;;  %v20294_v57 = vld [vmem:[#allocation139_spill] sm:$0xff]  ;;  %v248_v26 = vld [vmem:[#allocation2 + $0x1ac] sm:$0x1] }
 0x3af   :  { %v17130_v13 = vrot.slane %v20289_v46, %v19340_v49  ;;  %10405 = vrot.lane.b32.xlu1 %v10399_v3, %s11617_s24  ;;  %v5439_v52 = vrot.slane %v2475_v23, %v19340_v49  ;;  %v20295_v16 = vrot.slane %v20294_v57, 3  ;;  %v17147_v46 = vpop.permute.xlu1 %3999  ;;  %v17154_v1 = vsel %vm3579_vm15, %v5613_v43, %v5612_v47 }
 0x3b0   :  { %v5514_v17 = vsel %vm3570_vm12, %v20290_v37, %v5513_v53  ;;  %20291 = vst [vmem:[#allocation102_spill] sm:$0xff] %v17138_v20  ;;  %20296 = vst [vmem:[#allocation105_spill] sm:$0xff] %v17147_v46  ;;  %v5432_v53 = vrot.slane %v5425_v19, %v19340_v49  ;;  %v17151_v37 = vsel %vm3579_vm15, %v5599_v15, %v5598_v11  ;;  %v237_v3 = vsel %vm11661_vm4, 0, %v236_v55 }
 0x3b1   :  { %v5507_v42 = vsel %vm3573_vm13, %v20295_v16, %v5506_v7  ;;  %20297 = vst [vmem:[#allocation26_spill] sm:$0xff] %v17154_v1  ;;  %v20298_v23 = vrot.slane %v16984_v36, %v19340_v49  ;;  %v5446_v7 = vrot.slane %v5439_v52, %v19340_v49  ;;  %v20299_v30 = vrot.slane %v16050_v60, 3  ;;  %238 = vst [vmem:[#allocation2 + $0x17c] sm:$0x1] %v237_v3  ;;  %v17192_v3 = vpop.permute.xlu0 %10699 }
 0x3b2   :  { %v243_v15 = vsel %vm11661_vm4, 0, %v242_v45  ;;  %v20300_v11 = vrot.slane %v16987_v51, %v19340_v49  ;;  %v17176_v36 = vunpack.c.l.b16 %v5432_v53  ;;  %v249_v55 = vsel %vm11661_vm4, 0, %v248_v26  ;;  %20303 = vst [vmem:[#allocation73_spill] sm:$0xff] %v17192_v3 }
 0x3b3   :  { %v17161_v12 = vunpack.c.l.b16 %v20298_v23  ;;  %v5515_v19 = vsel %vm3573_vm13, %v20299_v30, %v5514_v17  ;;  %244 = vst [vmem:[#allocation2 + $0x194] sm:$0x1] %v243_v15  ;;  %10965 = vrot.lane.b32.xlu1 %v10961_v59, %s11625_s5  ;;  %v17181_v17 = vunpack.c.l.b16 %v5446_v7  ;;  %v20301_v45 = vrot.slane %v16043_v2, 2  ;;  %250 = vst [vmem:[#allocation2 + $0x1ac] sm:$0x1] %v249_v55  ;;  %v17212_v27 = vpop.permute.xlu1 %5854 }
 0x3b4   :  { %v17174_v47 = vunpack.c.l.b16 %v20300_v11  ;;  %v5645_v16 = vpack.c.b16 %v17154_v1, %v17151_v37  ;;  %v20302_v51 = vrot.slane %v20183_v24, 7  ;;  %v5509_v59 = vrot.slane %v17176_v36, 1  ;;  %v20306_v11 = vld [vmem:[#allocation56_spill] sm:$0xff]  ;;  %20308 = vst [vmem:[#allocation166_spill] sm:$0xff] %v17212_v27 }
 0x3b5   :  { %v5508_v52 = vsel %vm3576_vm14, %v20301_v45, %v5507_v42  ;;  %v20304_v26 = vrot.slane %v16055_v40, 2  ;;  %v20305_v23 = vrot.slane %v20196_v56, 7  ;;  %v17205_v30 = vunpack.c.l.b16 %v17004_v28  ;;  %v20311_v28 = vld [vmem:[#allocation85_spill] sm:$0xff]  ;;  %v20380_v1 = vld [vmem:[#allocation136_spill] sm:$0xff] }
 0x3b6   :  { %v10381_v53 = vsel %vm3561_vm9, %v20302_v51, %v20187_v61  ;;  %v5517_v15 = vrot.slane %v17181_v17, 1  ;;  %v1001_v55 = vrot.slane %v20306_v11, 4  ;;  %v20307_v45 = vrot.slane %v20184_v58, 6 }
 0x3b7   :  { %v5516_v42 = vsel %vm3576_vm14, %v20304_v26, %v5515_v19  ;;  %v10389_v7 = vsel %vm3561_vm9, %v20305_v23, %v20204_v31  ;;  %v17215_v19 = vunpack.c.l.b16 %v17029_v48  ;;  %v6008_v26 = vrot.slane %v17138_v20, 7  ;;  %5651 = vrot.lane.b32.xlu1 %v5645_v16, %s11618_s25  ;;  %v20315_v48 = vld [vmem:[#allocation183_spill] sm:$0xff]  ;;  %v20319_v16 = vld [vmem:[#allocation74_spill] sm:$0xff] }
 0x3b8   :  { %v10382_v51 = vsel %vm3564_vm10, %v20307_v45, %v10381_v53  ;;  %v17219_v23 = vsel %vm3579_vm15, %v5509_v59, %v5508_v52  ;;  %v1035_v43 = vrot.slane %v20311_v28, 4  ;;  %v17223_v25 = vsel %vm3579_vm15, %v5517_v15, %v5516_v42  ;;  %v20313_v53 = vld [vmem:[#allocation86_spill] sm:$0xff]  ;;  %v20314_v45 = vld [vmem:[#allocation121_spill] sm:$0xff]  ;;  %v1352_v15 = vld [vmem:[#allocation2 + $0x17c] sm:$0x1]  ;;  %v17246_v59 = vpop.permute.xlu0 %4001 }
 0x3b9   :  { %20309 = vst [vmem:[#allocation9_spill] sm:$0xff] %v17215_v19  ;;  %20310 = vst [vmem:[#allocation80_spill] sm:$0xff] %v17219_v23  ;;  %v6109_v3 = vpack.c.b16 %v20314_v45, %v20313_v53  ;;  %v20316_v41 = vrot.slane %v20315_v48, 6  ;;  %v6010_v52 = vrot.slane %v17161_v12, 6  ;;  %v5522_v42 = vpack.c.b16 %v17223_v25, %v17219_v23  ;;  %v20317_v28 = vld [vmem:[#allocation177_spill] sm:$0xff] }
 0x3ba   :  { %20312 = vst [vmem:[#allocation15_spill] sm:$0xff] %v17223_v25  ;;  %v20318_v27 = vrot.slane %v20317_v28, 5  ;;  %v6084_v35 = vpack.c.b16 %v16954_v33, %v20319_v16  ;;  %v1353_v53 = vsel %vm11649_vm2, %v1001_v55, %v1352_v15  ;;  %v1366_v45 = vld [vmem:[#allocation2 + $0x194] sm:$0x1]  ;;  %v10467_v44 = vrot.slane %v20096_v50, 7  ;;  %20321 = vst [vmem:[#allocation34_spill] sm:$0xff] %v17246_v59 }
 0x3bb   :  { %v10390_v39 = vsel %vm3564_vm10, %v20316_v41, %v10389_v7  ;;  %v20320_v41 = vld [vmem:[#allocation107_spill] sm:$0xff]  ;;  %5529 = vrot.lane.b32.xlu0 %v5522_v42, %s11617_s24  ;;  %1354 = vst [vmem:[#allocation2 + $0x17c] sm:$0x1] %v1353_v53  ;;  %v1367_v25 = vsel %vm11649_vm2, %v1035_v43, %v1366_v45  ;;  %v10469_v16 = vrot.slane %v20251_v63, 6  ;;  %v10471_v55 = vrot.slane %v20259_v6, 5  ;;  %6113 = vrot.lane.b32.xlu1 %v6109_v3, %s11626_s21  ;;  %v20325_v42 = vld [vmem:[#allocation178_spill] sm:$0xff] }
 0x3bc   :  { %v10383_v11 = vsel %vm3567_vm11, %v20318_v27, %v10382_v51  ;;  %v10465_v7 = vrot.slane %v20320_v41, 1  ;;  %v20322_v27 = vld [vmem:[#allocation185_spill] sm:$0xff]  ;;  %v20324_v15 = vunpack.c.l.b16 %v17001_v34  ;;  %v11466_v41 = vld.sshfl [vmem:[#allocation2 + $0x1a8] sm:$0x33 pattern:$0x75316420] }
 0x3bd   :  { %v20323_v51 = vrot.slane %v20322_v27, 5  ;;  %1368 = vst [vmem:[#allocation2 + $0x194] sm:$0x1] %v1367_v25  ;;  %v20326_v22 = vrot.slane %v20325_v42, 4  ;;  %v20327_v53 = vld [vmem:[#allocation32_spill] sm:$0xff]  ;;  %v20328_v45 = vld [vmem:[#allocation38_spill] sm:$0xff] }
 0x3be   :  { %v6009_v50 = vsel %vm3561_vm9, %v6008_v26, %v20324_v15  ;;  %v10473_v63 = vrot.slane %v20328_v45, 4  ;;  %v10475_v26 = vrot.slane %v20276_v62, 3  ;;  %v20329_v15 = vld [vmem:[#allocation110_spill] sm:$0xff]  ;;  %v20330_v59 = vld [vmem:[#allocation72_spill] sm:$0xff]  ;;  %v10477_v62 = vrot.slane %v17080_v0, 2 }
 0x3bf   :  { %v10391_v33 = vsel %vm3567_vm11, %v20323_v51, %v10390_v39  ;;  %v10384_v43 = vsel %vm3570_vm12, %v20326_v22, %v10383_v11  ;;  %v10466_v39 = vsel %vm3561_vm9, %v20327_v53, %v10465_v7  ;;  %v17266_v51 = vpop.permute.xlu1 %8877  ;;  %v10479_v23 = vrot.slane %v20329_v15, 1  ;;  %v20331_v25 = vld [vmem:[#allocation186_spill] sm:$0xff]  ;;  %v20333_v22 = vld [vmem:[#allocation87_spill] sm:$0xff]  ;;  %6089 = vrot.lane.b32.xlu0 %v6084_v35, %s11625_s5 }
 0x3c0   :  { %v10468_v6 = vsel %vm3564_vm10, %v10467_v44, %v10466_v39  ;;  %v10481_v3 = vrot.slane %v20330_v59, 7  ;;  %v20332_v46 = vrot.slane %v20331_v25, 4  ;;  %v10483_v7 = vrot.slane %v20333_v22, 6  ;;  %v20334_v53 = vld [vmem:[#allocation78_spill] sm:$0xff]  ;;  %v20335_v39 = vld [vmem:[#allocation7_spill] sm:$0xff] }
 0x3c1   :  { %v10470_v11 = vsel %vm3567_vm11, %v10469_v16, %v10468_v6  ;;  %v10485_v45 = vrot.slane %v20334_v53, 5  ;;  %v10480_v15 = vsel %vm3561_vm9, %v20335_v39, %v10479_v23  ;;  %v10487_v59 = vrot.slane %v20273_v54, 4  ;;  %v20339_v53 = vld [vmem:[#allocation180_spill] sm:$0xff] }
 0x3c2   :  { %v10392_v20 = vsel %vm3570_vm12, %v20332_v46, %v10391_v33  ;;  %v10472_v44 = vsel %vm3570_vm12, %v10471_v55, %v10470_v11  ;;  %v11606_v46 = vld [vmem:[%s18362_s1] sm:$0xff]   ;;  %v10482_v16 = vsel %vm3564_vm10, %v10481_v3, %v10480_v15  ;;  %v10489_v6 = vrot.slane %v20281_v38, 3  ;;  %v17291_v55 = vpop.permute.xlu0 %5856  ;;  %v11455_v38 = vld.sshfl [vmem:[#allocation2 + $0x17c] sm:$0x1 pattern:$0x75316420] }
 0x3c3   :  { %v10474_v33 = vsel %vm3573_vm13, %v10473_v63, %v10472_v44  ;;  %v10491_v35 = vrot.slane %v17087_v18, 2  ;;  %20336 = vst [vmem:[#allocation104_spill] sm:$0xff] %v17291_v55  ;;  %v6011_v0 = vsel %vm3564_vm10, %v6010_v52, %v6009_v50  ;;  %v7454_v11 = vcombine.high %v11466_v41, %v11466_v41  ;;  %11557 = vmatprep.subr.bf16.mxu0 %v11606_v46  ;;  %v17306_v50 = vpop.permute.xlu1 %10732  ;;  %v20342_v39 = vld [vmem:[#allocation188_spill] sm:$0xff] }
 0x3c4   :  { %v10476_v23 = vsel %vm3576_vm14, %v10475_v26, %v10474_v33  ;;  %v10484_v54 = vsel %vm3567_vm11, %v10483_v7, %v10482_v16  ;;  %v20337_v22 = vrot.slane %v17058_v21, %v19340_v49  ;;  %v20340_v18 = vrot.slane %v20339_v53, 3  ;;  %20341 = vst [vmem:[#allocation88_spill] sm:$0xff] %v17306_v50  ;;  %11558 = vmatpush3.bf16.msra.mxu0 %v11606_v46  ;;  %v11461_v26 = vld.sshfl [vmem:[#allocation2 + $0x194] sm:$0x1 pattern:$0x75316420] }
 0x3c5   :  { %v10486_v52 = vsel %vm3570_vm12, %v10485_v45, %v10484_v54  ;;  %11581 = vmatprep.subr.bf16.mxu1 %v11606_v46  ;;  %v7236_v7 = vrot.slane %v11455_v38, %v19340_v49  ;;  %v20343_v21 = vrot.slane %v20342_v39, 3  ;;  %v17313_v33 = vsel %vm3579_vm15, %v10477_v62, %v10476_v23 }
 0x3c6   :  { %v17299_v63 = vunpack.c.l.b16 %v20337_v22  ;;  %v10385_v44 = vsel %vm3573_vm13, %v20340_v18, %v10384_v43  ;;  %v10488_v16 = vsel %vm3573_vm13, %v10487_v59, %v10486_v52  ;;  %11585 = vmatpush3.bf16.msra.mxu1 %v11606_v46  ;;  %v20344_v43 = vrot.slane %v17174_v47, 5  ;;  %v20347_v18 = vld [vmem:[#allocation184_spill] sm:$0xff] }
 0x3c7   :  { %v10393_v15 = vsel %vm3573_vm13, %v20343_v21, %v10392_v20  ;;  %v17322_v54 = vrot.slane %v11466_v41, %v19340_v49  ;;  %v7360_v22 = vrot.slane %v11461_v26, %v19340_v49  ;;  %v10490_v38 = vsel %vm3576_vm14, %v10489_v6, %v10488_v16  ;;  %v11607_v20 = vld [vmem:[%s18362_s1 + $0x8] sm:$0xff]   ;;  %v20349_v26 = vld [vmem:[#allocation189_spill] sm:$0xff]  ;;  %v17359_v50 = vpop.permute.xlu1 %4123 }
 0x3c8   :  { %20338 = vst [vmem:[#allocation106_spill] sm:$0xff] %v17299_v63  ;;  %v17319_v45 = vsel %vm3567_vm11, %v20344_v43, %v6011_v0  ;;  %v17330_v62 = vrot.slane %v7454_v11, %v19340_v49  ;;  %v10303_v59 = vrot.slane %v7236_v7, %v19340_v49  ;;  %v17334_v46 = vsel %vm3579_vm15, %v10491_v35, %v10490_v38  ;;  %v20346_v0 = vld [vmem:[#allocation117_spill] sm:$0xff]  ;;  %v17346_v43 = vpop.permute.xlu0 %8879  ;;  %v20351_v7 = vld [vmem:[#allocation76_spill] sm:$0xff] }
 0x3c9   :  { %20345 = vst [vmem:[#allocation75_spill] sm:$0xff] %v17334_v46  ;;  %v5615_v23 = vrot.slane %v20346_v0, 1  ;;  %v10317_v41 = vrot.slane %v7360_v22, %v19340_v49  ;;  %v20348_v52 = vrot.slane %v20347_v18, 2  ;;  %v20350_v21 = vrot.slane %v20349_v26, 2  ;;  %11559 = vmatprep.subr.bf16.mxu0 %v11607_v20  ;;  %v20352_v22 = vld [vmem:[#allocation5_spill] sm:$0xff]  ;;  %11582 = vmatprep.subr.bf16.mxu1 %v11607_v20 }
 0x3ca   :  { %v10523_v11 = vpack.c.b16 %v17334_v46, %v17313_v33  ;;  %v10310_v35 = vrot.slane %v10303_v59, %v19340_v49  ;;  %v5617_v0 = vrot.slane %v20352_v22, 7  ;;  %v5619_v3 = vrot.slane %v20278_v10, 6  ;;  %11560 = vmatpush3.bf16.msra.mxu0 %v11607_v20  ;;  %11586 = vmatpush3.bf16.msra.mxu1 %v11607_v20  ;;  %v20451_v63 = vld [vmem:[#allocation157_spill] sm:$0xff] }
 0x3cb   :  { %v10386_v6 = vsel %vm3576_vm14, %v20348_v52, %v10385_v44  ;;  %v10394_v16 = vsel %vm3576_vm14, %v20350_v21, %v10393_v15  ;;  %v5616_v38 = vsel %vm3561_vm9, %v20351_v7, %v5615_v23  ;;  %v10324_v44 = vrot.slane %v10317_v41, %v19340_v49  ;;  %v20353_v15 = vld [vmem:[#allocation82_spill] sm:$0xff]  ;;  %v20354_v52 = vld [vmem:[#allocation124_spill] sm:$0xff]  ;;  %v11608_v23 = vld [vmem:[%s18362_s1 + $0x10] sm:$0xff]  }
 0x3cc   :  { %10529 = vrot.lane.b32.xlu1 %v10523_v11, %s11618_s25  ;;  %v10987_v21 = vpack.c.b16 %v20354_v52, %v20353_v15  ;;  %v5621_v55 = vrot.slane %v20131_v4, 5  ;;  %v5623_v59 = vrot.slane %v20294_v57, 4  ;;  %v17364_v10 = vunpack.c.l.b16 %v10310_v35  ;;  %11561 = vmatprep.subr.bf16.mxu0 %v11608_v23  ;;  %v20355_v52 = vld [vmem:[#allocation133_spill] sm:$0xff] }
 0x3cd   :  { %v5618_v41 = vsel %vm3564_vm10, %v5617_v0, %v5616_v38  ;;  %v5625_v11 = vrot.slane %v16043_v2, 3  ;;  %v5629_v7 = vrot.slane %v20140_v5, 1  ;;  %v17369_v22 = vunpack.c.l.b16 %v10324_v44  ;;  %11583 = vmatprep.subr.bf16.mxu1 %v11608_v23  ;;  %v17384_v0 = vpop.permute.xlu0 %10734 }
 0x3ce   :  { %v5620_v4 = vsel %vm3567_vm11, %v5619_v3, %v5618_v41  ;;  %v5631_v57 = vrot.slane %v20138_v8, 7  ;;  %v5633_v15 = vrot.slane %v20141_v14, 6  ;;  %v10387_v20 = vrot.slane %v17364_v10, 1  ;;  %11562 = vmatpush3.bf16.msra.mxu0 %v11608_v23  ;;  %20356 = vst [vmem:[#allocation168_spill] sm:$0xff] %v17384_v0  ;;  %11587 = vmatpush3.bf16.msra.mxu1 %v11608_v23  ;;  %v17399_v23 = vpop.permute.xlu1 %5880 }
 0x3cf   :  { %v5622_v35 = vsel %vm3570_vm12, %v5621_v55, %v5620_v4  ;;  %v5630_v38 = vsel %vm3561_vm9, %v20355_v52, %v5629_v7  ;;  %v5635_v2 = vrot.slane %v16048_v32, 5  ;;  %v10395_v5 = vrot.slane %v17369_v22, 1  ;;  %20359 = vst [vmem:[#allocation109_spill] sm:$0xff] %v17399_v23  ;;  %v20361_v4 = vld [vmem:[#allocation192_spill] sm:$0xff]  ;;  %v20381_v23 = vld [vmem:[#allocation29_spill] sm:$0xff] }
 0x3d0   :  { %10991 = vrot.lane.b32.xlu1 %v10987_v21, %s11626_s21  ;;  %v5624_v8 = vsel %vm3573_vm13, %v5623_v59, %v5622_v35  ;;  %v5632_v14 = vsel %vm3564_vm10, %v5631_v57, %v5630_v38  ;;  %v5637_v3 = vrot.slane %v16050_v60, 4  ;;  %v17387_v55 = vsel %vm3579_vm15, %v10387_v20, %v10386_v6  ;;  %v20360_v6 = vld [vmem:[#allocation27_spill] sm:$0xff]  ;;  %v11609_v59 = vld [vmem:[%s18362_s1 + $0x18] sm:$0xff]   ;;  %v20378_v35 = vld [vmem:[#allocation130_spill] sm:$0xff] }
 0x3d1   :  { %20357 = vst [vmem:[#allocation83_spill] sm:$0xff] %v17387_v55  ;;  %v5627_v44 = vrot.slane %v17176_v36, 2  ;;  %v5634_v32 = vsel %vm3567_vm11, %v5633_v15, %v5632_v14  ;;  %v5639_v41 = vrot.slane %v16055_v40, 3  ;;  %v17393_v21 = vsel %vm3579_vm15, %v10395_v5, %v10394_v16  ;;  %11563 = vmatprep.subr.bf16.mxu0 %v11609_v59  ;;  %11584 = vmatprep.subr.bf16.mxu1 %v11609_v59 }
 0x3d2   :  { %20358 = vst [vmem:[#allocation81_spill] sm:$0xff] %v17393_v21  ;;  %v5626_v60 = vsel %vm3576_vm14, %v5625_v11, %v5624_v8  ;;  %v5636_v7 = vsel %vm3570_vm12, %v5635_v2, %v5634_v32  ;;  %v20362_v57 = vrot.slane %v20361_v4, 4  ;;  %v10400_v40 = vpack.c.b16 %v17393_v21, %v17387_v55  ;;  %v20375_v2 = vld [vmem:[#allocation112_spill] sm:$0xff]  ;;  %v20382_v55 = vld [vmem:[#allocation30_spill] sm:$0xff]  ;;  %11564 = vmatpush3.bf16.msra.mxu0 %v11609_v59 }
 0x3d3   :  { %v5638_v16 = vsel %vm3573_vm13, %v5637_v3, %v5636_v7  ;;  %v5641_v15 = vrot.slane %v17181_v17, 2  ;;  %v20364_v11 = vrot.slane %v17130_v13, %v19340_v49  ;;  %v20368_v8 = vrot.slane %v17205_v30, 4  ;;  %v11465_v3 = vld.sshfl [vmem:[#allocation2 + $0x1a4] sm:$0x33 pattern:$0x75316420]  ;;  %11588 = vmatpush3.bf16.msra.mxu1 %v11609_v59 }
 0x3d4   :  { %v17405_v36 = vsel %vm3573_vm13, %v20362_v57, %v20360_v6  ;;  %v5640_v5 = vsel %vm3576_vm14, %v5639_v41, %v5638_v16  ;;  %10407 = vrot.lane.b32.xlu0 %v10400_v40, %s11617_s24  ;;  %v20369_v13 = vld [vmem:[#allocation115_spill] sm:$0xff]  ;;  %v17431_v7 = vsel %vm3579_vm15, %v5627_v44, %v5626_v60  ;;  %v7469_v41 = vcombine.high %v17322_v54, %v17322_v54  ;;  %v17442_v16 = vpop.permute.xlu0 %4125  ;;  %v20372_v40 = vld [vmem:[#allocation113_spill] sm:$0xff] }
 0x3d5   :  { %20363 = vst [vmem:[#allocation139_spill] sm:$0xff] %v17405_v36  ;;  %v17414_v20 = vunpack.c.l.b16 %v20364_v11  ;;  %v17424_v14 = vsel %vm3570_vm12, %v20368_v8, %v17319_v45  ;;  %v10962_v32 = vpack.c.b16 %v17108_v29, %v20369_v13  ;;  %20370 = vst [vmem:[#allocation85_spill] sm:$0xff] %v17431_v7  ;;  %v17438_v45 = vsel %vm3579_vm15, %v5641_v15, %v5640_v5  ;;  %v20373_v60 = vld [vmem:[#allocation129_spill] sm:$0xff] }
 0x3d6   :  { %20371 = vst [vmem:[#allocation86_spill] sm:$0xff] %v17438_v45  ;;  %v10828_v29 = vrot.slane %v17322_v54, %v19340_v49  ;;  %v3637_v44 = vrot.slane %v20372_v40, 7  ;;  %v3639_v11 = vrot.slane %v20373_v60, 6  ;;  %v20374_v8 = vld [vmem:[#allocation137_spill] sm:$0xff]  ;;  %v7430_v15 = vcombine.high %v11465_v3, %v11465_v3  ;;  %v17458_v54 = vpop.permute.xlu1 %9001  ;;  %v20376_v60 = vld [vmem:[#allocation126_spill] sm:$0xff] }
 0x3d7   :  { %20365 = vst [vmem:[#allocation56_spill] sm:$0xff] %v17414_v20  ;;  %v3641_v13 = vrot.slane %v20374_v8, 5  ;;  %v17453_v5 = vrot.slane %v11465_v3, %v19340_v49  ;;  %v3643_v17 = vrot.slane %v20375_v2, 4  ;;  %v5646_v40 = vpack.c.b16 %v17438_v45, %v17431_v7  ;;  %v20379_v3 = vld [vmem:[#allocation147_spill] sm:$0xff]  ;;  %v20389_v59 = vld [vmem:[#allocation153_spill] sm:$0xff] }
 0x3d8   :  { %10967 = vrot.lane.b32.xlu0 %v10962_v32, %s11625_s5  ;;  %v20377_v8 = vunpack.c.l.b16 %v20376_v60  ;;  %v3645_v0 = vrot.slane %v20378_v35, 3  ;;  %v3651_v21 = vrot.slane %v20379_v3, 7  ;;  %v3647_v2 = vrot.slane %v20380_v1, 2  ;;  %v20383_v60 = vld [vmem:[#allocation131_spill] sm:$0xff]  ;;  %v20386_v3 = vld [vmem:[#allocation152_spill] sm:$0xff]  ;;  %v17484_v38 = vpop.permute.xlu0 %5882 }
 0x3d9   :  { %v3653_v9 = vrot.slane %v20381_v23, 6  ;;  %v3655_v32 = vrot.slane %v20382_v55, 5  ;;  %v3649_v7 = vrot.slane %v20383_v60, 1  ;;  %v3657_v52 = vrot.slane %v20386_v3, 4  ;;  %v20387_v23 = vld [vmem:[#allocation158_spill] sm:$0xff]  ;;  %20388 = vst [vmem:[#allocation121_spill] sm:$0xff] %v17484_v38 }
 0x3da   :  { %v3638_v6 = vsel %vm3561_vm9, %v3637_v44, %v20377_v8  ;;  %v20384_v44 = vld [vmem:[#allocation146_spill] sm:$0xff]  ;;  %v3661_v60 = vrot.slane %v20389_v59, 2  ;;  %v10495_v3 = vrot.slane %v20184_v58, 7  ;;  %v10503_v58 = vrot.slane %v20347_v18, 3 }
 0x3db   :  { %v3640_v57 = vsel %vm3564_vm10, %v3639_v11, %v3638_v6  ;;  %v20385_v8 = vunpack.c.l.b16 %v20384_v44  ;;  %v17479_v6 = vrot.slane %v10828_v29, %v19340_v49  ;;  %v3659_v11 = vrot.slane %v20387_v23, 3 }
 0x3dc   :  { %v3642_v45 = vsel %vm3567_vm11, %v3641_v13, %v3640_v57  ;;  %v7444_v57 = vrot.slane %v7430_v15, %v19340_v49  ;;  %5653 = vrot.lane.b32.xlu0 %v5646_v40, %s11618_s25  ;;  %v17492_v29 = vrot.slane %v7469_v41, %v19340_v49  ;;  %v7445_v15 = vcombine.high %v17453_v5, %v17453_v5 }
 0x3dd   :  { %v3652_v35 = vsel %vm3561_vm9, %v3651_v21, %v20385_v8  ;;  %v3644_v1 = vsel %vm3570_vm12, %v3643_v17, %v3642_v45  ;;  %v20390_v45 = vld [vmem:[#allocation159_spill] sm:$0xff]  ;;  %v17497_v8 = vpop.permute.xlu1 %10758  ;;  %v10499_v23 = vrot.slane %v20325_v42, 5  ;;  %v10511_v42 = vrot.slane %v20322_v27, 6 }
 0x3de   :  { %v3654_v55 = vsel %vm3564_vm10, %v3653_v9, %v3652_v35  ;;  %v3646_v21 = vsel %vm3573_vm13, %v3645_v0, %v3644_v1  ;;  %v3663_v44 = vrot.slane %v20390_v45, 1  ;;  %20391 = vst [vmem:[#allocation183_spill] sm:$0xff] %v17497_v8  ;;  %v10493_v35 = vrot.slane %v20187_v61, 1  ;;  %v20444_v8 = vld [vmem:[#allocation162_spill] sm:$0xff] }
 0x3df   :  { %v3656_v13 = vsel %vm3567_vm11, %v3655_v32, %v3654_v55  ;;  %v3648_v17 = vsel %vm3576_vm14, %v3647_v2, %v3646_v21  ;;  %v20392_v32 = vld [vmem:[#allocation122_spill] sm:$0xff]  ;;  %v10772_v2 = vrot.slane %v17453_v5, %v19340_v49  ;;  %v7446_v1 = vcombine.high %v7444_v57, %v7444_v57 }
 0x3e0   :  { %v3658_v9 = vsel %vm3570_vm12, %v3657_v52, %v3656_v13  ;;  %v17502_v0 = vsel %vm3579_vm15, %v3649_v7, %v3648_v17  ;;  %v6110_v41 = vpack.c.b16 %v17151_v37, %v20392_v32  ;;  %v10497_v7 = vrot.slane %v20317_v28, 6 }
 0x3e1   :  { %v3660_v40 = vsel %vm3573_vm13, %v3659_v11, %v3658_v9  ;;  %v10494_v5 = vsel %vm3561_vm9, %v20183_v24, %v10493_v35  ;;  %v10501_v61 = vrot.slane %v20339_v53, 4  ;;  %v17524_v11 = vpop.permute.xlu0 %9003  ;;  %v10507_v13 = vrot.slane %v20204_v31, 1  ;;  %v17535_v18 = vpop.permute.xlu1 %5207 }
 0x3e2   :  { %v3662_v52 = vsel %vm3576_vm14, %v3661_v60, %v3660_v40  ;;  %6115 = vrot.lane.b32.xlu0 %v6110_v41, %s11626_s21  ;;  %v10496_v21 = vsel %vm3564_vm10, %v10495_v3, %v10494_v5  ;;  %v10509_v28 = vrot.slane %v20315_v48, 7  ;;  %v10786_v59 = vrot.slane %v7444_v57, %v19340_v49 }
 0x3e3   :  { %v17513_v55 = vsel %vm3579_vm15, %v3663_v44, %v3662_v52  ;;  %v10800_v60 = vrot.slane %v7445_v15, %v19340_v49  ;;  %v10498_v24 = vsel %vm3567_vm11, %v10497_v7, %v10496_v21  ;;  %v10513_v53 = vrot.slane %v20331_v25, 5 }
 0x3e4   :  { %v5791_v37 = vpack.c.b16 %v17513_v55, %v17502_v0  ;;  %v10500_v17 = vsel %vm3570_vm12, %v10499_v23, %v10498_v24  ;;  %v10505_v31 = vrot.slane %v17364_v10, 2  ;;  %v10508_v48 = vsel %vm3561_vm9, %v20196_v56, %v10507_v13  ;;  %v20403_v13 = vld [vmem:[#allocation120_spill] sm:$0xff] }
 0x3e5   :  { %v10515_v27 = vrot.slane %v20342_v39, 4  ;;  %v10814_v57 = vrot.slane %v7446_v1, %v19340_v49  ;;  %v10502_v9 = vsel %vm3573_vm13, %v10501_v61, %v10500_v17  ;;  %v10510_v45 = vsel %vm3564_vm10, %v10509_v28, %v10508_v48  ;;  %v17567_v3 = vpop.permute.xlu0 %10760  ;;  %v17583_v61 = vpop.permute.xlu1 %6026  ;;  %v20440_v1 = vld [vmem:[#allocation40_spill] sm:$0xff] }
 0x3e6   :  { %5797 = vrot.lane.b32.xlu1 %v5791_v37, %s11619_s26  ;;  %v10517_v44 = vrot.slane %v20349_v26, 3  ;;  %v20393_v25 = vrot.slane %v17330_v62, %v19340_v49  ;;  %v10504_v10 = vsel %vm3576_vm14, %v10503_v58, %v10502_v9  ;;  %v10512_v40 = vsel %vm3567_vm11, %v10511_v42, %v10510_v45  ;;  %20398 = vst [vmem:[#allocation107_spill] sm:$0xff] %v17567_v3  ;;  %v20409_v45 = vld [vmem:[#allocation141_spill] sm:$0xff]  ;;  %v20443_v3 = vld [vmem:[#allocation12_spill] sm:$0xff] }
 0x3e7   :  { %v10519_v56 = vrot.slane %v17369_v22, 2  ;;  %v20394_v39 = vrot.slane %v17215_v19, 3  ;;  %v10793_v41 = vrot.slane %v10786_v59, %v19340_v49  ;;  %v20396_v26 = vcombine.high %v17330_v62, %v17330_v62  ;;  %20400 = vst [vmem:[#allocation178_spill] sm:$0xff] %v17583_v61  ;;  %v20449_v61 = vld [vmem:[#allocation22_spill] sm:$0xff] }
 0x3e8   :  { %v10849_v15 = vrot.slane %v20393_v25, %v19340_v49  ;;  %v10514_v35 = vsel %vm3570_vm12, %v10513_v53, %v10512_v40  ;;  %v17570_v22 = vrot.slane %v10772_v2, %v19340_v49  ;;  %v10807_v23 = vrot.slane %v10800_v60, %v19340_v49  ;;  %v20404_v60 = vld [vmem:[#allocation140_spill] sm:$0xff]  ;;  %v20405_v53 = vld [vmem:[#allocation127_spill] sm:$0xff] }
 0x3e9   :  { %v17557_v32 = vsel %vm3573_vm13, %v20394_v39, %v17424_v14  ;;  %v17564_v52 = vrot.slane %v20396_v26, %v19340_v49  ;;  %v17575_v14 = vsel %vm3579_vm15, %v10505_v31, %v10504_v10  ;;  %v10516_v7 = vsel %vm3573_vm13, %v10515_v27, %v10514_v35  ;;  %v20410_v40 = vld [vmem:[#allocation135_spill] sm:$0xff]  ;;  %v17613_v39 = vpop.permute.xlu0 %5209  ;;  %v20411_v26 = vld [vmem:[#allocation44_spill] sm:$0xff] }
 0x3ea   :  { %20395 = vst [vmem:[#allocation177_spill] sm:$0xff] %v17557_v32  ;;  %20399 = vst [vmem:[#allocation185_spill] sm:$0xff] %v17575_v14  ;;  %v10821_v62 = vrot.slane %v10814_v57, %v19340_v49  ;;  %v10518_v37 = vsel %vm3576_vm14, %v10517_v44, %v10516_v7  ;;  %v17586_v2 = vunpack.c.l.b16 %v17479_v6  ;;  %v17588_v58 = vunpack.c.l.b16 %v10849_v15  ;;  %v20406_v6 = vld [vmem:[#allocation132_spill] sm:$0xff]  ;;  %v20408_v57 = vld [vmem:[#allocation134_spill] sm:$0xff] }
 0x3eb   :  { %20397 = vst [vmem:[#allocation74_spill] sm:$0xff] %v17564_v52  ;;  %v17591_v21 = vsel %vm3579_vm15, %v10519_v56, %v10518_v37  ;;  %v8515_v28 = vrot.slane %v20403_v13, 7  ;;  %v17594_v42 = vunpack.c.l.b16 %v10793_v41  ;;  %v8517_v24 = vrot.slane %v20404_v60, 6  ;;  %v20412_v7 = vld [vmem:[#allocation52_spill] sm:$0xff]  ;;  %v20413_v13 = vld [vmem:[#allocation53_spill] sm:$0xff]  ;;  %v20414_v60 = vld [vmem:[#allocation142_spill] sm:$0xff] }
 0x3ec   :  { %20401 = vst [vmem:[#allocation32_spill] sm:$0xff] %v17588_v58  ;;  %20402 = vst [vmem:[#allocation38_spill] sm:$0xff] %v17591_v21  ;;  %v10524_v59 = vpack.c.b16 %v17591_v21, %v17575_v14  ;;  %v8519_v17 = vrot.slane %v20405_v53, 5  ;;  %v19118_v31 = vunpack.c.l.b16 %v17570_v22  ;;  %v20407_v48 = vunpack.c.l.b16 %v20406_v6  ;;  %v20415_v53 = vld [vmem:[#allocation54_spill] sm:$0xff]  ;;  %v17623_v6 = vpop.permute.xlu1 %10085  ;;  %v20446_v14 = vld [vmem:[#allocation21_spill] sm:$0xff] }
 0x3ed   :  { %v8521_v9 = vrot.slane %v20408_v57, 4  ;;  %v8523_v44 = vrot.slane %v20409_v45, 3  ;;  %v17606_v25 = vunpack.c.l.b16 %v10807_v23  ;;  %v17608_v15 = vunpack.c.l.b16 %v10821_v62  ;;  %v20418_v45 = vld [vmem:[#allocation18_spill] sm:$0xff]  ;;  %v20447_v21 = vld [vmem:[#allocation51_spill] sm:$0xff]  ;;  %v20450_v52 = vld [vmem:[#allocation41_spill] sm:$0xff] }
 0x3ee   :  { %v8516_v27 = vsel %vm3561_vm9, %v8515_v28, %v20407_v48  ;;  %10531 = vrot.lane.b32.xlu1 %v10524_v59, %s11618_s25  ;;  %v8525_v56 = vrot.slane %v20410_v40, 2  ;;  %v8529_v35 = vrot.slane %v20411_v26, 7  ;;  %v8531_v37 = vrot.slane %v20412_v7, 6  ;;  %v20419_v40 = vld [vmem:[#allocation118_spill] sm:$0xff] }
 0x3ef   :  { %v8518_v10 = vsel %vm3564_vm10, %v8517_v24, %v8516_v27  ;;  %v8533_v28 = vrot.slane %v20413_v13, 5  ;;  %v10886_v23 = vrot.slane %v17594_v42, 7  ;;  %v8527_v59 = vrot.slane %v20414_v60, 1  ;;  %v20416_v27 = vld [vmem:[#allocation50_spill] sm:$0xff]  ;;  %v20421_v60 = vld [vmem:[#allocation160_spill] sm:$0xff] }
 0x3f0   :  { %v8520_v41 = vsel %vm3567_vm11, %v8519_v17, %v8518_v10  ;;  %v8535_v24 = vrot.slane %v20415_v53, 4  ;;  %v20417_v17 = vunpack.c.l.b16 %v20416_v27  ;;  %v8537_v10 = vrot.slane %v20418_v45, 3  ;;  %v20426_v45 = vld [vmem:[#allocation161_spill] sm:$0xff] }
 0x3f1   :  { %v8522_v62 = vsel %vm3570_vm12, %v8521_v9, %v8520_v41  ;;  %v10988_v26 = vpack.c.b16 %v17313_v33, %v20419_v40  ;;  %v20420_v41 = vld [vmem:[#allocation14_spill] sm:$0xff]  ;;  %v3665_v53 = vrot.slane %v20421_v60, 7  ;;  %v10888_v5 = vrot.slane %v17606_v25, 6 }
 0x3f2   :  { %v8524_v48 = vsel %vm3573_vm13, %v8523_v44, %v8522_v62  ;;  %v8530_v57 = vsel %vm3561_vm9, %v8529_v35, %v20417_v17  ;;  %v8539_v13 = vrot.slane %v20420_v41, 2  ;;  %v20422_v62 = vld [vmem:[#allocation16_spill] sm:$0xff]  ;;  %v20423_v35 = vld [vmem:[#allocation154_spill] sm:$0xff]  ;;  %v3669_v40 = vrot.slane %v20426_v45, 5  ;;  %v17649_v41 = vpop.permute.xlu0 %6028 }
 0x3f3   :  { %v8526_v7 = vsel %vm3576_vm14, %v8525_v56, %v8524_v48  ;;  %v8532_v9 = vsel %vm3564_vm10, %v8531_v37, %v8530_v57  ;;  %v8541_v27 = vrot.slane %v20422_v62, 1  ;;  %10993 = vrot.lane.b32.xlu1 %v10988_v26, %s11626_s21  ;;  %v3667_v17 = vrot.slane %v20423_v35, 6  ;;  %v20424_v37 = vld [vmem:[#allocation151_spill] sm:$0xff]  ;;  %20427 = vst [vmem:[#allocation110_spill] sm:$0xff] %v17649_v41  ;;  %v20429_v62 = vld [vmem:[#allocation36_spill] sm:$0xff] }
 0x3f4   :  { %v8534_v44 = vsel %vm3567_vm11, %v8533_v28, %v8532_v9  ;;  %v17642_v33 = vsel %vm3579_vm15, %v8527_v59, %v8526_v7  ;;  %v20425_v48 = vunpack.c.l.b16 %v20424_v37  ;;  %v20428_v26 = vld [vmem:[#allocation35_spill] sm:$0xff]  ;;  %v3673_v35 = vrot.slane %v20429_v62, 3  ;;  %v17661_v37 = vpop.permute.xlu1 %10904 }
 0x3f5   :  { %v8536_v56 = vsel %vm3570_vm12, %v8535_v24, %v8534_v44  ;;  %v3671_v60 = vrot.slane %v20428_v26, 4  ;;  %v10887_v59 = vsel %vm3561_vm9, %v10886_v23, %v19118_v31  ;;  %20431 = vst [vmem:[#allocation72_spill] sm:$0xff] %v17661_v37  ;;  %v8547_v41 = vrot.slane %v20443_v3, 5 }
 0x3f6   :  { %v3666_v57 = vsel %vm3561_vm9, %v3665_v53, %v20425_v48  ;;  %v8538_v28 = vsel %vm3573_vm13, %v8537_v10, %v8536_v56  ;;  %v20430_v53 = vld [vmem:[#allocation37_spill] sm:$0xff]  ;;  %v20432_v56 = vld [vmem:[#allocation31_spill] sm:$0xff]  ;;  %v8551_v3 = vrot.slane %v20449_v61, 3  ;;  %v10539_v19 = vrot.slane %v20450_v52, %v19340_v49 }
 0x3f7   :  { %v3668_v9 = vsel %vm3564_vm10, %v3667_v17, %v3666_v57  ;;  %v8540_v24 = vsel %vm3576_vm14, %v8539_v13, %v8538_v28  ;;  %v3675_v44 = vrot.slane %v20430_v53, 2  ;;  %v3677_v48 = vrot.slane %v20432_v56, 1  ;;  %v20433_v57 = vld [vmem:[#allocation103_spill] sm:$0xff]  ;;  %v20438_v13 = vld [vmem:[#allocation138_spill] sm:$0xff] }
 0x3f8   :  { %v3670_v7 = vsel %vm3567_vm11, %v3669_v40, %v3668_v9  ;;  %v17664_v10 = vsel %vm3579_vm15, %v8541_v27, %v8540_v24  ;;  %v5661_v45 = vrot.slane %v20433_v57, %v19340_v49  ;;  %v17681_v24 = vsel %vm3564_vm10, %v10888_v5, %v10887_v59  ;;  %v20435_v53 = vld [vmem:[#allocation79_spill] sm:$0xff]  ;;  %v20436_v57 = vld [vmem:[#allocation46_spill] sm:$0xff]  ;;  %v20439_v5 = vld [vmem:[#allocation33_spill] sm:$0xff]  ;;  %v17700_v38 = vpop.permute.xlu1 %5331 }
 0x3f9   :  { %v3672_v17 = vsel %vm3570_vm12, %v3671_v60, %v3670_v7  ;;  %v10669_v40 = vpack.c.b16 %v17664_v10, %v17642_v33  ;;  %v20434_v60 = vld [vmem:[#allocation77_spill] sm:$0xff]  ;;  %v5777_v56 = vrot.slane %v20435_v53, 6  ;;  %v5817_v59 = vpack.c.b16 %v20439_v5, %v20438_v13 }
 0x3fa   :  { %v3674_v28 = vsel %vm3573_vm13, %v3673_v35, %v3672_v17  ;;  %v5668_v26 = vrot.slane %v5661_v45, %v19340_v49  ;;  %v5775_v62 = vrot.slane %v20434_v60, 7  ;;  %v5779_v35 = vrot.slane %v20436_v57, 5  ;;  %v17689_v17 = vpop.permute.xlu0 %10087  ;;  %v20441_v27 = vld [vmem:[#allocation17_spill] sm:$0xff] }
 0x3fb   :  { %v3676_v9 = vsel %vm3576_vm14, %v3675_v44, %v3674_v28  ;;  %10675 = vrot.lane.b32.xlu0 %v10669_v40, %s11619_s26  ;;  %v20437_v28 = vld [vmem:[#allocation47_spill] sm:$0xff]  ;;  %v5783_v40 = vrot.slane %v20440_v1, 3  ;;  %v5785_v44 = vrot.slane %v20444_v8, 2  ;;  %5823 = vrot.lane.b32.xlu1 %v5817_v59, %s11620_s14  ;;  %v8549_v13 = vrot.slane %v20446_v14, 4  ;;  %v20452_v59 = vld [vmem:[#allocation156_spill] sm:$0xff] }
 0x3fc   :  { %v17685_v7 = vsel %vm3579_vm15, %v3677_v48, %v3676_v9  ;;  %v5767_v45 = vunpack.c.l.b16 %v5668_v26  ;;  %v5781_v23 = vrot.slane %v20437_v28, 4  ;;  %v8543_v48 = vrot.slane %v20441_v27, 7  ;;  %v20442_v9 = vld [vmem:[#allocation19_spill] sm:$0xff]  ;;  %v20445_v26 = vld [vmem:[#allocation42_spill] sm:$0xff] }
 0x3fd   :  { %v8545_v31 = vrot.slane %v20442_v9, 6  ;;  %v5787_v46 = vrot.slane %v20445_v26, 1  ;;  %v20448_v27 = vunpack.c.l.b16 %v20447_v21  ;;  %v8553_v32 = vrot.slane %v20451_v63, 2  ;;  %v20456_v63 = vld [vmem:[#allocation145_spill] sm:$0xff] }
 0x3fe   :  { %v5776_v37 = vsel %vm3561_vm9, %v5775_v62, %v5767_v45  ;;  %v8555_v58 = vrot.slane %v20452_v59, 1  ;;  %v10546_v21 = vrot.slane %v10539_v19, %v19340_v49  ;;  %v17722_v61 = vpop.permute.xlu0 %10906  ;;  %v20455_v52 = vunpack.c.l.b16 %v17001_v34 }
 0x3ff   :  { %v5778_v5 = vsel %vm3564_vm10, %v5777_v56, %v5776_v37  ;;  %v8544_v9 = vsel %vm3561_vm9, %v8543_v48, %v20448_v27  ;;  %v20453_v56 = vld [vmem:[#allocation144_spill] sm:$0xff]  ;;  %20454 = vst [vmem:[#allocation186_spill] sm:$0xff] %v17722_v61  ;;  %vm6143_vm2 = vcmask 97280   ;;  %vm6161_vm4 = vcmask 162816  }
 0x400   :  { %v5780_v62 = vsel %vm3567_vm11, %v5779_v35, %v5778_v5  ;;  %v8546_v20 = vsel %vm3564_vm10, %v8545_v31, %v8544_v9  ;;  %v10653_v48 = vrot.slane %v20453_v56, 7  ;;  %v6034_v27 = vrot.slane %v20455_v52, 1  ;;  %v20459_v52 = vld [vmem:[#allocation164_spill] sm:$0xff] }
 0x401   :  { %v5782_v14 = vsel %vm3570_vm12, %v5781_v23, %v5780_v62  ;;  %v8548_v37 = vsel %vm3567_vm11, %v8547_v41, %v8546_v20  ;;  %v10655_v5 = vrot.slane %v20456_v63, 6  ;;  %v10645_v20 = vunpack.c.l.b16 %v10546_v21  ;;  %v20457_v41 = vld [vmem:[#allocation64_spill] sm:$0xff]  ;;  %v17732_v62 = vpop.permute.xlu1 %6052  ;;  %v20462_v21 = vld [vmem:[#allocation169_spill] sm:$0xff] }
 0x402   :  { %v5784_v35 = vsel %vm3573_vm13, %v5783_v40, %v5782_v14  ;;  %v8550_v31 = vsel %vm3570_vm12, %v8549_v13, %v8548_v37  ;;  %v10657_v19 = vrot.slane %v20457_v41, 5  ;;  %20458 = vst [vmem:[#allocation87_spill] sm:$0xff] %v17732_v62  ;;  %v10659_v61 = vrot.slane %v20459_v52, 4  ;;  %v20460_v40 = vld [vmem:[#allocation149_spill] sm:$0xff] }
 0x403   :  { %v5786_v9 = vsel %vm3576_vm14, %v5785_v44, %v5784_v35  ;;  %v8552_v23 = vsel %vm3573_vm13, %v8551_v3, %v8550_v31  ;;  %v20461_v14 = vld [vmem:[#allocation65_spill] sm:$0xff]  ;;  %v10654_v3 = vsel %vm3561_vm9, %v10653_v48, %v10645_v20  ;;  %v10661_v35 = vrot.slane %v20462_v21, 3 }
 0x404   :  { %v5788_v59 = vsel %vm3579_vm15, %v5787_v46, %v5786_v9  ;;  %v8554_v34 = vsel %vm3576_vm14, %v8553_v32, %v8552_v23  ;;  %v10695_v13 = vpack.c.b16 %v20461_v14, %v20460_v40  ;;  %v10656_v62 = vsel %vm3564_vm10, %v10655_v5, %v10654_v3  ;;  %v20463_v23 = vld [vmem:[#allocation193_spill] sm:$0xff]  ;;  %v20466_v3 = vld [vmem:[#allocation102_spill] sm:$0xff] }
 0x405   :  { %v5792_v37 = vpack.c.b16 %v5788_v59, %v17685_v7  ;;  %v8556_v44 = vsel %vm3579_vm15, %v8555_v58, %v8554_v34  ;;  %v10663_v46 = vrot.slane %v20361_v4, 2  ;;  %v5801_v32 = vrot.slane %v5767_v45, 1  ;;  %v20464_v59 = vld [vmem:[#allocation49_spill] sm:$0xff]  ;;  %v10210_v36 = vpop.permute.xlu1 %10209 }
 0x406   :  { %v8560_v31 = vpack.c.b16 %v8556_v44, %v17664_v10  ;;  %10701 = vrot.lane.b32.xlu1 %v10695_v13, %s11620_s14  ;;  %v10658_v58 = vsel %vm3567_vm11, %v10657_v19, %v10656_v62  ;;  %v10665_v48 = vrot.slane %v20463_v23, 1  ;;  %v20465_v34 = vld [vmem:[#allocation57_spill] sm:$0xff]  ;;  %v17753_v10 = vpop.permute.xlu0 %5333  ;;  %v10679_v13 = vrot.slane %v10645_v20, 1  ;;  %v20471_v20 = vld [vmem:[#allocation94_spill] sm:$0xff] }
 0x407   :  { %5799 = vrot.lane.b32.xlu0 %v5792_v37, %s11619_s26  ;;  %v5852_v40 = vpack.c.b16 %v20465_v34, %v20464_v59  ;;  %v10660_v14 = vsel %vm3570_vm12, %v10659_v61, %v10658_v58  ;;  %v5802_v45 = vsel %vm3561_vm9, %v20434_v60, %v5801_v32  ;;  %v6035_v37 = vsel %vm3561_vm9, %v20466_v3, %v6034_v27 }
 0x408   :  { %v20467_v19 = vunpack.c.l.b16 %v17570_v22  ;;  %v10662_v9 = vsel %vm3573_vm13, %v10661_v35, %v10660_v14  ;;  %v20468_v59 = vrot.slane %v20435_v53, 7  ;;  %v20469_v61 = vrot.slane %v20436_v57, 6  ;;  %v20470_v22 = vld [vmem:[#allocation67_spill] sm:$0xff] }
 0x409   :  { %v10664_v5 = vsel %vm3576_vm14, %v10663_v46, %v10662_v9  ;;  %v10680_v27 = vsel %vm3561_vm9, %v20453_v56, %v10679_v13  ;;  %v10730_v32 = vpack.c.b16 %v20471_v20, %v20470_v22  ;;  %v20472_v35 = vld [vmem:[#allocation119_spill] sm:$0xff]  ;;  %v20473_v14 = vrot.slane %v20437_v28, 5 }
 0x40a   :  { %v10912_v62 = vrot.slane %v20467_v19, 1  ;;  %v5804_v34 = vsel %vm3564_vm10, %v20468_v59, %v5802_v45  ;;  %5858 = vrot.lane.b32.xlu1 %v5852_v40, %s11621_s17  ;;  %v3681_v53 = vpack.c.b16 %v17502_v0, %v20472_v35  ;;  %v10666_v58 = vsel %vm3579_vm15, %v10665_v48, %v10664_v5  ;;  %v20475_v40 = vld [vmem:[#allocation150_spill] sm:$0xff] }
 0x40b   :  { %v5806_v60 = vsel %vm3567_vm11, %v20469_v61, %v5804_v34  ;;  %v20474_v57 = vrot.slane %v20456_v63, 7  ;;  %v8559_v45 = vpack.c.b16 %v17642_v33, %v20475_v40  ;;  %v10670_v56 = vpack.c.b16 %v10666_v58, %v8556_v44  ;;  %v20485_v58 = vld [vmem:[#allocation175_spill] sm:$0xff]  ;;  %v20490_v40 = vld [vmem:[#allocation105_spill] sm:$0xff] }
 0x40c   :  { %v5808_v46 = vsel %vm3570_vm12, %v20473_v14, %v5806_v60  ;;  %v20476_v13 = vrot.slane %v20440_v1, 4  ;;  %v20477_v0 = vrot.slane %v20457_v41, 6  ;;  %v20478_v28 = vrot.slane %v17161_v12, 7  ;;  %v17802_v1 = vpop.permute.xlu0 %6054  ;;  %v20486_v14 = vld [vmem:[#allocation8_spill] sm:$0xff] }
 0x40d   :  { %v10682_v9 = vsel %vm3564_vm10, %v20474_v57, %v10680_v27  ;;  %v20479_v63 = vrot.slane %v20444_v8, 3  ;;  %v20480_v33 = vrot.slane %v20459_v52, 5  ;;  %v10914_v41 = vrot.slane %v17606_v25, 7  ;;  %10677 = vrot.lane.b32.xlu0 %v10670_v56, %s11619_s26  ;;  %v20483_v27 = vld [vmem:[#allocation48_spill] sm:$0xff] }
 0x40e   :  { %v5810_v19 = vsel %vm3573_vm13, %v20476_v13, %v5808_v46  ;;  %v10684_v48 = vsel %vm3567_vm11, %v20477_v0, %v10682_v9  ;;  %v6037_v5 = vsel %vm3564_vm10, %v20478_v28, %v6035_v37  ;;  %v20481_v34 = vrot.slane %v20445_v26, 2  ;;  %10736 = vrot.lane.b32.xlu1 %v10730_v32, %s11621_s17  ;;  %v17820_v26 = vpop.permute.xlu1 %10930  ;;  %v20487_v32 = vld [vmem:[#allocation13_spill] sm:$0xff] }
 0x40f   :  { %v5812_v59 = vsel %vm3576_vm14, %v20479_v63, %v5810_v19  ;;  %v10686_v44 = vsel %vm3570_vm12, %v20480_v33, %v10684_v48  ;;  %v20482_v61 = vrot.slane %v20462_v21, 4  ;;  %v10913_v52 = vsel %vm3561_vm9, %v17594_v42, %v10912_v62  ;;  %v20491_v13 = vld [vmem:[#allocation93_spill] sm:$0xff]  ;;  %v20494_v48 = vld [vmem:[#allocation95_spill] sm:$0xff] }
 0x410   :  { %v5814_v37 = vsel %vm3579_vm15, %v20481_v34, %v5812_v59  ;;  %v10916_v60 = vrot.slane %v17608_v15, 6  ;;  %v20484_v20 = vrot.slane %v20361_v4, 3  ;;  %v6130_v21 = vsel %vm19130_vm0, %v3681_v53, %v20485_v58  ;;  %v20495_v28 = vld [vmem:[#allocation69_spill] sm:$0xff] }
 0x411   :  { %v10688_v8 = vsel %vm3573_vm13, %v20482_v61, %v10686_v44  ;;  %v5818_v22 = vpack.c.b16 %v5814_v37, %v20483_v27  ;;  %v11007_v46 = vsel %vm19130_vm0, %v8559_v45, %v20486_v14  ;;  %v20488_v62 = vpack.c.b16 %v17685_v7, %v17513_v55  ;;  %v20492_v45 = vld [vmem:[#allocation34_spill] sm:$0xff]  ;;  %v10212_v37 = vpop.permute.xlu0 %10211 }
 0x412   :  { %v10690_v35 = vsel %vm3576_vm14, %v20484_v20, %v10688_v8  ;;  %v20489_v9 = vrot.slane %v20463_v23, 2  ;;  %v6140_v56 = vsel %vm19129_vm1, %v6130_v21, %v20490_v40  ;;  %v11010_v19 = vsel %vm19130_vm0, %v8560_v31, %v20491_v13  ;;  %v20493_v55 = vld [vmem:[#allocation66_spill] sm:$0xff]  ;;  %v20502_v20 = vld [vmem:[#allocation61_spill] sm:$0xff] }
 0x413   :  { %v6133_v57 = vsel %vm19130_vm0, %v20488_v62, %v20487_v32  ;;  %v11016_v53 = vsel %vm19129_vm1, %v11007_v46, %v17266_v51  ;;  %5825 = vrot.lane.b32.xlu0 %v5818_v22, %s11620_s14  ;;  %v20496_v63 = vpack.c.b16 %v20494_v48, %v20495_v28  ;;  %v11018_v59 = vsel %vm19129_vm1, %v11010_v19, %v17346_v43  ;;  %v20498_v8 = vld [vmem:[#allocation98_spill] sm:$0xff]  ;;  %v20501_v22 = vld [vmem:[#allocation3_spill] sm:$0xff]  ;;  %v20515_v28 = vld [vmem:[#allocation9_spill] sm:$0xff] }
 0x414   :  { %v10692_v4 = vsel %vm3579_vm15, %v20489_v9, %v10690_v35  ;;  %v6142_v0 = vsel %vm19129_vm1, %v6133_v57, %v20492_v45  ;;  %v11024_v31 = vsel %vm6143_vm2, %v11016_v53, %v17458_v54  ;;  %v6149_v51 = vsel %vm6143_vm2, %v6140_v56, %v17359_v50  ;;  %v20506_v62 = vld [vmem:[#allocation139_spill] sm:$0xff]  ;;  %v20509_v56 = vld [vmem:[#allocation32_spill] sm:$0xff]  ;;  %v20510_v53 = vld [vmem:[#allocation177_spill] sm:$0xff] }
 0x415   :  { %v10696_v7 = vpack.c.b16 %v10692_v4, %v20493_v55  ;;  %5884 = vrot.lane.b32.xlu1 %v20496_v63, %s11622_s27  ;;  %v6151_v33 = vsel %vm6143_vm2, %v6142_v0, %v17442_v16  ;;  %v11026_v44 = vsel %vm6143_vm2, %v11018_v59, %v17524_v11  ;;  %v11032_v34 = vsel %vm6152_vm3, %v11024_v31, %v17623_v6  ;;  %v5528_v6 = vpop.permute.xlu1 %5527  ;;  %v20508_v4 = vld [vmem:[#allocation163_spill] sm:$0xff]  ;;  %v20511_v45 = vld [vmem:[#allocation106_spill] sm:$0xff]  ;;  %v20513_v55 = vld [vmem:[#allocation56_spill] sm:$0xff] }
 0x416   :  { %v6158_v61 = vsel %vm6152_vm3, %v6149_v51, %v17535_v18  ;;  %v6160_v43 = vsel %vm6152_vm3, %v6151_v33, %v17613_v39  ;;  %v11034_v54 = vsel %vm6152_vm3, %v11026_v44, %v17689_v17  ;;  %v17867_v50 = vsel %vm6161_vm4, %v11032_v34, %v10210_v36  ;;  %v11413_v19 = vld.sshfl [vmem:[#allocation2 + $0xd4] sm:$0x1 pattern:$0x75316420]  ;;  %v20516_v59 = vld [vmem:[#allocation74_spill] sm:$0xff] }
 0x417   :  { %v10915_v16 = vsel %vm3564_vm10, %v10914_v41, %v10913_v52  ;;  %v6167_v11 = vsel %vm6161_vm4, %v6158_v61, %v17700_v38  ;;  %v17876_v18 = vsel %vm6161_vm4, %v6160_v43, %v17753_v10  ;;  %v20497_v39 = vrot.slane %v17608_v15, 5  ;;  %10703 = vrot.lane.b32.xlu0 %v10696_v7, %s11620_s14  ;;  %v20499_v52 = vld [vmem:[#allocation70_spill] sm:$0xff]  ;;  %v20519_v44 = vld [vmem:[#allocation55_spill] sm:$0xff]  ;;  %v20520_v43 = vld [vmem:[#allocation201_spill] sm:$0xff] }
 0x418   :  { %v6040_v36 = vrot.slane %v17205_v30, 5  ;;  %v20500_v27 = vpack.c.b16 %v20498_v8, %v20499_v52  ;;  %v17889_v38 = vsel %vm6170_vm5, %v6167_v11, %v5528_v6  ;;  %v17892_v10 = vsel %vm6161_vm4, %v11034_v54, %v10212_v37  ;;  %v20518_v33 = vld [vmem:[#allocation114_spill] sm:$0xff]  ;;  %v20521_v54 = vld [vmem:[#allocation68_spill] sm:$0xff]  ;;  %v20523_v11 = vld [vmem:[#allocation45_spill] sm:$0xff] }
 0x419   :  { %v10891_v17 = vsel %vm3567_vm11, %v20497_v39, %v17681_v24  ;;  %v20503_v35 = vrot.slane %v20502_v20, 2  ;;  %v20504_v58 = vrot.slane %v17492_v29, %v19340_v49  ;;  %v20505_v14 = vrot.slane %v17174_v47, 6  ;;  %v20524_v6 = vld [vmem:[#allocation108_spill] sm:$0xff] }
 0x41a   :  { %10762 = vrot.lane.b32.xlu1 %v20500_v27, %s11622_s27  ;;  %v10918_v32 = vrot.slane %v17586_v2, 5  ;;  %v20507_v57 = vrot.slane %v20463_v23, 3  ;;  %v10752_v40 = vrot.slane %v20508_v4, 2  ;;  %v10894_v13 = vrot.slane %v20509_v56, 3  ;;  %v20527_v20 = vld [vmem:[#allocation96_spill] sm:$0xff] }
 0x41b   :  { %v5875_v24 = vsel %vm3579_vm15, %v20503_v35, %v20501_v22  ;;  %v17901_v21 = vunpack.c.l.b16 %v20504_v58  ;;  %v6039_v46 = vsel %vm3567_vm11, %v20505_v14, %v6037_v5  ;;  %v10917_v29 = vsel %vm3567_vm11, %v10916_v60, %v10915_v16  ;;  %v20530_v4 = vld [vmem:[#allocation4_spill] sm:$0xff] }
 0x41c   :  { %v10751_v9 = vsel %vm3576_vm14, %v20507_v57, %v20506_v62  ;;  %v20512_v0 = vrot.slane %v20511_v45, 2  ;;  %v6020_v7 = vrot.slane %v20513_v55, 1  ;;  %v20514_v23 = vrot.slane %v17586_v2, 4  ;;  %v20528_v62 = vld [vmem:[#allocation39_spill] sm:$0xff]  ;;  %v20529_v57 = vld [vmem:[#allocation116_spill] sm:$0xff] }
 0x41d   :  { %v6042_v63 = vrot.slane %v20515_v28, 4  ;;  %v20517_v31 = vrot.slane %v20516_v59, %v19340_v49  ;;  %v10902_v34 = vpack.c.b16 %v20519_v44, %v20518_v33  ;;  %v6041_v37 = vsel %vm3570_vm12, %v6040_v36, %v6039_v46  ;;  %v20533_v59 = vld [vmem:[#allocation202_spill] sm:$0xff] }
 0x41e   :  { %v6019_v5 = vsel %vm3576_vm14, %v20512_v0, %v20510_v53  ;;  %v10893_v48 = vsel %vm3570_vm12, %v20514_v23, %v10891_v17  ;;  %v10920_v61 = vrot.slane %v20509_v56, 4  ;;  %v20522_v16 = vpack.c.b16 %v20520_v43, %v20521_v54  ;;  %v20536_v43 = vld [vmem:[#allocation187_spill] sm:$0xff] }
 0x41f   :  { %v17928_v51 = vunpack.c.l.b16 %v20517_v31  ;;  %v20525_v39 = vpack.c.b16 %v20523_v11, %v20524_v6  ;;  %v10896_v17 = vrot.slane %v17901_v21, 2  ;;  %v10919_v8 = vsel %vm3570_vm12, %v10918_v32, %v10917_v29  ;;  %v20534_v31 = vld [vmem:[#allocation71_spill] sm:$0xff] }
 0x420   :  { %5860 = vrot.lane.b32.xlu0 %v20522_v16, %s11621_s17  ;;  %v2599_v52 = vrot.slane %v11413_v19, %v19340_v49  ;;  %v20526_v27 = vrot.slane %v17161_v12, 7  ;;  %v5879_v35 = vpack.c.b16 %v5875_v24, %v20527_v20  ;;  %v10753_v58 = vsel %vm3579_vm15, %v10752_v40, %v10751_v9  ;;  %v20538_v20 = vld [vmem:[#allocation58_spill] sm:$0xff] }
 0x421   :  { %6030 = vrot.lane.b32.xlu1 %v20525_v39, %s11623_s6  ;;  %v10895_v14 = vsel %vm3573_vm13, %v10894_v13, %v10893_v48  ;;  %v6044_v46 = vrot.slane %v20511_v45, 3  ;;  %v20531_v53 = vpack.c.b16 %v20529_v57, %v20530_v4  ;;  %v6043_v19 = vsel %vm3573_vm13, %v6042_v63, %v6041_v37  ;;  %v11467_v48 = vld.sshfl [vmem:[#allocation2 + $0x1ac] sm:$0x1 pattern:$0x75316420] }
 0x422   :  { %v6075_v22 = vsel %vm3561_vm9, %v20526_v27, %v20466_v3  ;;  %v10922_v0 = vrot.slane %v17901_v21, 3  ;;  %v10973_v23 = vrot.slane %v17594_v42, 1  ;;  %v6021_v24 = vsel %vm3579_vm15, %v6020_v7, %v6019_v5  ;;  %v20537_v27 = vld [vmem:[#allocation99_spill] sm:$0xff] }
 0x423   :  { %v6124_v29 = vsel %vm19130_vm0, %v20531_v53, %v20528_v62  ;;  %v10921_v9 = vsel %vm3573_vm13, %v10920_v61, %v10919_v8  ;;  %v20532_v40 = vrot.slane %v17174_v47, 6  ;;  %v20535_v33 = vpack.c.b16 %v20533_v59, %v20534_v31  ;;  %v20540_v62 = vld [vmem:[#allocation199_spill] sm:$0xff]  ;;  %v20542_v53 = vld [vmem:[#allocation196_spill] sm:$0xff] }
 0x424   :  { %v10897_v44 = vsel %vm3576_vm14, %v10896_v17, %v10895_v14  ;;  %v10898_v5 = vrot.slane %v17928_v51, 1  ;;  %v6046_v7 = vrot.slane %v20513_v55, 2  ;;  %v6066_v37 = vrot.slane %v2599_v52, %v19340_v49  ;;  %v17991_v52 = vpop.permute.xlu1 %6087  ;;  %v20539_v14 = vld [vmem:[#allocation125_spill] sm:$0xff] }
 0x425   :  { %v6076_v13 = vsel %vm3564_vm10, %v20532_v40, %v6075_v22  ;;  %10738 = vrot.lane.b32.xlu0 %v20535_v33, %s11621_s17  ;;  %10908 = vrot.lane.b32.xlu1 %v10902_v34, %s11623_s6  ;;  %v6136_v54 = vsel %vm19129_vm1, %v6124_v29, %v20536_v43  ;;  %v6045_v16 = vsel %vm3576_vm14, %v6044_v46, %v6043_v19  ;;  %v10924_v11 = vrot.slane %v17928_v51, 2  ;;  %v20544_v19 = vld [vmem:[#allocation59_spill] sm:$0xff]  ;;  %v20547_v43 = vld [vmem:[#allocation60_spill] sm:$0xff] }
 0x426   :  { %v10975_v6 = vrot.slane %v17608_v15, 7  ;;  %v10923_v34 = vsel %vm3576_vm14, %v10922_v0, %v10921_v9  ;;  %v6077_v39 = vsel %vm3567_vm11, %v6040_v36, %v6076_v13  ;;  %v7484_v17 = vrot.slane %v11467_v48, %v19340_v49  ;;  %v20543_v36 = vld [vmem:[#allocation84_spill] sm:$0xff]  ;;  %v20546_v48 = vld [vmem:[#allocation43_spill] sm:$0xff] }
 0x427   :  { %v10974_v8 = vsel %vm3561_vm9, %v17606_v25, %v10973_v23  ;;  %v10757_v22 = vpack.c.b16 %v10753_v58, %v20537_v27  ;;  %v20541_v57 = vpack.c.b16 %v20539_v14, %v20540_v62  ;;  %v6145_v29 = vsel %vm6143_vm2, %v6136_v54, %v20542_v53  ;;  %v20548_v54 = vld [vmem:[#allocation194_spill] sm:$0xff]  ;;  %v20552_v25 = vld [vmem:[#allocation155_spill] sm:$0xff] }
 0x428   :  { %v20545_v9 = vpack.c.b16 %v20543_v36, %v20544_v19  ;;  %v10899_v23 = vsel %vm3579_vm15, %v10898_v5, %v10897_v44  ;;  %v18008_v58 = vsel %vm3579_vm15, %v6046_v7, %v6045_v16  ;;  %v6073_v40 = vrot.slane %v6066_v37, %v19340_v49  ;;  %v10406_v62 = vpop.permute.xlu1 %10405 }
 0x429   :  { %v11001_v4 = vsel %vm19130_vm0, %v20541_v57, %v20538_v20  ;;  %5886 = vrot.lane.b32.xlu0 %v5879_v35, %s11622_s27  ;;  %v10977_v13 = vrot.slane %v17586_v2, 6  ;;  %v6025_v59 = vpack.c.b16 %v6021_v24, %v20546_v48  ;;  %v18016_v35 = vsel %vm3579_vm15, %v10924_v11, %v10923_v34  ;;  %v20549_v34 = vld [vmem:[#allocation10_spill] sm:$0xff]  ;;  %v20555_v57 = vld [vmem:[#allocation171_spill] sm:$0xff] }
 0x42a   :  { %6056 = vrot.lane.b32.xlu1 %v20545_v9, %s11624_s0  ;;  %v6078_v31 = vsel %vm3570_vm12, %v6042_v63, %v6077_v39  ;;  %v10976_v33 = vsel %vm3564_vm10, %v10975_v6, %v10974_v8  ;;  %v6154_v44 = vsel %vm6152_vm3, %v6145_v29, %v20547_v43  ;;  %v10944_v5 = vrot.slane %v7484_v17, %v19340_v49  ;;  %v20550_v63 = vld [vmem:[#allocation191_spill] sm:$0xff]  ;;  %v20551_v17 = vld [vmem:[#allocation25_spill] sm:$0xff]  ;;  %v20556_v9 = vld [vmem:[#allocation90_spill] sm:$0xff] }
 0x42b   :  { %v10953_v37 = vsel %vm3561_vm9, %v10914_v41, %v17594_v42  ;;  %v6095_v24 = vrot.slane %v20466_v3, 1  ;;  %v10903_v16 = vpack.c.b16 %v10899_v23, %v20548_v54  ;;  %v6051_v27 = vpack.c.b16 %v18008_v58, %v20549_v34  ;;  %v20554_v42 = vld [vmem:[#allocation176_spill] sm:$0xff]  ;;  %v20563_v54 = vld [vmem:[#allocation83_spill] sm:$0xff] }
 0x42c   :  { %v18033_v6 = vsel %vm19129_vm1, %v11001_v4, %v20550_v63  ;;  %v10979_v39 = vrot.slane %v20509_v56, 5  ;;  %v20553_v8 = vpack.c.b16 %v20551_v17, %v20552_v25  ;;  %v10929_v3 = vpack.c.b16 %v18016_v35, %v20554_v42  ;;  %v20564_v34 = vld [vmem:[#allocation24_spill] sm:$0xff]  ;;  %v20566_v25 = vld [vmem:[#allocation166_spill] sm:$0xff] }
 0x42d   :  { %10764 = vrot.lane.b32.xlu0 %v10757_v22, %s11622_s27  ;;  %v18043_v41 = vunpack.c.l.b16 %v6073_v40  ;;  %v6079_v20 = vsel %vm3573_vm13, %v6044_v46, %v6078_v31  ;;  %v10978_v14 = vsel %vm3567_vm11, %v10977_v13, %v10976_v33  ;;  %v6163_v4 = vsel %vm6161_vm4, %v6154_v44, %v20555_v57  ;;  %v20560_v13 = vld [vmem:[#allocation92_spill] sm:$0xff]  ;;  %v18081_v33 = vpop.permute.xlu0 %10932  ;;  %v20561_v44 = vld [vmem:[#allocation174_spill] sm:$0xff] }
 0x42e   :  { %10934 = vrot.lane.b32.xlu1 %v20553_v8, %s11624_s0  ;;  %v10954_v22 = vsel %vm3564_vm10, %v10916_v60, %v10953_v37  ;;  %v6097_v53 = vrot.slane %v17174_v47, 7  ;;  %v18055_v29 = vsel %vm6170_vm5, %v17867_v50, %v10406_v62  ;;  %v10951_v36 = vrot.slane %v10944_v5, %v19340_v49  ;;  %v20557_v60 = vld [vmem:[#allocation80_spill] sm:$0xff]  ;;  %v20567_v8 = vld [vmem:[#allocation109_spill] sm:$0xff]  ;;  %v20568_v57 = vld [vmem:[#allocation178_spill] sm:$0xff] }
 0x42f   :  { %v6096_v46 = vsel %vm3561_vm9, %v17161_v12, %v6095_v24  ;;  %v10981_v19 = vrot.slane %v17901_v21, 4  ;;  %v6172_v23 = vsel %vm6170_vm5, %v6163_v4, %v20556_v9  ;;  %v6080_v15 = vsel %vm3576_vm14, %v6046_v7, %v6079_v20  ;;  %v20558_v50 = vld [vmem:[#allocation20_spill] sm:$0xff]  ;;  %v18075_v7 = vpop.permute.xlu1 %10965  ;;  %v20572_v21 = vld [vmem:[#allocation87_spill] sm:$0xff] }
 0x430   :  { %v10980_v47 = vsel %vm3570_vm12, %v10979_v39, %v10978_v14  ;;  %v20559_v58 = vpack.c.b16 %v20557_v60, %v20558_v50  ;;  %v6081_v49 = vrot.slane %v18043_v41, 1  ;;  %v10955_v12 = vsel %vm3567_vm11, %v10918_v32, %v10954_v22  ;;  %v20562_v37 = vld [vmem:[#allocation28_spill] sm:$0xff] }
 0x431   :  { %6032 = vrot.lane.b32.xlu0 %v6025_v59, %s11623_s6  ;;  %v6099_v40 = vrot.slane %v17205_v30, 6  ;;  %v6181_v48 = vsel %vm6179_vm6, %v6172_v23, %v20560_v13  ;;  %v6098_v59 = vsel %vm3564_vm10, %v6097_v53, %v6096_v46  ;;  %v10983_v31 = vrot.slane %v17928_v51, 3  ;;  %v20576_v51 = vld [vmem:[#allocation185_spill] sm:$0xff]  ;;  %v20582_v42 = vld [vmem:[#allocation200_spill] sm:$0xff] }
 0x432   :  { %6091 = vrot.lane.b32.xlu1 %v20559_v58, %s11625_s5  ;;  %vm6206_vm9 = vcmask 326656   ;;  %v10952_v43 = vunpack.c.l.b16 %v10951_v36  ;;  %v6190_v2 = vsel %vm6188_vm7, %v6181_v48, %v20561_v44  ;;  %v10982_v32 = vsel %vm3573_vm13, %v10981_v19, %v10980_v47  ;;  %v20569_v36 = vld [vmem:[#allocation85_spill] sm:$0xff]  ;;  %v5530_v19 = vpop.permute.xlu0 %5529  ;;  %v20573_v47 = vld [vmem:[#allocation198_spill] sm:$0xff] }
 0x433   :  { %vm19132_vm1 = vcmask 359424   ;;  %v10956_v30 = vsel %vm3570_vm12, %v10920_v61, %v10955_v12  ;;  %v6101_v5 = vrot.slane %v20515_v28, 5  ;;  %v6199_v24 = vsel %vm19131_vm8, %v6190_v2, %v20562_v37  ;;  %v5652_v61 = vpop.permute.xlu1 %5651  ;;  %v20580_v44 = vld [vmem:[#allocation173_spill] sm:$0xff] }
 0x434   :  { %vm6224_vm10 = vcmask 392192   ;;  %v20565_v63 = vpack.c.b16 %v20563_v54, %v20564_v34  ;;  %v6100_v39 = vsel %vm3567_vm11, %v6099_v40, %v6098_v59  ;;  %v10985_v17 = vrot.slane %v10952_v43, 2  ;;  %v20585_v54 = vld [vmem:[#allocation86_spill] sm:$0xff] }
 0x435   :  { %10910 = vrot.lane.b32.xlu0 %v10903_v16, %s11623_s6  ;;  %v6208_v56 = vsel %vm6206_vm9, %v6199_v24, %v20566_v25  ;;  %vm6233_vm0 = vcmask 424960   ;;  %v10984_v28 = vsel %vm3576_vm14, %v10983_v31, %v10982_v32  ;;  %vm6242_vm8 = vcmask 457728   ;;  %v20581_v32 = vld [vmem:[#allocation81_spill] sm:$0xff] }
 0x436   :  { %10969 = vrot.lane.b32.xlu1 %v20565_v63, %s11625_s5  ;;  %v6217_v20 = vsel %vm19132_vm1, %v6208_v56, %v20567_v8  ;;  %v18105_v16 = vsel %vm6179_vm6, %v17889_v38, %v5652_v61  ;;  %v10957_v14 = vsel %vm3573_vm13, %v10922_v0, %v10956_v30  ;;  %v6103_v62 = vrot.slane %v20511_v45, 4  ;;  %v20570_v38 = vld [vmem:[#allocation26_spill] sm:$0xff]  ;;  %v20586_v63 = vld [vmem:[#allocation101_spill] sm:$0xff]  ;;  %v20589_v61 = vld [vmem:[#allocation183_spill] sm:$0xff] }
 0x437   :  { %v6226_v4 = vsel %vm6224_vm10, %v6217_v20, %v20568_v57  ;;  %vm6251_vm11 = vcmask 490496   ;;  %v6082_v22 = vsel %vm3579_vm15, %v6081_v49, %v6080_v15  ;;  %v6102_v53 = vsel %vm3570_vm12, %v6101_v5, %v6100_v39  ;;  %v20583_v5 = vld [vmem:[#allocation100_spill] sm:$0xff]  ;;  %v6090_v57 = vpop.permute.xlu0 %6089 }
 0x438   :  { %v20571_v46 = vpack.c.b16 %v20569_v36, %v20570_v38  ;;  %v6235_v0 = vsel %vm6233_vm0, %v6226_v4, %v20572_v21  ;;  %vm11162_vm1 = vcmask 523264   ;;  %v10959_v45 = vrot.slane %v10952_v43, 1  ;;  %v20591_v20 = vld [vmem:[#allocation72_spill] sm:$0xff]  ;;  %v20592_v4 = vld [vmem:[#allocation143_spill] sm:$0xff] }
 0x439   :  { %6058 = vrot.lane.b32.xlu0 %v6051_v27, %s11624_s0  ;;  %v10986_v9 = vsel %vm3579_vm15, %v10985_v17, %v10984_v28  ;;  %v6244_v23 = vsel %vm6242_vm8, %v6235_v0, %v17991_v52  ;;  %v6178_v15 = vsel %vm6170_vm5, %v17876_v18, %v5530_v19  ;;  %v6114_v27 = vpop.permute.xlu1 %6113  ;;  %v11020_v60 = vsel %vm6143_vm2, %v18033_v6, %v20573_v47  ;;  %v20574_v52 = vld [vmem:[#allocation15_spill] sm:$0xff]  ;;  %v20575_v18 = vld [vmem:[#allocation38_spill] sm:$0xff]  ;;  %v20588_v17 = vld [vmem:[#allocation88_spill] sm:$0xff] }
 0x43a   :  { %6117 = vrot.lane.b32.xlu1 %v20571_v46, %s11626_s21  ;;  %v10958_v50 = vsel %vm3576_vm14, %v10924_v11, %v10957_v14  ;;  %v6105_v58 = vrot.slane %v20513_v55, 3  ;;  %v6253_v49 = vsel %vm6251_vm11, %v6244_v23, %v6114_v27  ;;  %v6104_v12 = vsel %vm3573_vm13, %v6103_v62, %v6102_v53  ;;  %v20577_v11 = vld [vmem:[#allocation75_spill] sm:$0xff] }
 0x43b   :  { %11565 = vmatprep.mubr.msk.bf16.mxu0 %vm11162_vm1, %v6253_v49  ;;  %v6086_v40 = vpack.c.b16 %v6082_v22, %v20574_v52  ;;  %v10990_v13 = vpack.c.b16 %v10986_v9, %v20575_v18  ;;  %v20578_v6 = vpack.c.b16 %v20576_v51, %v20577_v11  ;;  %v20579_v55 = vld [vmem:[#allocation63_spill] sm:$0xff]  ;;  %v10960_v59 = vsel %vm3579_vm15, %v10959_v45, %v10958_v50  ;;  %v20606_v11 = vld [vmem:[#allocation104_spill] sm:$0xff] }
 0x43c   :  { %v11028_v48 = vsel %vm6152_vm3, %v11020_v60, %v20579_v55  ;;  %v6107_v31 = vrot.slane %v18043_v41, 2  ;;  %v6106_v43 = vsel %vm3576_vm14, %v6105_v58, %v6104_v12  ;;  %v10964_v35 = vpack.c.b16 %v10960_v59, %v20581_v32  ;;  %v20584_v41 = vld [vmem:[#allocation182_spill] sm:$0xff]  ;;  %v20593_v22 = vld [vmem:[#allocation111_spill] sm:$0xff]  ;;  %v20603_v12 = vld [vmem:[#allocation165_spill] sm:$0xff] }
 0x43d   :  { %10936 = vrot.lane.b32.xlu0 %v10929_v3, %s11624_s0  ;;  %v11036_v2 = vsel %vm6161_vm4, %v11028_v48, %v20580_v44  ;;  %vm20587_vm12 = vcmask 293888   ;;  %vm20590_vm13 = vcmask 359424   ;;  %v20594_v53 = vld [vmem:[#allocation123_spill] sm:$0xff]  ;;  %vm20596_vm14 = vcmask 31744   ;;  %v20601_v60 = vld [vmem:[#allocation170_spill] sm:$0xff]  ;;  %v20607_v55 = vld [vmem:[#allocation121_spill] sm:$0xff] }
 0x43e   :  { %10995 = vrot.lane.b32.xlu1 %v20578_v6, %s11626_s21  ;;  %v11044_v3 = vsel %vm6170_vm5, %v11036_v2, %v20582_v42  ;;  %v6108_v30 = vsel %vm3579_vm15, %v6107_v31, %v6106_v43  ;;  %v10530_v56 = vpop.permute.xlu1 %10529  ;;  %v20595_v36 = vpack.c.b16 %v20593_v22, %v20594_v53  ;;  %v20597_v21 = vld [vmem:[#allocation179_spill] sm:$0xff]  ;;  %vm20598_vm15 = vcmask 64512   ;;  %v20608_v31 = vld [vmem:[#allocation110_spill] sm:$0xff]  ;;  %v20610_v42 = vld [vmem:[#allocation148_spill] sm:$0xff] }
 0x43f   :  { %v11052_v37 = vsel %vm6179_vm6, %v11044_v3, %v20583_v5  ;;  %v6112_v34 = vpack.c.b16 %v6108_v30, %v20585_v54  ;;  %v18174_v8 = vsel %vm6179_vm6, %v18055_v29, %v10530_v56  ;;  %v20599_v45 = vld [vmem:[#allocation195_spill] sm:$0xff]  ;;  %v20611_v3 = vld [vmem:[#allocation89_spill] sm:$0xff]  ;;  %v20621_v22 = vld [vmem:[#allocation168_spill] sm:$0xff] }
 0x440   :  { %v11060_v24 = vsel %vm6188_vm7, %v11052_v37, %v20584_v41  ;;  %v6127_v38 = vsel %vm20596_vm14, %v20595_v36, %v20592_v4  ;;  %v20602_v50 = vld [vmem:[#allocation167_spill] sm:$0xff]  ;;  %v20612_v30 = vpack.c.b16 %v20610_v42, %v20611_v3  ;;  %v20613_v41 = vld [vmem:[#allocation190_spill] sm:$0xff] }
 0x441   :  { %6093 = vrot.lane.b32.xlu0 %v6086_v40, %s11625_s5  ;;  %v11068_v39 = vsel %vm20587_vm12, %v11060_v24, %v20586_v63  ;;  %v6138_v0 = vsel %vm20598_vm15, %v6127_v38, %v20597_v21  ;;  %v20604_v40 = vld [vmem:[#allocation6_spill] sm:$0xff]  ;;  %v20614_v24 = vld [vmem:[#allocation197_spill] sm:$0xff]  ;;  %v20622_v38 = vld [vmem:[#allocation107_spill] sm:$0xff] }
 0x442   :  { %10997 = vrot.lane.b32.xlu1 %v10990_v13, %s11626_s21  ;;  %v11076_v25 = vsel %vm6206_vm9, %v11068_v39, %v20588_v17  ;;  %v10992_v29 = vpop.permute.xlu1 %10991  ;;  %v6147_v9 = vsel %vm6143_vm2, %v6138_v0, %v20599_v45  ;;  %v20605_v13 = vld [vmem:[#allocation23_spill] sm:$0xff]  ;;  %v20616_v39 = vld [vmem:[#allocation172_spill] sm:$0xff] }
 0x443   :  { %v11084_v28 = vsel %vm20590_vm13, %v11076_v25, %v20589_v61  ;;  %v20617_v25 = vld [vmem:[#allocation11_spill] sm:$0xff]  ;;  %v20618_v61 = vld [vmem:[#allocation97_spill] sm:$0xff] }
 0x444   :  { %v11092_v14 = vsel %vm6224_vm10, %v11084_v28, %v20591_v20  ;;  %v20619_v20 = vld [vmem:[#allocation181_spill] sm:$0xff] }
 0x445   :  { %10971 = vrot.lane.b32.xlu0 %v10964_v35, %s11625_s5  ;;  %v11100_v62 = vsel %vm6233_vm0, %v11092_v14, %v17820_v26  ;;  %v20600_v26 = vld [vmem:[#allocation128_spill] sm:$0xff]  ;;  %v20609_v35 = vld [vmem:[#allocation91_spill] sm:$0xff] }
 0x446   :  { %v11108_v46 = vsel %vm6242_vm8, %v11100_v62, %v18075_v7  ;;  %v6156_v23 = vsel %vm6152_vm3, %v6147_v9, %v20600_v26  ;;  %v10408_v27 = vpop.permute.xlu0 %10407  ;;  %v11004_v5 = vsel %vm20596_vm14, %v20612_v30, %v20609_v35  ;;  %v20620_v62 = vld [vmem:[#allocation73_spill] sm:$0xff] }
 0x447   :  { %v11116_v19 = vsel %vm6251_vm11, %v11108_v46, %v10992_v29  ;;  %v11050_v47 = vsel %vm6170_vm5, %v17892_v10, %v10408_v27  ;;  %v6165_v7 = vsel %vm6161_vm4, %v6156_v23, %v20601_v60  ;;  %v20624_v29 = vld [vmem:[#allocation186_spill] sm:$0xff] }
 0x448   :  { %11573 = vmatprep.mubr.msk.bf16.mxu1 %vm11162_vm1, %v11116_v19  ;;  %v6174_v58 = vsel %vm6170_vm5, %v6165_v7, %v20602_v50 }
 0x449   :  { %6119 = vrot.lane.b32.xlu0 %v6112_v34, %s11626_s21  ;;  %v6183_v52 = vsel %vm6179_vm6, %v6174_v58, %v20603_v12 }
 0x44a   :  { %v10968_v49 = vpop.permute.xlu0 %10967  ;;  %v6192_v18 = vsel %vm6188_vm7, %v6183_v52, %v20604_v40 }
 0x44b   :  { %v6201_v51 = vsel %vm20587_vm12, %v6192_v18, %v20605_v13 }
 0x44c   :  { %v6210_v6 = vsel %vm6206_vm9, %v6201_v51, %v20606_v11 }
 0x44d   :  { %v6219_v48 = vsel %vm20590_vm13, %v6210_v6, %v20607_v55 }
 0x44e   :  { %v5654_v10 = vpop.permute.xlu0 %5653  ;;  %v6228_v43 = vsel %vm6224_vm10, %v6219_v48, %v20608_v31 }
 0x44f   :  { %v18213_v59 = vsel %vm6179_vm6, %v6178_v15, %v5654_v10  ;;  %v6237_v44 = vsel %vm6233_vm0, %v6228_v43, %v17802_v1  ;;  %v11014_v15 = vsel %vm20598_vm15, %v11004_v5, %v20613_v41  ;;  %v20615_v1 = vld [vmem:[#allocation62_spill] sm:$0xff] }
 0x450   :  { %v6246_v2 = vsel %vm6242_vm8, %v6237_v44, %v6090_v57  ;;  %v11022_v54 = vsel %vm6143_vm2, %v11014_v15, %v20614_v24  ;;  %vm20623_vm2 = vmmov %vm20590_vm13 }
 0x451   :  { %v11030_v34 = vsel %vm6152_vm3, %v11022_v54, %v20615_v1  ;;  %vm20625_vm3 = vmmov %vm20587_vm12 }
 0x452   :  { %v11038_v17 = vsel %vm6161_vm4, %v11030_v34, %v20616_v39  ;;  %vm20626_vm4 = vmmov %vm20623_vm2 }
 0x453   :  { %v11046_v56 = vsel %vm6170_vm5, %v11038_v17, %v20617_v25  ;;  %vm20627_vm5 = vmmov %vm20625_vm3 }
 0x454   :  { %v6116_v32 = vpop.permute.xlu0 %6115  ;;  %v11054_v28 = vsel %vm6179_vm6, %v11046_v56, %v20618_v61  ;;  %vm20629_vm13 = vmmov %vm20625_vm3 }
 0x455   :  { %v6255_v37 = vsel %vm6251_vm11, %v6246_v2, %v6116_v32  ;;  %v11062_v14 = vsel %vm6188_vm7, %v11054_v28, %v20619_v20  ;;  %vm20630_vm14 = vmmov %vm20623_vm2 }
 0x456   :  { %11566 = vmatmul.mubr.msk.bf16.vlgmr.msra.gmra.mrb[0].mxu0 %vm11162_vm1, %v6255_v37  ;;  %v11070_v57 = vsel %vm20587_vm12, %v11062_v14, %v20620_v62  ;;  %vm20631_vm15 = vmmov %vm20625_vm3 }
 0x457   :  { %v11078_v53 = vsel %vm6206_vm9, %v11070_v57, %v20621_v22  ;;  %vm20632_vm12 = vmmov %vm20623_vm2 }
 0x458   :  { %v5798_v63 = vpop.permute.xlu1 %5797  ;;  %v11086_v46 = vsel %vm20623_vm2, %v11078_v53, %v20622_v38 }
 0x459   :  { %v11094_v21 = vsel %vm6224_vm10, %v11086_v46, %v20624_v29  ;;  %v6194_v31 = vsel %vm6188_vm7, %v18105_v16, %v5798_v63 }
 0x45a   :  { %v11102_v0 = vsel %vm6233_vm0, %v11094_v21, %v18081_v33 }
 0x45b   :  { %v11110_v19 = vsel %vm6242_vm8, %v11102_v0, %v10968_v49 }
 0x460   :  { %v10532_v4 = vpop.permute.xlu1 %10531 }
 0x461   :  { %v11058_v36 = vsel %vm6179_vm6, %v11050_v47, %v10532_v4  ;;  %vm20628_vm6 = vmmov %vm20623_vm2 }
 0x465   :  { %v10994_v45 = vpop.permute.xlu1 %10993 }
 0x466   :  { %v11118_v9 = vsel %vm6251_vm11, %v11110_v19, %v10994_v45 }
 0x467   :  { %11574 = vmatmul.mubr.msk.bf16.vlgmr.msra.gmra.mrb[0].mxu1 %vm11162_vm1, %v11118_v9  ;;  %v11468_v9 = vld [vmem:[%s18363_s2] ss:$0 sm:$0xff] }
 0x46d   :  { %v5824_v26 = vpop.permute.xlu1 %5823  ;;  %v10676_v23 = vpop.permute.xlu0 %10675 }
 0x46e   :  { %v6203_v43 = vsel %vm20625_vm3, %v6194_v31, %v5824_v26  ;;  %v11064_v42 = vsel %vm6188_vm7, %v18174_v8, %v10676_v23 }
 0x478   :  { %v10702_v27 = vpop.permute.xlu1 %10701 }
 0x479   :  { %v5800_v47 = vpop.permute.xlu0 %5799  ;;  %v11072_v30 = vsel %vm20627_vm5, %v11064_v42, %v10702_v27 }
 0x47a   :  { %v6196_v20 = vsel %vm6188_vm7, %v18213_v59, %v5800_v47 }
 0x47c   :  { %v5859_v60 = vpop.permute.xlu1 %5858 }
 0x47d   :  { %v6212_v44 = vsel %vm6206_vm9, %v6203_v43, %v5859_v60 }
 0x47f   :  { %v10678_v7 = vpop.permute.xlu0 %10677 }
 0x480   :  { %v10737_v50 = vpop.permute.xlu1 %10736  ;;  %v11066_v25 = vsel %vm6188_vm7, %v11058_v36, %v10678_v7  ;;  %vm20633_vm7 = vcmask 31744  }
 0x481   :  { %v11080_v37 = vsel %vm6206_vm9, %v11072_v30, %v10737_v50 }
 0x485   :  { %v5826_v58 = vpop.permute.xlu0 %5825 }
 0x486   :  { %v6205_v62 = vsel %vm20631_vm15, %v6196_v20, %v5826_v58 }
 0x487   :  { %v5885_v12 = vpop.permute.xlu1 %5884 }
 0x488   :  { %v6221_v35 = vsel %vm20626_vm4, %v6212_v44, %v5885_v12 }
 0x489   :  { %v10704_v52 = vpop.permute.xlu0 %10703 }
 0x48a   :  { %v11074_v56 = vsel %vm20629_vm13, %v11066_v25, %v10704_v52 }
 0x48c   :  { %v10763_v40 = vpop.permute.xlu1 %10762 }
 0x48d   :  { %v11088_v24 = vsel %vm20628_vm6, %v11080_v37, %v10763_v40 }
 0x492   :  { %v5861_v18 = vpop.permute.xlu0 %5860 }
 0x493   :  { %v6031_v33 = vpop.permute.xlu1 %6030  ;;  %v6214_v22 = vsel %vm6206_vm9, %v6205_v62, %v5861_v18 }
 0x494   :  { %v6230_v3 = vsel %vm6224_vm10, %v6221_v35, %v6031_v33 }
 0x497   :  { %v10739_v13 = vpop.permute.xlu0 %10738  ;;  %v10909_v49 = vpop.permute.xlu1 %10908 }
 0x498   :  { %v11096_v1 = vsel %vm6224_vm10, %v11088_v24, %v10909_v49  ;;  %v11082_v28 = vsel %vm6206_vm9, %v11074_v56, %v10739_v13 }
 0x49b   :  { %v5887_v51 = vpop.permute.xlu0 %5886 }
 0x49c   :  { %v6057_v11 = vpop.permute.xlu1 %6056  ;;  %v6223_v38 = vsel %vm20632_vm12, %v6214_v22, %v5887_v51 }
 0x49d   :  { %v6239_v5 = vsel %vm6233_vm0, %v6230_v3, %v6057_v11 }
 0x49f   :  { %v10765_v6 = vpop.permute.xlu0 %10764 }
 0x4a0   :  { %v10935_v10 = vpop.permute.xlu1 %10934  ;;  %v11090_v14 = vsel %vm20630_vm14, %v11082_v28, %v10765_v6 }
 0x4a1   :  { %v11104_v8 = vsel %vm6233_vm0, %v11096_v1, %v10935_v10 }
 0x4a3   :  { %v6033_v55 = vpop.permute.xlu0 %6032 }
 0x4a4   :  { %v6092_v48 = vpop.permute.xlu1 %6091  ;;  %v6232_v29 = vsel %vm6224_vm10, %v6223_v38, %v6033_v55 }
 0x4a5   :  { %v6248_v41 = vsel %vm6242_vm8, %v6239_v5, %v6092_v48 }
 0x4a7   :  { %v10911_v2 = vpop.permute.xlu0 %10910 }
 0x4a8   :  { %v10970_v32 = vpop.permute.xlu1 %10969  ;;  %v11098_v57 = vsel %vm6224_vm10, %v11090_v14, %v10911_v2 }
 0x4a9   :  { %v11112_v63 = vsel %vm6242_vm8, %v11104_v8, %v10970_v32 }
 0x4ab   :  { %v6059_v16 = vpop.permute.xlu0 %6058 }
 0x4ac   :  { %v6118_v15 = vpop.permute.xlu1 %6117  ;;  %v6241_v21 = vsel %vm6233_vm0, %v6232_v29, %v6059_v16 }
 0x4ad   :  { %v6257_v54 = vsel %vm6251_vm11, %v6248_v41, %v6118_v15 }
 0x4ae   :  { %11569 = vmatprep.mubr.msk.bf16.mxu0 %vm11162_vm1, %v6257_v54 }
 0x4af   :  { %v10937_v34 = vpop.permute.xlu0 %10936 }
 0x4b0   :  { %v10996_v39 = vpop.permute.xlu1 %10995  ;;  %v11106_v53 = vsel %vm6233_vm0, %v11098_v57, %v10937_v34  ;;  %vm20634_vm0 = vmmov %vm20633_vm7 }
 0x4b1   :  { %v11120_v17 = vsel %vm6251_vm11, %v11112_v63, %v10996_v39  ;;  %vm20637_vm9 = vmmov %vm20634_vm0 }
 0x4b2   :  { %11577 = vmatprep.mubr.msk.bf16.mxu1 %vm11162_vm1, %v11120_v17  ;;  %vm20638_vm10 = vmmov %vm20634_vm0 }
 0x4b3   :  { %v6094_v61 = vpop.permute.xlu0 %6093  ;;  %vm20640_vm2 = vmmov %vm20634_vm0 }
 0x4b4   :  { %v10998_v4 = vpop.permute.xlu1 %10997  ;;  %v6250_v0 = vsel %vm6242_vm8, %v6241_v21, %v6094_v61  ;;  %vm20641_vm3 = vmmov %vm20634_vm0 }
 0x4b5   :  { %vm20642_vm4 = vmmov %vm20634_vm0 }
 0x4b6   :  { %vm20643_vm5 = vmmov %vm20634_vm0 }
 0x4b7   :  { %v10972_v36 = vpop.permute.xlu0 %10971  ;;  %vm20644_vm6 = vmmov %vm20634_vm0 }
 0x4b8   :  { %v11114_v46 = vsel %vm6242_vm8, %v11106_v53, %v10972_v36  ;;  %vm20636_vm8 = vmmov %vm20634_vm0 }
 0x4b9   :  { %v11122_v59 = vsel %vm6251_vm11, %v11114_v46, %v10998_v4  ;;  %vm20645_vm13 = vmmov %vm20634_vm0 }
 0x4ba   :  { %11578 = vmatmul.mubr.msk.bf16.gmra.mrb[4].mxu1 %vm11162_vm1, %v11122_v59  ;;  %vm20646_vm14 = vmmov %vm20634_vm0 }
 0x4bb   :  { %v6120_v19 = vpop.permute.xlu0 %6119  ;;  %vm20647_vm15 = vmmov %vm20634_vm0 }
 0x4bc   :  { %v6259_v45 = vsel %vm6251_vm11, %v6250_v0, %v6120_v19  ;;  %vm20639_vm11 = vmmov %vm20634_vm0 }
 0x4bd   :  { %11570 = vmatmul.mubr.msk.bf16.gmra.mrb[4].mxu0 %vm11162_vm1, %v6259_v45  ;;  %vm20635_vm1 = vmmov %vm20634_vm0 }
 0x4be   :  { %vm20648_vm12 = vmmov %vm20634_vm0 }
 0x529   :  { %v11567_v26 = vpop.f32.mrb[0].mxu0 }
 0x52a   :  { %v11222_v23 = vadd.f32 %v11567_v26, %v11468_v9  ;;  %v11213_v27 = vpop.f32.mrb[1].mxu0 }
 0x52b   :  { %v11214_v47 = vadd.f32 %v11468_v9, %v11213_v27  ;;  %v11568_v60 = vpop.f32.mrb[2].mxu0 }
 0x52c   :  { %11278 = vst.msk [vmem:[%s18364_s3 + $0x10] sm:$0xff] %vm20633_vm7, %v11222_v23  ;;  %v11225_v7 = vadd.f32 %v11568_v60, %v11468_v9  ;;  %v11216_v50 = vpop.f32.mrb[3].mxu0 }
 0x52d   :  { %11276 = vst.msk [vmem:[%s18364_s3] sm:$0xff] %vm20634_vm0, %v11214_v47  ;;  %v11217_v58 = vadd.f32 %v11468_v9, %v11216_v50 }
 0x52e   :  { %11279 = vst.msk [vmem:[%s18364_s3 + $0x18] sm:$0xff] %vm20635_vm1, %v11225_v7 }
 0x52f   :  { %11277 = vst.msk [vmem:[%s18364_s3 + $0x8] sm:$0xff] %vm20636_vm8, %v11217_v58 }
 0x53a   :  { %v11575_v12 = vpop.f32.mrb[0].mxu1 }
 0x53b   :  { %v11254_v52 = vadd.f32 %v11575_v12, %v11468_v9  ;;  %v11245_v40 = vpop.f32.mrb[1].mxu1 }
 0x53c   :  { %v11246_v18 = vadd.f32 %v11468_v9, %v11245_v40  ;;  %v11576_v33 = vpop.f32.mrb[2].mxu1 }
 0x53d   :  { %11286 = vst.msk [vmem:[%s18364_s3 + $0x50] sm:$0xff] %vm20637_vm9, %v11254_v52  ;;  %v11257_v13 = vadd.f32 %v11576_v33, %v11468_v9  ;;  %v11248_v49 = vpop.f32.mrb[3].mxu1 }
 0x53e   :  { %11284 = vst.msk [vmem:[%s18364_s3 + $0x40] sm:$0xff] %vm20638_vm10, %v11246_v18  ;;  %v11249_v51 = vadd.f32 %v11468_v9, %v11248_v49 }
 0x53f   :  { %11287 = vst.msk [vmem:[%s18364_s3 + $0x58] sm:$0xff] %vm20639_vm11, %v11257_v13 }
 0x540   :  { %11285 = vst.msk [vmem:[%s18364_s3 + $0x48] sm:$0xff] %vm20640_vm2, %v11249_v51 }
 0x58d   :  { %v11579_v11 = vpop.f32.mrb[4].mxu1 }
 0x58e   :  { %v11270_v6 = vadd.f32 %v11579_v11, %v11468_v9  ;;  %v11261_v10 = vpop.f32.mrb[5].mxu1 }
 0x58f   :  { %v11262_v55 = vadd.f32 %v11468_v9, %v11261_v10  ;;  %v11580_v48 = vpop.f32.mrb[6].mxu1 }
 0x590   :  { %v11571_v31 = vpop.f32.mrb[4].mxu0  ;;  %11290 = vst.msk [vmem:[%s18364_s3 + $0x70] sm:$0xff] %vm20641_vm3, %v11270_v6  ;;  %v11273_v43 = vadd.f32 %v11580_v48, %v11468_v9  ;;  %v11264_v44 = vpop.f32.mrb[7].mxu1 }
 0x591   :  { %v11238_v2 = vadd.f32 %v11571_v31, %v11468_v9  ;;  %v11229_v32 = vpop.f32.mrb[5].mxu0  ;;  %11288 = vst.msk [vmem:[%s18364_s3 + $0x60] sm:$0xff] %vm20642_vm4, %v11262_v55  ;;  %v11265_v35 = vadd.f32 %v11468_v9, %v11264_v44 }
 0x592   :  { %v11230_v42 = vadd.f32 %v11468_v9, %v11229_v32  ;;  %v11572_v3 = vpop.f32.mrb[6].mxu0  ;;  %11291 = vst.msk [vmem:[%s18364_s3 + $0x78] sm:$0xff] %vm20643_vm5, %v11273_v43 }
 0x593   :  { %11282 = vst.msk [vmem:[%s18364_s3 + $0x30] sm:$0xff] %vm20644_vm6, %v11238_v2  ;;  %v11241_v30 = vadd.f32 %v11572_v3, %v11468_v9  ;;  %v11232_v5 = vpop.f32.mrb[7].mxu0 }
 0x594   :  { %11289 = vst.msk [vmem:[%s18364_s3 + $0x68] sm:$0xff] %vm20645_vm13, %v11265_v35  ;;  %v11233_v37 = vadd.f32 %v11468_v9, %v11232_v5 }
 0x595   :  { %11280 = vst.msk [vmem:[%s18364_s3 + $0x20] sm:$0xff] %vm20646_vm14, %v11230_v42 }
 0x596   :  { %11283 = vst.msk [vmem:[%s18364_s3 + $0x38] sm:$0xff] %vm20647_vm15, %v11241_v30 }
 0x597   :  { %11281 = vst.msk [vmem:[%s18364_s3 + $0x28] sm:$0xff] %vm20648_vm12, %v11233_v37 }

</bundles_post_ra>
